<compile_context>
chip_gen: v5e
topology: v5e:2x2
jax: 0.10.0
libtpu: 0.0.40
codegen_flags: <defaults>
</compile_context>

<pallas_src>
import math

import jax
import jax.numpy as jnp
from jax import lax
from jax.experimental import pallas as pl
from jax.experimental.pallas import tpu as pltpu


# -----------------------------------------------------------------------------
# Fused kernel: one (image, branch) pair per grid step.
#   branch 0 = cls tower -> [cls_logits | centerness] head
#   branch 1 = bbox tower -> exp(bbox_pred) head
# -----------------------------------------------------------------------------
def _siamtitp_branch_kernel(
    x_ref,       # (1, H, W, C)      bf16  input feature map for image n
    tw_ref,      # (1, L, 9, C, C)   bf16  tower conv weights (per-tap) for branch t
    gg_ref,      # (1, L, 1, C)      f32   GroupNorm gamma
    gb_ref,      # (1, L, 1, C)      f32   GroupNorm beta
    hw_ref,      # (1, 9, C, 128)    bf16  head conv weights (per-tap, lane-padded)
    hb_ref,      # (1, 1, 128)       f32   head bias (lane-padded)
    out_ref,     # (1, 1, HW, 128)   f32   lane-dense head output
    act_ref,     # scratch (H+2, Wp, C) bf16  halo'd activation buffer
):
    H, W, C = x_ref.shape[1], x_ref.shape[2], x_ref.shape[3]
    HW = H * W
    L = tw_ref.shape[1]
    Hp, Wp = act_ref.shape[0], act_ref.shape[1]

    # Zero the halo'd activation buffer once; all later writes touch only the
    # interior, so the 1-pixel zero halo survives every layer.
    act_ref[...] = jnp.zeros((Hp, Wp, C), jnp.bfloat16)
    act_ref[1:H + 1, 1:W + 1, :] = x_ref[0]

    def conv3x3(tap_w):
        """3x3 SAME conv as 9 shifted-view matmuls accumulated in f32.

        tap_w(k) -> (C, Cout) bf16 weight for tap k = dh*3 + dw.  No im2col
        scatter: each shifted (HW, C) view of the bf16 halo buffer feeds the
        MXU directly; the dw slice is hoisted so the sublane shift happens
        once per column offset.
        """
        y = None
        for dw in range(3):
            col = act_ref[:, dw:dw + W, :]                 # (H+2, W, C) bf16
            for dh in range(3):
                a = col[dh:dh + H].reshape(HW, C)
                d = jnp.dot(a, tap_w(dh * 3 + dw),
                            preferred_element_type=jnp.float32)
                y = d if y is None else y + d
        return y                                           # (HW, Cout) f32

    inv_hw = 1.0 / HW
    # Fully unrolled layer loop (L is small).
    # TODO(synk): switch to lax.fori_loop with dynamic weight indexing if
    # NUM_CONVS grows beyond ~2 to bound code size / vreg live ranges.
    for l in range(L):
        y = conv3x3(lambda k, _l=l: tw_ref[0, _l, k])      # (HW, C) f32
        # GroupNorm(32, C) with C == 32 -> one channel per group: per-channel
        # stats over the spatial dims, one-pass (sum / sum-of-squares, biased
        # var, eps=1e-5), affine fused into a single scale/shift.  The conv
        # bias is omitted on purpose: mean subtraction cancels any per-channel
        # constant, so it is an exact no-op here.
        # TODO(synk): generalize the group reduction for C > 32.
        s = jnp.sum(y, axis=0, keepdims=True)              # (1, C)
        s2 = jnp.sum(y * y, axis=0, keepdims=True)         # (1, C)
        mean = s * inv_hw
        var = s2 * inv_hw - mean * mean
        scale = gg_ref[0, l] * lax.rsqrt(var + 1e-5)       # (1, C)
        shift = gb_ref[0, l] - mean * scale
        y = jnp.maximum(y * scale + shift, 0.0)
        act_ref[1:H + 1, 1:W + 1, :] = y.astype(jnp.bfloat16).reshape(H, W, C)

    # Head conv: one lane-dense (HW, 128) result shared by all head outputs of
    # this branch (cls_logits + centerness for branch 0, bbox_pred for branch 1).
    yh = conv3x3(lambda k: hw_ref[0, k]) + hb_ref[0]       # (HW, 128) f32
    branch = pl.program_id(1)

    @pl.when(branch == 0)
    def _():
        out_ref[...] = yh[None, None]

    @pl.when(branch == 1)
    def _():
        out_ref[...] = jnp.exp(yh)[None, None]


# -----------------------------------------------------------------------------
# Wrapper: host-side weight re-layout + one pallas_call (grid = (batch, branch)).
# -----------------------------------------------------------------------------
def siamtitp_head_forward(x, params):
    N, H, W, C = x.shape
    assert C == 32, "GroupNorm(32, C) kernel specialized for one channel per group"
    HW = H * W
    L = len(params["cls_tower"])
    nc = params["cls_logits"][0].shape[-1]
    OUT = 128                      # lane-dense padded head output width
    Wp = ((W + 2 + 7) // 8) * 8    # sublane-padded halo buffer width

    def tower_taps(tower):
        w = jnp.stack([w.reshape(9, C, C) for (w, _, _, _) in tower])   # (L,9,C,C)
        g = jnp.stack([g.reshape(1, C) for (_, _, g, _) in tower])      # (L,1,C)
        bt = jnp.stack([bt.reshape(1, C) for (_, _, _, bt) in tower])   # (L,1,C)
        return w.astype(jnp.bfloat16), g, bt

    cls_w, cls_g, cls_bt = tower_taps(params["cls_tower"])
    box_w, box_g, box_bt = tower_taps(params["bbox_tower"])
    tower_w = jnp.stack([cls_w, box_w])                                 # (2,L,9,C,C)
    gn_g = jnp.stack([cls_g, box_g])                                    # (2,L,1,C)
    gn_b = jnp.stack([cls_bt, box_bt])                                  # (2,L,1,C)

    def pad_head(w_list, b_list):
        w = jnp.concatenate([w.reshape(9, C, -1) for w in w_list], axis=-1)
        b = jnp.concatenate([b.reshape(1, -1) for b in b_list], axis=-1)
        kpad = OUT - w.shape[-1]
        w = jnp.pad(w, ((0, 0), (0, 0), (0, kpad)))
        b = jnp.pad(b, ((0, 0), (0, kpad)))
        return w.astype(jnp.bfloat16), b

    wl, bl = params["cls_logits"]
    wc, bc = params["centerness"]
    wb, bb = params["bbox_pred"]
    cls_hw, cls_hb = pad_head([wl, wc], [bl, bc])   # [logits | centerness | 0-pad]
    box_hw, box_hb = pad_head([wb], [bb])           # [bbox | 0-pad]
    head_w = jnp.stack([cls_hw, box_hw])            # (2, 9, C, 128) bf16
    head_b = jnp.stack([cls_hb, box_hb])            # (2, 1, 128)    f32

    x_bf = x.astype(jnp.bfloat16)

    out = pl.pallas_call(
        _siamtitp_branch_kernel,
        out_shape=jax.ShapeDtypeStruct((N, 2, HW, OUT), jnp.float32),
        grid_spec=pltpu.PrefetchScalarGridSpec(
            num_scalar_prefetch=0,
            grid=(N, 2),
            in_specs=[
                pl.BlockSpec((1, H, W, C), lambda n, t: (n, 0, 0, 0)),
                pl.BlockSpec((1, L, 9, C, C), lambda n, t: (t, 0, 0, 0, 0)),
                pl.BlockSpec((1, L, 1, C), lambda n, t: (t, 0, 0, 0)),
                pl.BlockSpec((1, L, 1, C), lambda n, t: (t, 0, 0, 0)),
                pl.BlockSpec((1, 9, C, OUT), lambda n, t: (t, 0, 0, 0)),
                pl.BlockSpec((1, 1, OUT), lambda n, t: (t, 0, 0)),
            ],
            out_specs=pl.BlockSpec((1, 1, HW, OUT), lambda n, t: (n, t, 0, 0)),
            scratch_shapes=[pltpu.VMEM((H + 2, Wp, C), jnp.bfloat16)],
        ),
        compiler_params=pltpu.CompilerParams(
            dimension_semantics=("parallel", "parallel")),
    )(x_bf, tower_w, gn_g, gn_b, head_w, head_b)

    logits = out[:, 0, :, :nc].reshape(N, H, W, nc)
    centerness = out[:, 0, :, nc:nc + 1].reshape(N, H, W, 1)
    bbox_reg = out[:, 1, :, :4].reshape(N, H, W, 4)
    return logits, bbox_reg, centerness


# -----------------------------------------------------------------------------
# Parameter init (deterministic, mirrors the PyTorch __init__)
# -----------------------------------------------------------------------------
def init_params(key, in_channels, num_convs, num_classes, prior_prob):
    C = in_channels
    keys = jax.random.split(key, 2 * num_convs + 3)
    ki = iter(keys)

    def conv_w(k, cin, cout):
        return (0.01 * jax.random.normal(k, (3, 3, cin, cout))).astype(jnp.float32)

    cls_tower, bbox_tower = [], []
    for _ in range(num_convs):
        cls_tower.append((conv_w(next(ki), C, C),
                          jnp.zeros((1, C), jnp.float32),      # conv bias = 0
                          jnp.ones((1, C), jnp.float32),       # GN gamma = 1
                          jnp.zeros((1, C), jnp.float32)))     # GN beta = 0
    for _ in range(num_convs):
        bbox_tower.append((conv_w(next(ki), C, C),
                           jnp.zeros((1, C), jnp.float32),
                           jnp.ones((1, C), jnp.float32),
                           jnp.zeros((1, C), jnp.float32)))

    bias_value = -math.log((1.0 - prior_prob) / prior_prob)
    cls_logits = (conv_w(next(ki), C, num_classes),
                  jnp.full((1, num_classes), bias_value, jnp.float32))
    bbox_pred = (conv_w(next(ki), C, 4), jnp.zeros((1, 4), jnp.float32))
    centerness = (conv_w(next(ki), C, 1), jnp.zeros((1, 1), jnp.float32))

    return dict(cls_tower=cls_tower, bbox_tower=bbox_tower,
                cls_logits=cls_logits, bbox_pred=bbox_pred, centerness=centerness)


# -----------------------------------------------------------------------------
# Pure-JAX f32 reference (correctness sanity check)
# -----------------------------------------------------------------------------
def _conv_ref(x, w, b):
    y = lax.conv_general_dilated(x, w, (1, 1), "SAME",
                                 dimension_numbers=("NHWC", "HWIO", "NHWC"),
                                 precision=lax.Precision.HIGHEST)
    return y + b.reshape(1, 1, 1, -1)


def _gn_relu_ref(y, gamma, beta):
    mean = jnp.mean(y, axis=(1, 2), keepdims=True)
    var = jnp.var(y, axis=(1, 2), keepdims=True)
    y = (y - mean) / jnp.sqrt(var + 1e-5)
    y = y * gamma.reshape(1, 1, 1, -1) + beta.reshape(1, 1, 1, -1)
    return jnp.maximum(y, 0.0)


def _forward_ref(x, params):
    cls_t = x
    for (w, b, g, bt) in params["cls_tower"]:
        cls_t = _gn_relu_ref(_conv_ref(cls_t, w, b), g, bt)
    bbox_t = x
    for (w, b, g, bt) in params["bbox_tower"]:
        bbox_t = _gn_relu_ref(_conv_ref(bbox_t, w, b), g, bt)
    logits = _conv_ref(cls_t, *params["cls_logits"])
    centerness = _conv_ref(cls_t, *params["centerness"])
    bbox_reg = jnp.exp(_conv_ref(bbox_t, *params["bbox_pred"]))
    return logits, bbox_reg, centerness


# -----------------------------------------------------------------------------
if __name__ == "__main__":
    # Small config consistent with the module: GroupNorm(32, C) requires C % 32 == 0.
    N, H, W, C = 2, 16, 16, 32
    NUM_CONVS = 2
    NUM_CLASSES = 2
    PRIOR_PROB = 0.01

    key = jax.random.PRNGKey(0)
    kx, kp = jax.random.split(key)
    x = jax.random.normal(kx, (N, H, W, C), jnp.float32)
    params = init_params(kp, C, NUM_CONVS, NUM_CLASSES, PRIOR_PROB)

    fwd = jax.jit(siamtitp_head_forward)
    logits, bbox_reg, centerness = fwd(x, params)
    jax.block_until_ready((logits, bbox_reg, centerness))

    assert logits.shape == (N, H, W, NUM_CLASSES)
    assert bbox_reg.shape == (N, H, W, 4)
    assert centerness.shape == (N, H, W, 1)

    # Sanity check against a pure-JAX f32 reference.  The kernel stores tower
    # activations and matmul operands in bf16 (f32 accumulation), so use a
    # bf16-appropriate tolerance.
    r_logits, r_bbox, r_ctr = _forward_ref(x, params)
    assert jnp.allclose(logits, r_logits, atol=2e-2, rtol=2e-2)
    assert jnp.allclose(bbox_reg, r_bbox, atol=2e-2, rtol=2e-2)
    assert jnp.allclose(centerness, r_ctr, atol=2e-2, rtol=2e-2)

    print("KERNEL_OK")
</pallas_src>

<mosaic_0001>
module attributes {stable_mosaic.version = 11 : i64} {
  func.func @_siamtitp_branch_kernel(%arg0: i32, %arg1: i32, %arg2: memref<1x16x16x32xbf16, #tpu.memory_space<vmem>>, %arg3: memref<1x2x9x32x32xbf16, #tpu.memory_space<vmem>>, %arg4: memref<1x2x1x32xf32, #tpu.memory_space<vmem>>, %arg5: memref<1x2x1x32xf32, #tpu.memory_space<vmem>>, %arg6: memref<1x9x32x128xbf16, #tpu.memory_space<vmem>>, %arg7: memref<1x1x128xf32, #tpu.memory_space<vmem>>, %arg8: memref<1x1x256x128xf32, #tpu.memory_space<vmem>>, %arg9: memref<18x24x32xbf16, #tpu.memory_space<vmem>>) attributes {dimension_semantics = [#tpu.dimension_semantics<parallel>, #tpu.dimension_semantics<parallel>], iteration_bounds = array<i64: 2, 2>, scalar_prefetch = 0 : i64, scratch_operands = 1 : i64, tpu.core_type = #tpu.core_type<tc>, window_params = [{transform_indices = @transform_0, window_bounds = array<i64: 1, 16, 16, 32>}, {transform_indices = @transform_1, window_bounds = array<i64: 1, 2, 9, 32, 32>}, {transform_indices = @transform_2, window_bounds = array<i64: 1, 2, 1, 32>}, {transform_indices = @transform_3, window_bounds = array<i64: 1, 2, 1, 32>}, {transform_indices = @transform_4, window_bounds = array<i64: 1, 9, 32, 128>}, {transform_indices = @transform_5, window_bounds = array<i64: 1, 1, 128>}, {transform_indices = @transform_6, window_bounds = array<i64: 1, 1, 256, 128>}]} {
    %cst = arith.constant 0.000000e+00 : bf16
    %0 = vector.broadcast %cst : bf16 to vector<18x24x32xbf16>
    %c0 = arith.constant 0 : index
    %c0_0 = arith.constant 0 : index
    %c0_1 = arith.constant 0 : index
    %1 = vector.load %arg9[%c0, %c0_0, %c0_1] : memref<18x24x32xbf16, #tpu.memory_space<vmem>>, vector<18x24x32xbf16>
    tpu.vector_store %arg9[%c0, %c0_0, %c0_1], %0 {strides = array<i32>} : memref<18x24x32xbf16, #tpu.memory_space<vmem>>, vector<18x24x32xbf16>,
    %c0_2 = arith.constant 0 : index
    %c0_3 = arith.constant 0 : index
    %c0_4 = arith.constant 0 : index
    %c0_5 = arith.constant 0 : index
    %2 = vector.load %arg2[%c0_2, %c0_3, %c0_4, %c0_5] : memref<1x16x16x32xbf16, #tpu.memory_space<vmem>>, vector<1x16x16x32xbf16>
    %3 = vector.shape_cast %2 : vector<1x16x16x32xbf16> to vector<16x16x32xbf16>
    %c1 = arith.constant 1 : index
    %c1_6 = arith.constant 1 : index
    %c0_7 = arith.constant 0 : index
    %4 = vector.load %arg9[%c1, %c1_6, %c0_7] : memref<18x24x32xbf16, #tpu.memory_space<vmem>>, vector<16x16x32xbf16>
    tpu.vector_store %arg9[%c1, %c1_6, %c0_7], %3 {strides = array<i32>} : memref<18x24x32xbf16, #tpu.memory_space<vmem>>, vector<16x16x32xbf16>,
    %c0_8 = arith.constant 0 : index
    %c0_9 = arith.constant 0 : index
    %c0_10 = arith.constant 0 : index
    %5 = vector.load %arg9[%c0_8, %c0_9, %c0_10] : memref<18x24x32xbf16, #tpu.memory_space<vmem>>, vector<18x16x32xbf16>
    %6 = vector.extract_strided_slice %5 {offsets = [0, 0, 0], sizes = [16, 16, 32], strides = [1, 1, 1]} : vector<18x16x32xbf16> to vector<16x16x32xbf16>
    %7 = vector.shape_cast %6 : vector<16x16x32xbf16> to vector<256x32xbf16>
    %c0_11 = arith.constant 0 : index
    %c0_12 = arith.constant 0 : index
    %c0_13 = arith.constant 0 : index
    %c0_14 = arith.constant 0 : index
    %c0_15 = arith.constant 0 : index
    %8 = vector.load %arg3[%c0_11, %c0_12, %c0_13, %c0_14, %c0_15] : memref<1x2x9x32x32xbf16, #tpu.memory_space<vmem>>, vector<1x1x1x32x32xbf16>
    %9 = vector.shape_cast %8 : vector<1x1x1x32x32xbf16> to vector<32x32xbf16>
    %cst_16 = arith.constant dense<0.000000e+00> : vector<256x32xf32>
    %10 = tpu.matmul %7, %9, %cst_16 {dimension_numbers = #tpu.dot_dimension_numbers<[1], [0], [0], [1], [0, 0, 1, 1], [], []>} : vector<256x32xbf16>, vector<32x32xbf16>, vector<256x32xf32> -> vector<256x32xf32>
    %11 = vector.extract_strided_slice %5 {offsets = [1, 0, 0], sizes = [16, 16, 32], strides = [1, 1, 1]} : vector<18x16x32xbf16> to vector<16x16x32xbf16>
    %12 = vector.shape_cast %11 : vector<16x16x32xbf16> to vector<256x32xbf16>
    %c0_17 = arith.constant 0 : index
    %c0_18 = arith.constant 0 : index
    %c3 = arith.constant 3 : index
    %c0_19 = arith.constant 0 : index
    %c0_20 = arith.constant 0 : index
    %13 = vector.load %arg3[%c0_17, %c0_18, %c3, %c0_19, %c0_20] : memref<1x2x9x32x32xbf16, #tpu.memory_space<vmem>>, vector<1x1x1x32x32xbf16>
    %14 = vector.shape_cast %13 : vector<1x1x1x32x32xbf16> to vector<32x32xbf16>
    %cst_21 = arith.constant dense<0.000000e+00> : vector<256x32xf32>
    %15 = tpu.matmul %12, %14, %cst_21 {dimension_numbers = #tpu.dot_dimension_numbers<[1], [0], [0], [1], [0, 0, 1, 1], [], []>} : vector<256x32xbf16>, vector<32x32xbf16>, vector<256x32xf32> -> vector<256x32xf32>
    %16 = arith.addf %10, %15 : vector<256x32xf32>
    %17 = vector.extract_strided_slice %5 {offsets = [2, 0, 0], sizes = [16, 16, 32], strides = [1, 1, 1]} : vector<18x16x32xbf16> to vector<16x16x32xbf16>
    %18 = vector.shape_cast %17 : vector<16x16x32xbf16> to vector<256x32xbf16>
    %c0_22 = arith.constant 0 : index
    %c0_23 = arith.constant 0 : index
    %c6 = arith.constant 6 : index
    %c0_24 = arith.constant 0 : index
    %c0_25 = arith.constant 0 : index
    %19 = vector.load %arg3[%c0_22, %c0_23, %c6, %c0_24, %c0_25] : memref<1x2x9x32x32xbf16, #tpu.memory_space<vmem>>, vector<1x1x1x32x32xbf16>
    %20 = vector.shape_cast %19 : vector<1x1x1x32x32xbf16> to vector<32x32xbf16>
    %cst_26 = arith.constant dense<0.000000e+00> : vector<256x32xf32>
    %21 = tpu.matmul %18, %20, %cst_26 {dimension_numbers = #tpu.dot_dimension_numbers<[1], [0], [0], [1], [0, 0, 1, 1], [], []>} : vector<256x32xbf16>, vector<32x32xbf16>, vector<256x32xf32> -> vector<256x32xf32>
    %22 = arith.addf %16, %21 : vector<256x32xf32>
    %c0_27 = arith.constant 0 : index
    %c1_28 = arith.constant 1 : index
    %c0_29 = arith.constant 0 : index
    %23 = vector.load %arg9[%c0_27, %c1_28, %c0_29] : memref<18x24x32xbf16, #tpu.memory_space<vmem>>, vector<18x16x32xbf16>
    %24 = vector.extract_strided_slice %23 {offsets = [0, 0, 0], sizes = [16, 16, 32], strides = [1, 1, 1]} : vector<18x16x32xbf16> to vector<16x16x32xbf16>
    %25 = vector.shape_cast %24 : vector<16x16x32xbf16> to vector<256x32xbf16>
    %c0_30 = arith.constant 0 : index
    %c0_31 = arith.constant 0 : index
    %c1_32 = arith.constant 1 : index
    %c0_33 = arith.constant 0 : index
    %c0_34 = arith.constant 0 : index
    %26 = vector.load %arg3[%c0_30, %c0_31, %c1_32, %c0_33, %c0_34] : memref<1x2x9x32x32xbf16, #tpu.memory_space<vmem>>, vector<1x1x1x32x32xbf16>
    %27 = vector.shape_cast %26 : vector<1x1x1x32x32xbf16> to vector<32x32xbf16>
    %cst_35 = arith.constant dense<0.000000e+00> : vector<256x32xf32>
    %28 = tpu.matmul %25, %27, %cst_35 {dimension_numbers = #tpu.dot_dimension_numbers<[1], [0], [0], [1], [0, 0, 1, 1], [], []>} : vector<256x32xbf16>, vector<32x32xbf16>, vector<256x32xf32> -> vector<256x32xf32>
    %29 = arith.addf %22, %28 : vector<256x32xf32>
    %30 = vector.extract_strided_slice %23 {offsets = [1, 0, 0], sizes = [16, 16, 32], strides = [1, 1, 1]} : vector<18x16x32xbf16> to vector<16x16x32xbf16>
    %31 = vector.shape_cast %30 : vector<16x16x32xbf16> to vector<256x32xbf16>
    %c0_36 = arith.constant 0 : index
    %c0_37 = arith.constant 0 : index
    %c4 = arith.constant 4 : index
    %c0_38 = arith.constant 0 : index
    %c0_39 = arith.constant 0 : index
    %32 = vector.load %arg3[%c0_36, %c0_37, %c4, %c0_38, %c0_39] : memref<1x2x9x32x32xbf16, #tpu.memory_space<vmem>>, vector<1x1x1x32x32xbf16>
    %33 = vector.shape_cast %32 : vector<1x1x1x32x32xbf16> to vector<32x32xbf16>
    %cst_40 = arith.constant dense<0.000000e+00> : vector<256x32xf32>
    %34 = tpu.matmul %31, %33, %cst_40 {dimension_numbers = #tpu.dot_dimension_numbers<[1], [0], [0], [1], [0, 0, 1, 1], [], []>} : vector<256x32xbf16>, vector<32x32xbf16>, vector<256x32xf32> -> vector<256x32xf32>
    %35 = arith.addf %29, %34 : vector<256x32xf32>
    %36 = vector.extract_strided_slice %23 {offsets = [2, 0, 0], sizes = [16, 16, 32], strides = [1, 1, 1]} : vector<18x16x32xbf16> to vector<16x16x32xbf16>
    %37 = vector.shape_cast %36 : vector<16x16x32xbf16> to vector<256x32xbf16>
    %c0_41 = arith.constant 0 : index
    %c0_42 = arith.constant 0 : index
    %c7 = arith.constant 7 : index
    %c0_43 = arith.constant 0 : index
    %c0_44 = arith.constant 0 : index
    %38 = vector.load %arg3[%c0_41, %c0_42, %c7, %c0_43, %c0_44] : memref<1x2x9x32x32xbf16, #tpu.memory_space<vmem>>, vector<1x1x1x32x32xbf16>
    %39 = vector.shape_cast %38 : vector<1x1x1x32x32xbf16> to vector<32x32xbf16>
    %cst_45 = arith.constant dense<0.000000e+00> : vector<256x32xf32>
    %40 = tpu.matmul %37, %39, %cst_45 {dimension_numbers = #tpu.dot_dimension_numbers<[1], [0], [0], [1], [0, 0, 1, 1], [], []>} : vector<256x32xbf16>, vector<32x32xbf16>, vector<256x32xf32> -> vector<256x32xf32>
    %41 = arith.addf %35, %40 : vector<256x32xf32>
    %c0_46 = arith.constant 0 : index
    %c2 = arith.constant 2 : index
    %c0_47 = arith.constant 0 : index
    %42 = vector.load %arg9[%c0_46, %c2, %c0_47] : memref<18x24x32xbf16, #tpu.memory_space<vmem>>, vector<18x16x32xbf16>
    %43 = vector.extract_strided_slice %42 {offsets = [0, 0, 0], sizes = [16, 16, 32], strides = [1, 1, 1]} : vector<18x16x32xbf16> to vector<16x16x32xbf16>
    %44 = vector.shape_cast %43 : vector<16x16x32xbf16> to vector<256x32xbf16>
    %c0_48 = arith.constant 0 : index
    %c0_49 = arith.constant 0 : index
    %c2_50 = arith.constant 2 : index
    %c0_51 = arith.constant 0 : index
    %c0_52 = arith.constant 0 : index
    %45 = vector.load %arg3[%c0_48, %c0_49, %c2_50, %c0_51, %c0_52] : memref<1x2x9x32x32xbf16, #tpu.memory_space<vmem>>, vector<1x1x1x32x32xbf16>
    %46 = vector.shape_cast %45 : vector<1x1x1x32x32xbf16> to vector<32x32xbf16>
    %cst_53 = arith.constant dense<0.000000e+00> : vector<256x32xf32>
    %47 = tpu.matmul %44, %46, %cst_53 {dimension_numbers = #tpu.dot_dimension_numbers<[1], [0], [0], [1], [0, 0, 1, 1], [], []>} : vector<256x32xbf16>, vector<32x32xbf16>, vector<256x32xf32> -> vector<256x32xf32>
    %48 = arith.addf %41, %47 : vector<256x32xf32>
    %49 = vector.extract_strided_slice %42 {offsets = [1, 0, 0], sizes = [16, 16, 32], strides = [1, 1, 1]} : vector<18x16x32xbf16> to vector<16x16x32xbf16>
    %50 = vector.shape_cast %49 : vector<16x16x32xbf16> to vector<256x32xbf16>
    %c0_54 = arith.constant 0 : index
    %c0_55 = arith.constant 0 : index
    %c5 = arith.constant 5 : index
    %c0_56 = arith.constant 0 : index
    %c0_57 = arith.constant 0 : index
    %51 = vector.load %arg3[%c0_54, %c0_55, %c5, %c0_56, %c0_57] : memref<1x2x9x32x32xbf16, #tpu.memory_space<vmem>>, vector<1x1x1x32x32xbf16>
    %52 = vector.shape_cast %51 : vector<1x1x1x32x32xbf16> to vector<32x32xbf16>
    %cst_58 = arith.constant dense<0.000000e+00> : vector<256x32xf32>
    %53 = tpu.matmul %50, %52, %cst_58 {dimension_numbers = #tpu.dot_dimension_numbers<[1], [0], [0], [1], [0, 0, 1, 1], [], []>} : vector<256x32xbf16>, vector<32x32xbf16>, vector<256x32xf32> -> vector<256x32xf32>
    %54 = arith.addf %48, %53 : vector<256x32xf32>
    %55 = vector.extract_strided_slice %42 {offsets = [2, 0, 0], sizes = [16, 16, 32], strides = [1, 1, 1]} : vector<18x16x32xbf16> to vector<16x16x32xbf16>
    %56 = vector.shape_cast %55 : vector<16x16x32xbf16> to vector<256x32xbf16>
    %c0_59 = arith.constant 0 : index
    %c0_60 = arith.constant 0 : index
    %c8 = arith.constant 8 : index
    %c0_61 = arith.constant 0 : index
    %c0_62 = arith.constant 0 : index
    %57 = vector.load %arg3[%c0_59, %c0_60, %c8, %c0_61, %c0_62] : memref<1x2x9x32x32xbf16, #tpu.memory_space<vmem>>, vector<1x1x1x32x32xbf16>
    %58 = vector.shape_cast %57 : vector<1x1x1x32x32xbf16> to vector<32x32xbf16>
    %cst_63 = arith.constant dense<0.000000e+00> : vector<256x32xf32>
    %59 = tpu.matmul %56, %58, %cst_63 {dimension_numbers = #tpu.dot_dimension_numbers<[1], [0], [0], [1], [0, 0, 1, 1], [], []>} : vector<256x32xbf16>, vector<32x32xbf16>, vector<256x32xf32> -> vector<256x32xf32>
    %60 = arith.addf %54, %59 : vector<256x32xf32>
    %cst_64 = arith.constant dense<0.000000e+00> : vector<32xf32>
    %61 = vector.multi_reduction <add>, %60, %cst_64 [0] : vector<256x32xf32> to vector<32xf32>
    %62 = vector.shape_cast %61 : vector<32xf32> to vector<1x32xf32>
    %63 = arith.mulf %60, %60 : vector<256x32xf32>
    %cst_65 = arith.constant dense<0.000000e+00> : vector<32xf32>
    %64 = vector.multi_reduction <add>, %63, %cst_65 [0] : vector<256x32xf32> to vector<32xf32>
    %65 = vector.shape_cast %64 : vector<32xf32> to vector<1x32xf32>
    %cst_66 = arith.constant 3.906250e-03 : f32
    %66 = vector.broadcast %cst_66 : f32 to vector<1x32xf32>
    %67 = arith.mulf %62, %66 : vector<1x32xf32>
    %cst_67 = arith.constant 3.906250e-03 : f32
    %68 = vector.broadcast %cst_67 : f32 to vector<1x32xf32>
    %69 = arith.mulf %65, %68 : vector<1x32xf32>
    %70 = arith.mulf %67, %67 : vector<1x32xf32>
    %71 = arith.subf %69, %70 : vector<1x32xf32>
    %c0_68 = arith.constant 0 : index
    %c0_69 = arith.constant 0 : index
    %c0_70 = arith.constant 0 : index
    %c0_71 = arith.constant 0 : index
    %72 = vector.load %arg4[%c0_68, %c0_69, %c0_70, %c0_71] : memref<1x2x1x32xf32, #tpu.memory_space<vmem>>, vector<1x1x1x32xf32>
    %73 = vector.shape_cast %72 : vector<1x1x1x32xf32> to vector<1x32xf32>
    %cst_72 = arith.constant 9.99999974E-6 : f32
    %74 = vector.broadcast %cst_72 : f32 to vector<1x32xf32>
    %75 = arith.addf %71, %74 : vector<1x32xf32>
    %76 = math.rsqrt %75 : vector<1x32xf32>
    %77 = arith.mulf %73, %76 : vector<1x32xf32>
    %c0_73 = arith.constant 0 : index
    %c0_74 = arith.constant 0 : index
    %c0_75 = arith.constant 0 : index
    %c0_76 = arith.constant 0 : index
    %78 = vector.load %arg5[%c0_73, %c0_74, %c0_75, %c0_76] : memref<1x2x1x32xf32, #tpu.memory_space<vmem>>, vector<1x1x1x32xf32>
    %79 = vector.shape_cast %78 : vector<1x1x1x32xf32> to vector<1x32xf32>
    %80 = arith.mulf %67, %77 : vector<1x32xf32>
    %81 = arith.subf %79, %80 : vector<1x32xf32>
    %82 = vector.broadcast %77 : vector<1x32xf32> to vector<256x32xf32>
    %83 = arith.mulf %60, %82 : vector<256x32xf32>
    %84 = vector.broadcast %81 : vector<1x32xf32> to vector<256x32xf32>
    %85 = arith.addf %83, %84 : vector<256x32xf32>
    %cst_77 = arith.constant 0.000000e+00 : f32
    %86 = vector.broadcast %cst_77 : f32 to vector<256x32xf32>
    %87 = arith.maximumf %85, %86 : vector<256x32xf32>
    %88 = arith.truncf %87 : vector<256x32xf32> to vector<256x32xbf16>
    %89 = vector.shape_cast %88 : vector<256x32xbf16> to vector<16x16x32xbf16>
    %c1_78 = arith.constant 1 : index
    %c1_79 = arith.constant 1 : index
    %c0_80 = arith.constant 0 : index
    %90 = vector.load %arg9[%c1_78, %c1_79, %c0_80] : memref<18x24x32xbf16, #tpu.memory_space<vmem>>, vector<16x16x32xbf16>
    tpu.vector_store %arg9[%c1_78, %c1_79, %c0_80], %89 {strides = array<i32>} : memref<18x24x32xbf16, #tpu.memory_space<vmem>>, vector<16x16x32xbf16>,
    %c0_81 = arith.constant 0 : index
    %c0_82 = arith.constant 0 : index
    %c0_83 = arith.constant 0 : index
    %91 = vector.load %arg9[%c0_81, %c0_82, %c0_83] : memref<18x24x32xbf16, #tpu.memory_space<vmem>>, vector<18x16x32xbf16>
    %92 = vector.extract_strided_slice %91 {offsets = [0, 0, 0], sizes = [16, 16, 32], strides = [1, 1, 1]} : vector<18x16x32xbf16> to vector<16x16x32xbf16>
    %93 = vector.shape_cast %92 : vector<16x16x32xbf16> to vector<256x32xbf16>
    %c0_84 = arith.constant 0 : index
    %c1_85 = arith.constant 1 : index
    %c0_86 = arith.constant 0 : index
    %c0_87 = arith.constant 0 : index
    %c0_88 = arith.constant 0 : index
    %94 = vector.load %arg3[%c0_84, %c1_85, %c0_86, %c0_87, %c0_88] : memref<1x2x9x32x32xbf16, #tpu.memory_space<vmem>>, vector<1x1x1x32x32xbf16>
    %95 = vector.shape_cast %94 : vector<1x1x1x32x32xbf16> to vector<32x32xbf16>
    %cst_89 = arith.constant dense<0.000000e+00> : vector<256x32xf32>
    %96 = tpu.matmul %93, %95, %cst_89 {dimension_numbers = #tpu.dot_dimension_numbers<[1], [0], [0], [1], [0, 0, 1, 1], [], []>} : vector<256x32xbf16>, vector<32x32xbf16>, vector<256x32xf32> -> vector<256x32xf32>
    %97 = vector.extract_strided_slice %91 {offsets = [1, 0, 0], sizes = [16, 16, 32], strides = [1, 1, 1]} : vector<18x16x32xbf16> to vector<16x16x32xbf16>
    %98 = vector.shape_cast %97 : vector<16x16x32xbf16> to vector<256x32xbf16>
    %c0_90 = arith.constant 0 : index
    %c1_91 = arith.constant 1 : index
    %c3_92 = arith.constant 3 : index
    %c0_93 = arith.constant 0 : index
    %c0_94 = arith.constant 0 : index
    %99 = vector.load %arg3[%c0_90, %c1_91, %c3_92, %c0_93, %c0_94] : memref<1x2x9x32x32xbf16, #tpu.memory_space<vmem>>, vector<1x1x1x32x32xbf16>
    %100 = vector.shape_cast %99 : vector<1x1x1x32x32xbf16> to vector<32x32xbf16>
    %cst_95 = arith.constant dense<0.000000e+00> : vector<256x32xf32>
    %101 = tpu.matmul %98, %100, %cst_95 {dimension_numbers = #tpu.dot_dimension_numbers<[1], [0], [0], [1], [0, 0, 1, 1], [], []>} : vector<256x32xbf16>, vector<32x32xbf16>, vector<256x32xf32> -> vector<256x32xf32>
    %102 = arith.addf %96, %101 : vector<256x32xf32>
    %103 = vector.extract_strided_slice %91 {offsets = [2, 0, 0], sizes = [16, 16, 32], strides = [1, 1, 1]} : vector<18x16x32xbf16> to vector<16x16x32xbf16>
    %104 = vector.shape_cast %103 : vector<16x16x32xbf16> to vector<256x32xbf16>
    %c0_96 = arith.constant 0 : index
    %c1_97 = arith.constant 1 : index
    %c6_98 = arith.constant 6 : index
    %c0_99 = arith.constant 0 : index
    %c0_100 = arith.constant 0 : index
    %105 = vector.load %arg3[%c0_96, %c1_97, %c6_98, %c0_99, %c0_100] : memref<1x2x9x32x32xbf16, #tpu.memory_space<vmem>>, vector<1x1x1x32x32xbf16>
    %106 = vector.shape_cast %105 : vector<1x1x1x32x32xbf16> to vector<32x32xbf16>
    %cst_101 = arith.constant dense<0.000000e+00> : vector<256x32xf32>
    %107 = tpu.matmul %104, %106, %cst_101 {dimension_numbers = #tpu.dot_dimension_numbers<[1], [0], [0], [1], [0, 0, 1, 1], [], []>} : vector<256x32xbf16>, vector<32x32xbf16>, vector<256x32xf32> -> vector<256x32xf32>
    %108 = arith.addf %102, %107 : vector<256x32xf32>
    %c0_102 = arith.constant 0 : index
    %c1_103 = arith.constant 1 : index
    %c0_104 = arith.constant 0 : index
    %109 = vector.load %arg9[%c0_102, %c1_103, %c0_104] : memref<18x24x32xbf16, #tpu.memory_space<vmem>>, vector<18x16x32xbf16>
    %110 = vector.extract_strided_slice %109 {offsets = [0, 0, 0], sizes = [16, 16, 32], strides = [1, 1, 1]} : vector<18x16x32xbf16> to vector<16x16x32xbf16>
    %111 = vector.shape_cast %110 : vector<16x16x32xbf16> to vector<256x32xbf16>
    %c0_105 = arith.constant 0 : index
    %c1_106 = arith.constant 1 : index
    %c1_107 = arith.constant 1 : index
    %c0_108 = arith.constant 0 : index
    %c0_109 = arith.constant 0 : index
    %112 = vector.load %arg3[%c0_105, %c1_106, %c1_107, %c0_108, %c0_109] : memref<1x2x9x32x32xbf16, #tpu.memory_space<vmem>>, vector<1x1x1x32x32xbf16>
    %113 = vector.shape_cast %112 : vector<1x1x1x32x32xbf16> to vector<32x32xbf16>
    %cst_110 = arith.constant dense<0.000000e+00> : vector<256x32xf32>
    %114 = tpu.matmul %111, %113, %cst_110 {dimension_numbers = #tpu.dot_dimension_numbers<[1], [0], [0], [1], [0, 0, 1, 1], [], []>} : vector<256x32xbf16>, vector<32x32xbf16>, vector<256x32xf32> -> vector<256x32xf32>
    %115 = arith.addf %108, %114 : vector<256x32xf32>
    %116 = vector.extract_strided_slice %109 {offsets = [1, 0, 0], sizes = [16, 16, 32], strides = [1, 1, 1]} : vector<18x16x32xbf16> to vector<16x16x32xbf16>
    %117 = vector.shape_cast %116 : vector<16x16x32xbf16> to vector<256x32xbf16>
    %c0_111 = arith.constant 0 : index
    %c1_112 = arith.constant 1 : index
    %c4_113 = arith.constant 4 : index
    %c0_114 = arith.constant 0 : index
    %c0_115 = arith.constant 0 : index
    %118 = vector.load %arg3[%c0_111, %c1_112, %c4_113, %c0_114, %c0_115] : memref<1x2x9x32x32xbf16, #tpu.memory_space<vmem>>, vector<1x1x1x32x32xbf16>
    %119 = vector.shape_cast %118 : vector<1x1x1x32x32xbf16> to vector<32x32xbf16>
    %cst_116 = arith.constant dense<0.000000e+00> : vector<256x32xf32>
    %120 = tpu.matmul %117, %119, %cst_116 {dimension_numbers = #tpu.dot_dimension_numbers<[1], [0], [0], [1], [0, 0, 1, 1], [], []>} : vector<256x32xbf16>, vector<32x32xbf16>, vector<256x32xf32> -> vector<256x32xf32>
    %121 = arith.addf %115, %120 : vector<256x32xf32>
    %122 = vector.extract_strided_slice %109 {offsets = [2, 0, 0], sizes = [16, 16, 32], strides = [1, 1, 1]} : vector<18x16x32xbf16> to vector<16x16x32xbf16>
    %123 = vector.shape_cast %122 : vector<16x16x32xbf16> to vector<256x32xbf16>
    %c0_117 = arith.constant 0 : index
    %c1_118 = arith.constant 1 : index
    %c7_119 = arith.constant 7 : index
    %c0_120 = arith.constant 0 : index
    %c0_121 = arith.constant 0 : index
    %124 = vector.load %arg3[%c0_117, %c1_118, %c7_119, %c0_120, %c0_121] : memref<1x2x9x32x32xbf16, #tpu.memory_space<vmem>>, vector<1x1x1x32x32xbf16>
    %125 = vector.shape_cast %124 : vector<1x1x1x32x32xbf16> to vector<32x32xbf16>
    %cst_122 = arith.constant dense<0.000000e+00> : vector<256x32xf32>
    %126 = tpu.matmul %123, %125, %cst_122 {dimension_numbers = #tpu.dot_dimension_numbers<[1], [0], [0], [1], [0, 0, 1, 1], [], []>} : vector<256x32xbf16>, vector<32x32xbf16>, vector<256x32xf32> -> vector<256x32xf32>
    %127 = arith.addf %121, %126 : vector<256x32xf32>
    %c0_123 = arith.constant 0 : index
    %c2_124 = arith.constant 2 : index
    %c0_125 = arith.constant 0 : index
    %128 = vector.load %arg9[%c0_123, %c2_124, %c0_125] : memref<18x24x32xbf16, #tpu.memory_space<vmem>>, vector<18x16x32xbf16>
    %129 = vector.extract_strided_slice %128 {offsets = [0, 0, 0], sizes = [16, 16, 32], strides = [1, 1, 1]} : vector<18x16x32xbf16> to vector<16x16x32xbf16>
    %130 = vector.shape_cast %129 : vector<16x16x32xbf16> to vector<256x32xbf16>
    %c0_126 = arith.constant 0 : index
    %c1_127 = arith.constant 1 : index
    %c2_128 = arith.constant 2 : index
    %c0_129 = arith.constant 0 : index
    %c0_130 = arith.constant 0 : index
    %131 = vector.load %arg3[%c0_126, %c1_127, %c2_128, %c0_129, %c0_130] : memref<1x2x9x32x32xbf16, #tpu.memory_space<vmem>>, vector<1x1x1x32x32xbf16>
    %132 = vector.shape_cast %131 : vector<1x1x1x32x32xbf16> to vector<32x32xbf16>
    %cst_131 = arith.constant dense<0.000000e+00> : vector<256x32xf32>
    %133 = tpu.matmul %130, %132, %cst_131 {dimension_numbers = #tpu.dot_dimension_numbers<[1], [0], [0], [1], [0, 0, 1, 1], [], []>} : vector<256x32xbf16>, vector<32x32xbf16>, vector<256x32xf32> -> vector<256x32xf32>
    %134 = arith.addf %127, %133 : vector<256x32xf32>
    %135 = vector.extract_strided_slice %128 {offsets = [1, 0, 0], sizes = [16, 16, 32], strides = [1, 1, 1]} : vector<18x16x32xbf16> to vector<16x16x32xbf16>
    %136 = vector.shape_cast %135 : vector<16x16x32xbf16> to vector<256x32xbf16>
    %c0_132 = arith.constant 0 : index
    %c1_133 = arith.constant 1 : index
    %c5_134 = arith.constant 5 : index
    %c0_135 = arith.constant 0 : index
    %c0_136 = arith.constant 0 : index
    %137 = vector.load %arg3[%c0_132, %c1_133, %c5_134, %c0_135, %c0_136] : memref<1x2x9x32x32xbf16, #tpu.memory_space<vmem>>, vector<1x1x1x32x32xbf16>
    %138 = vector.shape_cast %137 : vector<1x1x1x32x32xbf16> to vector<32x32xbf16>
    %cst_137 = arith.constant dense<0.000000e+00> : vector<256x32xf32>
    %139 = tpu.matmul %136, %138, %cst_137 {dimension_numbers = #tpu.dot_dimension_numbers<[1], [0], [0], [1], [0, 0, 1, 1], [], []>} : vector<256x32xbf16>, vector<32x32xbf16>, vector<256x32xf32> -> vector<256x32xf32>
    %140 = arith.addf %134, %139 : vector<256x32xf32>
    %141 = vector.extract_strided_slice %128 {offsets = [2, 0, 0], sizes = [16, 16, 32], strides = [1, 1, 1]} : vector<18x16x32xbf16> to vector<16x16x32xbf16>
    %142 = vector.shape_cast %141 : vector<16x16x32xbf16> to vector<256x32xbf16>
    %c0_138 = arith.constant 0 : index
    %c1_139 = arith.constant 1 : index
    %c8_140 = arith.constant 8 : index
    %c0_141 = arith.constant 0 : index
    %c0_142 = arith.constant 0 : index
    %143 = vector.load %arg3[%c0_138, %c1_139, %c8_140, %c0_141, %c0_142] : memref<1x2x9x32x32xbf16, #tpu.memory_space<vmem>>, vector<1x1x1x32x32xbf16>
    %144 = vector.shape_cast %143 : vector<1x1x1x32x32xbf16> to vector<32x32xbf16>
    %cst_143 = arith.constant dense<0.000000e+00> : vector<256x32xf32>
    %145 = tpu.matmul %142, %144, %cst_143 {dimension_numbers = #tpu.dot_dimension_numbers<[1], [0], [0], [1], [0, 0, 1, 1], [], []>} : vector<256x32xbf16>, vector<32x32xbf16>, vector<256x32xf32> -> vector<256x32xf32>
    %146 = arith.addf %140, %145 : vector<256x32xf32>
    %cst_144 = arith.constant dense<0.000000e+00> : vector<32xf32>
    %147 = vector.multi_reduction <add>, %146, %cst_144 [0] : vector<256x32xf32> to vector<32xf32>
    %148 = vector.shape_cast %147 : vector<32xf32> to vector<1x32xf32>
    %149 = arith.mulf %146, %146 : vector<256x32xf32>
    %cst_145 = arith.constant dense<0.000000e+00> : vector<32xf32>
    %150 = vector.multi_reduction <add>, %149, %cst_145 [0] : vector<256x32xf32> to vector<32xf32>
    %151 = vector.shape_cast %150 : vector<32xf32> to vector<1x32xf32>
    %cst_146 = arith.constant 3.906250e-03 : f32
    %152 = vector.broadcast %cst_146 : f32 to vector<1x32xf32>
    %153 = arith.mulf %148, %152 : vector<1x32xf32>
    %cst_147 = arith.constant 3.906250e-03 : f32
    %154 = vector.broadcast %cst_147 : f32 to vector<1x32xf32>
    %155 = arith.mulf %151, %154 : vector<1x32xf32>
    %156 = arith.mulf %153, %153 : vector<1x32xf32>
    %157 = arith.subf %155, %156 : vector<1x32xf32>
    %c0_148 = arith.constant 0 : index
    %c1_149 = arith.constant 1 : index
    %c0_150 = arith.constant 0 : index
    %c0_151 = arith.constant 0 : index
    %158 = vector.load %arg4[%c0_148, %c1_149, %c0_150, %c0_151] : memref<1x2x1x32xf32, #tpu.memory_space<vmem>>, vector<1x1x1x32xf32>
    %159 = vector.shape_cast %158 : vector<1x1x1x32xf32> to vector<1x32xf32>
    %cst_152 = arith.constant 9.99999974E-6 : f32
    %160 = vector.broadcast %cst_152 : f32 to vector<1x32xf32>
    %161 = arith.addf %157, %160 : vector<1x32xf32>
    %162 = math.rsqrt %161 : vector<1x32xf32>
    %163 = arith.mulf %159, %162 : vector<1x32xf32>
    %c0_153 = arith.constant 0 : index
    %c1_154 = arith.constant 1 : index
    %c0_155 = arith.constant 0 : index
    %c0_156 = arith.constant 0 : index
    %164 = vector.load %arg5[%c0_153, %c1_154, %c0_155, %c0_156] : memref<1x2x1x32xf32, #tpu.memory_space<vmem>>, vector<1x1x1x32xf32>
    %165 = vector.shape_cast %164 : vector<1x1x1x32xf32> to vector<1x32xf32>
    %166 = arith.mulf %153, %163 : vector<1x32xf32>
    %167 = arith.subf %165, %166 : vector<1x32xf32>
    %168 = vector.broadcast %163 : vector<1x32xf32> to vector<256x32xf32>
    %169 = arith.mulf %146, %168 : vector<256x32xf32>
    %170 = vector.broadcast %167 : vector<1x32xf32> to vector<256x32xf32>
    %171 = arith.addf %169, %170 : vector<256x32xf32>
    %cst_157 = arith.constant 0.000000e+00 : f32
    %172 = vector.broadcast %cst_157 : f32 to vector<256x32xf32>
    %173 = arith.maximumf %171, %172 : vector<256x32xf32>
    %174 = arith.truncf %173 : vector<256x32xf32> to vector<256x32xbf16>
    %175 = vector.shape_cast %174 : vector<256x32xbf16> to vector<16x16x32xbf16>
    %c1_158 = arith.constant 1 : index
    %c1_159 = arith.constant 1 : index
    %c0_160 = arith.constant 0 : index
    %176 = vector.load %arg9[%c1_158, %c1_159, %c0_160] : memref<18x24x32xbf16, #tpu.memory_space<vmem>>, vector<16x16x32xbf16>
    tpu.vector_store %arg9[%c1_158, %c1_159, %c0_160], %175 {strides = array<i32>} : memref<18x24x32xbf16, #tpu.memory_space<vmem>>, vector<16x16x32xbf16>,
    %c0_161 = arith.constant 0 : index
    %c0_162 = arith.constant 0 : index
    %c0_163 = arith.constant 0 : index
    %177 = vector.load %arg9[%c0_161, %c0_162, %c0_163] : memref<18x24x32xbf16, #tpu.memory_space<vmem>>, vector<18x16x32xbf16>
    %178 = vector.extract_strided_slice %177 {offsets = [0, 0, 0], sizes = [16, 16, 32], strides = [1, 1, 1]} : vector<18x16x32xbf16> to vector<16x16x32xbf16>
    %179 = vector.shape_cast %178 : vector<16x16x32xbf16> to vector<256x32xbf16>
    %c0_164 = arith.constant 0 : index
    %c0_165 = arith.constant 0 : index
    %c0_166 = arith.constant 0 : index
    %c0_167 = arith.constant 0 : index
    %180 = vector.load %arg6[%c0_164, %c0_165, %c0_166, %c0_167] : memref<1x9x32x128xbf16, #tpu.memory_space<vmem>>, vector<1x1x32x128xbf16>
    %181 = vector.shape_cast %180 : vector<1x1x32x128xbf16> to vector<32x128xbf16>
    %cst_168 = arith.constant dense<0.000000e+00> : vector<256x128xf32>
    %182 = tpu.matmul %179, %181, %cst_168 {dimension_numbers = #tpu.dot_dimension_numbers<[1], [0], [0], [1], [0, 0, 1, 1], [], []>} : vector<256x32xbf16>, vector<32x128xbf16>, vector<256x128xf32> -> vector<256x128xf32>
    %183 = vector.extract_strided_slice %177 {offsets = [1, 0, 0], sizes = [16, 16, 32], strides = [1, 1, 1]} : vector<18x16x32xbf16> to vector<16x16x32xbf16>
    %184 = vector.shape_cast %183 : vector<16x16x32xbf16> to vector<256x32xbf16>
    %c0_169 = arith.constant 0 : index
    %c3_170 = arith.constant 3 : index
    %c0_171 = arith.constant 0 : index
    %c0_172 = arith.constant 0 : index
    %185 = vector.load %arg6[%c0_169, %c3_170, %c0_171, %c0_172] : memref<1x9x32x128xbf16, #tpu.memory_space<vmem>>, vector<1x1x32x128xbf16>
    %186 = vector.shape_cast %185 : vector<1x1x32x128xbf16> to vector<32x128xbf16>
    %cst_173 = arith.constant dense<0.000000e+00> : vector<256x128xf32>
    %187 = tpu.matmul %184, %186, %cst_173 {dimension_numbers = #tpu.dot_dimension_numbers<[1], [0], [0], [1], [0, 0, 1, 1], [], []>} : vector<256x32xbf16>, vector<32x128xbf16>, vector<256x128xf32> -> vector<256x128xf32>
    %188 = arith.addf %182, %187 : vector<256x128xf32>
    %189 = vector.extract_strided_slice %177 {offsets = [2, 0, 0], sizes = [16, 16, 32], strides = [1, 1, 1]} : vector<18x16x32xbf16> to vector<16x16x32xbf16>
    %190 = vector.shape_cast %189 : vector<16x16x32xbf16> to vector<256x32xbf16>
    %c0_174 = arith.constant 0 : index
    %c6_175 = arith.constant 6 : index
    %c0_176 = arith.constant 0 : index
    %c0_177 = arith.constant 0 : index
    %191 = vector.load %arg6[%c0_174, %c6_175, %c0_176, %c0_177] : memref<1x9x32x128xbf16, #tpu.memory_space<vmem>>, vector<1x1x32x128xbf16>
    %192 = vector.shape_cast %191 : vector<1x1x32x128xbf16> to vector<32x128xbf16>
    %cst_178 = arith.constant dense<0.000000e+00> : vector<256x128xf32>
    %193 = tpu.matmul %190, %192, %cst_178 {dimension_numbers = #tpu.dot_dimension_numbers<[1], [0], [0], [1], [0, 0, 1, 1], [], []>} : vector<256x32xbf16>, vector<32x128xbf16>, vector<256x128xf32> -> vector<256x128xf32>
    %194 = arith.addf %188, %193 : vector<256x128xf32>
    %c0_179 = arith.constant 0 : index
    %c1_180 = arith.constant 1 : index
    %c0_181 = arith.constant 0 : index
    %195 = vector.load %arg9[%c0_179, %c1_180, %c0_181] : memref<18x24x32xbf16, #tpu.memory_space<vmem>>, vector<18x16x32xbf16>
    %196 = vector.extract_strided_slice %195 {offsets = [0, 0, 0], sizes = [16, 16, 32], strides = [1, 1, 1]} : vector<18x16x32xbf16> to vector<16x16x32xbf16>
    %197 = vector.shape_cast %196 : vector<16x16x32xbf16> to vector<256x32xbf16>
    %c0_182 = arith.constant 0 : index
    %c1_183 = arith.constant 1 : index
    %c0_184 = arith.constant 0 : index
    %c0_185 = arith.constant 0 : index
    %198 = vector.load %arg6[%c0_182, %c1_183, %c0_184, %c0_185] : memref<1x9x32x128xbf16, #tpu.memory_space<vmem>>, vector<1x1x32x128xbf16>
    %199 = vector.shape_cast %198 : vector<1x1x32x128xbf16> to vector<32x128xbf16>
    %cst_186 = arith.constant dense<0.000000e+00> : vector<256x128xf32>
    %200 = tpu.matmul %197, %199, %cst_186 {dimension_numbers = #tpu.dot_dimension_numbers<[1], [0], [0], [1], [0, 0, 1, 1], [], []>} : vector<256x32xbf16>, vector<32x128xbf16>, vector<256x128xf32> -> vector<256x128xf32>
    %201 = arith.addf %194, %200 : vector<256x128xf32>
    %202 = vector.extract_strided_slice %195 {offsets = [1, 0, 0], sizes = [16, 16, 32], strides = [1, 1, 1]} : vector<18x16x32xbf16> to vector<16x16x32xbf16>
    %203 = vector.shape_cast %202 : vector<16x16x32xbf16> to vector<256x32xbf16>
    %c0_187 = arith.constant 0 : index
    %c4_188 = arith.constant 4 : index
    %c0_189 = arith.constant 0 : index
    %c0_190 = arith.constant 0 : index
    %204 = vector.load %arg6[%c0_187, %c4_188, %c0_189, %c0_190] : memref<1x9x32x128xbf16, #tpu.memory_space<vmem>>, vector<1x1x32x128xbf16>
    %205 = vector.shape_cast %204 : vector<1x1x32x128xbf16> to vector<32x128xbf16>
    %cst_191 = arith.constant dense<0.000000e+00> : vector<256x128xf32>
    %206 = tpu.matmul %203, %205, %cst_191 {dimension_numbers = #tpu.dot_dimension_numbers<[1], [0], [0], [1], [0, 0, 1, 1], [], []>} : vector<256x32xbf16>, vector<32x128xbf16>, vector<256x128xf32> -> vector<256x128xf32>
    %207 = arith.addf %201, %206 : vector<256x128xf32>
    %208 = vector.extract_strided_slice %195 {offsets = [2, 0, 0], sizes = [16, 16, 32], strides = [1, 1, 1]} : vector<18x16x32xbf16> to vector<16x16x32xbf16>
    %209 = vector.shape_cast %208 : vector<16x16x32xbf16> to vector<256x32xbf16>
    %c0_192 = arith.constant 0 : index
    %c7_193 = arith.constant 7 : index
    %c0_194 = arith.constant 0 : index
    %c0_195 = arith.constant 0 : index
    %210 = vector.load %arg6[%c0_192, %c7_193, %c0_194, %c0_195] : memref<1x9x32x128xbf16, #tpu.memory_space<vmem>>, vector<1x1x32x128xbf16>
    %211 = vector.shape_cast %210 : vector<1x1x32x128xbf16> to vector<32x128xbf16>
    %cst_196 = arith.constant dense<0.000000e+00> : vector<256x128xf32>
    %212 = tpu.matmul %209, %211, %cst_196 {dimension_numbers = #tpu.dot_dimension_numbers<[1], [0], [0], [1], [0, 0, 1, 1], [], []>} : vector<256x32xbf16>, vector<32x128xbf16>, vector<256x128xf32> -> vector<256x128xf32>
    %213 = arith.addf %207, %212 : vector<256x128xf32>
    %c0_197 = arith.constant 0 : index
    %c2_198 = arith.constant 2 : index
    %c0_199 = arith.constant 0 : index
    %214 = vector.load %arg9[%c0_197, %c2_198, %c0_199] : memref<18x24x32xbf16, #tpu.memory_space<vmem>>, vector<18x16x32xbf16>
    %215 = vector.extract_strided_slice %214 {offsets = [0, 0, 0], sizes = [16, 16, 32], strides = [1, 1, 1]} : vector<18x16x32xbf16> to vector<16x16x32xbf16>
    %216 = vector.shape_cast %215 : vector<16x16x32xbf16> to vector<256x32xbf16>
    %c0_200 = arith.constant 0 : index
    %c2_201 = arith.constant 2 : index
    %c0_202 = arith.constant 0 : index
    %c0_203 = arith.constant 0 : index
    %217 = vector.load %arg6[%c0_200, %c2_201, %c0_202, %c0_203] : memref<1x9x32x128xbf16, #tpu.memory_space<vmem>>, vector<1x1x32x128xbf16>
    %218 = vector.shape_cast %217 : vector<1x1x32x128xbf16> to vector<32x128xbf16>
    %cst_204 = arith.constant dense<0.000000e+00> : vector<256x128xf32>
    %219 = tpu.matmul %216, %218, %cst_204 {dimension_numbers = #tpu.dot_dimension_numbers<[1], [0], [0], [1], [0, 0, 1, 1], [], []>} : vector<256x32xbf16>, vector<32x128xbf16>, vector<256x128xf32> -> vector<256x128xf32>
    %220 = arith.addf %213, %219 : vector<256x128xf32>
    %221 = vector.extract_strided_slice %214 {offsets = [1, 0, 0], sizes = [16, 16, 32], strides = [1, 1, 1]} : vector<18x16x32xbf16> to vector<16x16x32xbf16>
    %222 = vector.shape_cast %221 : vector<16x16x32xbf16> to vector<256x32xbf16>
    %c0_205 = arith.constant 0 : index
    %c5_206 = arith.constant 5 : index
    %c0_207 = arith.constant 0 : index
    %c0_208 = arith.constant 0 : index
    %223 = vector.load %arg6[%c0_205, %c5_206, %c0_207, %c0_208] : memref<1x9x32x128xbf16, #tpu.memory_space<vmem>>, vector<1x1x32x128xbf16>
    %224 = vector.shape_cast %223 : vector<1x1x32x128xbf16> to vector<32x128xbf16>
    %cst_209 = arith.constant dense<0.000000e+00> : vector<256x128xf32>
    %225 = tpu.matmul %222, %224, %cst_209 {dimension_numbers = #tpu.dot_dimension_numbers<[1], [0], [0], [1], [0, 0, 1, 1], [], []>} : vector<256x32xbf16>, vector<32x128xbf16>, vector<256x128xf32> -> vector<256x128xf32>
    %226 = arith.addf %220, %225 : vector<256x128xf32>
    %227 = vector.extract_strided_slice %214 {offsets = [2, 0, 0], sizes = [16, 16, 32], strides = [1, 1, 1]} : vector<18x16x32xbf16> to vector<16x16x32xbf16>
    %228 = vector.shape_cast %227 : vector<16x16x32xbf16> to vector<256x32xbf16>
    %c0_210 = arith.constant 0 : index
    %c8_211 = arith.constant 8 : index
    %c0_212 = arith.constant 0 : index
    %c0_213 = arith.constant 0 : index
    %229 = vector.load %arg6[%c0_210, %c8_211, %c0_212, %c0_213] : memref<1x9x32x128xbf16, #tpu.memory_space<vmem>>, vector<1x1x32x128xbf16>
    %230 = vector.shape_cast %229 : vector<1x1x32x128xbf16> to vector<32x128xbf16>
    %cst_214 = arith.constant dense<0.000000e+00> : vector<256x128xf32>
    %231 = tpu.matmul %228, %230, %cst_214 {dimension_numbers = #tpu.dot_dimension_numbers<[1], [0], [0], [1], [0, 0, 1, 1], [], []>} : vector<256x32xbf16>, vector<32x128xbf16>, vector<256x128xf32> -> vector<256x128xf32>
    %232 = arith.addf %226, %231 : vector<256x128xf32>
    %c0_215 = arith.constant 0 : index
    %c0_216 = arith.constant 0 : index
    %c0_217 = arith.constant 0 : index
    %233 = vector.load %arg7[%c0_215, %c0_216, %c0_217] : memref<1x1x128xf32, #tpu.memory_space<vmem>>, vector<1x1x128xf32>
    %234 = vector.shape_cast %233 : vector<1x1x128xf32> to vector<1x128xf32>
    %235 = vector.broadcast %234 : vector<1x128xf32> to vector<256x128xf32>
    %236 = arith.addf %232, %235 : vector<256x128xf32>
    %c0_i32 = arith.constant 0 : i32
    %237 = arith.cmpi eq, %arg1, %c0_i32 : i32
    %238 = arith.extui %237 : i1 to i32
    %c0_i32_218 = arith.constant 0 : i32
    %239 = arith.cmpi ne, %238, %c0_i32_218 : i32
    scf.if %239 {
      %243 = vector.shape_cast %236 : vector<256x128xf32> to vector<1x1x256x128xf32>
      %c0_220 = arith.constant 0 : index
      %c0_221 = arith.constant 0 : index
      %c0_222 = arith.constant 0 : index
      %c0_223 = arith.constant 0 : index
      %244 = vector.load %arg8[%c0_220, %c0_221, %c0_222, %c0_223] : memref<1x1x256x128xf32, #tpu.memory_space<vmem>>, vector<1x1x256x128xf32>
      tpu.vector_store %arg8[%c0_220, %c0_221, %c0_222, %c0_223], %243 {strides = array<i32>} : memref<1x1x256x128xf32, #tpu.memory_space<vmem>>, vector<1x1x256x128xf32>,
    } else {
    }
    %c1_i32 = arith.constant 1 : i32
    %240 = arith.cmpi eq, %arg1, %c1_i32 : i32
    %241 = arith.extui %240 : i1 to i32
    %c0_i32_219 = arith.constant 0 : i32
    %242 = arith.cmpi ne, %241, %c0_i32_219 : i32
    scf.if %242 {
      %243 = math.exp %236 : vector<256x128xf32>
      %244 = vector.shape_cast %243 : vector<256x128xf32> to vector<1x1x256x128xf32>
      %c0_220 = arith.constant 0 : index
      %c0_221 = arith.constant 0 : index
      %c0_222 = arith.constant 0 : index
      %c0_223 = arith.constant 0 : index
      %245 = vector.load %arg8[%c0_220, %c0_221, %c0_222, %c0_223] : memref<1x1x256x128xf32, #tpu.memory_space<vmem>>, vector<1x1x256x128xf32>
      tpu.vector_store %arg8[%c0_220, %c0_221, %c0_222, %c0_223], %244 {strides = array<i32>} : memref<1x1x256x128xf32, #tpu.memory_space<vmem>>, vector<1x1x256x128xf32>,
    } else {
    }
    return
  }
  func.func @transform_0(%arg0: i32, %arg1: i32) -> (i32, i32, i32, i32) {
    %c0_i32 = arith.constant 0 : i32
    %c0_i32_0 = arith.constant 0 : i32
    %c0_i32_1 = arith.constant 0 : i32
    %c0_i32_2 = arith.constant 0 : i32
    return %arg0, %c0_i32, %c0_i32_0, %c0_i32_1 : i32, i32, i32, i32
  }
  func.func @transform_1(%arg0: i32, %arg1: i32) -> (i32, i32, i32, i32, i32) {
    %c0_i32 = arith.constant 0 : i32
    %c0_i32_0 = arith.constant 0 : i32
    %c0_i32_1 = arith.constant 0 : i32
    %c0_i32_2 = arith.constant 0 : i32
    %c0_i32_3 = arith.constant 0 : i32
    return %arg1, %c0_i32, %c0_i32_0, %c0_i32_1, %c0_i32_2 : i32, i32, i32, i32, i32
  }
  func.func @transform_2(%arg0: i32, %arg1: i32) -> (i32, i32, i32, i32) {
    %c0_i32 = arith.constant 0 : i32
    %c0_i32_0 = arith.constant 0 : i32
    %c0_i32_1 = arith.constant 0 : i32
    %c0_i32_2 = arith.constant 0 : i32
    return %arg1, %c0_i32, %c0_i32_0, %c0_i32_1 : i32, i32, i32, i32
  }
  func.func @transform_3(%arg0: i32, %arg1: i32) -> (i32, i32, i32, i32) {
    %c0_i32 = arith.constant 0 : i32
    %c0_i32_0 = arith.constant 0 : i32
    %c0_i32_1 = arith.constant 0 : i32
    %c0_i32_2 = arith.constant 0 : i32
    return %arg1, %c0_i32, %c0_i32_0, %c0_i32_1 : i32, i32, i32, i32
  }
  func.func @transform_4(%arg0: i32, %arg1: i32) -> (i32, i32, i32, i32) {
    %c0_i32 = arith.constant 0 : i32
    %c0_i32_0 = arith.constant 0 : i32
    %c0_i32_1 = arith.constant 0 : i32
    %c0_i32_2 = arith.constant 0 : i32
    return %arg1, %c0_i32, %c0_i32_0, %c0_i32_1 : i32, i32, i32, i32
  }
  func.func @transform_5(%arg0: i32, %arg1: i32) -> (i32, i32, i32) {
    %c0_i32 = arith.constant 0 : i32
    %c0_i32_0 = arith.constant 0 : i32
    %c0_i32_1 = arith.constant 0 : i32
    return %arg1, %c0_i32, %c0_i32_0 : i32, i32, i32
  }
  func.func @transform_6(%arg0: i32, %arg1: i32) -> (i32, i32, i32, i32) {
    %c0_i32 = arith.constant 0 : i32
    %c0_i32_0 = arith.constant 0 : i32
    %c0_i32_1 = arith.constant 0 : i32
    return %arg0, %arg1, %c0_i32, %c0_i32_0 : i32, i32, i32, i32
  }
}

</mosaic_0001>

<bundles_post_ra>
// kernel: squeeze.4
= control target key start
LH: loop header
LB: loop body
LE: loop exit
PB: predicated region body
PF: predicated region fallthrough
CT: control target
= control target key end

     0   :  { %s144_s0 = inlined_call_operand.vmem [shape: f32[2,256], index: 0, kind: input, shape index: {}]   ;;  %s145_s1 = inlined_call_operand.hbm [shape: f32[2,16,16,1], index: 1, kind: output, shape index: {}]  }
   0x1   :  { %v73_v0 = vld [vmem:[%s144_s0 + $0x2] sm:$0x3]  ;;  %v9_v1 = vld [vmem:[%s144_s0] sm:$0x3] }
   0x2   :  { %8 = vst [vmem:[#allocation2 + $0x8] sm:$0x3] %v73_v0 }
   0x3   :  { %10 = vst [vmem:[#allocation2] sm:$0x3] %v9_v1 }
   0x4   :  { %2 = vsyncpa [#allocation1], 0  ;;  %s108_s0 = smov 112   ;;  %s109_s10 = smov 80   ;;  %vm12_vm0 = vcmask 130048  }
   0x5   :  { %s110_s11 = smov 48   ;;  %s111_s12 = smov 96  }
   0x6   :  { %s112_s13 = smov 64   ;;  %s113_s14 = smov 32  }
   0x7   :  { %s114_s15 = smov 16   ;;  %s115_s16 = smov [#allocation0]  }
   0x8   :  { %s64_s17 = sshll.u32 %s115_s16, 4  ;;  %s66_s1 = sshll.u32 %s145_s1, 4  ;;  %s65_s17 = int_to_ptr.vmem [resolvable:$true] %s64_s17  ;;  %s67_s1 = int_to_ptr.hbm [resolvable:$true] %s66_s1 }
   0x9   :  { %v15_v5 = vld [vmem:[#allocation2 + $0x8] sm:$0x3]  }
   0xa   :  { %v19_v2 = vld.sshfl [vmem:[#allocation2] sm:$0xff pattern:$0x99999180]   ;;  %18 = vst.msk [vmem:[#allocation0 + $0x8] ss:$16 sm:$0x3] %vm12_vm0, %v15_v5  }
   0xb   :  { %20 = vrot.lane.b32.xlu0 %v19_v2, %s108_s0  ;;  %32 = vrot.lane.b32.xlu1 %v19_v2, %s109_s10  ;;  %v11_v4 = vld [vmem:[#allocation2] sm:$0x3]  }
   0xc   :  { %44 = vrot.lane.b32.xlu2 %v19_v2, %s110_s11  ;;  %13 = vst.msk [vmem:[#allocation0] ss:$16 sm:$0x3] %vm12_vm0, %v11_v4  }
  0x13   :  { %26 = vrot.lane.b32.xlu0 %v19_v2, %s111_s12  ;;  %38 = vrot.lane.b32.xlu1 %v19_v2, %s112_s13 }
  0x14   :  { %50 = vrot.lane.b32.xlu2 %v19_v2, %s113_s14 }
  0x1b   :  { %56 = vrot.lane.b32.xlu0 %v19_v2, %s114_s15 }
  0x66   :  { %v45_v3 = vpop.permute.xlu2 %44  }
  0x67   :  { %48 = vst.msk [vmem:[#allocation0 + $0x5] ss:$8 sm:$0xf] %vm12_vm0, %v45_v3  }
  0x6e   :  { %v51_v6 = vpop.permute.xlu2 %50  }
  0x6f   :  { %54 = vst.msk [vmem:[#allocation0 + $0x6] ss:$8 sm:$0xf] %vm12_vm0, %v51_v6  }
  0x7d   :  { %v21_v7 = vpop.permute.xlu0 %20   ;;  %v33_v8 = vpop.permute.xlu1 %32  }
  0x7e   :  { %24 = vst.msk [vmem:[#allocation0 + $0x1] ss:$8 sm:$0xf] %vm12_vm0, %v21_v7  }
  0x7f   :  { %36 = vst.msk [vmem:[#allocation0 + $0x3] ss:$8 sm:$0xf] %vm12_vm0, %v33_v8  }
  0x85   :  { %v27_v9 = vpop.permute.xlu0 %26   ;;  %v39_v10 = vpop.permute.xlu1 %38  }
  0x86   :  { %30 = vst.msk [vmem:[#allocation0 + $0x2] ss:$8 sm:$0xf] %vm12_vm0, %v27_v9  }
  0x87   :  { %42 = vst.msk [vmem:[#allocation0 + $0x4] ss:$8 sm:$0xf] %vm12_vm0, %v39_v10  }
  0x8d   :  { %v57_v11 = vpop.permute.xlu0 %56  }
  0x8e   :  { %60 = vst.msk [vmem:[#allocation0 + $0x7] ss:$8 sm:$0xf] %vm12_vm0, %v57_v11  }
  0x8f   :  { %69 = dma.vmem_to_hbm [thread:$0]  %s65_s17, 512, %s67_s1, [#allocation1]  }
  0x90   :  { %106 = dma.done.wait [#allocation1], 512  }
  0x91   :  { %107 = vsyncadd [#allocation1], 4294966784 }
  0x92   :  { %72 = vsyncpa [#allocation1], 1 }

// kernel: siamtitp_head_forward.1
= control target key start
LH: loop header
LB: loop body
LE: loop exit
PB: predicated region body
PF: predicated region fallthrough
CT: control target
= control target key end

     0   :  { %s10866_s21 = smov 0   ;;  %s10868_s22 = smov 0   ;;  %s16489_s0 = inlined_call_operand.vmem [shape: bf16[2,16,16,32], index: 0, kind: input, shape index: {}]   ;;  %s16490_s1 = inlined_call_operand.vmem [shape: bf16[2,2,9,32,32], index: 1, kind: input, shape index: {}]   ;;  %s16491_s2 = inlined_call_operand.vmem [shape: f32[2,2,1,32], index: 2, kind: input, shape index: {}]   ;;  %s16492_s3 = inlined_call_operand.vmem [shape: f32[2,2,1,32], index: 3, kind: input, shape index: {}]   ;;  %s16493_s4 = inlined_call_operand.vmem [shape: bf16[2,9,32,128], index: 4, kind: input, shape index: {}]   ;;  %s16494_s5 = inlined_call_operand.vmem [shape: f32[2,1,128], index: 5, kind: input, shape index: {}]   ;;  %s16495_s6 = inlined_call_operand.vmem [shape: f32[2,2,256,128], index: 6, kind: output, shape index: {}]  }
   0x1   :  { %s10870_s23 = smov 0   ;;  %s10872_s24 = smov 0  }
   0x2   :  { %s10874_s25 = smov 0  }
   0x3 LB: > { %s25_s26 = sadd.s32 1, %s10820_s23  ;;  %s28_s27 = sadd.s32 1, %s10824_s24  ;;  %s10828_s25 = sphi %s10874_s25, %s16_s25   ;;  %s10824_s24 = sphi %s10872_s24, %s17231_s24   ;;  %s10820_s23 = sphi %s10870_s23, %s17230_s23   ;;  %s10816_s22 = sphi %s10868_s22, %s17229_s22   ;;  %s10812_s21 = sphi %s10866_s21, %s17228_s21  }
   0x4   : > { %p26_p0 = scmp.ge.s32.totalorder %s25_s26, 2  ;;  %p9503_p1 = scmp.ge.s32.totalorder %s10828_s25, 1 }
   0x5   : > { %p272_p2 = scmp.lt.s32.totalorder %s10828_s25, 5 }
   0x6   : > { %s17233_s26 = smov (%p26_p0, %s25_s26), 0  ;;  %s17235_s27 = smov (!%p26_p0, %s28_s27), %s10824_s24 }
   0x7   : > { %p273_p3 = pnand %p9503_p1, %p272_p2  ;;  %p30_p4 = scmp.ge.s32.totalorder %s17235_s27, 2 }
   0x9   : > { %s17237_s27 = smov (%p30_p4, %s17235_s27), 0  ;;  %276 = sbr.rel (%p273_p3) target bundleno = 3029 (0xbd5), region = 44 }
   0xe   : > { %p332_p5 = scmp.lt.s32.totalorder %s10812_s21, 1  ;;  %p327_p6 = scmp.lt.s32.totalorder %s10816_s22, 1  ;;  %vm363_vm0 = vcmask 257024   ;;  %v10830_v0 = vmov 0   ;;  %vm450_vm1 = vsmask.f32 256 }
   0xf   : > { %367 = vst.msk [vmem:[#allocation2 + $0xc] sm:$0xf] %vm363_vm0, %v10830_v0  ;;  %vm451_vm2 = vsmask.f32 4368  ;;  %vm775_vm3 = vsmask.f32 7938 }
  0x10   : > { %s10902_s28 = scalar_select %p332_p5, %s10812_s21, 1  ;;  %368 = vst.msk [vmem:[#allocation2 + $0x10] sm:$0xf] %vm363_vm0, %v10830_v0  ;;  %vm10952_vm4 = vmor %vm450_vm1, %vm451_vm2  ;;  %v16612_v13 = vmov 0  ;;  %v16615_v16 = vmov 0  ;;  %vm1028_vm6 = vcmask 261120  }
  0x11   : > { %s17239_s22 = smov (!%p327_p6, %s10816_s22), 1  ;;  %369 = vst.msk [vmem:[#allocation2 + $0x14] sm:$0xf] %vm363_vm0, %v10830_v0  ;;  %v16613_v13 = vsel %vm10952_vm4, 4294967295, %v16612_v13  ;;  %vm10962_vm5 = vmand %vm363_vm0, %vm775_vm3  ;;  %vm781_vm7 = vcmask 253952   ;;  %v16618_v56 = vmov 0 }
  0x12   : > { %s10652_s29 = smul.u32 288, %s10902_s28  ;;  %s9510_s30 = sshll.u32 %s10902_s28, 5  ;;  %364 = vst.msk [vmem:[#allocation2] sm:$0xf] %vm363_vm0, %v10830_v0  ;;  %v16616_v16 = vsel %vm10962_vm5, 4294967295, %v16615_v16  ;;  %vm11079_vm8 = vmand %vm781_vm7, %vm450_vm1  ;;  %vm2498_vm12 = vcmask 1042432  }
  0x13   : > { %s10537_s7 = sshll.u32 %s17239_s22, 7  ;;  %s9511_s8 = sshll.u32 %s17239_s22, 6  ;;  %365 = vst.msk [vmem:[#allocation2 + $0x4] sm:$0xf] %vm363_vm0, %v10830_v0  ;;  %v16619_v56 = vsel %vm11079_vm8, 4294967295, %v16618_v56  ;;  %vm2499_vm13 = vcmask 1046532  }
  0x14   : > { %s10917_s11 = scalar_lea.vmem %s16490_s1, %s10652_s29  ;;  %s10922_s14 = scalar_lea.vmem %s16489_s0, %s10537_s7  ;;  %366 = vst.msk [vmem:[#allocation2 + $0x8] sm:$0xf] %vm363_vm0, %v10830_v0  ;;  %vm1475_vm9 = vsmask.f32 3328  ;;  %vm1476_vm10 = vsmask.f32 7440  ;;  %vm11443_vm14 = vmor %vm2498_vm12, %vm2499_vm13 }
  0x15   : > { %v10559_v1 = vld [vmem:[%s10917_s11 + $0x38] sm:$0xff]  ;;  %v10557_v2 = vld [vmem:[%s10917_s11 + $0x8] sm:$0xff]  ;;  %s359_s15 = sadd.s32 %s9511_s8, %s9510_s30  ;;  %370 = vst.msk [vmem:[#allocation2 + $0x18] sm:$0xf] %vm363_vm0, %v10830_v0  ;;  %v10558_v4 = vld [vmem:[%s10917_s11 + $0x30] sm:$0xff]  ;;  %s9507_s20 = sshll.u32 %s10902_s28, 1 }
  0x16   : > { %v10929_v3 = vld [vmem:[%s10917_s11 + $0x68] sm:$0xff]  ;;  %s9512_s16 = sshll.u32 %s359_s15, 3  ;;  %371 = vst.msk [vmem:[#allocation2 + $0x1c] sm:$0xf] %vm363_vm0, %v10830_v0  ;;  %1083 = vmatpush.bf16.msra.mxu0 %v10559_v1  ;;  %10646 = vmatpush.bf16.msra.mxu3 %v10559_v1  ;;  %v418_v5 = vld [vmem:[%s10922_s14] sm:$0xf]  ;;  %vm11371_vm11 = vmor %vm1475_vm9, %vm1476_vm10  ;;  %s12713_s30 = scalar_lea.vmem %s16491_s2, %s9507_s20 }
  0x17   : > { %s10939_s19 = scalar_lea.vmem %s16495_s6, %s9512_s16  ;;  %v419_v6 = vld [vmem:[%s10922_s14 + $0x4] sm:$0xf]  ;;  %1192 = vmatpush.bf16.msra.mxu1 %v10557_v2  ;;  %1306 = vmatpush.bf16.msra.mxu2 %v10929_v3  ;;  %v454_v9 = vshrl.u32 %v418_v5, 16  ;;  %v457_v10 = vshll.u32 %v418_v5, 16  ;;  %372 = vst.msk [vmem:[#allocation2 + $0x20] sm:$0xf] %vm363_vm0, %v10830_v0  ;;  %s12719_s9 = scalar_lea.vmem %s16492_s3, %s9507_s20 }
  0x18   : > { %v10556_v7 = vld [vmem:[%s10917_s11] sm:$0xff]  ;;  %v462_v11 = vshrl.u32 %v419_v6, 16  ;;  %v465_v12 = vshll.u32 %v419_v6, 16  ;;  %16614 = vst [vmem:[#allocation3_spill] sm:$0xff] %v16613_v13  ;;  %v777_v17 = vld [vmem:[#allocation2 + $0xc] sm:$0xf]  ;;  %s352_s16 = scalar_lea.vmem %s16494_s5, %s10902_s28 }
  0x19   : > { %v10946_v8 = vld [vmem:[%s10917_s11 + $0x60] sm:$0xff]  ;;  %v456_v14 = vrot.slane %v454_v9, 7  ;;  %373 = vst.msk [vmem:[#allocation2 + $0x24] sm:$0xf] %vm363_vm0, %v10830_v0  ;;  %v420_v27 = vld [vmem:[%s10922_s14 + $0x8] sm:$0xf] }
  0x1a   : > { %v10956_v15 = vrot.slane %v462_v11, 7  ;;  %1084 = vmatpush.bf16.msra.mxu0 %v10558_v4  ;;  %10647 = vmatpush.bf16.msra.mxu3 %v10558_v4  ;;  %16617 = vst [vmem:[#allocation4_spill] sm:$0xff] %v16616_v16  ;;  %v10538_v24 = vld [vmem:[#allocation2] sm:$0xff]  ;;  %v10565_v28 = vld [vmem:[%s10917_s11 + $0x48] sm:$0xff]  ;;  %v471_v32 = vshrl.u32 %v420_v27, 16  ;;  %v474_v42 = vshll.u32 %v420_v27, 16 }
  0x1b   : > { %374 = vst.msk [vmem:[#allocation2 + $0x28] sm:$0xf] %vm363_vm0, %v10830_v0  ;;  %1193 = vmatpush.bf16.msra.mxu1 %v10556_v7  ;;  %1307 = vmatpush.bf16.msra.mxu2 %v10946_v8  ;;  %v459_v18 = vor.u32 %v457_v10, %v456_v14  ;;  %v460_v19 = vrot.slane %v456_v14, 4  ;;  %v442_v25 = vld [vmem:[%s10922_s14 + $0x60] sm:$0xf]  ;;  %s10653_s10 = smul.u32 144, %s10902_s28 }
  0x1c   : > { %v467_v20 = vor.u32 %v465_v12, %v10956_v15  ;;  %375 = vst.msk [vmem:[#allocation2 + $0x2c] sm:$0xf] %vm363_vm0, %v10830_v0  ;;  %v443_v26 = vld [vmem:[%s10922_s14 + $0x64] sm:$0xf]  ;;  %v421_v29 = vld [vmem:[%s10922_s14 + $0xc] sm:$0xf] }
  0x1d   : > { %376 = vst.msk [vmem:[#allocation2 + $0x30] sm:$0xf] %vm363_vm0, %v10830_v0  ;;  %v778_v22 = vsel %vm10962_vm5, %v459_v18, %v777_v17  ;;  %v658_v30 = vshrl.u32 %v442_v25, 16  ;;  %v666_v31 = vshrl.u32 %v443_v26, 16  ;;  %v11042_v33 = vld [vmem:[%s10922_s14 + $0x68] sm:$0xf]  ;;  %s14186_s13 = scalar_lea.vmem %s16493_s4, %s10653_s10 }
  0x1e   : > { %10648 = vmatpush.bf16.msrb.mxu3 %v10557_v2  ;;  %v468_v21 = vsel %vm10952_vm4, %v460_v19, %v467_v20  ;;  %377 = vst.msk [vmem:[#allocation2 + $0x34] sm:$0xf] %vm363_vm0, %v10830_v0  ;;  %9617 = vmatmul.msk.bf16.vlgmr.msra.gmra.mxu1 %vm1028_vm6, %v10538_v24  ;;  %v479_v34 = vshrl.u32 %v421_v29, 16  ;;  %v11049_v35 = vld [vmem:[%s10922_s14 + $0x6c] sm:$0xf]  ;;  %v661_v37 = vshll.u32 %v442_v25, 16 }
  0x1f   : > { %779 = vst [vmem:[#allocation2 + $0xc] sm:$0xf] %v778_v22  ;;  %2149 = vmatpush.bf16.msrb.mxu0 %v10565_v28  ;;  %v660_v36 = vrot.slane %v658_v30, 7  ;;  %v675_v38 = vshrl.u32 %v11042_v33, 16  ;;  %v11056_v39 = vrot.slane %v666_v31, 7  ;;  %v669_v40 = vshll.u32 %v443_v26, 16 }
  0x20   : > { %780 = vst.msk [vmem:[#allocation2 + $0x10] sm:$0xf] %vm363_vm0, %v468_v21  ;;  %v473_v41 = vrot.slane %v471_v32, 7  ;;  %v11060_v43 = vrot.slane %v479_v34, 7  ;;  %v482_v44 = vshll.u32 %v421_v29, 16  ;;  %v683_v45 = vshrl.u32 %v11049_v35, 16 }
  0x21   : > { %378 = vst.msk [vmem:[#allocation2 + $0x38] sm:$0xf] %vm363_vm0, %v10830_v0  ;;  %v422_v46 = vld [vmem:[%s10922_s14 + $0x10] sm:$0xf]  ;;  %v11067_v47 = vld [vmem:[%s10922_s14 + $0x14] sm:$0xf]  ;;  %v663_v49 = vor.u32 %v661_v37, %v660_v36  ;;  %v671_v53 = vor.u32 %v669_v40, %v11056_v39 }
  0x22   : > { %10649 = vmatpush.bf16.msrb.mxu3 %v10556_v7  ;;  %379 = vst.msk [vmem:[#allocation2 + $0x3c] sm:$0xf] %vm363_vm0, %v10830_v0  ;;  %v469_v48 = vrot.slane %v10956_v15, 4  ;;  %v11072_v50 = vrot.slane %v675_v38, 7  ;;  %v783_v51 = vld [vmem:[#allocation2 + $0x14] sm:$0x1]  ;;  %v476_v54 = vor.u32 %v474_v42, %v473_v41  ;;  %v484_v57 = vor.u32 %v482_v44, %v11060_v43 }
  0x23   : > { %380 = vst.msk [vmem:[#allocation2 + $0x40] sm:$0xf] %vm363_vm0, %v10830_v0  ;;  %v664_v52 = vrot.slane %v660_v36, 4  ;;  %v477_v55 = vrot.slane %v473_v41, 4  ;;  %v486_v58 = vrot.slane %v11060_v43, 4  ;;  %v488_v60 = vshrl.u32 %v422_v46, 16 }
  0x24   : > { %381 = vst.msk [vmem:[#allocation2 + $0x44] sm:$0xf] %vm363_vm0, %v10830_v0  ;;  %v786_v59 = vld [vmem:[#allocation2 + $0x18] sm:$0xf]  ;;  %v496_v61 = vshrl.u32 %v11067_v47, 16  ;;  %v678_v62 = vshll.u32 %v11042_v33, 16  ;;  %v784_v7 = vsel %vm11079_vm8, %v469_v48, %v783_v51 }
  0x25   : > { %382 = vst.msk [vmem:[#allocation2 + $0x48] sm:$0xf] %vm363_vm0, %v10830_v0  ;;  %v11091_v63 = vrot.slane %v683_v45, 7  ;;  %v686_v1 = vshll.u32 %v11049_v35, 16  ;;  %v491_v2 = vshll.u32 %v422_v46, 16  ;;  %v681_v5 = vrot.slane %v11072_v50, 4 }
  0x26   : > { %383 = vst.msk [vmem:[#allocation2 + $0x4c] sm:$0xf] %vm363_vm0, %v10830_v0  ;;  %v499_v6 = vshll.u32 %v11067_v47, 16  ;;  %v790_v9 = vld [vmem:[#allocation2 + $0x20] sm:$0x1]  ;;  %v490_v12 = vrot.slane %v488_v60, 7  ;;  %v672_v18 = vsel %vm10952_vm4, %v664_v52, %v671_v53  ;;  %v485_v20 = vsel %vm10952_vm4, %v477_v55, %v484_v57 }
  0x27   : > { %v10993_v23 = vld [vmem:[#allocation2 + $0xc] sm:$0xff]  ;;  %384 = vst.msk [vmem:[#allocation2 + $0x50] sm:$0xf] %vm363_vm0, %v10830_v0  ;;  %v447_v11 = vld [vmem:[%s10922_s14 + $0x74] sm:$0xf]  ;;  %v11108_v14 = vrot.slane %v496_v61, 7  ;;  %v787_v21 = vsel %vm10962_vm5, %v476_v54, %v786_v59  ;;  %v680_v24 = vor.u32 %v678_v62, %v11072_v50  ;;  %v688_v25 = vor.u32 %v686_v1, %v11091_v63 }
  0x28   : > { %385 = vst.msk [vmem:[#allocation2 + $0x54] sm:$0xf] %vm363_vm0, %v10830_v0  ;;  %9589 = vmatmul.msk.bf16.vlgmr.msra.gmra.mxu0 %vm1028_vm6, %v10993_v23  ;;  %v446_v10 = vld [vmem:[%s10922_s14 + $0x70] sm:$0xf]  ;;  %v700_v17 = vshrl.u32 %v447_v11, 16  ;;  %v703_v30 = vshll.u32 %v447_v11, 16  ;;  %v791_v33 = vsel %vm11079_vm8, %v486_v58, %v790_v9  ;;  %v493_v34 = vor.u32 %v491_v2, %v490_v12 }
  0x29   : > { %386 = vst.msk [vmem:[#allocation2 + $0x58] sm:$0xf] %vm363_vm0, %v10830_v0  ;;  %v692_v15 = vshrl.u32 %v446_v10, 16  ;;  %v695_v27 = vshll.u32 %v446_v10, 16  ;;  %v425_v28 = vld [vmem:[%s10922_s14 + $0x1c] sm:$0xf]  ;;  %v501_v37 = vor.u32 %v499_v6, %v11108_v14  ;;  %v689_v44 = vsel %vm10952_vm4, %v681_v5, %v688_v25 }
  0x2a   : > { %387 = vst.msk [vmem:[#allocation2 + $0x5c] sm:$0xf] %vm363_vm0, %v10830_v0  ;;  %v11126_v29 = vrot.slane %v700_v17, 7  ;;  %v513_v32 = vshrl.u32 %v425_v28, 16  ;;  %v494_v35 = vrot.slane %v490_v12, 4  ;;  %v516_v41 = vshll.u32 %v425_v28, 16 }
  0x2b   : > { %388 = vst.msk [vmem:[#allocation2 + $0x60] sm:$0xf] %vm363_vm0, %v10830_v0  ;;  %v694_v26 = vrot.slane %v692_v15, 7  ;;  %v800_v53 = vld [vmem:[#allocation2 + $0x30] sm:$0xf]  ;;  %p10533_p7 = scmp.ne.s32.totalorder %s10812_s21, 0 }
  0x2c   : > { %389 = vst.msk [vmem:[#allocation2 + $0x64] sm:$0xf] %vm363_vm0, %v10830_v0  ;;  %v11132_v40 = vrot.slane %v513_v32, 7  ;;  %v705_v46 = vor.u32 %v703_v30, %v11126_v29  ;;  %v502_v50 = vsel %vm10952_vm4, %v494_v35, %v501_v37  ;;  %v448_v61 = vld [vmem:[%s10922_s14 + $0x78] sm:$0xf] }
  0x2d   : > { %390 = vst.msk [vmem:[#allocation2 + $0x68] sm:$0xf] %vm363_vm0, %v10830_v0  ;;  %v697_v43 = vor.u32 %v695_v27, %v694_v26  ;;  %v698_v45 = vrot.slane %v694_v26, 4  ;;  %v449_v62 = vld [vmem:[%s10922_s14 + $0x7c] sm:$0xf]  ;;  %v709_v1 = vshrl.u32 %v448_v61, 16 }
  0x2e   : > { %391 = vst.msk [vmem:[#allocation2 + $0x6c] sm:$0xf] %vm363_vm0, %v10830_v0  ;;  %9618 = vmatmul.msk.bf16.gmra.mxu1 %vm1028_vm6, %v10993_v23  ;;  %v424_v23 = vld [vmem:[%s10922_s14 + $0x18] sm:$0xf]  ;;  %v518_v52 = vor.u32 %v516_v41, %v11132_v40  ;;  %v712_v2 = vshll.u32 %v448_v61, 16  ;;  %v720_v5 = vshll.u32 %v449_v62, 16 }
  0x2f   : > { %392 = vst.msk [vmem:[#allocation2 + $0x70] sm:$0xf] %vm363_vm0, %v10830_v0  ;;  %v505_v31 = vshrl.u32 %v424_v23, 16  ;;  %v508_v36 = vshll.u32 %v424_v23, 16  ;;  %v706_v55 = vsel %vm10952_vm4, %v698_v45, %v705_v46  ;;  %v426_v6 = vld [vmem:[%s10922_s14 + $0x20] sm:$0xf] }
  0x30   : > { %393 = vst.msk [vmem:[#allocation2 + $0x74] sm:$0xf] %vm363_vm0, %v10830_v0  ;;  %v427_v10 = vld [vmem:[%s10922_s14 + $0x24] sm:$0xf]  ;;  %v522_v11 = vshrl.u32 %v426_v6, 16 }
  0x31   : > { %394 = vst.msk [vmem:[#allocation2 + $0x78] sm:$0xf] %vm363_vm0, %v10830_v0  ;;  %v507_v38 = vrot.slane %v505_v31, 7  ;;  %v530_v15 = vshrl.u32 %v427_v10, 16  ;;  %v533_v17 = vshll.u32 %v427_v10, 16 }
  0x32   : > { %395 = vst.msk [vmem:[#allocation2 + $0x7c] sm:$0xf] %vm363_vm0, %v10830_v0  ;;  %v807_v25 = vld [vmem:[#allocation2 + $0x3c] sm:$0xf]  ;;  %v429_v41 = vld [vmem:[%s10922_s14 + $0x2c] sm:$0xf] }
  0x33   : > { %396 = vst.msk [vmem:[#allocation2 + $0x80] sm:$0xf] %vm363_vm0, %v10830_v0  ;;  %v511_v51 = vrot.slane %v507_v38, 4 }
  0x34   : > { %397 = vst.msk [vmem:[#allocation2 + $0x84] sm:$0xf] %vm363_vm0, %v10830_v0 }
  0x35   : > { %398 = vst.msk [vmem:[#allocation2 + $0x88] sm:$0xf] %vm363_vm0, %v10830_v0  ;;  %v519_v59 = vsel %vm10952_vm4, %v511_v51, %v518_v52 }
  0x36   : > { %399 = vst.msk [vmem:[#allocation2 + $0x8c] sm:$0xf] %vm363_vm0, %v10830_v0 }
  0x37   : > { %400 = vst.msk [vmem:[#allocation2 + $0x90] sm:$0xf] %vm363_vm0, %v10830_v0 }
  0x38   : > { %401 = vst.msk [vmem:[#allocation2 + $0x94] sm:$0xf] %vm363_vm0, %v10830_v0 }
  0x39   : > { %402 = vst.msk [vmem:[#allocation2 + $0x98] sm:$0xf] %vm363_vm0, %v10830_v0 }
  0x3a   : > { %403 = vst.msk [vmem:[#allocation2 + $0x9c] sm:$0xf] %vm363_vm0, %v10830_v0 }
  0x3b   : > { %404 = vst.msk [vmem:[#allocation2 + $0xa0] sm:$0xf] %vm363_vm0, %v10830_v0 }
  0x3c   : > { %405 = vst.msk [vmem:[#allocation2 + $0xa4] sm:$0xf] %vm363_vm0, %v10830_v0 }
  0x3d   : > { %406 = vst.msk [vmem:[#allocation2 + $0xa8] sm:$0xf] %vm363_vm0, %v10830_v0 }
  0x3e   : > { %407 = vst.msk [vmem:[#allocation2 + $0xac] sm:$0xf] %vm363_vm0, %v10830_v0  ;;  %v856_v45 = vld [vmem:[#allocation2 + $0x90] sm:$0xf] }
  0x3f   : > { %408 = vst.msk [vmem:[#allocation2 + $0xb0] sm:$0xf] %vm363_vm0, %v10830_v0 }
  0x40   : > { %409 = vst.msk [vmem:[#allocation2 + $0xb4] sm:$0xf] %vm363_vm0, %v10830_v0 }
  0x41   : > { %410 = vst.msk [vmem:[#allocation2 + $0xb8] sm:$0xf] %vm363_vm0, %v10830_v0  ;;  %v863_v4 = vld [vmem:[#allocation2 + $0x9c] sm:$0xf] }
  0x42   : > { %16620 = vst [vmem:[#allocation5_spill] sm:$0xff] %v16619_v56  ;;  %v864_v19 = vsel %vm10962_vm5, %v663_v49, %v863_v4  ;;  %v510_v49 = vor.u32 %v508_v36, %v507_v38  ;;  %v717_v4 = vshrl.u32 %v449_v62, 16  ;;  %v428_v38 = vld [vmem:[%s10922_s14 + $0x28] sm:$0xf] }
  0x43   : > { %411 = vst.msk [vmem:[#allocation2 + $0xbc] sm:$0xf] %vm363_vm0, %v10830_v0  ;;  %v542_v46 = vshll.u32 %v428_v38, 16 }
  0x44   : > { %412 = vst.msk [vmem:[#allocation2 + $0xc0] sm:$0xf] %vm363_vm0, %v10830_v0  ;;  %v870_v22 = vld [vmem:[#allocation2 + $0xa8] sm:$0xf]  ;;  %v801_v58 = vsel %vm10962_vm5, %v510_v49, %v800_v53  ;;  %v11168_v9 = vrot.slane %v717_v4, 7 }
  0x45   : > { %413 = vst.msk [vmem:[#allocation2 + $0xc4] sm:$0xf] %vm363_vm0, %v10830_v0  ;;  %v871_v42 = vsel %vm10962_vm5, %v680_v24, %v870_v22  ;;  %v11173_v22 = vrot.slane %v530_v15, 7 }
  0x46   : > { %414 = vst.msk [vmem:[#allocation2 + $0xc8] sm:$0xf] %vm363_vm0, %v10830_v0 }
  0x47   : > { %415 = vst.msk [vmem:[#allocation2 + $0xcc] sm:$0xf] %vm363_vm0, %v10830_v0  ;;  %v877_v47 = vld [vmem:[#allocation2 + $0xb4] sm:$0xf] }
  0x48   : > { %416 = vst.msk [vmem:[#allocation2 + $0xd0] sm:$0xf] %vm363_vm0, %v10830_v0  ;;  %v878_v54 = vsel %vm10962_vm5, %v697_v43, %v877_v47  ;;  %v547_v47 = vshrl.u32 %v429_v41, 16 }
  0x49   : > { %417 = vst.msk [vmem:[#allocation2 + $0xd4] sm:$0xf] %vm363_vm0, %v10830_v0  ;;  %v793_v0 = vld [vmem:[#allocation2 + $0x24] sm:$0xf] }
  0x4a   : > { %785 = vst [vmem:[#allocation2 + $0x14] sm:$0x1] %v784_v7  ;;  %v794_v48 = vsel %vm10962_vm5, %v493_v34, %v793_v0  ;;  %v711_v7 = vrot.slane %v709_v1, 7  ;;  %v441_v34 = vld [vmem:[%s10922_s14 + $0x5c] sm:$0xf]  ;;  %v11200_v53 = vrot.slane %v547_v47, 7 }
  0x4b   : > { %16621 = vst [vmem:[#allocation6_spill] sm:$0xff] %v11126_v29  ;;  %v884_v12 = vld [vmem:[#allocation2 + $0xc0] sm:$0xf]  ;;  %v649_v36 = vshrl.u32 %v441_v34, 16  ;;  %v652_v37 = vshll.u32 %v441_v34, 16 }
  0x4c   : > { %865 = vst [vmem:[#allocation2 + $0x9c] sm:$0xf] %v864_v19  ;;  %v715_v19 = vrot.slane %v711_v7, 4  ;;  %v10564_v47 = vld [vmem:[%s10917_s11 + $0x40] sm:$0xff] }
  0x4d   : > { %866 = vst.msk [vmem:[#allocation2 + $0xa0] sm:$0xf] %vm363_vm0, %v672_v18  ;;  %v714_v18 = vor.u32 %v712_v2, %v711_v7  ;;  %v11197_v43 = vrot.slane %v649_v36, 7  ;;  %2150 = vmatpush.bf16.msrb.mxu0 %v10564_v47  ;;  %v849_v47 = vld [vmem:[#allocation2 + $0x84] sm:$0xf] }
  0x4e   : > { %788 = vst [vmem:[#allocation2 + $0x18] sm:$0xf] %v787_v21  ;;  %v524_v21 = vrot.slane %v522_v11, 7 }
  0x4f   : > { %789 = vst.msk [vmem:[#allocation2 + $0x1c] sm:$0xf] %vm363_vm0, %v485_v20  ;;  %v722_v20 = vor.u32 %v720_v5, %v11168_v9  ;;  %v885_v24 = vsel %vm10962_vm5, %v714_v18, %v884_v12  ;;  %v654_v51 = vor.u32 %v652_v37, %v11197_v43  ;;  %v430_v5 = vld [vmem:[%s10922_s14 + $0x30] sm:$0xf]  ;;  %v828_v37 = vld [vmem:[#allocation2 + $0x60] sm:$0xf] }
  0x50   : > { %792 = vst [vmem:[#allocation2 + $0x20] sm:$0x1] %v791_v33  ;;  %v528_v27 = vrot.slane %v524_v21, 4  ;;  %v440_v33 = vld [vmem:[%s10922_s14 + $0x58] sm:$0xf]  ;;  %v556_v7 = vshrl.u32 %v430_v5, 16 }
  0x51   : > { %872 = vst [vmem:[#allocation2 + $0xa8] sm:$0xf] %v871_v42  ;;  %v723_v23 = vsel %vm10952_vm4, %v715_v19, %v722_v20  ;;  %v641_v35 = vshrl.u32 %v440_v33, 16  ;;  %v644_v0 = vshll.u32 %v440_v33, 16  ;;  %v559_v12 = vshll.u32 %v430_v5, 16 }
  0x52   : > { %873 = vst.msk [vmem:[#allocation2 + $0xac] sm:$0xf] %vm363_vm0, %v689_v44  ;;  %v539_v44 = vshrl.u32 %v428_v38, 16  ;;  %v558_v11 = vrot.slane %v556_v7, 7  ;;  %v821_v20 = vld [vmem:[#allocation2 + $0x54] sm:$0xf] }
  0x53   : > { %795 = vst [vmem:[#allocation2 + $0x24] sm:$0xf] %v794_v48  ;;  %v643_v42 = vrot.slane %v641_v35, 7  ;;  %v550_v48 = vshll.u32 %v429_v41, 16  ;;  %v437_v5 = vld [vmem:[%s10922_s14 + $0x4c] sm:$0xf] }
  0x54   : > { %v11150_v57 = vld [vmem:[#allocation2 + $0x9c] sm:$0xff]  ;;  %796 = vst.msk [vmem:[#allocation2 + $0x28] sm:$0xf] %vm363_vm0, %v502_v50  ;;  %v541_v52 = vrot.slane %v539_v44, 7  ;;  %v562_v18 = vrot.slane %v558_v11, 4 }
  0x55   : > { %879 = vst [vmem:[#allocation2 + $0xb4] sm:$0xf] %v878_v54  ;;  %9601 = vmatmul.msk.bf16.vlgmr.msra.gmra.mxu3 %vm1028_vm6, %v11150_v57  ;;  %v646_v49 = vor.u32 %v644_v0, %v643_v42  ;;  %v647_v50 = vrot.slane %v643_v42, 4  ;;  %v552_v61 = vor.u32 %v550_v48, %v11200_v53 }
  0x56   : > { %v10540_v60 = vld [vmem:[#allocation2 + $0x18] sm:$0xff]  ;;  %880 = vst.msk [vmem:[#allocation2 + $0xb8] sm:$0xf] %vm363_vm0, %v706_v55  ;;  %10650 = vmatpush.bf16.msra.mxu3 %v10929_v3  ;;  %v525_v3 = vshll.u32 %v426_v6, 16  ;;  %v431_v6 = vld [vmem:[%s10922_s14 + $0x34] sm:$0xf] }
  0x57   : > { %802 = vst [vmem:[#allocation2 + $0x30] sm:$0xf] %v801_v58  ;;  %9649 = vmatmul.msk.bf16.vlgmr.msra.gmra.mxu2 %vm1028_vm6, %v10540_v60  ;;  %9590 = vmatmul.msk.bf16.gmra.mxu0 %vm1028_vm6, %v10540_v60  ;;  %v655_v54 = vsel %vm10952_vm4, %v647_v50, %v654_v51  ;;  %v857_v55 = vsel %vm10962_vm5, %v646_v49, %v856_v45  ;;  %v814_v58 = vld [vmem:[#allocation2 + $0x48] sm:$0xf]  ;;  %v564_v10 = vshrl.u32 %v431_v6, 16  ;;  %v567_v15 = vshll.u32 %v431_v6, 16 }
  0x58   : > { %803 = vst.msk [vmem:[#allocation2 + $0x34] sm:$0xf] %vm363_vm0, %v519_v59  ;;  %9619 = vmatmul.msk.bf16.gmra.mxu1 %vm1028_vm6, %v10540_v60  ;;  %v527_v26 = vor.u32 %v525_v3, %v524_v21  ;;  %v544_v59 = vor.u32 %v542_v46, %v541_v52  ;;  %v545_v60 = vrot.slane %v541_v52, 4  ;;  %v434_v45 = vld [vmem:[%s10922_s14 + $0x40] sm:$0xf] }
  0x59   : > { %16622 = vst [vmem:[#allocation7_spill] sm:$0xff] %v11168_v9  ;;  %v11185_v31 = vld [vmem:[#allocation2 + $0xa8] sm:$0xff]  ;;  %v11222_v3 = vrot.slane %v564_v10, 7  ;;  %v435_v46 = vld [vmem:[%s10922_s14 + $0x44] sm:$0xf]  ;;  %v590_v48 = vshrl.u32 %v434_v45, 16 }
  0x5a   : > { %10651 = vmatpush.bf16.msra.mxu3 %v10946_v8  ;;  %886 = vst [vmem:[#allocation2 + $0xc0] sm:$0xf] %v885_v24  ;;  %v535_v8 = vor.u32 %v533_v17, %v11173_v22  ;;  %v808_v30 = vsel %vm10962_vm5, %v527_v26, %v807_v25  ;;  %v553_v62 = vsel %vm10952_vm4, %v545_v60, %v552_v61  ;;  %v432_v26 = vld [vmem:[%s10922_s14 + $0x38] sm:$0xf]  ;;  %v598_v49 = vshrl.u32 %v435_v46, 16 }
  0x5b   : > { %887 = vst.msk [vmem:[#allocation2 + $0xc4] sm:$0xf] %vm363_vm0, %v723_v23  ;;  %v10541_v32 = vld [vmem:[#allocation2 + $0x24] sm:$0xff]  ;;  %v815_v1 = vsel %vm10962_vm5, %v544_v59, %v814_v58  ;;  %v561_v17 = vor.u32 %v559_v12, %v558_v11  ;;  %v569_v19 = vor.u32 %v567_v15, %v11222_v3  ;;  %v592_v50 = vrot.slane %v590_v48, 7  ;;  %v835_v60 = vld [vmem:[#allocation2 + $0x6c] sm:$0xf] }
  0x5c   : > { %v536_v28 = vsel %vm10952_vm4, %v528_v27, %v535_v8  ;;  %809 = vst [vmem:[#allocation2 + $0x3c] sm:$0xf] %v808_v30  ;;  %v433_v27 = vld [vmem:[%s10922_s14 + $0x3c] sm:$0xf]  ;;  %v573_v8 = vshrl.u32 %v432_v26, 16  ;;  %v593_v51 = vshll.u32 %v434_v45, 16 }
  0x5d   : > { %810 = vst.msk [vmem:[#allocation2 + $0x40] sm:$0xf] %vm363_vm0, %v536_v28  ;;  %v11212_v2 = vld [vmem:[#allocation2 + $0xb4] sm:$0xff]  ;;  %v570_v21 = vsel %vm10952_vm4, %v562_v18, %v569_v19  ;;  %v822_v23 = vsel %vm10962_vm5, %v561_v17, %v821_v20  ;;  %v581_v28 = vshrl.u32 %v433_v27, 16  ;;  %v584_v34 = vshll.u32 %v433_v27, 16 }
  0x5e   : > { %858 = vst [vmem:[#allocation2 + $0x90] sm:$0xf] %v857_v55  ;;  %v575_v30 = vrot.slane %v573_v8, 7  ;;  %v11257_v52 = vrot.slane %v598_v49, 7  ;;  %v595_v55 = vor.u32 %v593_v51, %v592_v50  ;;  %v596_v58 = vrot.slane %v592_v50, 4 }
  0x5f   : > { %859 = vst.msk [vmem:[#allocation2 + $0x94] sm:$0xf] %vm363_vm0, %v655_v54  ;;  %v10542_v4 = vld [vmem:[#allocation2 + $0x30] sm:$0xff]  ;;  %v11239_v33 = vrot.slane %v581_v28, 7  ;;  %v601_v54 = vshll.u32 %v435_v46, 16  ;;  %v615_v10 = vshrl.u32 %v437_v5, 16 }
  0x60   : > { %816 = vst [vmem:[#allocation2 + $0x48] sm:$0xf] %v815_v1  ;;  %v579_v0 = vrot.slane %v575_v30, 4  ;;  %v618_v11 = vshll.u32 %v437_v5, 16  ;;  %v842_v17 = vld [vmem:[#allocation2 + $0x78] sm:$0xf] }
  0x61   : > { %817 = vst.msk [vmem:[#allocation2 + $0x4c] sm:$0xf] %vm363_vm0, %v553_v62  ;;  %v586_v36 = vor.u32 %v584_v34, %v11239_v33  ;;  %v603_v59 = vor.u32 %v601_v54, %v11257_v52  ;;  %v836_v62 = vsel %vm10962_vm5, %v595_v55, %v835_v60  ;;  %v11272_v15 = vrot.slane %v615_v10, 7  ;;  %v438_v28 = vld [vmem:[%s10922_s14 + $0x50] sm:$0xf] }
  0x62   : > { %823 = vst [vmem:[#allocation2 + $0x54] sm:$0xf] %v822_v23  ;;  %v11230_v24 = vld [vmem:[#allocation2 + $0xc0] sm:$0xff]  ;;  %v624_v34 = vshrl.u32 %v438_v28, 16 }
  0x63   : > { %824 = vst.msk [vmem:[#allocation2 + $0x58] sm:$0xf] %vm363_vm0, %v570_v21  ;;  %v587_v38 = vsel %vm10952_vm4, %v579_v0, %v586_v36  ;;  %v604_v61 = vsel %vm10952_vm4, %v596_v58, %v603_v59  ;;  %v620_v20 = vor.u32 %v618_v11, %v11272_v15  ;;  %v627_v36 = vshll.u32 %v438_v28, 16 }
  0x64   : > { %v10543_v25 = vld [vmem:[#allocation2 + $0x3c] sm:$0xff]  ;;  %831 = vst.msk [vmem:[#allocation2 + $0x64] sm:$0xf] %vm363_vm0, %v587_v38  ;;  %v626_v0 = vrot.slane %v624_v34, 7 }
  0x65   : > { %9602 = vmatmul.msk.bf16.gmra.mxu3 %vm1028_vm6, %v11185_v31  ;;  %837 = vst [vmem:[#allocation2 + $0x6c] sm:$0xf] %v836_v62  ;;  %v10562_v62 = vld [vmem:[%s10917_s11 + $0x10] sm:$0xff] }
  0x66   : > { %v11247_v42 = vld [vmem:[#allocation2 + $0x90] sm:$0xff]  ;;  %838 = vst.msk [vmem:[#allocation2 + $0x70] sm:$0xf] %vm363_vm0, %v604_v61  ;;  %v630_v45 = vrot.slane %v626_v0, 4 }
  0x67   : > { %9650 = vmatmul.msk.bf16.gmra.mxu2 %vm1028_vm6, %v10541_v32  ;;  %9591 = vmatmul.msk.bf16.gmra.mxu0 %vm1028_vm6, %v10541_v32 }
  0x68   : > { %9620 = vmatmul.msk.bf16.gmra.mxu1 %vm1028_vm6, %v10541_v32  ;;  %v576_v32 = vshll.u32 %v432_v26, 16  ;;  %v10544_v44 = vld [vmem:[#allocation2 + $0x48] sm:$0xff] }
  0x6a   : > { %v578_v35 = vor.u32 %v576_v32, %v575_v30  ;;  %v10545_v1 = vld [vmem:[#allocation2 + $0x54] sm:$0xff] }
  0x6b   : > { %v439_v30 = vld [vmem:[%s10922_s14 + $0x54] sm:$0xf]  ;;  %v10563_v32 = vld [vmem:[%s10917_s11 + $0x18] sm:$0xff] }
  0x6c   : > { %v829_v41 = vsel %vm10962_vm5, %v578_v35, %v828_v37  ;;  %v632_v35 = vshrl.u32 %v439_v30, 16  ;;  %v635_v38 = vshll.u32 %v439_v30, 16 }
  0x6d   : > { %830 = vst [vmem:[#allocation2 + $0x60] sm:$0xf] %v829_v41  ;;  %v10547_v50 = vld [vmem:[#allocation2 + $0x6c] sm:$0xff] }
  0x6e   : > { %v11288_v37 = vrot.slane %v632_v35, 7 }
  0x70   : > { %v637_v46 = vor.u32 %v635_v38, %v11288_v37  ;;  %v11340_v38 = vld [vmem:[#allocation2 + $0x14] sm:$0x1] }
  0x72   : > { %v638_v48 = vsel %vm10952_vm4, %v630_v45, %v637_v46 }
  0x73   : > { %852 = vst.msk [vmem:[#allocation2 + $0x88] sm:$0xf] %vm363_vm0, %v638_v48  ;;  %v10569_v48 = vld [vmem:[%s10917_s11 + $0x28] sm:$0xff] }
  0x74   : > { %v10546_v27 = vld [vmem:[#allocation2 + $0x60] sm:$0xff]  ;;  %2732 = vmatpush.bf16.msrb.mxu2 %v10569_v48 }
  0x75   : > { %9603 = vmatmul.msk.bf16.gmra.mxu3 %vm1028_vm6, %v11212_v2 }
  0x77   : > { %9651 = vmatmul.msk.bf16.gmra.mxu2 %vm1028_vm6, %v10542_v4  ;;  %9592 = vmatmul.msk.bf16.gmra.mxu0 %vm1028_vm6, %v10542_v4 }
  0x78   : > { %9621 = vmatmul.msk.bf16.gmra.mxu1 %vm1028_vm6, %v10542_v4  ;;  %v436_v4 = vld [vmem:[%s10922_s14 + $0x48] sm:$0xf] }
  0x79   : > { %v607_v6 = vshrl.u32 %v436_v4, 16  ;;  %v610_v7 = vshll.u32 %v436_v4, 16 }
  0x7b   : > { %v609_v12 = vrot.slane %v607_v6, 7 }
  0x7d   : > { %v612_v18 = vor.u32 %v610_v7, %v609_v12  ;;  %v613_v19 = vrot.slane %v609_v12, 4 }
  0x7f   : > { %v621_v21 = vsel %vm10952_vm4, %v613_v19, %v620_v20  ;;  %v843_v23 = vsel %vm10962_vm5, %v612_v18, %v842_v17 }
  0x80   : > { %844 = vst [vmem:[#allocation2 + $0x78] sm:$0xf] %v843_v23 }
  0x81   : > { %845 = vst.msk [vmem:[#allocation2 + $0x7c] sm:$0xf] %vm363_vm0, %v621_v21  ;;  %v1424_v21 = vld [vmem:[#allocation2 + $0xc] sm:$0xf] }
  0x85   : > { %9604 = vmatmul.msk.bf16.gmra.mxu3 %vm1028_vm6, %v11230_v24 }
  0x87   : > { %9652 = vmatmul.msk.bf16.gmra.mxu2 %vm1028_vm6, %v10543_v25  ;;  %9593 = vmatmul.msk.bf16.gmra.mxu0 %vm1028_vm6, %v10543_v25 }
  0x88   : > { %9622 = vmatmul.msk.bf16.gmra.mxu1 %vm1028_vm6, %v10543_v25  ;;  %v10548_v58 = vld [vmem:[#allocation2 + $0x78] sm:$0xff] }
  0x95   : > { %9629 = vmatmul.msk.bf16.vlgmr.msrb.gmra.mxu3 %vm1028_vm6, %v11247_v42 }
  0x96   : > { %1981 = vmatpush.bf16.msrb.mxu3 %v10563_v32 }
  0x97   : > { %9653 = vmatmul.msk.bf16.gmra.mxu2 %vm1028_vm6, %v10544_v44  ;;  %9594 = vmatmul.msk.bf16.gmra.mxu0 %vm1028_vm6, %v10544_v44 }
  0x98   : > { %9623 = vmatmul.msk.bf16.gmra.mxu1 %vm1028_vm6, %v10544_v44  ;;  %v629_v44 = vor.u32 %v627_v36, %v626_v0 }
  0x9a   : > { %v850_v49 = vsel %vm10962_vm5, %v629_v44, %v849_v47  ;;  %1982 = vmatpush.bf16.msrb.mxu3 %v10562_v62 }
  0x9b   : > { %v1195_v26 = vpop.f32.mrf.mxu1  ;;  %851 = vst [vmem:[#allocation2 + $0x84] sm:$0xf] %v850_v49 }
  0xa2   : > { %v10549_v12 = vld [vmem:[#allocation2 + $0x84] sm:$0xff] }
  0xa3   : > { %v11290_v41 = vpop.f32.mrf.mxu1 }
  0xa5   : > { %9630 = vmatmul.msk.bf16.gmra.mxu3 %vm1028_vm6, %v11150_v57  ;;  %v1086_v25 = vpop.f32.mrf.mxu0 }
  0xa6   : > { %v1196_v8 = vadd.f32 %v1195_v26, %v1086_v25  ;;  %v11328_v25 = vld [vmem:[#allocation2 + $0x10] sm:$0xf] }
  0xa7   : > { %9654 = vmatmul.msk.bf16.gmra.mxu2 %vm1028_vm6, %v10545_v1  ;;  %9595 = vmatmul.msk.bf16.gmra.mxu0 %vm1028_vm6, %v10545_v1  ;;  %v1512_v28 = vshll.u32 %v11328_v25, 16  ;;  %v1516_v0 = vshrl.u32 %v11328_v25, 16 }
  0xa8   : > { %9624 = vmatmul.msk.bf16.gmra.mxu1 %vm1028_vm6, %v10545_v1 }
  0xa9   : > { %v11342_v44 = vrot.slane %v1512_v28, 5  ;;  %v1518_v45 = vrot.slane %v1516_v0, 4  ;;  %v10567_v28 = vld [vmem:[%s10917_s11 + $0x78] sm:$0xff] }
  0xaa   : > { %2317 = vmatpush.bf16.msrb.mxu1 %v10567_v28 }
  0xab   : > { %v1200_v51 = vpop.f32.mrf.mxu1 }
  0xad   : > { %v11303_v54 = vpop.f32.mrf.mxu0 }
  0xb3   : > { %v1202_v55 = vpop.f32.mrf.mxu1 }
  0xb5   : > { %9631 = vmatmul.msk.bf16.gmra.mxu3 %vm1028_vm6, %v11185_v31 }
  0xb7   : > { %9655 = vmatmul.msk.bf16.gmra.mxu2 %vm1028_vm6, %v10546_v27  ;;  %9596 = vmatmul.msk.bf16.gmra.mxu0 %vm1028_vm6, %v10546_v27 }
  0xb8   : > { %9625 = vmatmul.msk.bf16.gmra.mxu1 %vm1028_vm6, %v10546_v27  ;;  %v1503_v27 = vshrl.u32 %v1424_v21, 16 }
  0xba   : > { %v1505_v34 = vrot.slane %v1503_v27, 4 }
  0xc5   : > { %9632 = vmatmul.msk.bf16.gmra.mxu3 %vm1028_vm6, %v11212_v2 }
  0xc7   : > { %9656 = vmatmul.msk.bf16.gmra.mxu2 %vm1028_vm6, %v10547_v50  ;;  %9597 = vmatmul.msk.bf16.gmra.mxu0 %vm1028_vm6, %v10547_v50 }
  0xc8   : > { %9626 = vmatmul.msk.bf16.gmra.mxu1 %vm1028_vm6, %v10547_v50  ;;  %v1522_v50 = vshll.u32 %v11340_v38, 16 }
  0xd4   : > { %v1091_v59 = vpop.f32.mrf.mxu0 }
  0xd5   : > { %9661 = vmatmul.msk.bf16.vlgmr.msra.gmra.mxu3 %vm1028_vm6, %v11185_v31  ;;  %v1201_v60 = vadd.f32 %v1200_v51, %v1091_v59  ;;  %v1205_v61 = vpop.f32.mrf.mxu1  ;;  %v1427_v51 = vld [vmem:[#allocation2 + $0x18] sm:$0xf]  ;;  %v1421_v59 = vld [vmem:[#allocation2] sm:$0xf] }
  0xd7   : > { %9657 = vmatmul.msk.bf16.gmra.mxu2 %vm1028_vm6, %v10548_v58  ;;  %9598 = vmatmul.msk.bf16.gmra.mxu0 %vm1028_vm6, %v10548_v58 }
  0xd8   : > { %v11310_v1 = vpop.f32.mrf.mxu3  ;;  %9627 = vmatmul.msk.bf16.gmra.mxu1 %vm1028_vm6, %v10548_v58 }
  0xda   : > { %v1309_v4 = vpop.f32.mrf.mxu2 }
  0xdb   : > { %v11313_v5 = vadd.f32 %v1309_v4, %v1196_v8  ;;  %v10571_v4 = vld [vmem:[%s10917_s11 + $0x58] sm:$0xff] }
  0xdc   : > { %v1093_v6 = vpop.f32.mrf.mxu0  ;;  %2886 = vmatpush.bf16.msra.mxu3 %v10571_v4 }
  0xdd   : > { %v1203_v7 = vadd.f32 %v1202_v55, %v1093_v6  ;;  %v1207_v10 = vpop.f32.mrf.mxu1  ;;  %v11348_v55 = vld [vmem:[#allocation2 + $0x1c] sm:$0xf]  ;;  %v1527_v6 = vshrl.u32 %v1427_v51, 16 }
  0xde   : > { %v1540_v0 = vshrl.u32 %v11348_v55, 16 }
  0xe0   : > { %v11315_v11 = vpop.f32.mrf.mxu3 }
  0xe2   : > { %v11317_v31 = vpop.f32.mrf.mxu2 }
  0xe4   : > { %v1096_v17 = vpop.f32.mrf.mxu0 }
  0xe5   : > { %9662 = vmatmul.msk.bf16.gmra.mxu3 %vm1028_vm6, %v11212_v2  ;;  %v11321_v18 = vadd.f32 %v1205_v61, %v1096_v17  ;;  %v1210_v19 = vpop.f32.mrf.mxu1  ;;  %v1506_v2 = vshll.u32 %v1424_v21, 16  ;;  %v11365_v21 = vld [vmem:[#allocation2 + $0x20] sm:$0x1] }
  0xe7   : > { %9658 = vmatmul.msk.bf16.gmra.mxu2 %vm1028_vm6, %v10549_v12  ;;  %9599 = vmatmul.msk.bf16.gmra.mxu0 %vm1028_vm6, %v10549_v12  ;;  %v1508_v35 = vrot.slane %v1506_v2, 5  ;;  %v16623_v2 = vmov 0 }
  0xe8   : > { %v11325_v20 = vpop.f32.mrf.mxu3  ;;  %9628 = vmatmul.msk.bf16.gmra.mxu1 %vm1028_vm6, %v10549_v12  ;;  %v11359_v12 = vld [vmem:[#allocation2 + $0x4] sm:$0xf]  ;;  %v16624_v2 = vsel %vm11371_vm11, 4294967295, %v16623_v2 }
  0xe9   : > { %v1509_v49 = vor.u32 %v1508_v35, %v1505_v34  ;;  %16625 = vst [vmem:[#allocation8_spill] sm:$0xff] %v16624_v2  ;;  %v10568_v34 = vld [vmem:[%s10917_s11 + $0x20] sm:$0xff]  ;;  %v1492_v48 = vshrl.u32 %v11359_v12, 16 }
  0xea   : > { %v1314_v23 = vpop.f32.mrf.mxu2  ;;  %2733 = vmatpush.bf16.msrb.mxu2 %v10568_v34 }
  0xeb   : > { %v11330_v26 = vadd.f32 %v1314_v23, %v1201_v60  ;;  %v1519_v60 = vor.u32 %v1518_v45, %v11342_v44  ;;  %v1510_v17 = vrot.slane %v1509_v49, 4  ;;  %v1529_v23 = vrot.slane %v1527_v6, 4 }
  0xec   : > { %v1098_v8 = vpop.f32.mrf.mxu0  ;;  %v1482_v45 = vshll.u32 %v1421_v59, 16  ;;  %v1546_v49 = vshll.u32 %v11365_v21, 16 }
  0xed   : > { %v11333_v30 = vadd.f32 %v1207_v10, %v1098_v8  ;;  %v11335_v32 = vpop.f32.mrf.mxu1  ;;  %v1536_v10 = vshll.u32 %v11348_v55, 16  ;;  %v1520_v8 = vrot.slane %v1519_v60, 4  ;;  %v503_v60 = vrot.slane %v11108_v14, 4 }
  0xee   : > { %v1484_v14 = vrot.slane %v1482_v45, 5 }
  0xf0   : > { %v11338_v36 = vpop.f32.mrf.mxu3 }
  0xf2   : > { %v1316_v46 = vpop.f32.mrf.mxu2 }
  0xf3   : > { %v11344_v47 = vadd.f32 %v1316_v46, %v1203_v7  ;;  %v1530_v7 = vshll.u32 %v1427_v51, 16  ;;  %v1488_v46 = vshll.u32 %v11359_v12, 16 }
  0xf4   : > { %v1101_v58 = vpop.f32.mrf.mxu0 }
  0xf5   : > { %9663 = vmatmul.msk.bf16.gmra.mxu3 %vm1028_vm6, %v11230_v24  ;;  %v11353_v61 = vadd.f32 %v1210_v19, %v1101_v58  ;;  %v11355_v62 = vpop.f32.mrf.mxu1  ;;  %v1479_v24 = vshrl.u32 %v1421_v59, 16  ;;  %v1524_v19 = vrot.slane %v1522_v50, 5  ;;  %v1532_v35 = vrot.slane %v1530_v7, 5  ;;  %v10566_v7 = vld [vmem:[%s10917_s11 + $0x70] sm:$0xff] }
  0xf6   : > { %v1542_v58 = vrot.slane %v1540_v0, 4  ;;  %v1515_v59 = vsel %vm11371_vm11, %v1510_v17, %v11342_v44  ;;  %2318 = vmatpush.bf16.msrb.mxu1 %v10566_v7 }
  0xf7   : > { %9659 = vmatmul.msk.bf16.gmra.mxu2 %vm1028_vm6, %v11247_v42  ;;  %9600 = vmatmul.msk.bf16.gmra.mxu0 %vm1028_vm6, %v11247_v42  ;;  %v1538_v42 = vrot.slane %v1536_v10, 5  ;;  %v1533_v51 = vor.u32 %v1532_v35, %v1529_v23  ;;  %v1481_v6 = vrot.slane %v1479_v24, 4  ;;  %v10573_v10 = vld [vmem:[%s10917_s11 + $0x88] sm:$0xff]  ;;  %v1525_v13 = vsel %vm11371_vm11, %v1520_v8, %v1524_v19 }
  0xf8   : > { %v11367_v27 = vpop.f32.mrf.mxu3  ;;  %v1548_v23 = vrot.slane %v1546_v49, 5  ;;  %v1494_v24 = vrot.slane %v1492_v48, 4  ;;  %3040 = vmatpush.bf16.msra.mxu0 %v10573_v10  ;;  %v11401_v19 = vld [vmem:[#allocation2 + $0x8] sm:$0x1]  ;;  %v1869_v8 = vunpack.c.l.b16 %v1515_v59  ;;  %v1870_v49 = vunpack.c.l.b16 %v1525_v13 }
  0xf9   : > { %v1534_v28 = vrot.slane %v1533_v51, 4  ;;  %v1543_v34 = vor.u32 %v1542_v58, %v1538_v42  ;;  %v1485_v48 = vor.u32 %v1484_v14, %v1481_v6  ;;  %v1498_v10 = vshll.u32 %v11401_v19, 16 }
  0xfa   : > { %v1319_v50 = vpop.f32.mrf.mxu2  ;;  %v11414_v59 = vpack.c.b16 %v1870_v49, %v1869_v8  ;;  %v2432_v8 = vld [vmem:[#allocation2] sm:$0xe] }
  0xfb   : > { %v11383_v4 = vadd.f32 %v1319_v50, %v11321_v18  ;;  %v11395_v18 = vrot.slane %v1488_v46, 5  ;;  %v1539_v44 = vsel %vm11371_vm11, %v1534_v28, %v1538_v42  ;;  %v1544_v17 = vrot.slane %v1543_v34, 4  ;;  %v797_v50 = vld [vmem:[#allocation2 + $0x2c] sm:$0x1]  ;;  %v1430_v28 = vld [vmem:[#allocation2 + $0x24] sm:$0xf] }
  0xfc   : > { %v1103_v16 = vpop.f32.mrf.mxu0  ;;  %v1871_v51 = vunpack.c.l.b16 %v1539_v44  ;;  %v10555_v46 = vld [vmem:[#allocation2 + $0xcc] sm:$0xff]  ;;  %v11418_v34 = vld [vmem:[#allocation2 + $0x28] sm:$0xf]  ;;  %v2503_v44 = vrot.slane %v11359_v12, 5  ;;  %v1551_v6 = vshrl.u32 %v1430_v28, 16  ;;  %v1554_v14 = vshll.u32 %v1430_v28, 16 }
  0xfd   : > { %16626 = vst [vmem:[#allocation9_spill] sm:$0xff] %v11383_v4  ;;  %v11393_v35 = vadd.f32 %v11335_v32, %v1103_v16  ;;  %v11397_v0 = vpop.f32.mrf.mxu1  ;;  %v798_v16 = vsel %vm11079_vm8, %v503_v60, %v797_v50  ;;  %v1549_v45 = vsel %vm11371_vm11, %v1544_v17, %v1548_v23  ;;  %v1495_v42 = vor.u32 %v1494_v24, %v11395_v18 }
  0xfe   : > { %799 = vst [vmem:[#allocation2 + $0x2c] sm:$0x1] %v798_v16  ;;  %v1872_v58 = vunpack.c.l.b16 %v1549_v45  ;;  %v1560_v24 = vshll.u32 %v11418_v34, 16  ;;  %v1500_v16 = vrot.slane %v1498_v10, 5  ;;  %v1553_v12 = vrot.slane %v1551_v6, 4 }
  0xff   : > { %v1496_v50 = vrot.slane %v1495_v42, 4  ;;  %v1556_v45 = vrot.slane %v1554_v14, 5  ;;  %v2506_v10 = vrot.slane %v11401_v19, 5  ;;  %v520_v19 = vrot.slane %v11132_v40, 4 }
 0x100   : > { %v11405_v32 = vpop.f32.mrf.mxu3  ;;  %v11416_v60 = vpack.c.b16 %v1872_v58, %v1871_v51  ;;  %v1564_v51 = vshrl.u32 %v11418_v34, 16  ;;  %v9749_v58 = vrot.slane %v2432_v8, 9 }
 0x101   : > { %v1557_v6 = vor.u32 %v1556_v45, %v1553_v12  ;;  %v1501_v8 = vsel %vm11371_vm11, %v1496_v50, %v1500_v16 }
 0x102   : > { %v1321_v7 = vpop.f32.mrf.mxu2  ;;  %9733 = vmatmul.msk.bf16.vlgmr.msrb.gmra.mxu1 %vm1028_vm6, %v11416_v60  ;;  %v2504_v4 = vsel %vm11443_vm14, %v9749_v58, %v2503_v44  ;;  %v1868_v45 = vunpack.c.l.b16 %v1501_v8 }
 0x103   : > { %v11412_v13 = vadd.f32 %v1321_v7, %v11333_v30  ;;  %v1486_v30 = vrot.slane %v1485_v48, 4  ;;  %v1566_v48 = vrot.slane %v1564_v51, 4  ;;  %v2505_v7 = vrot.slane %v2503_v44, 4 }
 0x104   : > { %v1106_v23 = vpop.f32.mrf.mxu0 }
 0x105   : > { %16627 = vst [vmem:[#allocation10_spill] sm:$0xff] %v11412_v13  ;;  %9664 = vmatmul.msk.bf16.gmra.mxu3 %vm1028_vm6, %v10555_v46  ;;  %v11424_v17 = vadd.f32 %v11355_v62, %v1106_v23  ;;  %v1220_v49 = vpop.f32.mrf.mxu1  ;;  %v11433_v62 = vld [vmem:[#allocation2 + $0x2c] sm:$0x1]  ;;  %v1562_v46 = vrot.slane %v1560_v24, 5  ;;  %v16628_v23 = vmov 0  ;;  %v1558_v13 = vrot.slane %v1557_v6, 4 }
 0x106   : > { %v1570_v28 = vshll.u32 %v11433_v62, 16  ;;  %v16629_v23 = vsel %vm11443_vm14, 4294967295, %v16628_v23  ;;  %v2507_v12 = vsel %vm11443_vm14, %v2505_v7, %v2506_v10  ;;  %v2618_v6 = vunpack.c.l.b16 %v2504_v4 }
 0x107   : > { %9660 = vmatmul.msk.bf16.gmra.mxu2 %vm1028_vm6, %v11150_v57  ;;  %9705 = vmatmul.msk.bf16.vlgmr.msrb.gmra.mxu0 %vm1028_vm6, %v11414_v59  ;;  %v1491_v57 = vsel %vm11371_vm11, %v1486_v30, %v11395_v18  ;;  %16630 = vst [vmem:[#allocation11_spill] sm:$0xff] %v16629_v23  ;;  %v1567_v14 = vor.u32 %v1566_v48, %v1562_v46  ;;  %v2510_v4 = vrot.slane %v11328_v25, 5 }
 0x108   : > { %v11435_v42 = vpop.f32.mrf.mxu3  ;;  %v1572_v51 = vrot.slane %v1570_v28, 5  ;;  %v1867_v18 = vunpack.c.l.b16 %v1491_v57  ;;  %v1563_v40 = vsel %vm11371_vm11, %v1558_v13, %v1562_v46  ;;  %v804_v57 = vld [vmem:[#allocation2 + $0x38] sm:$0x1] }
 0x109   : > { %v1568_v29 = vrot.slane %v1567_v14, 4  ;;  %v1873_v16 = vunpack.c.l.b16 %v1563_v40  ;;  %v2619_v14 = vunpack.c.l.b16 %v2507_v12  ;;  %v805_v44 = vsel %vm11079_vm8, %v520_v19, %v804_v57  ;;  %v2433_v12 = vld [vmem:[#allocation2 + $0xc] sm:$0xe] }
 0x10a   : > { %v1324_v24 = vpop.f32.mrf.mxu2  ;;  %806 = vst [vmem:[#allocation2 + $0x38] sm:$0x1] %v805_v44  ;;  %v9750_v57 = vrot.slane %v2433_v12, 9 }
 0x10b   : > { %v11451_v9 = vadd.f32 %v1324_v24, %v11353_v61  ;;  %v1573_v61 = vsel %vm11371_vm11, %v1568_v29, %v1572_v51  ;;  %v2650_v46 = vpack.c.b16 %v2619_v14, %v2618_v6  ;;  %v1433_v29 = vld [vmem:[#allocation2 + $0x30] sm:$0xf]  ;;  %v11473_v24 = vld [vmem:[#allocation2 + $0x34] sm:$0xf]  ;;  %v2512_v6 = vrot.slane %v2510_v4, 4 }
 0x10c   : > { %v1108_v30 = vpop.f32.mrf.mxu0  ;;  %v1874_v28 = vunpack.c.l.b16 %v1573_v61  ;;  %v1575_v51 = vshrl.u32 %v1433_v29, 16  ;;  %v1584_v19 = vshll.u32 %v11473_v24, 16  ;;  %v2513_v14 = vrot.slane %v11340_v38, 5 }
 0x10d   : > { %v11458_v48 = vadd.f32 %v11397_v0, %v1108_v30  ;;  %v1222_v50 = vpop.f32.mrf.mxu1  ;;  %v1899_v0 = vpack.c.b16 %v1868_v45, %v1867_v18  ;;  %v1578_v30 = vshll.u32 %v1433_v29, 16  ;;  %v1588_v45 = vshrl.u32 %v11473_v24, 16 }
 0x10e   : > { %v11468_v7 = vpack.c.b16 %v1874_v28, %v1873_v16  ;;  %v1577_v40 = vrot.slane %v1575_v51, 4  ;;  %v1586_v16 = vrot.slane %v1584_v19, 5  ;;  %v537_v51 = vrot.slane %v11173_v22, 4 }
 0x10f   : > { %v1580_v61 = vrot.slane %v1578_v30, 5  ;;  %v1590_v28 = vrot.slane %v1588_v45, 4  ;;  %v2511_v12 = vsel %vm11443_vm14, %v9750_v57, %v2510_v4  ;;  %v2514_v38 = vsel %vm11443_vm14, %v2512_v6, %v2513_v14 }
 0x110   : > { %v11466_v58 = vpop.f32.mrf.mxu3 }
 0x111   : > { %v11486_v25 = vld [vmem:[#allocation2 + $0x38] sm:$0x1]  ;;  %v1591_v29 = vor.u32 %v1590_v28, %v1586_v16  ;;  %v811_v28 = vld [vmem:[#allocation2 + $0x44] sm:$0x1] }
 0x112   : > { %v1326_v10 = vpop.f32.mrf.mxu2  ;;  %9734 = vmatmul.msk.bf16.gmra.mxu1 %vm1028_vm6, %v11468_v7  ;;  %v1594_v44 = vshll.u32 %v11486_v25, 16  ;;  %v812_v4 = vsel %vm11079_vm8, %v537_v51, %v811_v28 }
 0x113   : > { %v11471_v13 = vadd.f32 %v1326_v10, %v11393_v35  ;;  %v1581_v10 = vor.u32 %v1580_v61, %v1577_v40  ;;  %813 = vst [vmem:[#allocation2 + $0x44] sm:$0x1] %v812_v4 }
 0x114   : > { %v1111_v8 = vpop.f32.mrf.mxu0 }
 0x115   : > { %16631 = vst [vmem:[#allocation12_spill] sm:$0xff] %v11471_v13  ;;  %9677 = vmatmul.msk.bf16.vlgmr.msrb.gmra.mxu3 %vm1028_vm6, %v1899_v0  ;;  %v11478_v18 = vadd.f32 %v1220_v49, %v1111_v8  ;;  %v1225_v35 = vpop.f32.mrf.mxu1  ;;  %v1596_v8 = vrot.slane %v1594_v44, 5  ;;  %v1582_v19 = vrot.slane %v1581_v10, 4  ;;  %v1592_v13 = vrot.slane %v1591_v29, 4  ;;  %v11519_v29 = vld [vmem:[#allocation2 + $0x40] sm:$0xf] }
 0x116   : > { %v2621_v44 = vunpack.c.l.b16 %v2514_v38  ;;  %v2434_v38 = vld [vmem:[#allocation2 + $0x18] sm:$0xe] }
 0x117   : > { %9777 = vmatmul.msk.bf16.vlgmr.msrb.gmra.mxu2 %vm1028_vm6, %v2650_v46  ;;  %9706 = vmatmul.msk.bf16.gmra.mxu0 %vm1028_vm6, %v11416_v60  ;;  %v1587_v61 = vsel %vm11371_vm11, %v1582_v19, %v1586_v16  ;;  %v1597_v22 = vsel %vm11371_vm11, %v1592_v13, %v1596_v8  ;;  %v2517_v19 = vrot.slane %v11348_v55, 5 }
 0x118   : > { %v1255_v49 = vpop.f32.mrf.mxu3  ;;  %v1876_v10 = vunpack.c.l.b16 %v1597_v22 }
 0x119   : > { %v11491_v0 = vadd.f32 %v1255_v49, %v11310_v1  ;;  %v2620_v49 = vunpack.c.l.b16 %v2511_v12  ;;  %v1608_v12 = vshll.u32 %v11519_v29, 16 }
 0x11a   : > { %v1329_v46 = vpop.f32.mrf.mxu2  ;;  %v11534_v55 = vld [vmem:[#allocation2 + $0x44] sm:$0x1] }
 0x11b   : > { %v11495_v30 = vadd.f32 %v1329_v46, %v11424_v17  ;;  %v1875_v17 = vunpack.c.l.b16 %v1587_v61  ;;  %v11517_v13 = vpack.c.b16 %v2621_v44, %v2620_v49  ;;  %v1436_v46 = vld [vmem:[#allocation2 + $0x3c] sm:$0xf]  ;;  %v1612_v61 = vshrl.u32 %v11519_v29, 16 }
 0x11c   : > { %v1113_v45 = vpop.f32.mrf.mxu0  ;;  %v1599_v51 = vshrl.u32 %v1436_v46, 16  ;;  %v9751_v49 = vrot.slane %v2434_v38, 9  ;;  %v2519_v44 = vrot.slane %v2517_v19, 4  ;;  %v1618_v4 = vshll.u32 %v11534_v55, 16 }
 0x11d   : > { %v11501_v1 = vadd.f32 %v1222_v50, %v1113_v45  ;;  %v1227_v40 = vpop.f32.mrf.mxu1  ;;  %v11512_v6 = vpack.c.b16 %v1876_v10, %v1875_v17  ;;  %16633 = vst [vmem:[#allocation14_spill] sm:$0xff] %v11517_v13  ;;  %v1602_v45 = vshll.u32 %v1436_v46, 16  ;;  %v2520_v10 = vrot.slane %v11365_v21, 5 }
 0x11e   : > { %v1601_v22 = vrot.slane %v1599_v51, 4  ;;  %v1620_v51 = vrot.slane %v1618_v4, 5  ;;  %v2518_v38 = vsel %vm11443_vm14, %v9751_v49, %v2517_v19 }
 0x11f   : > { %v1604_v17 = vrot.slane %v1602_v45, 5  ;;  %v2521_v21 = vsel %vm11443_vm14, %v2519_v44, %v2520_v10 }
 0x120   : > { %v1257_v57 = vpop.f32.mrf.mxu3  ;;  %v2623_v4 = vunpack.c.l.b16 %v2521_v21  ;;  %v2435_v21 = vld [vmem:[#allocation2 + $0x24] sm:$0xe] }
 0x121   : > { %v11510_v50 = vadd.f32 %v1257_v57, %v11315_v11 }
 0x122   : > { %v1331_v14 = vpop.f32.mrf.mxu2  ;;  %9735 = vmatmul.msk.bf16.gmra.mxu1 %vm1028_vm6, %v11512_v6 }
 0x123   : > { %v11515_v16 = vadd.f32 %v1331_v14, %v11458_v48  ;;  %v1605_v14 = vor.u32 %v1604_v17, %v1601_v22 }
 0x124   : > { %v1116_v8 = vpop.f32.mrf.mxu0 }
 0x125   : > { %16632 = vst [vmem:[#allocation13_spill] sm:$0xff] %v11515_v16  ;;  %9678 = vmatmul.msk.bf16.gmra.mxu3 %vm1028_vm6, %v11414_v59  ;;  %v11525_v11 = vadd.f32 %v1225_v35, %v1116_v8  ;;  %v1230_v48 = vpop.f32.mrf.mxu1  ;;  %v1610_v59 = vrot.slane %v1608_v12, 5  ;;  %v1614_v35 = vrot.slane %v1612_v61, 4  ;;  %v1606_v12 = vrot.slane %v1605_v14, 4 }
 0x127   : > { %9778 = vmatmul.msk.bf16.gmra.mxu2 %vm1028_vm6, %v11517_v13  ;;  %9707 = vmatmul.msk.bf16.gmra.mxu0 %vm1028_vm6, %v11468_v7  ;;  %v1615_v8 = vor.u32 %v1614_v35, %v1610_v59  ;;  %v554_v13 = vrot.slane %v11200_v53, 4  ;;  %v1611_v17 = vsel %vm11371_vm11, %v1606_v12, %v1610_v59  ;;  %v818_v35 = vld [vmem:[#allocation2 + $0x50] sm:$0x1]  ;;  %v2524_v12 = vrot.slane %v11418_v34, 5 }
 0x128   : > { %v1260_v28 = vpop.f32.mrf.mxu3 }
 0x129   : > { %v11539_v57 = vadd.f32 %v1260_v28, %v11325_v20  ;;  %v1616_v16 = vrot.slane %v1615_v8, 4  ;;  %v2622_v28 = vunpack.c.l.b16 %v2518_v38  ;;  %v819_v19 = vsel %vm11079_vm8, %v554_v13, %v818_v35  ;;  %v11567_v8 = vld [vmem:[#allocation2 + $0x4c] sm:$0xf] }
 0x12a   : > { %v1334_v46 = vpop.f32.mrf.mxu2  ;;  %820 = vst [vmem:[#allocation2 + $0x50] sm:$0x1] %v819_v19  ;;  %v1632_v38 = vshll.u32 %v11567_v8, 16 }
 0x12b   : > { %v11543_v45 = vadd.f32 %v1334_v46, %v11478_v18  ;;  %v1621_v53 = vsel %vm11371_vm11, %v1616_v16, %v1620_v51  ;;  %v1877_v18 = vunpack.c.l.b16 %v1611_v17  ;;  %v11565_v16 = vpack.c.b16 %v2623_v4, %v2622_v28  ;;  %v1439_v46 = vld [vmem:[#allocation2 + $0x48] sm:$0xf] }
 0x12c   : > { %v1118_v61 = vpop.f32.mrf.mxu0  ;;  %v1878_v14 = vunpack.c.l.b16 %v1621_v53  ;;  %v1623_v13 = vshrl.u32 %v1439_v46, 16  ;;  %v1636_v17 = vshrl.u32 %v11567_v8, 16  ;;  %v9752_v28 = vrot.slane %v2435_v21, 9 }
 0x12d   : > { %v11549_v20 = vadd.f32 %v1227_v40, %v1118_v61  ;;  %v1232_v22 = vpop.f32.mrf.mxu1  ;;  %16635 = vst [vmem:[#allocation16_spill] sm:$0xff] %v11565_v16  ;;  %v1626_v61 = vshll.u32 %v1439_v46, 16  ;;  %v2526_v4 = vrot.slane %v2524_v12, 4 }
 0x12e   : > { %v11560_v44 = vpack.c.b16 %v1878_v14, %v1877_v18  ;;  %v1625_v53 = vrot.slane %v1623_v13, 4  ;;  %v2527_v14 = vrot.slane %v11433_v62, 5  ;;  %v2525_v21 = vsel %vm11443_vm14, %v9752_v28, %v2524_v12 }
 0x12f   : > { %v1628_v18 = vrot.slane %v1626_v61, 5 }
 0x130   : > { %v1262_v49 = vpop.f32.mrf.mxu3  ;;  %v2528_v62 = vsel %vm11443_vm14, %v2526_v4, %v2527_v14 }
 0x131   : > { %v11558_v40 = vadd.f32 %v1262_v49, %v11338_v36  ;;  %v11582_v34 = vld [vmem:[#allocation2 + $0x50] sm:$0x1] }
 0x132   : > { %v1336_v10 = vpop.f32.mrf.mxu2  ;;  %9736 = vmatmul.msk.bf16.gmra.mxu1 %vm1028_vm6, %v11560_v44  ;;  %v1642_v19 = vshll.u32 %v11582_v34, 16 }
 0x133   : > { %v11563_v59 = vadd.f32 %v1336_v10, %v11501_v1  ;;  %v1629_v10 = vor.u32 %v1628_v18, %v1625_v53 }
 0x134   : > { %v1121_v51 = vpop.f32.mrf.mxu0  ;;  %v1644_v13 = vrot.slane %v1642_v19, 5  ;;  %v2625_v19 = vunpack.c.l.b16 %v2528_v62  ;;  %v2436_v62 = vld [vmem:[#allocation2 + $0x30] sm:$0xe] }
 0x135   : > { %16634 = vst [vmem:[#allocation15_spill] sm:$0xff] %v11563_v59  ;;  %9679 = vmatmul.msk.bf16.gmra.mxu3 %vm1028_vm6, %v11416_v60  ;;  %v11573_v36 = vadd.f32 %v1230_v48, %v1121_v51  ;;  %v1235_v1 = vpop.f32.mrf.mxu1  ;;  %v1634_v60 = vrot.slane %v1632_v38, 5  ;;  %v1638_v48 = vrot.slane %v1636_v17, 4  ;;  %v1630_v38 = vrot.slane %v1629_v10, 4 }
 0x137   : > { %9779 = vmatmul.msk.bf16.gmra.mxu2 %vm1028_vm6, %v11565_v16  ;;  %9708 = vmatmul.msk.bf16.gmra.mxu0 %vm1028_vm6, %v11512_v6  ;;  %v1639_v51 = vor.u32 %v1638_v48, %v1634_v60  ;;  %v571_v16 = vrot.slane %v11222_v3, 4  ;;  %v1635_v53 = vsel %vm11371_vm11, %v1630_v38, %v1634_v60  ;;  %v825_v48 = vld [vmem:[#allocation2 + $0x5c] sm:$0x1]  ;;  %v2531_v38 = vrot.slane %v11473_v24, 5 }
 0x138   : > { %v1265_v35 = vpop.f32.mrf.mxu3 }
 0x139   : > { %v11587_v49 = vadd.f32 %v1265_v35, %v11367_v27  ;;  %v1640_v59 = vrot.slane %v1639_v51, 4  ;;  %v2624_v35 = vunpack.c.l.b16 %v2525_v21  ;;  %v826_v12 = vsel %vm11079_vm8, %v571_v16, %v825_v48  ;;  %v11615_v51 = vld [vmem:[#allocation2 + $0x58] sm:$0xf] }
 0x13a   : > { %v1339_v46 = vpop.f32.mrf.mxu2  ;;  %827 = vst [vmem:[#allocation2 + $0x5c] sm:$0x1] %v826_v12  ;;  %v1656_v21 = vshll.u32 %v11615_v51, 16  ;;  %v9753_v48 = vrot.slane %v2436_v62, 9 }
 0x13b   : > { %v11591_v61 = vadd.f32 %v1339_v46, %v11525_v11  ;;  %v1645_v3 = vsel %vm11371_vm11, %v1640_v59, %v1644_v13  ;;  %v1879_v11 = vunpack.c.l.b16 %v1635_v53  ;;  %v11613_v59 = vpack.c.b16 %v2625_v19, %v2624_v35  ;;  %v1442_v46 = vld [vmem:[#allocation2 + $0x54] sm:$0xf] }
 0x13c   : > { %v1123_v17 = vpop.f32.mrf.mxu0  ;;  %v1880_v10 = vunpack.c.l.b16 %v1645_v3  ;;  %v1647_v16 = vshrl.u32 %v1442_v46, 16  ;;  %v2533_v35 = vrot.slane %v2531_v38, 4  ;;  %v2534_v19 = vrot.slane %v11486_v25, 5 }
 0x13d   : > { %v11597_v27 = vadd.f32 %v1232_v22, %v1123_v17  ;;  %v1237_v18 = vpop.f32.mrf.mxu1  ;;  %16637 = vst [vmem:[#allocation18_spill] sm:$0xff] %v11613_v59  ;;  %v1650_v17 = vshll.u32 %v1442_v46, 16  ;;  %v2532_v25 = vsel %vm11443_vm14, %v9753_v48, %v2531_v38 }
 0x13e   : > { %v11608_v4 = vpack.c.b16 %v1880_v10, %v1879_v11  ;;  %v1649_v53 = vrot.slane %v1647_v16, 4  ;;  %v1658_v11 = vrot.slane %v1656_v21, 5 }
 0x13f   : > { %v1652_v3 = vrot.slane %v1650_v17, 5 }
 0x140   : > { %v1267_v28 = vpop.f32.mrf.mxu3 }
 0x141   : > { %v11606_v22 = vadd.f32 %v1267_v28, %v11405_v32  ;;  %v11630_v24 = vld [vmem:[#allocation2 + $0x5c] sm:$0x1] }
 0x142   : > { %v1341_v60 = vpop.f32.mrf.mxu2  ;;  %9737 = vmatmul.msk.bf16.gmra.mxu1 %vm1028_vm6, %v11608_v4  ;;  %v1666_v12 = vshll.u32 %v11630_v24, 16 }
 0x143   : > { %v11611_v14 = vadd.f32 %v1341_v60, %v11549_v20  ;;  %v1660_v20 = vshrl.u32 %v11615_v51, 16  ;;  %v1653_v60 = vor.u32 %v1652_v3, %v1649_v53 }
 0x144   : > { %v1126_v13 = vpop.f32.mrf.mxu0  ;;  %v1668_v16 = vrot.slane %v1666_v12, 5 }
 0x145   : > { %16636 = vst [vmem:[#allocation17_spill] sm:$0xff] %v11611_v14  ;;  %9680 = vmatmul.msk.bf16.gmra.mxu3 %vm1028_vm6, %v11468_v7  ;;  %v11621_v32 = vadd.f32 %v1235_v1, %v1126_v13  ;;  %v1662_v7 = vrot.slane %v1660_v20, 4  ;;  %v1240_v10 = vpop.f32.mrf.mxu1  ;;  %v1654_v21 = vrot.slane %v1653_v60, 4  ;;  %v2535_v20 = vsel %vm11443_vm14, %v2533_v35, %v2534_v19 }
 0x147   : > { %9780 = vmatmul.msk.bf16.gmra.mxu2 %vm1028_vm6, %v11613_v59  ;;  %9709 = vmatmul.msk.bf16.gmra.mxu0 %vm1028_vm6, %v11560_v44  ;;  %v1663_v13 = vor.u32 %v1662_v7, %v1658_v11  ;;  %v588_v59 = vrot.slane %v11239_v33, 4  ;;  %v1659_v53 = vsel %vm11371_vm11, %v1654_v21, %v1658_v11  ;;  %v2626_v7 = vunpack.c.l.b16 %v2532_v25 }
 0x148   : > { %v1270_v1 = vpop.f32.mrf.mxu3  ;;  %v1881_v3 = vunpack.c.l.b16 %v1659_v53 }
 0x149   : > { %v11635_v28 = vadd.f32 %v1270_v1, %v11435_v42  ;;  %v1664_v14 = vrot.slane %v1663_v13, 4  ;;  %v2627_v1 = vunpack.c.l.b16 %v2535_v20  ;;  %v11663_v13 = vld [vmem:[#allocation2 + $0x64] sm:$0xf]  ;;  %v2437_v20 = vld [vmem:[#allocation2 + $0x3c] sm:$0xe] }
 0x14a   : > { %v1344_v46 = vpop.f32.mrf.mxu2 }
 0x14b   : > { %v11639_v17 = vadd.f32 %v1344_v46, %v11573_v36  ;;  %v1669_v33 = vsel %vm11371_vm11, %v1664_v14, %v1668_v16  ;;  %v832_v36 = vld [vmem:[#allocation2 + $0x68] sm:$0x1]  ;;  %v11661_v14 = vpack.c.b16 %v2627_v1, %v2626_v7  ;;  %v1445_v46 = vld [vmem:[#allocation2 + $0x60] sm:$0xf]  ;;  %v2541_v1 = vrot.slane %v11534_v55, 5 }
 0x14c   : > { %v1128_v62 = vpop.f32.mrf.mxu0  ;;  %v1882_v12 = vunpack.c.l.b16 %v1669_v33  ;;  %v833_v38 = vsel %vm11079_vm8, %v588_v59, %v832_v36  ;;  %v2538_v59 = vrot.slane %v11519_v29, 5  ;;  %v1671_v21 = vshrl.u32 %v1445_v46, 16 }
 0x14d   : > { %v11645_v42 = vadd.f32 %v1237_v18, %v1128_v62  ;;  %834 = vst [vmem:[#allocation2 + $0x68] sm:$0x1] %v833_v38  ;;  %v1242_v11 = vpop.f32.mrf.mxu1  ;;  %v1674_v62 = vshll.u32 %v1445_v46, 16  ;;  %v9754_v36 = vrot.slane %v2437_v20, 9 }
 0x14e   : > { %v11656_v18 = vpack.c.b16 %v1882_v12, %v1881_v3  ;;  %16638 = vst [vmem:[#allocation19_spill] sm:$0xff] %v11661_v14  ;;  %v1673_v53 = vrot.slane %v1671_v21, 4  ;;  %v2540_v7 = vrot.slane %v2538_v59, 4  ;;  %v605_v21 = vrot.slane %v11257_v52, 4 }
 0x14f   : > { %v1676_v33 = vrot.slane %v1674_v62, 5  ;;  %v2539_v20 = vsel %vm11443_vm14, %v9754_v36, %v2538_v59 }
 0x150   : > { %v1272_v48 = vpop.f32.mrf.mxu3  ;;  %v2542_v55 = vsel %vm11443_vm14, %v2540_v7, %v2541_v1 }
 0x151   : > { %v11654_v35 = vadd.f32 %v1272_v48, %v11466_v58  ;;  %v1680_v58 = vshll.u32 %v11663_v13, 16  ;;  %v1677_v48 = vor.u32 %v1676_v33, %v1673_v53  ;;  %v839_v33 = vld [vmem:[#allocation2 + $0x74] sm:$0x1] }
 0x152   : > { %v1346_v19 = vpop.f32.mrf.mxu2  ;;  %9738 = vmatmul.msk.bf16.gmra.mxu1 %vm1028_vm6, %v11656_v18  ;;  %v840_v59 = vsel %vm11079_vm8, %v605_v21, %v839_v33 }
 0x153   : > { %v11659_v60 = vadd.f32 %v1346_v19, %v11597_v27  ;;  %v1684_v27 = vshrl.u32 %v11663_v13, 16  ;;  %v1682_v3 = vrot.slane %v1680_v58, 5  ;;  %v1678_v58 = vrot.slane %v1677_v48, 4  ;;  %841 = vst [vmem:[#allocation2 + $0x74] sm:$0x1] %v840_v59 }
 0x154   : > { %v1131_v16 = vpop.f32.mrf.mxu0  ;;  %v11678_v29 = vld [vmem:[#allocation2 + $0x68] sm:$0x1] }
 0x155   : > { %9681 = vmatmul.msk.bf16.gmra.mxu3 %vm1028_vm6, %v11512_v6  ;;  %v11669_v25 = vadd.f32 %v1240_v10, %v1131_v16  ;;  %v1686_v6 = vrot.slane %v1684_v27, 4  ;;  %v1690_v12 = vshll.u32 %v11678_v29, 16  ;;  %v1683_v53 = vsel %vm11371_vm11, %v1678_v58, %v1682_v3 }
 0x157   : > { %9781 = vmatmul.msk.bf16.gmra.mxu2 %vm1028_vm6, %v11661_v14  ;;  %9710 = vmatmul.msk.bf16.gmra.mxu0 %vm1028_vm6, %v11608_v4  ;;  %v1687_v46 = vor.u32 %v1686_v6, %v1682_v3  ;;  %v1692_v16 = vrot.slane %v1690_v12, 5  ;;  %v1245_v14 = vpop.f32.mrf.mxu1  ;;  %v2628_v6 = vunpack.c.l.b16 %v2539_v20  ;;  %v2629_v12 = vunpack.c.l.b16 %v2542_v55 }
 0x158   : > { %v1369_v10 = vpop.f32.mrf.mxu3 }
 0x159   : > { %v11683_v38 = vadd.f32 %v1369_v10, %v11491_v0  ;;  %v1688_v0 = vrot.slane %v1687_v46, 4  ;;  %v1448_v46 = vld [vmem:[#allocation2 + $0x6c] sm:$0xf] }
 0x15a   : > { %v1349_v19 = vpop.f32.mrf.mxu2  ;;  %v1695_v21 = vshrl.u32 %v1448_v46, 16  ;;  %v1698_v20 = vshll.u32 %v1448_v46, 16 }
 0x15b   : > { %16639 = vst [vmem:[#allocation20_spill] sm:$0xff] %v11683_v38  ;;  %v11687_v62 = vadd.f32 %v1349_v19, %v11621_v32  ;;  %v1693_v52 = vsel %vm11371_vm11, %v1688_v0, %v1692_v16  ;;  %v1883_v32 = vunpack.c.l.b16 %v1683_v53  ;;  %v11709_v19 = vpack.c.b16 %v2629_v12, %v2628_v6  ;;  %v11711_v16 = vld [vmem:[#allocation2 + $0x70] sm:$0xf]  ;;  %v2438_v0 = vld [vmem:[#allocation2 + $0x48] sm:$0xe] }
 0x15c   : > { %v1133_v27 = vpop.f32.mrf.mxu0  ;;  %v1884_v48 = vunpack.c.l.b16 %v1693_v52  ;;  %v1704_v55 = vshll.u32 %v11711_v16, 16  ;;  %v1697_v52 = vrot.slane %v1695_v21, 4  ;;  %v9755_v6 = vrot.slane %v2438_v0, 9 }
 0x15d   : > { %v11693_v10 = vadd.f32 %v1242_v11, %v1133_v27  ;;  %v2545_v27 = vrot.slane %v11567_v8, 5  ;;  %v11726_v8 = vld [vmem:[#allocation2 + $0x74] sm:$0x1] }
 0x15e   : > { %v11704_v11 = vpack.c.b16 %v1884_v48, %v1883_v32  ;;  %v1700_v32 = vrot.slane %v1698_v20, 5  ;;  %v2548_v48 = vrot.slane %v11582_v34, 5  ;;  %v1714_v59 = vshll.u32 %v11726_v8, 16 }
 0x15f   : > { %v1247_v53 = vpop.f32.mrf.mxu1  ;;  %v2547_v12 = vrot.slane %v2545_v27, 4  ;;  %v2546_v0 = vsel %vm11443_vm14, %v9755_v6, %v2545_v27 }
 0x160   : > { %v1371_v36 = vpop.f32.mrf.mxu3  ;;  %v1716_v21 = vrot.slane %v1714_v59, 5 }
 0x161   : > { %v11702_v7 = vadd.f32 %v1371_v36, %v11510_v50  ;;  %v2549_v34 = vsel %vm11443_vm14, %v2547_v12, %v2548_v48 }
 0x162   : > { %v1351_v1 = vpop.f32.mrf.mxu2  ;;  %9739 = vmatmul.msk.bf16.gmra.mxu1 %vm1028_vm6, %v11704_v11 }
 0x163   : > { %16640 = vst [vmem:[#allocation21_spill] sm:$0xff] %v11702_v7  ;;  %v11707_v3 = vadd.f32 %v1351_v1, %v11645_v42  ;;  %v1708_v42 = vshrl.u32 %v11711_v16, 16  ;;  %v1701_v1 = vor.u32 %v1700_v32, %v1697_v52  ;;  %v622_v7 = vrot.slane %v11272_v15, 4 }
 0x164   : > { %v1136_v58 = vpop.f32.mrf.mxu0 }
 0x165   : > { %9682 = vmatmul.msk.bf16.gmra.mxu3 %vm1028_vm6, %v11560_v44  ;;  %v11717_v50 = vadd.f32 %v1245_v14, %v1136_v58  ;;  %v1706_v44 = vrot.slane %v1704_v55, 5  ;;  %v1710_v14 = vrot.slane %v1708_v42, 4  ;;  %v1702_v55 = vrot.slane %v1701_v1, 4 }
 0x167   : > { %9782 = vmatmul.msk.bf16.gmra.mxu2 %vm1028_vm6, %v11709_v19  ;;  %9711 = vmatmul.msk.bf16.gmra.mxu0 %vm1028_vm6, %v11656_v18  ;;  %v1711_v58 = vor.u32 %v1710_v14, %v1706_v44  ;;  %v1707_v52 = vsel %vm11371_vm11, %v1702_v55, %v1706_v44  ;;  %v2630_v14 = vunpack.c.l.b16 %v2546_v0  ;;  %v1250_v1 = vpop.f32.mrf.mxu1 }
 0x168   : > { %v1374_v33 = vpop.f32.mrf.mxu3  ;;  %v1885_v32 = vunpack.c.l.b16 %v1707_v52 }
 0x169   : > { %v11731_v36 = vadd.f32 %v1374_v33, %v11539_v57  ;;  %v1712_v38 = vrot.slane %v1711_v58, 4  ;;  %v2631_v33 = vunpack.c.l.b16 %v2549_v34  ;;  %v11759_v58 = vld [vmem:[#allocation2 + $0x7c] sm:$0xf]  ;;  %v2439_v34 = vld [vmem:[#allocation2 + $0x54] sm:$0xe] }
 0x16a   : > { %v1354_v46 = vpop.f32.mrf.mxu2  ;;  %v1732_v52 = vshrl.u32 %v11759_v58, 16 }
 0x16b   : > { %16641 = vst [vmem:[#allocation22_spill] sm:$0xff] %v11731_v36  ;;  %v11735_v20 = vadd.f32 %v1354_v46, %v11669_v25  ;;  %v1717_v15 = vsel %vm11371_vm11, %v1712_v38, %v1716_v21  ;;  %v846_v25 = vld [vmem:[#allocation2 + $0x80] sm:$0x1]  ;;  %v11757_v48 = vpack.c.b16 %v2631_v33, %v2630_v14  ;;  %v1451_v46 = vld [vmem:[#allocation2 + $0x78] sm:$0xf]  ;;  %v9756_v33 = vrot.slane %v2439_v34, 9 }
 0x16c   : > { %v1138_v42 = vpop.f32.mrf.mxu0  ;;  %v1886_v59 = vunpack.c.l.b16 %v1717_v15  ;;  %v847_v27 = vsel %vm11079_vm8, %v622_v7, %v846_v25  ;;  %v2552_v7 = vrot.slane %v11615_v51, 5  ;;  %v1719_v55 = vshrl.u32 %v1451_v46, 16 }
 0x16d   : > { %v11741_v57 = vadd.f32 %v1247_v53, %v1138_v42  ;;  %848 = vst [vmem:[#allocation2 + $0x80] sm:$0x1] %v847_v27  ;;  %v1722_v42 = vshll.u32 %v1451_v46, 16  ;;  %v1734_v25 = vrot.slane %v1732_v52, 4  ;;  %v2555_v27 = vrot.slane %v11630_v24, 5 }
 0x16e   : > { %v11752_v12 = vpack.c.b16 %v1886_v59, %v1885_v32  ;;  %v1721_v15 = vrot.slane %v1719_v55, 4  ;;  %v2554_v59 = vrot.slane %v2552_v7, 4  ;;  %v2553_v24 = vsel %vm11443_vm14, %v9756_v33, %v2552_v7 }
 0x16f   : > { %v1724_v32 = vrot.slane %v1722_v42, 5  ;;  %v639_v42 = vrot.slane %v11288_v37, 4 }
 0x170   : > { %v1376_v6 = vpop.f32.mrf.mxu3 }
 0x171   : > { %v11750_v53 = vadd.f32 %v1376_v6, %v11558_v40  ;;  %v1728_v40 = vshll.u32 %v11759_v58, 16 }
 0x172   : > { %v1356_v44 = vpop.f32.mrf.mxu2  ;;  %9740 = vmatmul.msk.bf16.gmra.mxu1 %vm1028_vm6, %v11752_v12 }
 0x173   : > { %16642 = vst [vmem:[#allocation23_spill] sm:$0xff] %v11750_v53  ;;  %v11755_v38 = vadd.f32 %v1356_v44, %v11693_v10  ;;  %v10570_v10 = vld [vmem:[%s10917_s11 + $0x50] sm:$0xff]  ;;  %v1725_v44 = vor.u32 %v1724_v32, %v1721_v15  ;;  %v10572_v15 = vld [vmem:[%s10917_s11 + $0x80] sm:$0xff] }
 0x174   : > { %v1141_v21 = vpop.f32.mrf.mxu0  ;;  %v11775_v51 = vld [vmem:[#allocation2 + $0x80] sm:$0x1]  ;;  %2887 = vmatpush.bf16.msra.mxu3 %v10570_v10  ;;  %v2556_v10 = vsel %vm11443_vm14, %v2554_v59, %v2555_v27  ;;  %3041 = vmatpush.bf16.msra.mxu0 %v10572_v15  ;;  %v2440_v15 = vld [vmem:[#allocation2 + $0x60] sm:$0xe] }
 0x175   : > { %9683 = vmatmul.msk.bf16.gmra.mxu3 %vm1028_vm6, %v11608_v4  ;;  %v11765_v0 = vadd.f32 %v1250_v1, %v1141_v21  ;;  %v1730_v4 = vrot.slane %v1728_v40, 5  ;;  %v1738_v6 = vshll.u32 %v11775_v51, 16  ;;  %v1252_v21 = vpop.f32.mrf.mxu1  ;;  %v1726_v34 = vrot.slane %v1725_v44, 4 }
 0x176   : > { %v2633_v44 = vunpack.c.l.b16 %v2556_v10 }
 0x177   : > { %9783 = vmatmul.msk.bf16.gmra.mxu2 %vm1028_vm6, %v11757_v48  ;;  %9712 = vmatmul.msk.bf16.gmra.mxu0 %vm1028_vm6, %v11704_v11  ;;  %v1735_v55 = vor.u32 %v1734_v25, %v1730_v4  ;;  %v1740_v53 = vrot.slane %v1738_v6, 5  ;;  %v1731_v32 = vsel %vm11371_vm11, %v1726_v34, %v1730_v4  ;;  %v853_v25 = vld [vmem:[#allocation2 + $0x8c] sm:$0x1]  ;;  %v2632_v6 = vunpack.c.l.b16 %v2553_v24  ;;  %v1454_v34 = vld [vmem:[#allocation2 + $0x84] sm:$0xf] }
 0x178   : > { %v1379_v14 = vpop.f32.mrf.mxu3  ;;  %v854_v7 = vsel %vm11079_vm8, %v639_v42, %v853_v25  ;;  %v2559_v42 = vrot.slane %v11663_v13, 5  ;;  %v1743_v10 = vshrl.u32 %v1454_v34, 16 }
 0x179   : > { %v11780_v1 = vadd.f32 %v1379_v14, %v11587_v49  ;;  %v1736_v49 = vrot.slane %v1735_v55, 4  ;;  %855 = vst [vmem:[#allocation2 + $0x8c] sm:$0x1] %v854_v7  ;;  %v11809_v55 = vpack.c.b16 %v2633_v44, %v2632_v6 }
 0x17a   : > { %v1359_v46 = vpop.f32.mrf.mxu2  ;;  %v2561_v44 = vrot.slane %v2559_v42, 4 }
 0x17b   : > { %16643 = vst [vmem:[#allocation24_spill] sm:$0xff] %v11780_v1  ;;  %v11784_v40 = vadd.f32 %v1359_v46, %v11717_v50  ;;  %v1741_v37 = vsel %vm11371_vm11, %v1736_v49, %v1740_v53  ;;  %v1887_v50 = vunpack.c.l.b16 %v1731_v32  ;;  %v1745_v32 = vrot.slane %v1743_v10, 4 }
 0x17c   : > { %v1143_v52 = vpop.f32.mrf.mxu0  ;;  %v1888_v46 = vunpack.c.l.b16 %v1741_v37  ;;  %16645 = vst [vmem:[#allocation26_spill] sm:$0xff] %v11809_v55 }
 0x17d   : > { %v11790_v14 = vadd.f32 %v1252_v21, %v1143_v52  ;;  %v11811_v52 = vld [vmem:[#allocation2 + $0x88] sm:$0xf] }
 0x17e   : > { %v11802_v27 = vpack.c.b16 %v1888_v46, %v1887_v50  ;;  %v1752_v49 = vshll.u32 %v11811_v52, 16  ;;  %v2562_v46 = vrot.slane %v11678_v29, 5 }
 0x17f   : > { %v11804_v21 = vpop.f32.mrf.mxu1 }
 0x180   : > { %v1381_v33 = vpop.f32.mrf.mxu3  ;;  %v11826_v13 = vld [vmem:[#allocation2 + $0x8c] sm:$0x1]  ;;  %v1754_v50 = vrot.slane %v1752_v49, 5 }
 0x181   : > { %v11800_v59 = vadd.f32 %v1381_v33, %v11606_v22  ;;  %v1746_v22 = vshll.u32 %v1454_v34, 16  ;;  %v1762_v7 = vshll.u32 %v11826_v13, 16 }
 0x182   : > { %v1361_v4 = vpop.f32.mrf.mxu2  ;;  %9741 = vmatmul.msk.bf16.gmra.mxu1 %vm1028_vm6, %v11802_v27 }
 0x183   : > { %16644 = vst [vmem:[#allocation25_spill] sm:$0xff] %v11800_v59  ;;  %v11807_v53 = vadd.f32 %v1361_v4, %v11741_v57  ;;  %v1756_v57 = vshrl.u32 %v11811_v52, 16  ;;  %v1748_v37 = vrot.slane %v1746_v22, 5  ;;  %v1764_v1 = vrot.slane %v1762_v7, 5 }
 0x184   : > { %v11813_v24 = vpop.f32.mrf.mxu0  ;;  %v656_v22 = vrot.slane %v11197_v43, 4 }
 0x185   : > { %9684 = vmatmul.msk.bf16.gmra.mxu3 %vm1028_vm6, %v11656_v18  ;;  %v1758_v25 = vrot.slane %v1756_v57, 4  ;;  %v9757_v18 = vrot.slane %v2440_v15, 9  ;;  %v1749_v4 = vor.u32 %v1748_v37, %v1745_v32 }
 0x187   : > { %9784 = vmatmul.msk.bf16.gmra.mxu2 %vm1028_vm6, %v11809_v55  ;;  %9713 = vmatmul.msk.bf16.gmra.mxu0 %vm1028_vm6, %v11752_v12  ;;  %v11833_v10 = vpop.f32.mrf.mxu1  ;;  %v1759_v59 = vor.u32 %v1758_v25, %v1754_v50  ;;  %v1750_v15 = vrot.slane %v1749_v4, 4  ;;  %v2560_v29 = vsel %vm11443_vm14, %v9757_v18, %v2559_v42 }
 0x188   : > { %v1384_v6 = vpop.f32.mrf.mxu3 }
 0x189   : > { %v11831_v33 = vadd.f32 %v1384_v6, %v11635_v28  ;;  %v2563_v28 = vsel %vm11443_vm14, %v2561_v44, %v2562_v46  ;;  %v1760_v32 = vrot.slane %v1759_v59, 4  ;;  %v1755_v37 = vsel %vm11371_vm11, %v1750_v15, %v1754_v50  ;;  %v860_v6 = vld [vmem:[#allocation2 + $0x98] sm:$0x1]  ;;  %v1457_v46 = vld [vmem:[#allocation2 + $0x90] sm:$0xf] }
 0x18a   : > { %v1364_v34 = vpop.f32.mrf.mxu2  ;;  %v1889_v43 = vunpack.c.l.b16 %v1755_v37  ;;  %v2635_v7 = vunpack.c.l.b16 %v2563_v28  ;;  %v11863_v15 = vld [vmem:[#allocation2 + $0x94] sm:$0xf]  ;;  %v2566_v28 = vrot.slane %v11711_v16, 5 }
 0x18b   : > { %16646 = vst [vmem:[#allocation27_spill] sm:$0xff] %v11831_v33  ;;  %v11837_v49 = vadd.f32 %v1364_v34, %v11765_v0  ;;  %v1765_v25 = vsel %vm11371_vm11, %v1760_v32, %v1764_v1  ;;  %v2634_v0 = vunpack.c.l.b16 %v2560_v29  ;;  %v861_v34 = vsel %vm11079_vm8, %v656_v22, %v860_v6  ;;  %v2441_v22 = vld [vmem:[#allocation2 + $0x6c] sm:$0xe] }
 0x18c   : > { %v11839_v57 = vpop.f32.mrf.mxu0  ;;  %v1890_v4 = vunpack.c.l.b16 %v1765_v25  ;;  %862 = vst [vmem:[#allocation2 + $0x98] sm:$0x1] %v861_v34  ;;  %v1776_v32 = vshll.u32 %v11863_v15, 16  ;;  %v9758_v16 = vrot.slane %v2441_v22, 9  ;;  %v673_v22 = vrot.slane %v11056_v39, 4 }
 0x18d   : > { %v11861_v44 = vpack.c.b16 %v2635_v7, %v2634_v0 }
 0x18e   : > { %v11854_v59 = vpack.c.b16 %v1890_v4, %v1889_v43  ;;  %v1778_v6 = vrot.slane %v1776_v32, 5  ;;  %v2569_v4 = vrot.slane %v11726_v8, 5  ;;  %v2567_v32 = vsel %vm11443_vm14, %v9758_v16, %v2566_v28 }
 0x18f   : > { %v11856_v50 = vpop.f32.mrf.mxu1  ;;  %16648 = vst [vmem:[#allocation29_spill] sm:$0xff] %v11861_v44  ;;  %v1198_v8 = vadd.f32 %v11290_v41, %v11303_v54 }
 0x190   : > { %v1386_v33 = vpop.f32.mrf.mxu3 }
 0x191   : > { %v11852_v42 = vadd.f32 %v1386_v33, %v11654_v35  ;;  %v1767_v35 = vshrl.u32 %v1457_v46, 16  ;;  %v1770_v33 = vshll.u32 %v1457_v46, 16 }
 0x192   : > { %v1366_v18 = vpop.f32.mrf.mxu2  ;;  %9742 = vmatmul.msk.bf16.gmra.mxu1 %vm1028_vm6, %v11854_v59 }
 0x193   : > { %16647 = vst [vmem:[#allocation28_spill] sm:$0xff] %v11852_v42  ;;  %v11859_v1 = vadd.f32 %v1366_v18, %v11790_v14  ;;  %v1780_v14 = vshrl.u32 %v11863_v15, 16  ;;  %v1769_v37 = vrot.slane %v1767_v35, 4  ;;  %v11878_v25 = vld [vmem:[#allocation2 + $0x98] sm:$0x1]  ;;  %v1772_v43 = vrot.slane %v1770_v33, 5 }
 0x194   : > { %v11865_v29 = vpop.f32.mrf.mxu0  ;;  %v1786_v34 = vshll.u32 %v11878_v25, 16 }
 0x195   : > { %9685 = vmatmul.msk.bf16.gmra.mxu3 %vm1028_vm6, %v11704_v11  ;;  %v1782_v0 = vrot.slane %v1780_v14, 4  ;;  %v2568_v11 = vrot.slane %v2566_v28, 4  ;;  %v1773_v46 = vor.u32 %v1772_v43, %v1769_v37 }
 0x197   : > { %9785 = vmatmul.msk.bf16.gmra.mxu2 %vm1028_vm6, %v11861_v44  ;;  %9714 = vmatmul.msk.bf16.gmra.mxu0 %vm1028_vm6, %v11802_v27  ;;  %v11883_v42 = vpop.f32.mrf.mxu1  ;;  %v1783_v36 = vor.u32 %v1782_v0, %v1778_v6  ;;  %v1788_v44 = vrot.slane %v1786_v34, 5  ;;  %v1774_v14 = vrot.slane %v1773_v46, 4  ;;  %v2636_v0 = vunpack.c.l.b16 %v2567_v32  ;;  %v2442_v46 = vld [vmem:[#allocation2 + $0x78] sm:$0xe] }
 0x198   : > { %v1984_v7 = vpop.f32.mrf.mxu3 }
 0x199   : > { %v2064_v18 = vadd.f32 %v1984_v7, %v11313_v5  ;;  %v2570_v5 = vsel %vm11443_vm14, %v2568_v11, %v2569_v4  ;;  %v1784_v37 = vrot.slane %v1783_v36, 4  ;;  %v1779_v39 = vsel %vm11371_vm11, %v1774_v14, %v1778_v6  ;;  %v867_v7 = vld [vmem:[#allocation2 + $0xa4] sm:$0x1] }
 0x19a   : > { %v2735_v35 = vpop.f32.mrf.mxu2  ;;  %v1891_v16 = vunpack.c.l.b16 %v1779_v39  ;;  %v2637_v54 = vunpack.c.l.b16 %v2570_v5  ;;  %v868_v36 = vsel %vm11079_vm8, %v673_v22, %v867_v7  ;;  %v2573_v22 = vrot.slane %v11759_v58, 5 }
 0x19b   : > { %v2232_v33 = vadd.f32 %v11813_v24, %v2064_v18  ;;  %v1390_v24 = vadd.f32 %v11317_v31, %v1198_v8  ;;  %v1789_v28 = vsel %vm11371_vm11, %v1784_v37, %v1788_v44  ;;  %869 = vst [vmem:[#allocation2 + $0xa4] sm:$0x1] %v868_v36  ;;  %v2576_v7 = vrot.slane %v11775_v51, 5 }
 0x19c   : > { %v11891_v55 = vpop.f32.mrf.mxu0  ;;  %v1892_v34 = vunpack.c.l.b16 %v1789_v28  ;;  %v11910_v44 = vpack.c.b16 %v2637_v54, %v2636_v0 }
 0x19d   : > { %v2400_v43 = vadd.f32 %v11804_v21, %v2232_v33  ;;  %v11912_v33 = vld [vmem:[#allocation2 + $0xa0] sm:$0xf] }
 0x19e   : > { %v11905_v4 = vpack.c.b16 %v1892_v34, %v1891_v16  ;;  %v1800_v5 = vshll.u32 %v11912_v33, 16  ;;  %v2575_v16 = vrot.slane %v2573_v22, 4 }
 0x19f   : > { %v11901_v41 = vadd.f32 %v2735_v35, %v2400_v43  ;;  %v11907_v31 = vpop.f32.mrf.mxu1  ;;  %v1460_v35 = vld [vmem:[#allocation2 + $0x9c] sm:$0xf]  ;;  %v9759_v43 = vrot.slane %v2442_v46, 9  ;;  %v690_v46 = vrot.slane %v11091_v63, 4 }
 0x1a0   : > { %v1986_v11 = vpop.f32.mrf.mxu3  ;;  %v1791_v14 = vshrl.u32 %v1460_v35, 16  ;;  %v1794_v8 = vshll.u32 %v1460_v35, 16  ;;  %v1802_v0 = vrot.slane %v1800_v5, 5  ;;  %v2577_v51 = vsel %vm11443_vm14, %v2575_v16, %v2576_v7 }
 0x1a1   : > { %v2065_v21 = vadd.f32 %v1986_v11, %v1390_v24 }
 0x1a2   : > { %v2737_v6 = vpop.f32.mrf.mxu2  ;;  %9743 = vmatmul.msk.bf16.gmra.mxu1 %vm1028_vm6, %v11905_v4  ;;  %v1793_v39 = vrot.slane %v1791_v14, 4  ;;  %v11930_v58 = vld [vmem:[#allocation2 + $0xa4] sm:$0x1]  ;;  %v2574_v14 = vsel %vm11443_vm14, %v9759_v43, %v2573_v22  ;;  %v2639_v22 = vunpack.c.l.b16 %v2577_v51 }
 0x1a3   : > { %v2233_v18 = vadd.f32 %v11839_v57, %v2065_v21  ;;  %v1804_v57 = vshrl.u32 %v11912_v33, 16  ;;  %v1810_v54 = vshll.u32 %v11930_v58, 16 }
 0x1a4   : > { %v11914_v32 = vpop.f32.mrf.mxu0 }
 0x1a5   : > { %v2401_v37 = vadd.f32 %v11833_v10, %v2233_v18  ;;  %9686 = vmatmul.msk.bf16.gmra.mxu3 %vm1028_vm6, %v11752_v12  ;;  %v1796_v10 = vrot.slane %v1794_v8, 5  ;;  %v1806_v12 = vrot.slane %v1804_v57, 4  ;;  %v1812_v18 = vrot.slane %v1810_v54, 5 }
 0x1a7   : > { %v11924_v24 = vadd.f32 %v2737_v6, %v2401_v37  ;;  %9786 = vmatmul.msk.bf16.gmra.mxu2 %vm1028_vm6, %v11910_v44  ;;  %9715 = vmatmul.msk.bf16.gmra.mxu0 %vm1028_vm6, %v11854_v59  ;;  %v1797_v36 = vor.u32 %v1796_v10, %v1793_v39  ;;  %v11935_v21 = vpop.f32.mrf.mxu1  ;;  %v1807_v6 = vor.u32 %v1806_v12, %v1802_v0  ;;  %v2638_v39 = vunpack.c.l.b16 %v2574_v14  ;;  %v874_v10 = vld [vmem:[#allocation2 + $0xb0] sm:$0x1] }
 0x1a8   : > { %v1989_v28 = vpop.f32.mrf.mxu3 }
 0x1a9   : > { %v2066_v34 = vadd.f32 %v1989_v28, %v11330_v26  ;;  %v1798_v8 = vrot.slane %v1797_v36, 4  ;;  %v1808_v26 = vrot.slane %v1807_v6, 4  ;;  %v875_v28 = vsel %vm11079_vm8, %v690_v46, %v874_v10  ;;  %v1463_v6 = vld [vmem:[#allocation2 + $0xa8] sm:$0xf] }
 0x1aa   : > { %v2740_v11 = vpop.f32.mrf.mxu2  ;;  %876 = vst [vmem:[#allocation2 + $0xb0] sm:$0x1] %v875_v28  ;;  %v11960_v36 = vpack.c.b16 %v2639_v22, %v2638_v39  ;;  %v2580_v46 = vrot.slane %v11811_v52, 5  ;;  %v1815_v14 = vshrl.u32 %v1463_v6, 16  ;;  %v2583_v10 = vrot.slane %v11826_v13, 5 }
 0x1ab   : > { %v2234_v35 = vadd.f32 %v11865_v29, %v2066_v34  ;;  %v1803_v57 = vsel %vm11371_vm11, %v1798_v8, %v1802_v0  ;;  %v1813_v63 = vsel %vm11371_vm11, %v1808_v26, %v1812_v18  ;;  %v11962_v18 = vld [vmem:[#allocation2 + $0xac] sm:$0xf]  ;;  %v1818_v8 = vshll.u32 %v1463_v6, 16  ;;  %v16650_v6 = vld [vmem:[#allocation6_spill] sm:$0xff] }
 0x1ac   : > { %v11941_v5 = vpop.f32.mrf.mxu0  ;;  %v1893_v29 = vunpack.c.l.b16 %v1803_v57  ;;  %v1894_v43 = vunpack.c.l.b16 %v1813_v63 }
 0x1ad   : > { %v2402_v37 = vadd.f32 %v11856_v50, %v2234_v35 }
 0x1ae   : > { %v11955_v7 = vpack.c.b16 %v1894_v43, %v1893_v29  ;;  %v2582_v29 = vrot.slane %v2580_v46, 4  ;;  %v16649_v43 = vld [vmem:[#allocation9_spill] sm:$0xff] }
 0x1af   : > { %v11950_v12 = vadd.f32 %v2740_v11, %v2402_v37  ;;  %v11957_v54 = vpop.f32.mrf.mxu1  ;;  %v2443_v11 = vld [vmem:[#allocation2 + $0x84] sm:$0xe]  ;;  %v1817_v37 = vrot.slane %v1815_v14, 4  ;;  %v707_v14 = vrot.slane %v16650_v6, 4 }
 0x1b0   : > { %v1991_v16 = vpop.f32.mrf.mxu3  ;;  %v9760_v26 = vrot.slane %v2443_v11, 9  ;;  %v2584_v13 = vsel %vm11443_vm14, %v2582_v29, %v2583_v10  ;;  %v16652_v10 = vld [vmem:[#allocation10_spill] sm:$0xff] }
 0x1b1   : > { %v2067_v50 = vadd.f32 %v1991_v16, %v11344_v47  ;;  %v1824_v47 = vshll.u32 %v11962_v18, 16  ;;  %v11980_v52 = vld [vmem:[#allocation2 + $0xb0] sm:$0x1] }
 0x1b2   : > { %v2742_v0 = vpop.f32.mrf.mxu2  ;;  %9744 = vmatmul.msk.bf16.gmra.mxu1 %vm1028_vm6, %v11955_v7  ;;  %v1834_v22 = vshll.u32 %v11980_v52, 16 }
 0x1b3   : > { %v2235_v34 = vadd.f32 %v11891_v55, %v2067_v50  ;;  %v1828_v55 = vshrl.u32 %v11962_v18, 16  ;;  %v1826_v39 = vrot.slane %v1824_v47, 5  ;;  %v2581_v47 = vsel %vm11443_vm14, %v9760_v26, %v2580_v46 }
 0x1b4   : > { %v11964_v35 = vpop.f32.mrf.mxu0  ;;  %v1836_v11 = vrot.slane %v1834_v22, 5  ;;  %v2641_v46 = vunpack.c.l.b16 %v2584_v13 }
 0x1b5   : > { %v2403_v51 = vadd.f32 %v11883_v42, %v2235_v34  ;;  %9687 = vmatmul.msk.bf16.gmra.mxu3 %vm1028_vm6, %v11802_v27  ;;  %v1820_v42 = vrot.slane %v1818_v8, 5  ;;  %v1830_v27 = vrot.slane %v1828_v55, 4 }
 0x1b7   : > { %v11974_v57 = vadd.f32 %v2742_v0, %v2403_v51  ;;  %9787 = vmatmul.msk.bf16.gmra.mxu2 %vm1028_vm6, %v11960_v36  ;;  %9716 = vmatmul.msk.bf16.gmra.mxu0 %vm1028_vm6, %v11905_v4  ;;  %v1821_v16 = vor.u32 %v1820_v42, %v1817_v37  ;;  %v11985_v0 = vpop.f32.mrf.mxu1  ;;  %v1831_v34 = vor.u32 %v1830_v27, %v1826_v39  ;;  %v2640_v27 = vunpack.c.l.b16 %v2581_v47  ;;  %v1466_v47 = vld [vmem:[#allocation2 + $0xb4] sm:$0xf] }
 0x1b8   : > { %v1994_v63 = vpop.f32.mrf.mxu3 }
 0x1b9   : > { %v2068_v28 = vadd.f32 %v1994_v63, %v16649_v43  ;;  %v1822_v51 = vrot.slane %v1821_v16, 4  ;;  %v1832_v63 = vrot.slane %v1831_v34, 4  ;;  %v881_v43 = vld [vmem:[#allocation2 + $0xbc] sm:$0x1] }
 0x1ba   : > { %v2745_v50 = vpop.f32.mrf.mxu2  ;;  %v882_v16 = vsel %vm11079_vm8, %v707_v14, %v881_v43  ;;  %v2587_v14 = vrot.slane %v11863_v15, 5 }
 0x1bb   : > { %v2236_v8 = vadd.f32 %v11914_v32, %v2068_v28  ;;  %v1827_v42 = vsel %vm11371_vm11, %v1822_v51, %v1826_v39  ;;  %v1837_v22 = vsel %vm11371_vm11, %v1832_v63, %v1836_v11  ;;  %883 = vst [vmem:[#allocation2 + $0xbc] sm:$0x1] %v882_v16  ;;  %v12012_v51 = vld [vmem:[#allocation2 + $0xb8] sm:$0xf]  ;;  %v1839_v63 = vshrl.u32 %v1466_v47, 16 }
 0x1bc   : > { %v11991_v55 = vpop.f32.mrf.mxu0  ;;  %v1895_v32 = vunpack.c.l.b16 %v1827_v42  ;;  %v1896_v26 = vunpack.c.l.b16 %v1837_v22  ;;  %v1848_v42 = vshll.u32 %v12012_v51, 16  ;;  %v2589_v16 = vrot.slane %v2587_v14, 4 }
 0x1bd   : > { %v2404_v37 = vadd.f32 %v11907_v31, %v2236_v8  ;;  %v12010_v8 = vpack.c.b16 %v2641_v46, %v2640_v27 }
 0x1be   : > { %v12005_v34 = vpack.c.b16 %v1896_v26, %v1895_v32  ;;  %v1841_v32 = vrot.slane %v1839_v63, 4  ;;  %v1850_v46 = vrot.slane %v1848_v42, 5  ;;  %v16654_v63 = vld [vmem:[#allocation7_spill] sm:$0xff] }
 0x1bf   : > { %v12000_v28 = vadd.f32 %v2745_v50, %v2404_v37  ;;  %v12007_v6 = vpop.f32.mrf.mxu1  ;;  %v2444_v50 = vld [vmem:[#allocation2 + $0x90] sm:$0xe]  ;;  %v1842_v37 = vshll.u32 %v1466_v47, 16 }
 0x1c0   : > { %v1996_v29 = vpop.f32.mrf.mxu3  ;;  %v9761_v27 = vrot.slane %v2444_v50, 9 }
 0x1c1   : > { %16651 = vst [vmem:[#allocation9_spill] sm:$0xff] %v12000_v28  ;;  %v2069_v31 = vadd.f32 %v1996_v29, %v16652_v10  ;;  %v2590_v29 = vrot.slane %v11878_v25, 5 }
 0x1c2   : > { %v2747_v39 = vpop.f32.mrf.mxu2  ;;  %9745 = vmatmul.msk.bf16.gmra.mxu1 %vm1028_vm6, %v12005_v34  ;;  %v12030_v15 = vld [vmem:[#allocation2 + $0xbc] sm:$0x1] }
 0x1c3   : > { %v2237_v11 = vadd.f32 %v11941_v5, %v2069_v31  ;;  %v1852_v5 = vshrl.u32 %v12012_v51, 16  ;;  %v1858_v10 = vshll.u32 %v12030_v15, 16  ;;  %v2591_v25 = vsel %vm11443_vm14, %v2589_v16, %v2590_v29 }
 0x1c4   : > { %v12014_v13 = vpop.f32.mrf.mxu0 }
 0x1c5   : > { %v2405_v22 = vadd.f32 %v11935_v21, %v2237_v11  ;;  %9688 = vmatmul.msk.bf16.gmra.mxu3 %vm1028_vm6, %v11854_v59  ;;  %v1844_v21 = vrot.slane %v1842_v37, 5  ;;  %v1854_v59 = vrot.slane %v1852_v5, 4  ;;  %v1860_v47 = vrot.slane %v1858_v10, 5 }
 0x1c6   : > { %v2588_v37 = vsel %vm11443_vm14, %v9761_v27, %v2587_v14  ;;  %v888_v14 = vld [vmem:[#allocation2 + $0xc8] sm:$0x1]  ;;  %v2643_v10 = vunpack.c.l.b16 %v2591_v25 }
 0x1c7   : > { %v12024_v43 = vadd.f32 %v2747_v39, %v2405_v22  ;;  %9788 = vmatmul.msk.bf16.gmra.mxu2 %vm1028_vm6, %v12010_v8  ;;  %9717 = vmatmul.msk.bf16.gmra.mxu0 %vm1028_vm6, %v11955_v7  ;;  %v1845_v39 = vor.u32 %v1844_v21, %v1841_v32  ;;  %v1855_v50 = vor.u32 %v1854_v59, %v1850_v46  ;;  %v724_v22 = vrot.slane %v16654_v63, 4  ;;  %v12043_v28 = vpop.f32.mrf.mxu1 }
 0x1c8   : > { %v1999_v26 = vpop.f32.mrf.mxu3  ;;  %16655 = vst [vmem:[#allocation10_spill] sm:$0xff] %v12043_v28  ;;  %v2642_v59 = vunpack.c.l.b16 %v2588_v37  ;;  %v12060_v37 = vld [vmem:[#allocation2 + $0xc4] sm:$0xf] }
 0x1c9   : > { %16653 = vst [vmem:[#allocation6_spill] sm:$0xff] %v12024_v43  ;;  %v2070_v31 = vadd.f32 %v1999_v26, %v11451_v9  ;;  %v1846_v42 = vrot.slane %v1845_v39, 4  ;;  %v1856_v9 = vrot.slane %v1855_v50, 4  ;;  %v889_v16 = vsel %vm11079_vm8, %v724_v22, %v888_v14  ;;  %v16656_v39 = vld [vmem:[#allocation12_spill] sm:$0xff] }
 0x1ca   : > { %v2750_v11 = vpop.f32.mrf.mxu2  ;;  %890 = vst [vmem:[#allocation2 + $0xc8] sm:$0x1] %v889_v16  ;;  %v12058_v63 = vpack.c.b16 %v2643_v10, %v2642_v59 }
 0x1cb   : > { %v2238_v43 = vadd.f32 %v11964_v35, %v2070_v31  ;;  %v1851_v21 = vsel %vm11371_vm11, %v1846_v42, %v1850_v46  ;;  %v1861_v35 = vsel %vm11371_vm11, %v1856_v9, %v1860_v47  ;;  %v1469_v47 = vld [vmem:[#allocation2 + $0xc0] sm:$0xf]  ;;  %v2594_v42 = vrot.slane %v11912_v33, 5 }
 0x1cc   : > { %v12039_v5 = vpop.f32.mrf.mxu0  ;;  %v1897_v26 = vunpack.c.l.b16 %v1851_v21  ;;  %v1898_v31 = vunpack.c.l.b16 %v1861_v35  ;;  %v2097_v25 = vshrl.u32 %v1469_v47, 16  ;;  %v2100_v22 = vshll.u32 %v1469_v47, 16  ;;  %v2445_v21 = vld [vmem:[#allocation2 + $0x9c] sm:$0xe] }
 0x1cd   : > { %v2406_v32 = vadd.f32 %v11957_v54, %v2238_v43  ;;  %v2106_v9 = vshll.u32 %v12060_v37, 16  ;;  %v2596_v16 = vrot.slane %v2594_v42, 4 }
 0x1ce   : > { %v12055_v43 = vpack.c.b16 %v1898_v31, %v1897_v26  ;;  %v2099_v35 = vrot.slane %v2097_v25, 4  ;;  %v9762_v31 = vrot.slane %v2445_v21, 9 }
 0x1cf   : > { %v12050_v27 = vadd.f32 %v2750_v11, %v2406_v32  ;;  %v12072_v59 = vpop.f32.mrf.mxu1 }
 0x1d0   : > { %v2001_v29 = vpop.f32.mrf.mxu3 }
 0x1d1   : > { %v2071_v54 = vadd.f32 %v2001_v29, %v16656_v39  ;;  %v12080_v33 = vld [vmem:[#allocation2 + $0xc8] sm:$0x1]  ;;  %v2597_v29 = vrot.slane %v11930_v58, 5 }
 0x1d2   : > { %v2752_v46 = vpop.f32.mrf.mxu2  ;;  %9746 = vmatmul.msk.bf16.gmra.mxu1 %vm1028_vm6, %v12055_v43  ;;  %v2116_v39 = vshll.u32 %v12080_v33, 16 }
 0x1d3   : > { %v2239_v50 = vadd.f32 %v11991_v55, %v2071_v54  ;;  %v2110_v55 = vshrl.u32 %v12060_v37, 16 }
 0x1d4   : > { %v12062_v11 = vpop.f32.mrf.mxu0  ;;  %v2118_v25 = vrot.slane %v2116_v39, 5 }
 0x1d5   : > { %v2407_v32 = vadd.f32 %v11985_v0, %v2239_v50  ;;  %9689 = vmatmul.msk.bf16.gmra.mxu3 %vm1028_vm6, %v11905_v4  ;;  %v2102_v4 = vrot.slane %v2100_v22, 5  ;;  %v2108_v0 = vrot.slane %v2106_v9, 5  ;;  %v2112_v14 = vrot.slane %v2110_v55, 4 }
 0x1d6   : > { %v2595_v22 = vsel %vm11443_vm14, %v9762_v31, %v2594_v42  ;;  %v2598_v9 = vsel %vm11443_vm14, %v2596_v16, %v2597_v29  ;;  %v16658_v31 = vld [vmem:[#allocation13_spill] sm:$0xff] }
 0x1d7   : > { %v12074_v26 = vadd.f32 %v2752_v46, %v2407_v32  ;;  %9789 = vmatmul.msk.bf16.gmra.mxu2 %vm1028_vm6, %v12058_v63  ;;  %9718 = vmatmul.msk.bf16.gmra.mxu0 %vm1028_vm6, %v12005_v34  ;;  %v2103_v46 = vor.u32 %v2102_v4, %v2099_v35  ;;  %v2113_v47 = vor.u32 %v2112_v14, %v2108_v0  ;;  %v2644_v4 = vunpack.c.l.b16 %v2595_v22  ;;  %v12099_v42 = vpop.f32.mrf.mxu1 }
 0x1d8   : > { %v2004_v10 = vpop.f32.mrf.mxu3  ;;  %v2645_v14 = vunpack.c.l.b16 %v2598_v9  ;;  %16657 = vst [vmem:[#allocation7_spill] sm:$0xff] %v12099_v42  ;;  %v2446_v9 = vld [vmem:[#allocation2 + $0xa8] sm:$0xe] }
 0x1d9   : > { %v2072_v54 = vadd.f32 %v2004_v10, %v11495_v30  ;;  %v2104_v56 = vrot.slane %v2103_v46, 4  ;;  %v2114_v58 = vrot.slane %v2113_v47, 4  ;;  %v12109_v46 = vld [vmem:[#allocation2 + $0xd0] sm:$0xf]  ;;  %v2601_v47 = vrot.slane %v11962_v18, 5 }
 0x1da   : > { %v2755_v50 = vpop.f32.mrf.mxu2  ;;  %v2274_v22 = vshll.u32 %v12109_v46, 16  ;;  %v12121_v18 = vld [vmem:[#allocation2 + $0xd4] sm:$0x1] }
 0x1db   : > { %v2240_v32 = vadd.f32 %v12014_v13, %v2072_v54  ;;  %v2109_v30 = vsel %vm11371_vm11, %v2104_v56, %v2108_v0  ;;  %v2119_v55 = vsel %vm11371_vm11, %v2114_v58, %v2118_v25  ;;  %v12107_v56 = vpack.c.b16 %v2645_v14, %v2644_v4  ;;  %v1472_v0 = vld [vmem:[#allocation2 + $0xcc] sm:$0xf] }
 0x1dc   : > { %v12086_v28 = vpop.f32.mrf.mxu0  ;;  %v2125_v35 = vunpack.c.l.b16 %v2109_v30  ;;  %v2126_v10 = vunpack.c.l.b16 %v2119_v55  ;;  %v2265_v25 = vshrl.u32 %v1472_v0, 16  ;;  %v2276_v30 = vrot.slane %v2274_v22, 5 }
 0x1dd   : > { %v2408_v21 = vadd.f32 %v12007_v6, %v2240_v32  ;;  %v2268_v32 = vshll.u32 %v1472_v0, 16  ;;  %v9763_v4 = vrot.slane %v2446_v9, 9  ;;  %v2604_v14 = vrot.slane %v11980_v52, 5 }
 0x1de   : > { %v2127_v29 = vpack.c.b16 %v2126_v10, %v2125_v35  ;;  %v2267_v58 = vrot.slane %v2265_v25, 4  ;;  %v2284_v10 = vshll.u32 %v12121_v18, 16 }
 0x1df   : > { %v12097_v13 = vadd.f32 %v2755_v50, %v2408_v21  ;;  %v2270_v21 = vrot.slane %v2268_v32, 5  ;;  %v2350_v0 = vpop.f32.mrf.mxu1  ;;  %v2602_v22 = vsel %vm11443_vm14, %v9763_v4, %v2601_v47 }
 0x1e0   : > { %v2006_v39 = vpop.f32.mrf.mxu3  ;;  %v2286_v42 = vrot.slane %v2284_v10, 5 }
 0x1e1   : > { %v2073_v16 = vadd.f32 %v2006_v39, %v16658_v31  ;;  %v2271_v31 = vor.u32 %v2270_v21, %v2267_v58 }
 0x1e2   : > { %v12102_v54 = vpop.f32.mrf.mxu2  ;;  %9747 = vmatmul.msk.bf16.gmra.mxu1 %vm1028_vm6, %v2127_v29 }
 0x1e3   : > { %16659 = vst [vmem:[#allocation12_spill] sm:$0xff] %v12102_v54  ;;  %v12105_v6 = vadd.f32 %v12039_v5, %v2073_v16  ;;  %v2278_v5 = vshrl.u32 %v12109_v46, 16 }
 0x1e4   : > { %v2182_v50 = vpop.f32.mrf.mxu0 }
 0x1e5   : > { %16660 = vst [vmem:[#allocation13_spill] sm:$0xff] %v12105_v6  ;;  %9690 = vmatmul.msk.bf16.gmra.mxu3 %vm1028_vm6, %v11955_v7  ;;  %v2280_v55 = vrot.slane %v2278_v5, 4  ;;  %v2603_v7 = vrot.slane %v2601_v47, 4  ;;  %v2272_v6 = vrot.slane %v2271_v31, 4  ;;  %v16661_v47 = vld [vmem:[#allocation15_spill] sm:$0xff] }
 0x1e7   : > { %9790 = vmatmul.msk.bf16.gmra.mxu2 %vm1028_vm6, %v12107_v56  ;;  %9719 = vmatmul.msk.bf16.gmra.mxu0 %vm1028_vm6, %v12055_v43  ;;  %v2281_v25 = vor.u32 %v2280_v55, %v2276_v30  ;;  %v2605_v9 = vsel %vm11443_vm14, %v2603_v7, %v2604_v14  ;;  %v2447_v14 = vld [vmem:[#allocation2 + $0xb4] sm:$0xe] }
 0x1e8   : > { %v2009_v35 = vpop.f32.mrf.mxu3 }
 0x1e9   : > { %v2074_v39 = vadd.f32 %v2009_v35, %v11543_v45  ;;  %v2282_v52 = vrot.slane %v2281_v25, 4  ;;  %v2277_v45 = vsel %vm11371_vm11, %v2272_v6, %v2276_v30  ;;  %v2647_v35 = vunpack.c.l.b16 %v2605_v9  ;;  %v12146_v30 = vpop.f32.mrf.mxu1 }
 0x1ea   : > { %v2760_v16 = vpop.f32.mrf.mxu2  ;;  %v2293_v21 = vunpack.c.l.b16 %v2277_v45 }
 0x1eb   : > { %v2242_v54 = vadd.f32 %v12062_v11, %v2074_v39  ;;  %v2287_v58 = vsel %vm11371_vm11, %v2282_v52, %v2286_v42  ;;  %v2646_v11 = vunpack.c.l.b16 %v2602_v22  ;;  %v2608_v42 = vrot.slane %v12012_v51, 5 }
 0x1ec   : > { %v2184_v32 = vpop.f32.mrf.mxu0  ;;  %v2294_v10 = vunpack.c.l.b16 %v2287_v58  ;;  %v2611_v22 = vrot.slane %v12030_v15, 5 }
 0x1ed   : > { %v2410_v5 = vadd.f32 %v12072_v59, %v2242_v54  ;;  %v12144_v54 = vpack.c.b16 %v2647_v35, %v2646_v11  ;;  %v2610_v25 = vrot.slane %v2608_v42, 4 }
 0x1ee   : > { %v2295_v31 = vpack.c.b16 %v2294_v10, %v2293_v21 }
 0x1ef   : > { %v12136_v55 = vadd.f32 %v2760_v16, %v2410_v5  ;;  %v9764_v16 = vrot.slane %v2447_v14, 9  ;;  %v2612_v45 = vsel %vm11443_vm14, %v2610_v25, %v2611_v22 }
 0x1f0   : > { %v2011_v39 = vpop.f32.mrf.mxu3  ;;  %v2649_v35 = vunpack.c.l.b16 %v2612_v45 }
 0x1f1   : > { %v2075_v4 = vadd.f32 %v2011_v39, %v16661_v47  ;;  %v2355_v21 = vpop.f32.mrf.mxu1  ;;  %v16662_v39 = vld [vmem:[#allocation17_spill] sm:$0xff] }
 0x1f2   : > { %v12139_v7 = vpop.f32.mrf.mxu2  ;;  %9748 = vmatmul.msk.bf16.gmra.mxu1 %vm1028_vm6, %v2295_v31 }
 0x1f3   : > { %v12142_v59 = vadd.f32 %v12086_v28, %v2075_v4 }
 0x1f4   : > { %v2187_v6 = vpop.f32.mrf.mxu0 }
 0x1f5   : > { %9691 = vmatmul.msk.bf16.gmra.mxu3 %vm1028_vm6, %v12005_v34  ;;  %v2609_v34 = vsel %vm11443_vm14, %v9764_v16, %v2608_v42 }
 0x1f7   : > { %9791 = vmatmul.msk.bf16.gmra.mxu2 %vm1028_vm6, %v12144_v54  ;;  %9720 = vmatmul.msk.bf16.gmra.mxu0 %vm1028_vm6, %v2127_v29  ;;  %v2648_v29 = vunpack.c.l.b16 %v2609_v34 }
 0x1f8   : > { %v2014_v28 = vpop.f32.mrf.mxu3 }
 0x1f9   : > { %v2076_v9 = vadd.f32 %v2014_v28, %v11591_v61  ;;  %v12176_v42 = vpop.f32.mrf.mxu1 }
 0x1fa   : > { %v2765_v52 = vpop.f32.mrf.mxu2 }
 0x1fb   : > { %v2244_v51 = vadd.f32 %v2182_v50, %v2076_v9  ;;  %v12168_v50 = vpack.c.b16 %v2649_v35, %v2648_v29  ;;  %v16665_v29 = vld [vmem:[#allocation18_spill] sm:$0xff] }
 0x1fc   : > { %v2189_v5 = vpop.f32.mrf.mxu0 }
 0x1fd   : > { %v2412_v58 = vadd.f32 %v2350_v0, %v2244_v51  ;;  %v16663_v0 = vld [vmem:[#allocation16_spill] sm:$0xff] }
 0x1ff   : > { %v12161_v11 = vadd.f32 %v2765_v52, %v2412_v58  ;;  %v16664_v58 = vld [vmem:[#allocation14_spill] sm:$0xff] }
 0x200   : > { %v2016_v10 = vpop.f32.mrf.mxu3 }
 0x201   : > { %v2077_v15 = vadd.f32 %v2016_v10, %v16662_v39  ;;  %v2360_v51 = vpop.f32.mrf.mxu1 }
 0x202   : > { %v12164_v47 = vpop.f32.mrf.mxu2 }
 0x203   : > { %v12166_v61 = vadd.f32 %v2184_v32, %v2077_v15 }
 0x204   : > { %v2192_v4 = vpop.f32.mrf.mxu0 }
 0x205   : > { %9692 = vmatmul.msk.bf16.gmra.mxu3 %vm1028_vm6, %v12055_v43 }
 0x207   : > { %9792 = vmatmul.msk.bf16.gmra.mxu2 %vm1028_vm6, %v12168_v50  ;;  %9835 = vmatmul.msk.bf16.vlgmr.msra.gmra.mxu0 %vm1028_vm6, %v16663_v0 }
 0x208   : > { %v2019_v31 = vpop.f32.mrf.mxu3 }
 0x209   : > { %v2078_v14 = vadd.f32 %v2019_v31, %v11639_v17  ;;  %v12191_v10 = vpop.f32.mrf.mxu1 }
 0x20a   : > { %v2770_v28 = vpop.f32.mrf.mxu2 }
 0x20b   : > { %v2246_v32 = vadd.f32 %v2187_v6, %v2078_v14 }
 0x20c   : > { %v2194_v16 = vpop.f32.mrf.mxu0 }
 0x20d   : > { %v2414_v25 = vadd.f32 %v2355_v21, %v2246_v32 }
 0x20f   : > { %v12179_v22 = vadd.f32 %v2770_v28, %v2414_v25  ;;  %v16666_v25 = vld [vmem:[#allocation19_spill] sm:$0xff] }
 0x210   : > { %v2021_v9 = vpop.f32.mrf.mxu3 }
 0x211   : > { %v2079_v43 = vadd.f32 %v2021_v9, %v11659_v60 }
 0x212   : > { %v12182_v52 = vpop.f32.mrf.mxu2 }
 0x213   : > { %v12184_v34 = vadd.f32 %v2189_v5, %v2079_v43 }
 0x214   : > { %v2197_v45 = vpop.f32.mrf.mxu0 }
 0x215   : > { %9806 = vmatmul.msk.bf16.vlgmr.msra.gmra.mxu3 %vm1028_vm6, %v16664_v58 }
 0x217   : > { %9836 = vmatmul.msk.bf16.gmra.mxu0 %vm1028_vm6, %v16665_v29 }
 0x218   : > { %v2024_v17 = vpop.f32.mrf.mxu3 }
 0x219   : > { %v2080_v6 = vadd.f32 %v2024_v17, %v11687_v62  ;;  %v2365_v62 = vpop.f32.mrf.mxu1 }
 0x21a   : > { %v2775_v21 = vpop.f32.mrf.mxu2 }
 0x21b   : > { %v2248_v35 = vadd.f32 %v2192_v4, %v2080_v6 }
 0x21c   : > { %v2199_v60 = vpop.f32.mrf.mxu0 }
 0x21d   : > { %v2416_v39 = vadd.f32 %v2360_v51, %v2248_v35 }
 0x21f   : > { %v12193_v15 = vadd.f32 %v2775_v21, %v2416_v39 }
 0x220   : > { %v2026_v5 = vpop.f32.mrf.mxu3 }
 0x221   : > { %v2081_v31 = vadd.f32 %v2026_v5, %v11707_v3 }
 0x222   : > { %v12196_v14 = vpop.f32.mrf.mxu2 }
 0x223   : > { %v12198_v28 = vadd.f32 %v2194_v16, %v2081_v31  ;;  %v12207_v16 = vpop.f32.mrf.mxu1 }
 0x224   : > { %v2202_v32 = vpop.f32.mrf.mxu0 }
 0x225   : > { %9807 = vmatmul.msk.bf16.gmra.mxu3 %vm1028_vm6, %v16663_v0 }
 0x227   : > { %9837 = vmatmul.msk.bf16.gmra.mxu0 %vm1028_vm6, %v16666_v25 }
 0x228   : > { %v2029_v4 = vpop.f32.mrf.mxu3 }
 0x229   : > { %v2082_v9 = vadd.f32 %v2029_v4, %v11735_v20 }
 0x22a   : > { %v2780_v43 = vpop.f32.mrf.mxu2 }
 0x22b   : > { %v2250_v51 = vadd.f32 %v2197_v45, %v2082_v9  ;;  %v2370_v5 = vpop.f32.mrf.mxu1 }
 0x22c   : > { %v2204_v58 = vpop.f32.mrf.mxu0 }
 0x22d   : > { %v2418_v17 = vadd.f32 %v2365_v62, %v2250_v51 }
 0x22f   : > { %v12205_v3 = vadd.f32 %v2780_v43, %v2418_v17 }
 0x230   : > { %v2031_v6 = vpop.f32.mrf.mxu3 }
 0x231   : > { %v2083_v21 = vadd.f32 %v2031_v6, %v11755_v38 }
 0x232   : > { %v12210_v35 = vpop.f32.mrf.mxu2 }
 0x233   : > { %v12212_v0 = vadd.f32 %v2199_v60, %v2083_v21 }
 0x234   : > { %v2207_v39 = vpop.f32.mrf.mxu0 }
 0x235   : > { %9808 = vmatmul.msk.bf16.gmra.mxu3 %vm1028_vm6, %v16665_v29 }
 0x237   : > { %9838 = vmatmul.msk.bf16.gmra.mxu0 %vm1028_vm6, %v11709_v19 }
 0x238   : > { %v2034_v20 = vpop.f32.mrf.mxu3 }
 0x239   : > { %v2084_v45 = vadd.f32 %v2034_v20, %v11784_v40 }
 0x23a   : > { %v2785_v62 = vpop.f32.mrf.mxu2 }
 0x23b   : > { %v2252_v31 = vadd.f32 %v2202_v32, %v2084_v45 }
 0x23c   : > { %v2209_v4 = vpop.f32.mrf.mxu0 }
 0x23d   : > { %v2420_v9 = vadd.f32 %v2370_v5, %v2252_v31  ;;  %v16668_v5 = vld [vmem:[#allocation20_spill] sm:$0xff] }
 0x23f   : > { %v12219_v38 = vadd.f32 %v2785_v62, %v2420_v9  ;;  %v16669_v9 = vld [vmem:[#allocation21_spill] sm:$0xff] }
 0x240   : > { %v2036_v43 = vpop.f32.mrf.mxu3 }
 0x241   : > { %v2085_v60 = vadd.f32 %v2036_v43, %v11807_v53 }
 0x243   : > { %v12222_v51 = vadd.f32 %v2204_v58, %v2085_v60  ;;  %v16667_v58 = vld [vmem:[#allocation26_spill] sm:$0xff] }
 0x244   : > { %v2212_v17 = vpop.f32.mrf.mxu0 }
 0x245   : > { %9809 = vmatmul.msk.bf16.gmra.mxu3 %vm1028_vm6, %v16666_v25 }
 0x247   : > { %9839 = vmatmul.msk.bf16.gmra.mxu0 %vm1028_vm6, %v11757_v48 }
 0x248   : > { %v2039_v40 = vpop.f32.mrf.mxu3 }
 0x249   : > { %v2086_v29 = vadd.f32 %v2039_v40, %v11837_v49  ;;  %v16672_v40 = vld [vmem:[#allocation22_spill] sm:$0xff] }
 0x24b   : > { %v12229_v32 = vadd.f32 %v2207_v39, %v2086_v29 }
 0x24c   : > { %v2214_v6 = vpop.f32.mrf.mxu0 }
 0x250   : > { %v2041_v21 = vpop.f32.mrf.mxu3 }
 0x251   : > { %v2087_v20 = vadd.f32 %v2041_v21, %v11859_v1 }
 0x253   : > { %v12232_v45 = vadd.f32 %v2209_v4, %v2087_v20  ;;  %v16671_v4 = vld [vmem:[#allocation29_spill] sm:$0xff] }
 0x254   : > { %v2217_v53 = vpop.f32.mrf.mxu0 }
 0x255   : > { %9810 = vmatmul.msk.bf16.gmra.mxu3 %vm1028_vm6, %v11709_v19 }
 0x257   : > { %9840 = vmatmul.msk.bf16.gmra.mxu0 %vm1028_vm6, %v16667_v58 }
 0x258   : > { %v2044_v25 = vpop.f32.mrf.mxu3 }
 0x259   : > { %v2088_v31 = vadd.f32 %v2044_v25, %v16668_v5  ;;  %v16674_v25 = vld [vmem:[#allocation23_spill] sm:$0xff] }
 0x25b   : > { %v12239_v62 = vadd.f32 %v2212_v17, %v2088_v31 }
 0x25c   : > { %v2219_v49 = vpop.f32.mrf.mxu0 }
 0x260   : > { %v2046_v39 = vpop.f32.mrf.mxu3 }
 0x261   : > { %v2089_v43 = vadd.f32 %v2046_v39, %v16669_v9  ;;  %v16676_v39 = vld [vmem:[#allocation24_spill] sm:$0xff] }
 0x263   : > { %v12242_v60 = vadd.f32 %v2214_v6, %v2089_v43 }
 0x264   : > { %v2222_v1 = vpop.f32.mrf.mxu0 }
 0x265   : > { %16670 = vst [vmem:[#allocation15_spill] sm:$0xff] %v12242_v60  ;;  %9811 = vmatmul.msk.bf16.gmra.mxu3 %vm1028_vm6, %v11757_v48 }
 0x267   : > { %9841 = vmatmul.msk.bf16.gmra.mxu0 %vm1028_vm6, %v16671_v4 }
 0x268   : > { %v2049_v19 = vpop.f32.mrf.mxu3 }
 0x269   : > { %v2090_v29 = vadd.f32 %v2049_v19, %v16672_v40  ;;  %v16678_v40 = vld [vmem:[#allocation25_spill] sm:$0xff] }
 0x26b   : > { %v12249_v21 = vadd.f32 %v2217_v53, %v2090_v29 }
 0x26c   : > { %v2224_v17 = vpop.f32.mrf.mxu0 }
 0x26d   : > { %16673 = vst [vmem:[#allocation17_spill] sm:$0xff] %v12249_v21 }
 0x270   : > { %v2051_v20 = vpop.f32.mrf.mxu3 }
 0x271   : > { %v2091_v5 = vadd.f32 %v2051_v20, %v16674_v25  ;;  %v16680_v20 = vld [vmem:[#allocation27_spill] sm:$0xff] }
 0x273   : > { %v12252_v31 = vadd.f32 %v2219_v49, %v2091_v5 }
 0x274   : > { %v2227_v6 = vpop.f32.mrf.mxu0 }
 0x275   : > { %16675 = vst [vmem:[#allocation16_spill] sm:$0xff] %v12252_v31  ;;  %9812 = vmatmul.msk.bf16.gmra.mxu3 %vm1028_vm6, %v16667_v58 }
 0x277   : > { %9842 = vmatmul.msk.bf16.gmra.mxu0 %vm1028_vm6, %v11910_v44 }
 0x278   : > { %v2054_v48 = vpop.f32.mrf.mxu3 }
 0x279   : > { %v2092_v9 = vadd.f32 %v2054_v48, %v16676_v39  ;;  %v16682_v39 = vld [vmem:[#allocation28_spill] sm:$0xff] }
 0x27b   : > { %v12259_v43 = vadd.f32 %v2222_v1, %v2092_v9 }
 0x27c   : > { %v2229_v53 = vpop.f32.mrf.mxu0 }
 0x27d   : > { %16677 = vst [vmem:[#allocation14_spill] sm:$0xff] %v12259_v43 }
 0x280   : > { %v2056_v19 = vpop.f32.mrf.mxu3 }
 0x281   : > { %v2093_v29 = vadd.f32 %v2056_v19, %v16678_v40 }
 0x283   : > { %v12262_v2 = vadd.f32 %v2224_v17, %v2093_v29 }
 0x284   : > { %v3043_v49 = vpop.f32.mrf.mxu0 }
 0x285   : > { %16679 = vst [vmem:[#allocation18_spill] sm:$0xff] %v12262_v2  ;;  %9813 = vmatmul.msk.bf16.gmra.mxu3 %vm1028_vm6, %v16671_v4 }
 0x287   : > { %9843 = vmatmul.msk.bf16.gmra.mxu0 %vm1028_vm6, %v11960_v36 }
 0x288   : > { %v2059_v58 = vpop.f32.mrf.mxu3 }
 0x289   : > { %v2094_v25 = vadd.f32 %v2059_v58, %v16680_v20 }
 0x28b   : > { %v12269_v5 = vadd.f32 %v2227_v6, %v2094_v25 }
 0x28c   : > { %v3045_v1 = vpop.f32.mrf.mxu0 }
 0x28d   : > { %16681 = vst [vmem:[#allocation19_spill] sm:$0xff] %v12269_v5 }
 0x290   : > { %v2061_v48 = vpop.f32.mrf.mxu3 }
 0x291   : > { %v2095_v9 = vadd.f32 %v2061_v48, %v16682_v39 }
 0x293   : > { %v12272_v43 = vadd.f32 %v2229_v53, %v2095_v9  ;;  %v16688_v9 = vld [vmem:[#allocation9_spill] sm:$0xff] }
 0x294   : > { %v3048_v17 = vpop.f32.mrf.mxu0 }
 0x295   : > { %16683 = vst [vmem:[#allocation26_spill] sm:$0xff] %v12272_v43  ;;  %9814 = vmatmul.msk.bf16.gmra.mxu3 %vm1028_vm6, %v11910_v44 }
 0x297   : > { %9844 = vmatmul.msk.bf16.gmra.mxu0 %vm1028_vm6, %v12010_v8 }
 0x298   : > { %v2889_v4 = vpop.f32.mrf.mxu3 }
 0x299   : > { %v2969_v19 = vadd.f32 %v2889_v4, %v11901_v41 }
 0x29b   : > { %v12279_v40 = vadd.f32 %v3043_v49, %v2969_v19 }
 0x29c   : > { %v3050_v6 = vpop.f32.mrf.mxu0 }
 0x29d   : > { %16684 = vst [vmem:[#allocation20_spill] sm:$0xff] %v12279_v40  ;;  %v3155_v31 = vsel %vm1028_vm6, %v12279_v40, 0.0 }
 0x2a0   : > { %v2891_v29 = vpop.f32.mrf.mxu3 }
 0x2a1   : > { %v2970_v58 = vadd.f32 %v2891_v29, %v11924_v24  ;;  %v10595_v29 = vld [vmem:[%s10917_s11 + $0xc8] sm:$0xff] }
 0x2a2   : > { %4103 = vmatpush.bf16.msra.mxu1 %v10595_v29  ;;  %v2855_v29 = vrot.slane %v12080_v33, 5  ;;  %v3006_v33 = vrot.slane %v12109_v46, 5 }
 0x2a3   : > { %v12282_v20 = vadd.f32 %v3045_v1, %v2970_v58  ;;  %v16689_v58 = vld [vmem:[#allocation6_spill] sm:$0xff] }
 0x2a4   : > { %v3053_v53 = vpop.f32.mrf.mxu0 }
 0x2a5   : > { %16685 = vst [vmem:[#allocation21_spill] sm:$0xff] %v12282_v20  ;;  %9815 = vmatmul.msk.bf16.gmra.mxu3 %vm1028_vm6, %v11960_v36 }
 0x2a7   : > { %9845 = vmatmul.msk.bf16.gmra.mxu0 %vm1028_vm6, %v12058_v63 }
 0x2a8   : > { %v2894_v44 = vpop.f32.mrf.mxu3 }
 0x2a9   : > { %v2971_v25 = vadd.f32 %v2894_v44, %v11950_v12 }
 0x2ab   : > { %v12289_v41 = vadd.f32 %v3048_v17, %v2971_v25 }
 0x2ac   : > { %v3055_v49 = vpop.f32.mrf.mxu0 }
 0x2ad   : > { %16686 = vst [vmem:[#allocation29_spill] sm:$0xff] %v12289_v41 }
 0x2b0   : > { %v2896_v48 = vpop.f32.mrf.mxu3 }
 0x2b1   : > { %v2972_v39 = vadd.f32 %v2896_v48, %v11974_v57 }
 0x2b3   : > { %v12292_v24 = vadd.f32 %v3050_v6, %v2972_v39 }
 0x2b4   : > { %v3058_v1 = vpop.f32.mrf.mxu0 }
 0x2b5   : > { %16687 = vst [vmem:[#allocation22_spill] sm:$0xff] %v12292_v24  ;;  %9816 = vmatmul.msk.bf16.gmra.mxu3 %vm1028_vm6, %v12010_v8 }
 0x2b7   : > { %9846 = vmatmul.msk.bf16.gmra.mxu0 %vm1028_vm6, %v12107_v56 }
 0x2b8   : > { %v2899_v36 = vpop.f32.mrf.mxu3 }
 0x2b9   : > { %v2973_v4 = vadd.f32 %v2899_v36, %v16688_v9 }
 0x2bb   : > { %v12299_v19 = vadd.f32 %v3053_v53, %v2973_v4  ;;  %v2852_v4 = vrot.slane %v12060_v37, 5 }
 0x2bc   : > { %v3060_v12 = vpop.f32.mrf.mxu0 }
 0x2c0   : > { %v2901_v17 = vpop.f32.mrf.mxu3 }
 0x2c1   : > { %v2974_v44 = vadd.f32 %v2901_v17, %v16689_v58  ;;  %v2854_v17 = vrot.slane %v2852_v4, 4 }
 0x2c3   : > { %v12303_v57 = vadd.f32 %v3055_v49, %v2974_v44 }
 0x2c4   : > { %v3063_v6 = vpop.f32.mrf.mxu0 }
 0x2c5   : > { %9817 = vmatmul.msk.bf16.gmra.mxu3 %vm1028_vm6, %v12058_v63  ;;  %v2448_v63 = vld [vmem:[#allocation2 + $0xc0] sm:$0xe] }
 0x2c7   : > { %9847 = vmatmul.msk.bf16.gmra.mxu0 %vm1028_vm6, %v12144_v54 }
 0x2c8   : > { %v2904_v8 = vpop.f32.mrf.mxu3 }
 0x2c9   : > { %v2975_v25 = vadd.f32 %v2904_v8, %v12050_v27 }
 0x2cb   : > { %v12310_v53 = vadd.f32 %v3058_v1, %v2975_v25  ;;  %v9793_v1 = vrot.slane %v2448_v63, 9 }
 0x2cc   : > { %v12312_v48 = vpop.f32.mrf.mxu0 }
 0x2cd   : > { %v2853_v37 = vsel %vm11443_vm14, %v9793_v1, %v2852_v4  ;;  %v3008_v4 = vrot.slane %v3006_v33, 4 }
 0x2ce   : > { %v2862_v44 = vunpack.c.l.b16 %v2853_v37 }
 0x2d0   : > { %v2906_v39 = vpop.f32.mrf.mxu3 }
 0x2d1   : > { %v2976_v36 = vadd.f32 %v2906_v39, %v12074_v26 }
 0x2d3   : > { %v12315_v9 = vadd.f32 %v3060_v12, %v2976_v36 }
 0x2d4   : > { %v3068_v49 = vpop.f32.mrf.mxu0 }
 0x2d5   : > { %9818 = vmatmul.msk.bf16.gmra.mxu3 %vm1028_vm6, %v12107_v56  ;;  %v2856_v56 = vsel %vm11443_vm14, %v2854_v17, %v2855_v29 }
 0x2d6   : > { %v2863_v8 = vunpack.c.l.b16 %v2856_v56 }
 0x2d7   : > { %9848 = vmatmul.msk.bf16.gmra.mxu0 %vm1028_vm6, %v12168_v50 }
 0x2d8   : > { %v2909_v27 = vpop.f32.mrf.mxu3  ;;  %v2864_v39 = vpack.c.b16 %v2863_v8, %v2862_v44 }
 0x2d9   : > { %v2977_v58 = vadd.f32 %v2909_v27, %v12097_v13  ;;  %v2449_v13 = vld [vmem:[#allocation2 + $0xcc] sm:$0xe]  ;;  %v3009_v27 = vrot.slane %v12121_v18, 5 }
 0x2da   : > { %v9822_v63 = vrot.slane %v2449_v13, 9 }
 0x2db   : > { %v12324_v26 = vadd.f32 %v3063_v6, %v2977_v58 }
 0x2dc   : > { %v12326_v12 = vpop.f32.mrf.mxu0  ;;  %v3007_v46 = vsel %vm11443_vm14, %v9822_v63, %v3006_v33 }
 0x2dd   : > { %v3016_v58 = vunpack.c.l.b16 %v3007_v46 }
 0x2e0   : > { %v12332_v25 = vpop.f32.mrf.mxu3 }
 0x2e4   : > { %v3073_v36 = vpop.f32.mrf.mxu0 }
 0x2e5   : > { %9819 = vmatmul.msk.bf16.gmra.mxu3 %vm1028_vm6, %v12144_v54  ;;  %v3010_v54 = vsel %vm11443_vm14, %v3008_v4, %v3009_v27 }
 0x2e6   : > { %v3017_v37 = vunpack.c.l.b16 %v3010_v54 }
 0x2e7   : > { %9849 = vmatmul.msk.bf16.gmra.mxu0 %vm1028_vm6, %v2864_v39 }
 0x2e8   : > { %v2914_v6 = vpop.f32.mrf.mxu3  ;;  %v3018_v44 = vpack.c.b16 %v3017_v37, %v3016_v58 }
 0x2e9   : > { %v2979_v1 = vadd.f32 %v2914_v6, %v12136_v55 }
 0x2eb   : > { %v12340_v17 = vadd.f32 %v3068_v49, %v2979_v1 }
 0x2ec   : > { %v12342_v29 = vpop.f32.mrf.mxu0 }
 0x2f0   : > { %v12348_v56 = vpop.f32.mrf.mxu3 }
 0x2f4   : > { %v3078_v8 = vpop.f32.mrf.mxu0 }
 0x2f5   : > { %9820 = vmatmul.msk.bf16.gmra.mxu3 %vm1028_vm6, %v12168_v50 }
 0x2f7   : > { %9850 = vmatmul.msk.bf16.gmra.mxu0 %vm1028_vm6, %v3018_v44 }
 0x2f8   : > { %v2919_v18 = vpop.f32.mrf.mxu3 }
 0x2f9   : > { %v2981_v55 = vadd.f32 %v2919_v18, %v12161_v11 }
 0x2fb   : > { %v12354_v49 = vadd.f32 %v3073_v36, %v2981_v55 }
 0x2fc   : > { %v12356_v33 = vpop.f32.mrf.mxu0 }
 0x300   : > { %v12358_v13 = vpop.f32.mrf.mxu3 }
 0x304   : > { %v3083_v6 = vpop.f32.mrf.mxu0 }
 0x305   : > { %9821 = vmatmul.msk.bf16.gmra.mxu3 %vm1028_vm6, %v2864_v39  ;;  %v12375_v39 = vpop.f32.mrf.mxu1 }
 0x308   : > { %v2924_v63 = vpop.f32.mrf.mxu3 }
 0x309   : > { %v2983_v4 = vadd.f32 %v2924_v63, %v12179_v22  ;;  %v12377_v22 = vpop.f32.mrf.mxu2 }
 0x30b   : > { %v12362_v27 = vadd.f32 %v3078_v8, %v2983_v4 }
 0x30c   : > { %v12364_v50 = vpop.f32.mrf.mxu0 }
 0x30d   : > { %v12382_v63 = vpop.f32.mrf.mxu1 }
 0x310   : > { %v12366_v1 = vpop.f32.mrf.mxu3 }
 0x311   : > { %v12388_v4 = vpop.f32.mrf.mxu2 }
 0x314   : > { %v3088_v46 = vpop.f32.mrf.mxu0 }
 0x318   : > { %v2929_v11 = vpop.f32.mrf.mxu3 }
 0x319   : > { %v2985_v36 = vadd.f32 %v2929_v11, %v12193_v15  ;;  %v12390_v11 = vpop.f32.mrf.mxu1 }
 0x31b   : > { %v12369_v54 = vadd.f32 %v3083_v6, %v2985_v36 }
 0x31c   : > { %v12371_v58 = vpop.f32.mrf.mxu0 }
 0x31d   : > { %16690 = vst [vmem:[#allocation23_spill] sm:$0xff] %v12369_v54 }
 0x31e   : > { %16691 = vst [vmem:[#allocation24_spill] sm:$0xff] %v12371_v58 }
 0x320   : > { %v12373_v37 = vpop.f32.mrf.mxu3 }
 0x324   : > { %v3093_v44 = vpop.f32.mrf.mxu0 }
 0x328   : > { %v2934_v8 = vpop.f32.mrf.mxu3 }
 0x329   : > { %v2987_v18 = vadd.f32 %v2934_v8, %v12205_v3  ;;  %v12397_v3 = vpop.f32.mrf.mxu2  ;;  %v10594_v8 = vld [vmem:[%s10917_s11 + $0xc0] sm:$0xff] }
 0x32a   : > { %4104 = vmatpush.bf16.msra.mxu1 %v10594_v8 }
 0x32b   : > { %v12380_v55 = vadd.f32 %v3088_v46, %v2987_v18  ;;  %v12402_v18 = vpop.f32.mrf.mxu1 }
 0x32c   : > { %v12384_v15 = vpop.f32.mrf.mxu0 }
 0x32d   : > { %16692 = vst [vmem:[#allocation25_spill] sm:$0xff] %v12380_v55 }
 0x32e   : > { %16693 = vst [vmem:[#allocation27_spill] sm:$0xff] %v12384_v15 }
 0x330   : > { %v12386_v6 = vpop.f32.mrf.mxu3 }
 0x331   : > { %16694 = vst [vmem:[#allocation28_spill] sm:$0xff] %v12386_v6  ;;  %v12406_v15 = vpop.f32.mrf.mxu2 }
 0x332   : > { %16699 = vst [vmem:[#allocation32_spill] sm:$0xff] %v12406_v15 }
 0x333   : > { %v12410_v58 = vpop.f32.mrf.mxu1 }
 0x334   : > { %v12392_v23 = vpop.f32.mrf.mxu0  ;;  %16701 = vst [vmem:[#allocation34_spill] sm:$0xff] %v12410_v58 }
 0x335   : > { %16695 = vst [vmem:[#allocation9_spill] sm:$0xff] %v12392_v23 }
 0x338   : > { %v2939_v36 = vpop.f32.mrf.mxu3 }
 0x339   : > { %v2989_v43 = vadd.f32 %v2939_v36, %v12219_v38  ;;  %v12414_v38 = vpop.f32.mrf.mxu2  ;;  %v3225_v36 = vmul.f32 %v12282_v20, %v12282_v20 }
 0x33a   : > { %16703 = vst [vmem:[#allocation36_spill] sm:$0xff] %v12414_v38  ;;  %v3226_v38 = vmul.f32 %v12289_v41, %v12289_v41 }
 0x33b   : > { %v12395_v5 = vadd.f32 %v3093_v44, %v2989_v43  ;;  %v12418_v44 = vpop.f32.mrf.mxu1  ;;  %v3257_v54 = vsel %vm1028_vm6, %v3225_v36, 0.0  ;;  %v3160_v36 = vsel %vm1028_vm6, %v12292_v24, 0.0 }
 0x33c   : > { %v12404_v2 = vpop.f32.mrf.mxu0  ;;  %16705 = vst [vmem:[#allocation38_spill] sm:$0xff] %v12418_v44 }
 0x33d   : > { %16696 = vst [vmem:[#allocation6_spill] sm:$0xff] %v12395_v5  ;;  %v16706_v5 = vld [vmem:[#allocation13_spill] sm:$0xff] }
 0x33e   : > { %16698 = vst [vmem:[#allocation31_spill] sm:$0xff] %v12404_v2  ;;  %v16707_v2 = vld [vmem:[#allocation10_spill] sm:$0xff] }
 0x33f   : > { %v2409_v8 = vadd.f32 %v16707_v2, %v16706_v5  ;;  %v3158_v2 = vsel %vm1028_vm6, %v12289_v41, 0.0  ;;  %v3227_v5 = vmul.f32 %v12292_v24, %v12292_v24  ;;  %v3228_v41 = vmul.f32 %v12299_v19, %v12299_v19 }
 0x340   : > { %v12399_v46 = vpop.f32.mrf.mxu3 }
 0x341   : > { %16697 = vst [vmem:[#allocation30_spill] sm:$0xff] %v12399_v46  ;;  %v12444_v58 = vpop.f32.mrf.mxu2 }
 0x343   : > { %v12461_v24 = vpop.f32.mrf.mxu1 }
 0x344   : > { %v12412_v23 = vpop.f32.mrf.mxu0 }
 0x345   : > { %16702 = vst [vmem:[#allocation35_spill] sm:$0xff] %v12412_v23  ;;  %v3156_v23 = vsel %vm1028_vm6, %v12282_v20, 0.0  ;;  %v16711_v20 = vld [vmem:[#allocation7_spill] sm:$0xff] }
 0x346   : > { %v2411_v21 = vadd.f32 %v16711_v20, %v12142_v59  ;;  %v3157_v60 = vadd.f32 %v3156_v23, %v3155_v31  ;;  %v3162_v59 = vsel %vm1028_vm6, %v12299_v19, 0.0  ;;  %v3229_v23 = vmul.f32 %v12303_v57, %v12303_v57 }
 0x347   : > { %v2413_v31 = vadd.f32 %v12146_v30, %v12166_v61 }
 0x348   : > { %v12408_v55 = vpop.f32.mrf.mxu3  ;;  %v3159_v6 = vadd.f32 %v3158_v2, %v3157_v60  ;;  %v3263_v60 = vsel %vm1028_vm6, %v3228_v41, 0.0 }
 0x349   : > { %16700 = vst [vmem:[#allocation33_spill] sm:$0xff] %v12408_v55  ;;  %v3224_v55 = vmul.f32 %v12279_v40, %v12279_v40  ;;  %v3259_v40 = vsel %vm1028_vm6, %v3226_v38, 0.0  ;;  %v2826_v38 = vadd.f32 %v12139_v7, %v2411_v21  ;;  %v3265_v7 = vsel %vm1028_vm6, %v3229_v23, 0.0  ;;  %v12491_v23 = vpop.f32.mrf.mxu2 }
 0x34a   : > { %v3166_v21 = vsel %vm1028_vm6, %v12310_v53, 0.0 }
 0x34b   : > { %v2980_v41 = vadd.f32 %v12348_v56, %v2826_v38 }
 0x34c   : > { %v12424_v46 = vpop.f32.mrf.mxu0 }
 0x34d   : > { %16708 = vst [vmem:[#allocation13_spill] sm:$0xff] %v12424_v46  ;;  %v16710_v46 = vld [vmem:[#allocation12_spill] sm:$0xff] }
 0x34e   : > { %v2824_v44 = vadd.f32 %v16710_v46, %v2409_v8  ;;  %v3261_v8 = vsel %vm1028_vm6, %v3227_v5, 0.0 }
 0x350   : > { %v12416_v43 = vpop.f32.mrf.mxu3  ;;  %v2978_v46 = vadd.f32 %v12332_v25, %v2824_v44  ;;  %v3164_v25 = vsel %vm1028_vm6, %v12303_v57, 0.0 }
 0x351   : > { %16704 = vst [vmem:[#allocation37_spill] sm:$0xff] %v12416_v43 }
 0x352   : > { %v12469_v2 = vadd.f32 %v12312_v48, %v2978_v46  ;;  %v2415_v48 = vadd.f32 %v12176_v42, %v12184_v34  ;;  %v3168_v46 = vsel %vm1028_vm6, %v12315_v9, 0.0  ;;  %v3170_v34 = vsel %vm1028_vm6, %v12324_v26, 0.0 }
 0x354   : > { %v12473_v61 = vpop.f32.mrf.mxu0 }
 0x358   : > { %v12432_v43 = vpop.f32.mrf.mxu3 }
 0x359   : > { %16709 = vst [vmem:[#allocation10_spill] sm:$0xff] %v12432_v43  ;;  %v3256_v43 = vsel %vm1028_vm6, %v3224_v55, 0.0  ;;  %v3161_v55 = vadd.f32 %v3160_v36, %v3159_v6 }
 0x35a   : > { %v3258_v15 = vadd.f32 %v3257_v54, %v3256_v43  ;;  %v3230_v54 = vmul.f32 %v12310_v53, %v12310_v53 }
 0x35b   : > { %v3163_v44 = vadd.f32 %v3162_v59, %v3161_v55  ;;  %v2417_v59 = vadd.f32 %v12191_v10, %v12198_v28  ;;  %v2419_v10 = vadd.f32 %v12207_v16, %v12212_v0  ;;  %v12514_v16 = vpop.f32.mrf.mxu1 }
 0x35c   : > { %v3260_v20 = vadd.f32 %v3259_v40, %v3258_v15  ;;  %v3231_v40 = vmul.f32 %v12315_v9, %v12315_v9  ;;  %v2828_v15 = vadd.f32 %v12164_v47, %v2413_v31  ;;  %v3267_v36 = vsel %vm1028_vm6, %v3230_v54, 0.0 }
 0x35d   : > { %v3165_v5 = vadd.f32 %v3164_v25, %v3163_v44  ;;  %v3233_v31 = vmul.f32 %v12469_v2, %v12469_v2  ;;  %v3172_v54 = vsel %vm1028_vm6, %v12469_v2, 0.0 }
 0x35e   : > { %v3262_v43 = vadd.f32 %v3261_v8, %v3260_v20  ;;  %v3232_v8 = vmul.f32 %v12324_v26, %v12324_v26  ;;  %v3269_v42 = vsel %vm1028_vm6, %v3231_v40, 0.0  ;;  %v12499_v20 = vadd.f32 %v12326_v12, %v2980_v41 }
 0x35f   : > { %v3167_v47 = vadd.f32 %v3166_v21, %v3165_v5  ;;  %v2982_v55 = vadd.f32 %v12358_v13, %v2828_v15  ;;  %v2832_v12 = vadd.f32 %v12196_v14, %v2417_v59  ;;  %v3273_v13 = vsel %vm1028_vm6, %v3233_v31, 0.0 }
 0x360   : > { %v12471_v30 = vpop.f32.mrf.mxu3  ;;  %v3264_v6 = vadd.f32 %v3263_v60, %v3262_v43  ;;  %v2830_v60 = vadd.f32 %v12182_v52, %v2415_v48  ;;  %v3271_v25 = vsel %vm1028_vm6, %v3232_v8, 0.0  ;;  %v3234_v43 = vmul.f32 %v12340_v17, %v12340_v17  ;;  %v12527_v48 = vpop.f32.mrf.mxu0 }
 0x361   : > { %v3169_v38 = vadd.f32 %v3168_v46, %v3167_v47  ;;  %v3174_v52 = vsel %vm1028_vm6, %v12340_v17, 0.0  ;;  %v3235_v0 = vmul.f32 %v12499_v20, %v12499_v20  ;;  %v12521_v40 = vadd.f32 %v12342_v29, %v2982_v55 }
 0x362   : > { %v3266_v56 = vadd.f32 %v3265_v7, %v3264_v6  ;;  %v2984_v41 = vadd.f32 %v12366_v1, %v2830_v60  ;;  %v2834_v14 = vadd.f32 %v12210_v35, %v2419_v10  ;;  %v2421_v15 = vadd.f32 %v12375_v39, %v12222_v51 }
 0x363   : > { %v3171_v7 = vadd.f32 %v3170_v34, %v3169_v38  ;;  %v3275_v46 = vsel %vm1028_vm6, %v3234_v43, 0.0  ;;  %v3176_v29 = vsel %vm1028_vm6, %v12499_v20, 0.0  ;;  %v3236_v1 = vmul.f32 %v12354_v49, %v12354_v49  ;;  %v16713_v43 = vld [vmem:[#allocation32_spill] sm:$0xff] }
 0x364   : > { %v3268_v28 = vadd.f32 %v3267_v36, %v3266_v56  ;;  %v2422_v36 = vadd.f32 %v12382_v63, %v12229_v32  ;;  %v2423_v35 = vadd.f32 %v12390_v11, %v12232_v45  ;;  %v2986_v39 = vadd.f32 %v12373_v37, %v2832_v12  ;;  %v12550_v11 = vpop.f32.mrf.mxu2 }
 0x365   : > { %v3173_v5 = vadd.f32 %v3172_v54, %v3171_v7  ;;  %v3277_v59 = vsel %vm1028_vm6, %v3235_v0, 0.0  ;;  %v3178_v32 = vsel %vm1028_vm6, %v12354_v49, 0.0  ;;  %v3237_v63 = vmul.f32 %v12521_v40, %v12521_v40  ;;  %v16717_v0 = vld [vmem:[#allocation38_spill] sm:$0xff] }
 0x366   : > { %v3270_v44 = vadd.f32 %v3269_v42, %v3268_v28  ;;  %v12545_v56 = vadd.f32 %v12356_v33, %v2984_v41  ;;  %v2836_v47 = vadd.f32 %v12377_v22, %v2421_v15  ;;  %v2424_v45 = vadd.f32 %v12402_v18, %v12239_v62  ;;  %v2392_v15 = vpop.f32.mrf.mxu1 }
 0x367   : > { %v3175_v51 = vadd.f32 %v3174_v52, %v3173_v5  ;;  %v2837_v42 = vadd.f32 %v12388_v4, %v2422_v36  ;;  %v3279_v34 = vsel %vm1028_vm6, %v3236_v1, 0.0  ;;  %v3180_v55 = vsel %vm1028_vm6, %v12521_v40, 0.0  ;;  %v16716_v52 = vld [vmem:[#allocation17_spill] sm:$0xff]  ;;  %v16718_v36 = vld [vmem:[#allocation23_spill] sm:$0xff] }
 0x368   : > { %v12512_v21 = vpop.f32.mrf.mxu3  ;;  %v3272_v6 = vadd.f32 %v3271_v25, %v3270_v44  ;;  %v3238_v33 = vmul.f32 %v12362_v27, %v12362_v27  ;;  %v2838_v10 = vadd.f32 %v12397_v3, %v2423_v35  ;;  %v12560_v62 = vadd.f32 %v12364_v50, %v2986_v39  ;;  %v16712_v25 = vld [vmem:[#allocation28_spill] sm:$0xff]  ;;  %v16714_v3 = vld [vmem:[#allocation15_spill] sm:$0xff]  ;;  %v16715_v44 = vld [vmem:[#allocation34_spill] sm:$0xff] }
 0x369   : > { %v3177_v37 = vadd.f32 %v3176_v29, %v3175_v51  ;;  %v3281_v38 = vsel %vm1028_vm6, %v3237_v63, 0.0  ;;  %v3182_v4 = vsel %vm1028_vm6, %v12362_v27, 0.0  ;;  %v3239_v60 = vmul.f32 %v12545_v56, %v12545_v56  ;;  %v12584_v51 = vpop.f32.mrf.mxu0 }
 0x36a   : > { %v3274_v8 = vadd.f32 %v3273_v13, %v3272_v6  ;;  %v2988_v54 = vadd.f32 %v16712_v25, %v2834_v14  ;;  %v2839_v12 = vadd.f32 %v16713_v43, %v2424_v45  ;;  %v2425_v7 = vadd.f32 %v16715_v44, %v16714_v3  ;;  %v16719_v14 = vld [vmem:[#allocation16_spill] sm:$0xff]  ;;  %v16721_v45 = vld [vmem:[#allocation30_spill] sm:$0xff] }
 0x36b   : > { %v3179_v28 = vadd.f32 %v3178_v32, %v3177_v37  ;;  %v2426_v41 = vadd.f32 %v16717_v0, %v16716_v52  ;;  %v3283_v6 = vsel %vm1028_vm6, %v3238_v33, 0.0  ;;  %v3184_v5 = vsel %vm1028_vm6, %v12545_v56, 0.0  ;;  %v16720_v32 = vld [vmem:[#allocation24_spill] sm:$0xff]  ;;  %v16723_v33 = vld [vmem:[#allocation33_spill] sm:$0xff] }
 0x36c   : > { %v3276_v31 = vadd.f32 %v3275_v46, %v3274_v8  ;;  %v3240_v46 = vmul.f32 %v16718_v36, %v16718_v36  ;;  %v2427_v29 = vadd.f32 %v12461_v24, %v16719_v14  ;;  %v3241_v8 = vmul.f32 %v12560_v62, %v12560_v62  ;;  %v16722_v37 = vld [vmem:[#allocation36_spill] sm:$0xff]  ;;  %v2807_v43 = vpop.f32.mrf.mxu2  ;;  %v16726_v52 = vld [vmem:[#allocation37_spill] sm:$0xff] }
 0x36d   : > { %v3181_v50 = vadd.f32 %v3180_v55, %v3179_v28  ;;  %v3285_v39 = vsel %vm1028_vm6, %v3239_v60, 0.0  ;;  %v12590_v63 = vadd.f32 %v16720_v32, %v2988_v54  ;;  %v2841_v28 = vadd.f32 %v12444_v58, %v2426_v41  ;;  %v16724_v60 = vld [vmem:[#allocation25_spill] sm:$0xff]  ;;  %v16727_v41 = vld [vmem:[#allocation14_spill] sm:$0xff] }
 0x36e   : > { %v3278_v22 = vadd.f32 %v3277_v59, %v3276_v31  ;;  %v3186_v59 = vsel %vm1028_vm6, %v16718_v36, 0.0  ;;  %v2990_v31 = vadd.f32 %v16721_v45, %v2836_v47  ;;  %v3242_v25 = vmul.f32 %v16724_v60, %v16724_v60  ;;  %v16731_v32 = vld [vmem:[#allocation18_spill] sm:$0xff] }
 0x36f   : > { %v3183_v35 = vadd.f32 %v3182_v4, %v3181_v50  ;;  %v3188_v4 = vsel %vm1028_vm6, %v12560_v62, 0.0  ;;  %v2842_v54 = vadd.f32 %v12491_v23, %v2427_v29  ;;  %v3289_v44 = vsel %vm1028_vm6, %v3241_v8, 0.0 }
 0x370   : > { %v12562_v18 = vpop.f32.mrf.mxu3  ;;  %v3280_v13 = vadd.f32 %v3279_v34, %v3278_v22  ;;  %v2840_v34 = vadd.f32 %v16722_v37, %v2425_v7  ;;  %v2991_v22 = vadd.f32 %v16723_v33, %v2837_v42  ;;  %v3190_v42 = vsel %vm1028_vm6, %v16724_v60, 0.0  ;;  %v2395_v37 = vpop.f32.mrf.mxu1 }
 0x371   : > { %v3185_v55 = vadd.f32 %v3184_v5, %v3183_v35  ;;  %v3243_v58 = vmul.f32 %v12590_v63, %v12590_v63  ;;  %v2992_v0 = vadd.f32 %v16726_v52, %v2838_v10  ;;  %v2428_v23 = vadd.f32 %v12514_v16, %v16727_v41  ;;  %v16729_v35 = vld [vmem:[#allocation6_spill] sm:$0xff] }
 0x372   : > { %v3282_v1 = vadd.f32 %v3281_v38, %v3280_v13  ;;  %v3287_v38 = vsel %vm1028_vm6, %v3240_v46, 0.0  ;;  %v16725_v13 = vld [vmem:[#allocation27_spill] sm:$0xff]  ;;  %v16728_v46 = vld [vmem:[#allocation9_spill] sm:$0xff]  ;;  %v3291_v29 = vsel %vm1028_vm6, %v3242_v25, 0.0  ;;  %v3244_v8 = vmul.f32 %v16729_v35, %v16729_v35 }
 0x373   : > { %v3187_v3 = vadd.f32 %v3186_v59, %v3185_v55  ;;  %v12608_v50 = vadd.f32 %v16725_v13, %v2990_v31  ;;  %v12614_v14 = vadd.f32 %v16728_v46, %v2991_v22  ;;  %v2429_v10 = vadd.f32 %v2392_v15, %v16731_v32  ;;  %v16732_v22 = vld [vmem:[#allocation31_spill] sm:$0xff] }
 0x374   : > { %v3284_v24 = vadd.f32 %v3283_v6, %v3282_v1  ;;  %v3192_v1 = vsel %vm1028_vm6, %v12590_v63, 0.0  ;;  %v2994_v16 = vadd.f32 %v12471_v30, %v2840_v34  ;;  %v3194_v55 = vsel %vm1028_vm6, %v16729_v35, 0.0  ;;  %v3115_v30 = vpop.f32.mrf.mxu0 }
 0x375   : > { %v3189_v5 = vadd.f32 %v3188_v4, %v3187_v3  ;;  %v3245_v33 = vmul.f32 %v12608_v50, %v12608_v50  ;;  %v3246_v25 = vmul.f32 %v12614_v14, %v12614_v14  ;;  %v3295_v34 = vsel %vm1028_vm6, %v3244_v8, 0.0  ;;  %v16733_v3 = vld [vmem:[#allocation35_spill] sm:$0xff] }
 0x376   : > { %v3286_v47 = vadd.f32 %v3285_v39, %v3284_v24  ;;  %v16730_v39 = vld [vmem:[#allocation10_spill] sm:$0xff]  ;;  %v3293_v24 = vsel %vm1028_vm6, %v3243_v58, 0.0  ;;  %v2844_v58 = vadd.f32 %v2807_v43, %v2429_v10  ;;  %v2996_v46 = vadd.f32 %v12562_v18, %v2842_v54 }
 0x377   : > { %v2993_v59 = vadd.f32 %v16730_v39, %v2839_v12  ;;  %v3191_v31 = vadd.f32 %v3190_v42, %v3189_v5  ;;  %v2843_v12 = vadd.f32 %v12550_v11, %v2428_v23  ;;  %v2995_v42 = vadd.f32 %v12512_v21, %v2841_v28  ;;  %v16734_v11 = vld [vmem:[#allocation13_spill] sm:$0xff]  ;;  %v2810_v21 = vpop.f32.mrf.mxu2 }
 0x378   : > { %v2959_v7 = vpop.f32.mrf.mxu3  ;;  %v3288_v6 = vadd.f32 %v3287_v38, %v3286_v47  ;;  %v12630_v38 = vadd.f32 %v16732_v22, %v2992_v0  ;;  %v3196_v47 = vsel %vm1028_vm6, %v12608_v50, 0.0  ;;  %v12643_v0 = vadd.f32 %v16734_v11, %v2994_v16  ;;  %v16736_v11 = vld [vmem:[#allocation26_spill] sm:$0xff] }
 0x379   : > { %v3193_v15 = vadd.f32 %v3192_v1, %v3191_v31  ;;  %v3297_v23 = vsel %vm1028_vm6, %v3245_v33, 0.0  ;;  %v3299_v8 = vsel %vm1028_vm6, %v3246_v25, 0.0  ;;  %v12658_v32 = vadd.f32 %v12473_v61, %v2995_v42  ;;  %v2397_v61 = vpop.f32.mrf.mxu1 }
 0x37a   : > { %v3290_v45 = vadd.f32 %v3289_v44, %v3288_v6  ;;  %v12639_v44 = vadd.f32 %v16733_v3, %v2993_v59  ;;  %v3198_v6 = vsel %vm1028_vm6, %v12614_v14, 0.0  ;;  %v3247_v5 = vmul.f32 %v12630_v38, %v12630_v38 }
 0x37b   : > { %v3195_v52 = vadd.f32 %v3194_v55, %v3193_v15  ;;  %v3200_v39 = vsel %vm1028_vm6, %v12630_v38, 0.0  ;;  %v2997_v10 = vadd.f32 %v2959_v7, %v2843_v12  ;;  %v3249_v18 = vmul.f32 %v12643_v0, %v12643_v0 }
 0x37c   : > { %v3292_v4 = vadd.f32 %v3291_v29, %v3290_v45  ;;  %v16735_v29 = vld [vmem:[#allocation19_spill] sm:$0xff]  ;;  %v3248_v59 = vmul.f32 %v12639_v44, %v12639_v44  ;;  %v3301_v54 = vsel %vm1028_vm6, %v3247_v5, 0.0  ;;  %v3202_v16 = vsel %vm1028_vm6, %v12639_v44, 0.0 }
 0x37d   : > { %v2430_v1 = vadd.f32 %v2395_v37, %v16735_v29  ;;  %v3197_v43 = vadd.f32 %v3196_v47, %v3195_v52  ;;  %v12666_v37 = vadd.f32 %v12527_v48, %v2996_v46  ;;  %v3204_v12 = vsel %vm1028_vm6, %v12643_v0, 0.0  ;;  %v3118_v47 = vpop.f32.mrf.mxu0 }
 0x37e   : > { %v3294_v13 = vadd.f32 %v3293_v24, %v3292_v4  ;;  %v3303_v7 = vsel %vm1028_vm6, %v3248_v59, 0.0  ;;  %v3250_v4 = vmul.f32 %v12658_v32, %v12658_v32  ;;  %v12674_v15 = vadd.f32 %v12584_v51, %v2997_v10 }
 0x37f   : > { %v3199_v31 = vadd.f32 %v3198_v6, %v3197_v43  ;;  %v2845_v55 = vadd.f32 %v2810_v21, %v2430_v1  ;;  %v3305_v48 = vsel %vm1028_vm6, %v3249_v18, 0.0  ;;  %v3206_v42 = vsel %vm1028_vm6, %v12658_v32, 0.0  ;;  %v2812_v1 = vpop.f32.mrf.mxu2 }
 0x380   : > { %v2961_v41 = vpop.f32.mrf.mxu3  ;;  %v3296_v28 = vadd.f32 %v3295_v34, %v3294_v13  ;;  %v3307_v6 = vsel %vm1028_vm6, %v3250_v4, 0.0  ;;  %v3208_v5 = vsel %vm1028_vm6, %v12666_v37, 0.0  ;;  %v3252_v46 = vmul.f32 %v12674_v15, %v12674_v15 }
 0x381   : > { %v2998_v24 = vadd.f32 %v2961_v41, %v2844_v58  ;;  %v3201_v22 = vadd.f32 %v3200_v39, %v3199_v31  ;;  %v3251_v58 = vmul.f32 %v12666_v37, %v12666_v37  ;;  %v2431_v41 = vadd.f32 %v2397_v61, %v16736_v11 }
 0x382   : > { %v3298_v45 = vadd.f32 %v3297_v23, %v3296_v28  ;;  %v3210_v43 = vsel %vm1028_vm6, %v12674_v15, 0.0 }
 0x383   : > { %v3203_v34 = vadd.f32 %v3202_v16, %v3201_v22  ;;  %v12681_v13 = vadd.f32 %v3115_v30, %v2998_v24  ;;  %v3309_v30 = vsel %vm1028_vm6, %v3251_v58, 0.0  ;;  %v2846_v10 = vadd.f32 %v2812_v1, %v2431_v41 }
 0x384   : > { %v3300_v33 = vadd.f32 %v3299_v8, %v3298_v45  ;;  %v3311_v45 = vsel %vm1028_vm6, %v3252_v46, 0.0 }
 0x385   : > { %v3205_v51 = vadd.f32 %v3204_v12, %v3203_v34  ;;  %v3253_v8 = vmul.f32 %v12681_v13, %v12681_v13  ;;  %v3212_v31 = vsel %vm1028_vm6, %v12681_v13, 0.0  ;;  %v3120_v12 = vpop.f32.mrf.mxu0 }
 0x386   : > { %v3302_v25 = vadd.f32 %v3301_v54, %v3300_v33 }
 0x387   : > { %v3207_v28 = vadd.f32 %v3206_v42, %v3205_v51 }
 0x388   : > { %v2964_v3 = vpop.f32.mrf.mxu3  ;;  %v3304_v23 = vadd.f32 %v3303_v7, %v3302_v25 }
 0x389   : > { %v2999_v52 = vadd.f32 %v2964_v3, %v2845_v55  ;;  %v3209_v59 = vadd.f32 %v3208_v5, %v3207_v28  ;;  %v3313_v55 = vsel %vm1028_vm6, %v3253_v8, 0.0 }
 0x38a   : > { %v3306_v21 = vadd.f32 %v3305_v48, %v3304_v23 }
 0x38b   : > { %v12689_v29 = vadd.f32 %v3118_v47, %v2999_v52  ;;  %v3211_v16 = vadd.f32 %v3210_v43, %v3209_v59 }
 0x38c   : > { %v3308_v39 = vadd.f32 %v3307_v6, %v3306_v21 }
 0x38d   : > { %v3254_v18 = vmul.f32 %v12689_v29, %v12689_v29  ;;  %v3214_v33 = vsel %vm1028_vm6, %v12689_v29, 0.0  ;;  %v3213_v7 = vadd.f32 %v3212_v31, %v3211_v16 }
 0x38e   : > { %v3310_v54 = vadd.f32 %v3309_v30, %v3308_v39 }
 0x38f   : > { %v3315_v4 = vsel %vm1028_vm6, %v3254_v18, 0.0  ;;  %v3215_v48 = vadd.f32 %v3214_v33, %v3213_v7  ;;  %v10593_v18 = vld [vmem:[%s10917_s11 + $0x98] sm:$0xff] }
 0x390   : > { %v2966_v24 = vpop.f32.mrf.mxu3  ;;  %v3312_v61 = vadd.f32 %v3311_v45, %v3310_v54  ;;  %4212 = vmatpush.bf16.msra.mxu2 %v10593_v18 }
 0x391   : > { %v3000_v22 = vadd.f32 %v2966_v24, %v2846_v10 }
 0x392   : > { %v3314_v34 = vadd.f32 %v3313_v55, %v3312_v61  ;;  %v10592_v55 = vld [vmem:[%s10917_s11 + $0x90] sm:$0xff]  ;;  %v3329_v61 = vld [vmem:[%s12713_s30] sm:$0x1] }
 0x393   : > { %v3154_v25 = vadd.f32 %v3120_v12, %v3000_v22 }
 0x394   : > { %v3316_v42 = vadd.f32 %v3315_v4, %v3314_v34  ;;  %4213 = vmatpush.bf16.msra.mxu2 %v10592_v55  ;;  %v10574_v34 = vld [vmem:[#allocation2] sm:$0xff] }
 0x395   : > { %v3216_v47 = vsel %vm1028_vm6, %v3154_v25, 0.0  ;;  %v3255_v3 = vmul.f32 %v3154_v25, %v3154_v25 }
 0x396   : > { %v3217_v58 = vadd.f32 %v3216_v47, %v3215_v48  ;;  %v3342_v48 = vld [vmem:[%s12719_s9] sm:$0x1] }
 0x397   : > { %v3317_v52 = vsel %vm1028_vm6, %v3255_v3, 0.0  ;;  %9959 = vmatmul.msk.bf16.vlgmr.msra.gmra.mxu2 %vm1028_vm6, %v10574_v34 }
 0x398   : > { %v3218_v11 = vrot.slane %v3217_v58, 4  ;;  %v3318_v41 = vadd.f32 %v3317_v52, %v3316_v42 }
 0x39a   : > { %v3219_v23 = vadd.f32 %v3218_v11, %v3217_v58  ;;  %v3319_v51 = vrot.slane %v3318_v41, 4  ;;  %v16737_v11 = vld [vmem:[#allocation20_spill] sm:$0xff] }
 0x39c   : > { %v3220_v6 = vrot.slane %v3219_v23, 2  ;;  %v3320_v5 = vadd.f32 %v3319_v51, %v3318_v41 }
 0x39e   : > { %v3221_v46 = vadd.f32 %v3220_v6, %v3219_v23  ;;  %v3321_v1 = vrot.slane %v3320_v5, 2  ;;  %v16738_v23 = vld [vmem:[#allocation21_spill] sm:$0xff] }
 0x39f   : > { %v16739_v6 = vld [vmem:[#allocation29_spill] sm:$0xff] }
 0x3a0   : > { %v3222_v21 = vrot.slane %v3221_v46, 1  ;;  %v3322_v28 = vadd.f32 %v3321_v1, %v3320_v5 }
 0x3a2   : > { %v3223_v30 = vadd.f32 %v3222_v21, %v3221_v46  ;;  %v3323_v43 = vrot.slane %v3322_v28, 1  ;;  %v16740_v46 = vld [vmem:[#allocation22_spill] sm:$0xff] }
 0x3a4   : > { %v3324_v8 = vadd.f32 %v3323_v43, %v3322_v28  ;;  %v3325_v39 = vmul.f32 0.00390625, %v3223_v30 }
 0x3a6   : > { %v3326_v59 = vmul.f32 0.00390625, %v3324_v8  ;;  %v3327_v10 = vmul.f32 %v3325_v39, %v3325_v39 }
 0x3a8   : > { %v3328_v45 = vsub.f32 %v3326_v59, %v3327_v10  ;;  %v10599_v59 = vld [vmem:[%s10917_s11 + $0xa8] sm:$0xff] }
 0x3a9   : > { %4998 = vmatpush.bf16.msrb.mxu0 %v10599_v59 }
 0x3aa   : > { %v3330_v31 = vadd.f32 1e-05, %v3328_v45 }
 0x3ac   : > { %10696 = vrsqrt.f32 %v3330_v31  ;;  %vm3337_vm1 = vweird.f32 %v3330_v31 }
 0x3b2   : > { %v10697_v54 = vpop.eup %10696 }
 0x3b3   : > { %v3332_v16 = vmul.f32 %v10697_v54, %v3330_v31  ;;  %vm3338_vm15 = vweird.f32 %v10697_v54 }
 0x3b4   : > { %vm3339_vm2 = vmor %vm3337_vm1, %vm3338_vm15 }
 0x3b5   : > { %v3333_v24 = vmul.f32 %v10697_v54, %v3332_v16 }
 0x3b7   : > { %v3334_v33 = vmul.f32 0.5, %v3333_v24 }
 0x3b9   : > { %v3335_v22 = vsub.f32 1.5, %v3334_v33 }
 0x3bb   : > { %v3336_v7 = vmul.f32 %v10697_v54, %v3335_v22 }
 0x3bd   : > { %v3340_v12 = vsel %vm3339_vm2, %v10697_v54, %v3336_v7 }
 0x3be   : > { %v3341_v4 = vmul.f32 %v3340_v12, %v3329_v61 }
 0x3c0   : > { %v3343_v47 = vmul.f32 %v3341_v4, %v3325_v39  ;;  %v3346_v3 = vperm.slane %v3341_v4, 0 }
 0x3c2   : > { %v3344_v42 = vsub.f32 %v3342_v48, %v3343_v47  ;;  %v3378_v58 = vmul.f32 %v3346_v3, %v12689_v29  ;;  %v3379_v52 = vmul.f32 %v3346_v3, %v3154_v25  ;;  %v3348_v41 = vmul.f32 %v3346_v3, %v16737_v11 }
 0x3c3   : > { %v3349_v51 = vmul.f32 %v3346_v3, %v16738_v23  ;;  %v3350_v5 = vmul.f32 %v3346_v3, %v16739_v6  ;;  %v3351_v1 = vmul.f32 %v3346_v3, %v16740_v46  ;;  %v3352_v28 = vmul.f32 %v3346_v3, %v12299_v19 }
 0x3c4   : > { %v12728_v21 = vperm.slane %v3344_v42, 0  ;;  %v3353_v30 = vmul.f32 %v3346_v3, %v12303_v57  ;;  %v3354_v43 = vmul.f32 %v3346_v3, %v12310_v53  ;;  %v3355_v8 = vmul.f32 %v3346_v3, %v12315_v9 }
 0x3c5   : > { %v3356_v29 = vmul.f32 %v3346_v3, %v12324_v26  ;;  %v3357_v25 = vmul.f32 %v3346_v3, %v12469_v2  ;;  %v3358_v39 = vmul.f32 %v3346_v3, %v12340_v17  ;;  %v3359_v31 = vmul.f32 %v3346_v3, %v12499_v20 }
 0x3c6   : > { %v3413_v10 = vadd.f32 %v12728_v21, %v3378_v58  ;;  %v3414_v45 = vadd.f32 %v12728_v21, %v3379_v52  ;;  %v3360_v19 = vmul.f32 %v3346_v3, %v12354_v49  ;;  %v3361_v57 = vmul.f32 %v3346_v3, %v12521_v40 }
 0x3c7   : > { %v3362_v53 = vmul.f32 %v3346_v3, %v12362_v27  ;;  %v3363_v9 = vmul.f32 %v3346_v3, %v12545_v56  ;;  %v3364_v26 = vmul.f32 %v3346_v3, %v16718_v36  ;;  %v3365_v18 = vmul.f32 %v3346_v3, %v12560_v62 }
 0x3c8   : > { %v3445_v2 = vmax.f32 %v3413_v10, 0.0  ;;  %v3446_v17 = vmax.f32 %v3414_v45, 0.0  ;;  %v3366_v54 = vmul.f32 %v3346_v3, %v16724_v60  ;;  %v3367_v16 = vmul.f32 %v3346_v3, %v12590_v63  ;;  %v10597_v10 = vld [vmem:[%s10917_s11 + $0xf8] sm:$0xff] }
 0x3c9   : > { %v3368_v20 = vmul.f32 %v3346_v3, %v16729_v35  ;;  %v3369_v49 = vmul.f32 %v3346_v3, %v12608_v50  ;;  %v3370_v40 = vmul.f32 %v3346_v3, %v12614_v14  ;;  %v3371_v56 = vmul.f32 %v3346_v3, %v12630_v38  ;;  %4326 = vmatpush.bf16.msrb.mxu3 %v10597_v10 }
 0x3ca   : > { %v3477_v27 = vpack.c.bf16 %v3445_v2, %v3445_v2  ;;  %v3478_v24 = vpack.c.bf16 %v3446_v17, %v3446_v17  ;;  %v3372_v36 = vmul.f32 %v3346_v3, %v12639_v44  ;;  %v3373_v55 = vmul.f32 %v3346_v3, %v12643_v0  ;;  %v3904_v2 = vld [vmem:[#allocation2 + $0xc0] sm:$0xf] }
 0x3cb   : > { %v3374_v62 = vmul.f32 %v3346_v3, %v12658_v32  ;;  %v3375_v60 = vmul.f32 %v3346_v3, %v12666_v37  ;;  %v3376_v63 = vmul.f32 %v3346_v3, %v12674_v15  ;;  %v3377_v50 = vmul.f32 %v3346_v3, %v12681_v13  ;;  %v3908_v13 = vld [vmem:[#allocation2 + $0xc8] sm:$0x1]  ;;  %v10598_v17 = vld [vmem:[%s10917_s11 + $0xa0] sm:$0xff] }
 0x3cc   : > { %v3735_v33 = vshrl.u32 %v3477_v27, 16  ;;  %v3743_v35 = vshrl.u32 %v3478_v24, 16  ;;  %v3746_v22 = vshll.u32 %v3478_v24, 16  ;;  %v12760_v14 = vadd.f32 %v12728_v21, %v3348_v41  ;;  %4999 = vmatpush.bf16.msrb.mxu0 %v10598_v17 }
 0x3cd   : > { %v12763_v38 = vadd.f32 %v12728_v21, %v3349_v51  ;;  %v12766_v44 = vadd.f32 %v12728_v21, %v3350_v5  ;;  %v12769_v0 = vadd.f32 %v12728_v21, %v3351_v1  ;;  %v12772_v15 = vadd.f32 %v12728_v21, %v3352_v28 }
 0x3ce   : > { %v3737_v32 = vrot.slane %v3735_v33, 7  ;;  %v3745_v37 = vrot.slane %v3743_v35, 7  ;;  %v12775_v61 = vadd.f32 %v12728_v21, %v3353_v30  ;;  %v12778_v7 = vadd.f32 %v12728_v21, %v3354_v43 }
 0x3cf   : > { %v12781_v12 = vadd.f32 %v12728_v21, %v3355_v8  ;;  %v12784_v4 = vadd.f32 %v12728_v21, %v3356_v29  ;;  %v12787_v34 = vadd.f32 %v12728_v21, %v3357_v25  ;;  %v12790_v42 = vadd.f32 %v12728_v21, %v3358_v39 }
 0x3d0   : > { %v3741_v48 = vrot.slane %v3737_v32, 4  ;;  %v3748_v47 = vor.u32 %v3746_v22, %v3745_v37  ;;  %v3750_v3 = vrot.slane %v3745_v37, 4  ;;  %v12793_v58 = vadd.f32 %v12728_v21, %v3359_v31 }
 0x3d1   : > { %v12796_v52 = vadd.f32 %v12728_v21, %v3360_v19  ;;  %v12799_v11 = vadd.f32 %v12728_v21, %v3361_v57  ;;  %v12802_v41 = vadd.f32 %v12728_v21, %v3362_v53  ;;  %v12809_v46 = vadd.f32 %v12728_v21, %v3363_v9 }
 0x3d2   : > { %v3749_v51 = vsel %vm10952_vm4, %v3741_v48, %v3748_v47  ;;  %v3909_v5 = vsel %vm11079_vm8, %v3750_v3, %v3908_v13  ;;  %v12812_v1 = vadd.f32 %v12728_v21, %v3364_v26  ;;  %v12816_v28 = vadd.f32 %v12728_v21, %v3365_v18 }
 0x3d3   : > { %3907 = vst.msk [vmem:[#allocation2 + $0xc4] sm:$0xf] %vm363_vm0, %v3749_v51  ;;  %v12819_v30 = vadd.f32 %v12728_v21, %v3366_v54  ;;  %v12822_v43 = vadd.f32 %v12728_v21, %v3367_v16  ;;  %v12825_v8 = vadd.f32 %v12728_v21, %v3368_v20  ;;  %v12828_v29 = vadd.f32 %v12728_v21, %v3369_v49 }
 0x3d4   : > { %3910 = vst [vmem:[#allocation2 + $0xc8] sm:$0x1] %v3909_v5  ;;  %v12831_v25 = vadd.f32 %v12728_v21, %v3370_v40  ;;  %v12834_v39 = vadd.f32 %v12728_v21, %v3371_v56  ;;  %v12837_v59 = vadd.f32 %v12728_v21, %v3372_v36  ;;  %v12841_v45 = vadd.f32 %v12728_v21, %v3373_v55 }
 0x3d5   : > { %v12844_v31 = vadd.f32 %v12728_v21, %v3374_v62  ;;  %v12847_v19 = vadd.f32 %v12728_v21, %v3375_v60  ;;  %v12850_v57 = vadd.f32 %v12728_v21, %v3376_v63  ;;  %v12853_v53 = vadd.f32 %v12728_v21, %v3377_v50 }
 0x3d6   : > { %v3738_v9 = vshll.u32 %v3477_v27, 16  ;;  %v3415_v16 = vmax.f32 %v12760_v14, 0.0  ;;  %v3416_v20 = vmax.f32 %v12763_v38, 0.0  ;;  %v3417_v49 = vmax.f32 %v12766_v44, 0.0 }
 0x3d7   : > { %v3418_v40 = vmax.f32 %v12769_v0, 0.0  ;;  %v3419_v21 = vmax.f32 %v12772_v15, 0.0  ;;  %v3420_v27 = vmax.f32 %v12775_v61, 0.0  ;;  %v3421_v24 = vmax.f32 %v12778_v7, 0.0 }
 0x3d8   : > { %v3740_v26 = vor.u32 %v3738_v9, %v3737_v32  ;;  %v3422_v56 = vmax.f32 %v12781_v12, 0.0  ;;  %v3423_v36 = vmax.f32 %v12784_v4, 0.0  ;;  %v3424_v55 = vmax.f32 %v12787_v34, 0.0 }
 0x3d9   : > { %v3425_v62 = vmax.f32 %v12790_v42, 0.0  ;;  %v3426_v60 = vmax.f32 %v12793_v58, 0.0  ;;  %v3427_v63 = vmax.f32 %v12796_v52, 0.0  ;;  %v3428_v33 = vmax.f32 %v12799_v11, 0.0 }
 0x3da   : > { %v3905_v54 = vsel %vm10962_vm5, %v3740_v26, %v3904_v2  ;;  %v3429_v35 = vmax.f32 %v12802_v41, 0.0  ;;  %v3430_v22 = vmax.f32 %v12809_v46, 0.0  ;;  %v3431_v50 = vmax.f32 %v12812_v1, 0.0 }
 0x3db   : > { %3906 = vst [vmem:[#allocation2 + $0xc0] sm:$0xf] %v3905_v54  ;;  %v3432_v14 = vmax.f32 %v12816_v28, 0.0  ;;  %v3433_v38 = vmax.f32 %v12819_v30, 0.0  ;;  %v3434_v44 = vmax.f32 %v12822_v43, 0.0  ;;  %v3435_v0 = vmax.f32 %v12825_v8, 0.0 }
 0x3dc   : > { %v3436_v32 = vmax.f32 %v12828_v29, 0.0  ;;  %v3437_v37 = vmax.f32 %v12831_v25, 0.0  ;;  %v3438_v15 = vmax.f32 %v12834_v39, 0.0  ;;  %v3439_v61 = vmax.f32 %v12837_v59, 0.0 }
 0x3dd   : > { %v3440_v13 = vmax.f32 %v12841_v45, 0.0  ;;  %v3441_v7 = vmax.f32 %v12844_v31, 0.0  ;;  %v3442_v12 = vmax.f32 %v12847_v19, 0.0  ;;  %v3443_v4 = vmax.f32 %v12850_v57, 0.0 }
 0x3de   : > { %v3444_v34 = vmax.f32 %v12853_v53, 0.0  ;;  %v12888_v48 = vpack.c.bf16 %v3415_v16, %v3415_v16  ;;  %v12890_v47 = vpack.c.bf16 %v3416_v20, %v3416_v20  ;;  %v12892_v3 = vpack.c.bf16 %v3417_v49, %v3417_v49 }
 0x3df   : > { %v12894_v42 = vpack.c.bf16 %v3418_v40, %v3418_v40  ;;  %v12896_v58 = vpack.c.bf16 %v3419_v21, %v3419_v21  ;;  %v12898_v52 = vpack.c.bf16 %v3420_v27, %v3420_v27  ;;  %v12900_v11 = vpack.c.bf16 %v3421_v24, %v3421_v24 }
 0x3e0   : > { %v12902_v41 = vpack.c.bf16 %v3422_v56, %v3422_v56  ;;  %v12904_v51 = vpack.c.bf16 %v3423_v36, %v3423_v36  ;;  %v12906_v5 = vpack.c.bf16 %v3424_v55, %v3424_v55  ;;  %v12908_v46 = vpack.c.bf16 %v3425_v62, %v3425_v62 }
 0x3e1   : > { %v12910_v1 = vpack.c.bf16 %v3426_v60, %v3426_v60  ;;  %v12912_v28 = vpack.c.bf16 %v3427_v63, %v3427_v63  ;;  %v12914_v30 = vpack.c.bf16 %v3428_v33, %v3428_v33  ;;  %v12916_v43 = vpack.c.bf16 %v3429_v35, %v3429_v35 }
 0x3e2   : > { %16744 = vst [vmem:[#allocation12_spill] sm:$0xff] %v12904_v51  ;;  %v12918_v8 = vpack.c.bf16 %v3430_v22, %v3430_v22  ;;  %v12920_v29 = vpack.c.bf16 %v3431_v50, %v3431_v50  ;;  %v12922_v25 = vpack.c.bf16 %v3432_v14, %v3432_v14  ;;  %v12924_v39 = vpack.c.bf16 %v3433_v38, %v3433_v38 }
 0x3e3   : > { %16745 = vst [vmem:[#allocation7_spill] sm:$0xff] %v12912_v28  ;;  %v12926_v59 = vpack.c.bf16 %v3434_v44, %v3434_v44  ;;  %v12928_v10 = vpack.c.bf16 %v3435_v0, %v3435_v0  ;;  %v12930_v45 = vpack.c.bf16 %v3436_v32, %v3436_v32  ;;  %v12932_v31 = vpack.c.bf16 %v3437_v37, %v3437_v37 }
 0x3e4   : > { %16746 = vst [vmem:[#allocation28_spill] sm:$0xff] %v12916_v43  ;;  %v12934_v19 = vpack.c.bf16 %v3438_v15, %v3438_v15  ;;  %v12936_v57 = vpack.c.bf16 %v3439_v61, %v3439_v61  ;;  %v12938_v53 = vpack.c.bf16 %v3440_v13, %v3440_v13  ;;  %v12940_v9 = vpack.c.bf16 %v3441_v7, %v3441_v7 }
 0x3e5   : > { %16747 = vst [vmem:[#allocation32_spill] sm:$0xff] %v12920_v29  ;;  %v12942_v26 = vpack.c.bf16 %v3442_v12, %v3442_v12  ;;  %v12944_v2 = vpack.c.bf16 %v3443_v4, %v3443_v4  ;;  %v12946_v17 = vpack.c.bf16 %v3444_v34, %v3444_v34  ;;  %v3480_v54 = vshrl.u32 %v12888_v48, 16 }
 0x3e6   : > { %16748 = vst [vmem:[#allocation15_spill] sm:$0xff] %v12924_v39  ;;  %v3488_v20 = vshrl.u32 %v12890_v47, 16  ;;  %v3497_v40 = vshrl.u32 %v12892_v3, 16  ;;  %v3505_v27 = vshrl.u32 %v12894_v42, 16  ;;  %v3514_v56 = vshrl.u32 %v12896_v58, 16 }
 0x3e7   : > { %16749 = vst [vmem:[#allocation34_spill] sm:$0xff] %v12928_v10  ;;  %v3522_v55 = vshrl.u32 %v12898_v52, 16  ;;  %v3531_v60 = vshrl.u32 %v12900_v11, 16  ;;  %v3539_v33 = vshrl.u32 %v12902_v41, 16  ;;  %v3548_v22 = vshrl.u32 %v12904_v51, 16 }
 0x3e8   : > { %16750 = vst [vmem:[#allocation17_spill] sm:$0xff] %v12932_v31  ;;  %v3556_v14 = vshrl.u32 %v12906_v5, 16  ;;  %v3565_v44 = vshrl.u32 %v12908_v46, 16  ;;  %v3573_v0 = vshrl.u32 %v12910_v1, 16  ;;  %v3582_v37 = vshrl.u32 %v12912_v28, 16 }
 0x3e9   : > { %16751 = vst [vmem:[#allocation38_spill] sm:$0xff] %v12936_v57  ;;  %v3590_v15 = vshrl.u32 %v12914_v30, 16  ;;  %v3599_v13 = vshrl.u32 %v12916_v43, 16  ;;  %v3607_v7 = vshrl.u32 %v12918_v8, 16  ;;  %v3616_v4 = vshrl.u32 %v12920_v29, 16 }
 0x3ea   : > { %16752 = vst [vmem:[#allocation23_spill] sm:$0xff] %v12940_v9  ;;  %v3624_v34 = vshrl.u32 %v12922_v25, 16  ;;  %v3633_v63 = vshrl.u32 %v12924_v39, 16  ;;  %v3641_v32 = vshrl.u32 %v12926_v59, 16  ;;  %v3650_v61 = vshrl.u32 %v12928_v10, 16 }
 0x3eb   : > { %16753 = vst [vmem:[#allocation16_spill] sm:$0xff] %v12944_v2  ;;  %v3658_v35 = vshrl.u32 %v12930_v45, 16  ;;  %v3667_v12 = vshrl.u32 %v12932_v31, 16  ;;  %v3675_v36 = vshrl.u32 %v12934_v19, 16  ;;  %v3684_v50 = vshrl.u32 %v12936_v57, 16 }
 0x3ec   : > { %v3692_v21 = vshrl.u32 %v12938_v53, 16  ;;  %v3701_v38 = vshrl.u32 %v12940_v9, 16  ;;  %v3709_v16 = vshrl.u32 %v12942_v26, 16  ;;  %v3718_v62 = vshrl.u32 %v12944_v2, 16  ;;  %v10596_v9 = vld [vmem:[%s10917_s11 + $0xf0] sm:$0xff] }
 0x3ed   : > { %v3726_v31 = vshrl.u32 %v12946_v17, 16  ;;  %v12998_v29 = vrot.slane %v3480_v54, 7  ;;  %v13000_v24 = vrot.slane %v3488_v20, 7  ;;  %v13002_v57 = vrot.slane %v3497_v40, 7  ;;  %4327 = vmatpush.bf16.msrb.mxu3 %v10596_v9 }
 0x3ee   : > { %v13004_v43 = vrot.slane %v3505_v27, 7  ;;  %v13006_v49 = vrot.slane %v3514_v56, 7  ;;  %v13009_v28 = vrot.slane %v3522_v55, 7  ;;  %v13011_v10 = vrot.slane %v3531_v60, 7 }
 0x3ef   : > { %v13013_v2 = vrot.slane %v3539_v33, 7  ;;  %v13015_v51 = vrot.slane %v3548_v22, 7  ;;  %v13017_v39 = vrot.slane %v3556_v14, 7  ;;  %v13019_v54 = vrot.slane %v3565_v44, 7 }
 0x3f0   : > { %16754 = vst [vmem:[#allocation24_spill] sm:$0xff] %v13009_v28  ;;  %v13021_v20 = vrot.slane %v3573_v0, 7  ;;  %v13023_v40 = vrot.slane %v3582_v37, 7  ;;  %v13025_v27 = vrot.slane %v3590_v15, 7  ;;  %v13027_v56 = vrot.slane %v3599_v13, 7 }
 0x3f1   : > { %16755 = vst [vmem:[#allocation30_spill] sm:$0xff] %v13015_v51  ;;  %v13029_v55 = vrot.slane %v3607_v7, 7  ;;  %v13031_v60 = vrot.slane %v3616_v4, 7  ;;  %v13033_v33 = vrot.slane %v3624_v34, 7  ;;  %v13035_v22 = vrot.slane %v3633_v63, 7 }
 0x3f2   : > { %16756 = vst [vmem:[#allocation36_spill] sm:$0xff] %v13019_v54  ;;  %v13037_v14 = vrot.slane %v3641_v32, 7  ;;  %v13039_v44 = vrot.slane %v3650_v61, 7  ;;  %v13041_v0 = vrot.slane %v3658_v35, 7  ;;  %v13043_v37 = vrot.slane %v3667_v12, 7 }
 0x3f3   : > { %16757 = vst [vmem:[#allocation33_spill] sm:$0xff] %v13023_v40  ;;  %v13045_v9 = vrot.slane %v3675_v36, 7  ;;  %v13047_v15 = vrot.slane %v3684_v50, 7  ;;  %v13049_v13 = vrot.slane %v3692_v21, 7  ;;  %v13051_v7 = vrot.slane %v3701_v38, 7 }
 0x3f4   : > { %16758 = vst [vmem:[#allocation25_spill] sm:$0xff] %v13027_v56  ;;  %v13053_v4 = vrot.slane %v3709_v16, 7  ;;  %v13055_v63 = vrot.slane %v3718_v62, 7  ;;  %v13057_v32 = vrot.slane %v3726_v31, 7  ;;  %v16771_v35 = vshll.u32 %v12888_v48, 16 }
 0x3f5   : > { %16759 = vst [vmem:[#allocation27_spill] sm:$0xff] %v13029_v55  ;;  %v3486_v36 = vrot.slane %v12998_v29, 4  ;;  %v16772_v50 = vshll.u32 %v12890_v47, 16  ;;  %v16773_v16 = vshll.u32 %v12892_v3, 16  ;;  %v3503_v31 = vrot.slane %v13002_v57, 4 }
 0x3f6   : > { %16760 = vst [vmem:[#allocation37_spill] sm:$0xff] %v13031_v60  ;;  %v13062_v61 = vor.u32 %v16771_v35, %v12998_v29  ;;  %v16774_v48 = vshll.u32 %v12894_v42, 16  ;;  %v16775_v29 = vshll.u32 %v12896_v58, 16  ;;  %v3520_v35 = vrot.slane %v13006_v49, 4 }
 0x3f7   : > { %16761 = vst [vmem:[#allocation14_spill] sm:$0xff] %v13033_v33  ;;  %v3493_v21 = vor.u32 %v16772_v50, %v13000_v24  ;;  %v13072_v62 = vor.u32 %v16773_v16, %v13002_v57  ;;  %v16776_v3 = vshll.u32 %v12898_v52, 16  ;;  %v3537_v57 = vrot.slane %v13011_v10, 4 }
 0x3f8   : > { %16762 = vst [vmem:[#allocation9_spill] sm:$0xff] %v13035_v22  ;;  %v3510_v12 = vor.u32 %v16774_v48, %v13004_v43  ;;  %v13082_v47 = vor.u32 %v16775_v29, %v13006_v49  ;;  %v16777_v42 = vshll.u32 %v12902_v41, 16  ;;  %v3554_v34 = vrot.slane %v13015_v51, 4 }
 0x3f9   : > { %16763 = vst [vmem:[#allocation6_spill] sm:$0xff] %v13037_v14  ;;  %v3527_v50 = vor.u32 %v16776_v3, %v13009_v28  ;;  %v16778_v58 = vshll.u32 %v12906_v5, 16  ;;  %v3571_v49 = vrot.slane %v13019_v54, 4  ;;  %v16779_v52 = vshll.u32 %v12910_v1, 16 }
 0x3fa   : > { %16764 = vst [vmem:[#allocation10_spill] sm:$0xff] %v13039_v44  ;;  %v3544_v48 = vor.u32 %v16777_v42, %v13013_v2  ;;  %v3588_v16 = vrot.slane %v13023_v40, 4  ;;  %v16780_v38 = vshll.u32 %v12914_v30, 16  ;;  %v3605_v41 = vrot.slane %v13027_v56, 4  ;;  %v4442_v56 = vld [vmem:[#allocation2 + $0x4] sm:$0xf] }
 0x3fb   : > { %16765 = vst [vmem:[#allocation18_spill] sm:$0xff] %v13041_v0  ;;  %v3561_v29 = vor.u32 %v16778_v58, %v13017_v39  ;;  %v3578_v3 = vor.u32 %v16779_v52, %v13021_v20  ;;  %v16781_v42 = vshll.u32 %v12918_v8, 16  ;;  %v3622_v5 = vrot.slane %v13031_v60, 4 }
 0x3fc   : > { %16766 = vst [vmem:[#allocation31_spill] sm:$0xff] %v13043_v37  ;;  %v3595_v28 = vor.u32 %v16780_v38, %v13025_v27  ;;  %v16782_v58 = vshll.u32 %v12922_v25, 16  ;;  %v3639_v1 = vrot.slane %v13035_v22, 4  ;;  %v16783_v52 = vshll.u32 %v12926_v59, 16  ;;  %v4441_v38 = vld [vmem:[#allocation2] sm:$0xf] }
 0x3fd   : > { %16767 = vst [vmem:[#allocation35_spill] sm:$0xff] %v13045_v9  ;;  %v3612_v51 = vor.u32 %v16781_v42, %v13029_v55  ;;  %v3656_v30 = vrot.slane %v13039_v44, 4  ;;  %v16784_v8 = vshll.u32 %v12930_v45, 16  ;;  %v3673_v60 = vrot.slane %v13043_v37, 4 }
 0x3fe   : > { %16768 = vst [vmem:[#allocation13_spill] sm:$0xff] %v13047_v15  ;;  %v3629_v54 = vor.u32 %v16782_v58, %v13033_v33  ;;  %v3646_v40 = vor.u32 %v16783_v52, %v13037_v14  ;;  %v16785_v25 = vshll.u32 %v12934_v19, 16  ;;  %v3690_v22 = vrot.slane %v13047_v15, 4  ;;  %v4443_v33 = vld [vmem:[#allocation2 + $0x8] sm:$0x1] }
 0x3ff   : > { %16769 = vst [vmem:[#allocation19_spill] sm:$0xff] %v13051_v7  ;;  %v3663_v42 = vor.u32 %v16784_v8, %v13041_v0  ;;  %v16786_v59 = vshll.u32 %v12938_v53, 16  ;;  %v3707_v44 = vrot.slane %v13051_v7, 4  ;;  %v16787_v14 = vshll.u32 %v12942_v26, 16 }
 0x400   : > { %16770 = vst [vmem:[#allocation26_spill] sm:$0xff] %v13055_v63  ;;  %v3680_v58 = vor.u32 %v16785_v25, %v13045_v9  ;;  %v3724_v8 = vrot.slane %v13055_v63, 4  ;;  %v16788_v37 = vshll.u32 %v12946_v17, 16  ;;  %v4496_v25 = vshrl.u32 %v4441_v38, 16 }
 0x401   : > { %v3697_v52 = vor.u32 %v16786_v59, %v13049_v13  ;;  %v3714_v45 = vor.u32 %v16787_v14, %v13053_v4  ;;  %v4499_v9 = vshll.u32 %v4441_v38, 16  ;;  %v4505_v15 = vshll.u32 %v4442_v56, 16 }
 0x402   : > { %v3731_v19 = vor.u32 %v16788_v37, %v13057_v32  ;;  %v4509_v0 = vshrl.u32 %v4442_v56, 16  ;;  %v4515_v55 = vshll.u32 %v4443_v33, 16  ;;  %v3494_v53 = vsel %vm10952_vm4, %v3486_v36, %v3493_v21  ;;  %v3799_v36 = vld [vmem:[#allocation2 + $0xc] sm:$0xf]  ;;  %v3803_v21 = vld [vmem:[#allocation2 + $0x14] sm:$0x1] }
 0x403   : > { %v3511_v59 = vsel %vm10952_vm4, %v3503_v31, %v3510_v12  ;;  %v4498_v7 = vrot.slane %v4496_v25, 4  ;;  %v4501_v26 = vrot.slane %v4499_v9, 5  ;;  %v4507_v14 = vrot.slane %v4505_v15, 5  ;;  %3802 = vst.msk [vmem:[#allocation2 + $0x10] sm:$0xf] %vm363_vm0, %v3494_v53 }
 0x404   : > { %v3528_v63 = vsel %vm10952_vm4, %v3520_v35, %v3527_v50  ;;  %v4511_v17 = vrot.slane %v4509_v0, 4  ;;  %v4517_v37 = vrot.slane %v4515_v55, 5  ;;  %v3545_v56 = vsel %vm10952_vm4, %v3537_v57, %v3544_v48  ;;  %3809 = vst.msk [vmem:[#allocation2 + $0x1c] sm:$0xf] %vm363_vm0, %v3511_v59  ;;  %v3806_v0 = vld [vmem:[#allocation2 + $0x18] sm:$0xf] }
 0x405   : > { %v3562_v33 = vsel %vm10952_vm4, %v3554_v34, %v3561_v29  ;;  %v4502_v31 = vor.u32 %v4501_v26, %v4498_v7  ;;  %v3579_v9 = vsel %vm10952_vm4, %v3571_v49, %v3578_v3  ;;  %v13153_v15 = vsel %vm10952_vm4, %v3588_v16, %v3595_v28  ;;  %3816 = vst.msk [vmem:[#allocation2 + $0x28] sm:$0xf] %vm363_vm0, %v3528_v63  ;;  %v3810_v12 = vld [vmem:[#allocation2 + $0x20] sm:$0x1]  ;;  %v3817_v16 = vld [vmem:[#allocation2 + $0x2c] sm:$0x1] }
 0x406   : > { %v13157_v55 = vsel %vm10952_vm4, %v3605_v41, %v3612_v51  ;;  %v4512_v34 = vor.u32 %v4511_v17, %v4507_v14  ;;  %v13162_v35 = vsel %vm10952_vm4, %v3622_v5, %v3629_v54  ;;  %v13166_v7 = vsel %vm10952_vm4, %v3639_v1, %v3646_v40  ;;  %3823 = vst.msk [vmem:[#allocation2 + $0x34] sm:$0xf] %vm363_vm0, %v3545_v56  ;;  %v3813_v51 = vld [vmem:[#allocation2 + $0x24] sm:$0xf]  ;;  %v3820_v1 = vld [vmem:[#allocation2 + $0x30] sm:$0xf] }
 0x407   : > { %v13170_v28 = vsel %vm10952_vm4, %v3656_v30, %v3663_v42  ;;  %v4503_v50 = vrot.slane %v4502_v31, 4  ;;  %v13175_v63 = vsel %vm10952_vm4, %v3673_v60, %v3680_v58  ;;  %v13179_v54 = vsel %vm10952_vm4, %v3690_v22, %v3697_v52  ;;  %3830 = vst.msk [vmem:[#allocation2 + $0x40] sm:$0xf] %vm363_vm0, %v3562_v33  ;;  %v3824_v42 = vld [vmem:[#allocation2 + $0x38] sm:$0x1]  ;;  %v16794_v58 = vld [vmem:[#allocation12_spill] sm:$0xff] }
 0x408   : > { %v13183_v40 = vsel %vm10952_vm4, %v3707_v44, %v3714_v45  ;;  %v4513_v57 = vrot.slane %v4512_v34, 4  ;;  %v13188_v48 = vsel %vm10952_vm4, %v3724_v8, %v3731_v19  ;;  %v3800_v60 = vsel %vm10962_vm5, %v13062_v61, %v3799_v36  ;;  %3837 = vst.msk [vmem:[#allocation2 + $0x4c] sm:$0xf] %vm363_vm0, %v3579_v9  ;;  %v16796_v19 = vld [vmem:[#allocation24_spill] sm:$0xff]  ;;  %v3827_v53 = vld [vmem:[#allocation2 + $0x3c] sm:$0xf] }
 0x409   : > { %v16789_v29 = vrot.slane %v13000_v24, 4  ;;  %v16790_v44 = vshll.u32 %v12900_v11, 16  ;;  %v4508_v41 = vsel %vm11371_vm11, %v4503_v50, %v4507_v14  ;;  %v3807_v5 = vsel %vm10962_vm5, %v13072_v62, %v3806_v0  ;;  %3801 = vst [vmem:[#allocation2 + $0xc] sm:$0xf] %v3800_v60  ;;  %v16798_v26 = vld [vmem:[#allocation7_spill] sm:$0xff]  ;;  %v16799_v17 = vld [vmem:[#allocation36_spill] sm:$0xff] }
 0x40a   : > { %v16792_v61 = vrot.slane %v13004_v43, 4  ;;  %v3546_v30 = vrot.slane %v13013_v2, 4  ;;  %v4518_v11 = vsel %vm11371_vm11, %v4513_v57, %v4517_v37  ;;  %v3814_v38 = vsel %vm10962_vm5, %v13082_v47, %v3813_v51  ;;  %v16793_v43 = vld [vmem:[#allocation30_spill] sm:$0xff]  ;;  %3808 = vst [vmem:[#allocation2 + $0x18] sm:$0xf] %v3807_v5  ;;  %v16800_v36 = vld [vmem:[#allocation28_spill] sm:$0xff] }
 0x40b   : > { %v3804_v22 = vsel %vm11079_vm8, %v16789_v29, %v3803_v21  ;;  %v3536_v49 = vor.u32 %v16790_v44, %v13011_v10  ;;  %v4884_v10 = vunpack.c.l.b16 %v4508_v41  ;;  %v3568_v62 = vshll.u32 %v12908_v46, 16  ;;  %v3831_v47 = vld [vmem:[#allocation2 + $0x44] sm:$0x1]  ;;  %3815 = vst [vmem:[#allocation2 + $0x24] sm:$0xf] %v3814_v38  ;;  %v16802_v51 = vld [vmem:[#allocation33_spill] sm:$0xff] }
 0x40c   : > { %v3811_v24 = vsel %vm11079_vm8, %v16792_v61, %v3810_v12  ;;  %3805 = vst [vmem:[#allocation2 + $0x14] sm:$0x1] %v3804_v22  ;;  %v16795_v52 = vshll.u32 %v16794_v58, 16  ;;  %v4885_v8 = vunpack.c.l.b16 %v4518_v11  ;;  %v16797_v25 = vrot.slane %v16796_v19, 4  ;;  %v3834_v33 = vld [vmem:[#allocation2 + $0x48] sm:$0xf] }
 0x40d   : > { %v3563_v59 = vrot.slane %v13017_v39, 4  ;;  %3812 = vst [vmem:[#allocation2 + $0x20] sm:$0x1] %v3811_v24  ;;  %v3585_v14 = vshll.u32 %v16798_v26, 16  ;;  %v3570_v46 = vor.u32 %v3568_v62, %v16799_v17  ;;  %v3821_v56 = vsel %vm10962_vm5, %v3536_v49, %v3820_v1  ;;  %v3838_v9 = vld [vmem:[#allocation2 + $0x50] sm:$0x1] }
 0x40e   : > { %v3553_v45 = vor.u32 %v16795_v52, %v16793_v43  ;;  %v3818_v2 = vsel %vm11079_vm8, %v16797_v25, %v3817_v16  ;;  %v4916_v37 = vpack.c.b16 %v4885_v8, %v4884_v10  ;;  %v3602_v21 = vshll.u32 %v16800_v36, 16  ;;  %v3841_v0 = vld [vmem:[#allocation2 + $0x54] sm:$0xf]  ;;  %v16801_v12 = vld [vmem:[#allocation32_spill] sm:$0xff]  ;;  %v3845_v60 = vld [vmem:[#allocation2 + $0x5c] sm:$0x1] }
 0x40f   : > { %v3580_v31 = vrot.slane %v13021_v20, 4  ;;  %v3825_v39 = vsel %vm11079_vm8, %v3546_v30, %v3824_v42  ;;  %3819 = vst [vmem:[#allocation2 + $0x2c] sm:$0x1] %v3818_v2  ;;  %v3619_v34 = vshll.u32 %v16801_v12, 16  ;;  %v3587_v50 = vor.u32 %v3585_v14, %v16802_v51  ;;  %v10601_v22 = vld [vmem:[%s10917_s11 + $0xd8] sm:$0xff]  ;;  %v16803_v41 = vld [vmem:[#allocation25_spill] sm:$0xff] }
 0x410   : > { %v3597_v16 = vrot.slane %v13025_v27, 4  ;;  %10019 = vmatmul.msk.bf16.vlgmr.msrb.gmra.mxu0 %vm1028_vm6, %v4916_v37  ;;  %v3828_v57 = vsel %vm10962_vm5, %v3553_v45, %v3827_v53  ;;  %v3832_v20 = vsel %vm11079_vm8, %v3563_v59, %v3831_v47  ;;  %3822 = vst [vmem:[#allocation2 + $0x30] sm:$0xf] %v3821_v56  ;;  %v10575_v29 = vld [vmem:[#allocation2 + $0xc] sm:$0xff]  ;;  %v3848_v49 = vld [vmem:[#allocation2 + $0x60] sm:$0xf]  ;;  %v3604_v5 = vor.u32 %v3602_v21, %v16803_v41 }
 0x411   : > { %v4444_v44 = vld [vmem:[#allocation2 + $0xc] sm:$0xf]  ;;  %v3835_v61 = vsel %vm10962_vm5, %v3570_v46, %v3834_v33  ;;  %3826 = vst [vmem:[#allocation2 + $0x38] sm:$0x1] %v3825_v39  ;;  %v4445_v27 = vld [vmem:[#allocation2 + $0x10] sm:$0xf]  ;;  %v3839_v1 = vsel %vm11079_vm8, %v3580_v31, %v3838_v9  ;;  %9931 = vmatmul.msk.bf16.vlgmr.msra.gmra.mxu1 %vm1028_vm6, %v10575_v29  ;;  %9960 = vmatmul.msk.bf16.gmra.mxu2 %vm1028_vm6, %v10575_v29 }
 0x412   : > { %3829 = vst [vmem:[#allocation2 + $0x3c] sm:$0xf] %v3828_v57  ;;  %v13249_v30 = vld [vmem:[#allocation2 + $0x18] sm:$0xff]  ;;  %v4520_v11 = vshrl.u32 %v4444_v44, 16  ;;  %v4523_v10 = vshll.u32 %v4444_v44, 16  ;;  %v4529_v38 = vshll.u32 %v4445_v27, 16  ;;  %v3842_v45 = vsel %vm10962_vm5, %v3587_v50, %v3841_v0  ;;  %5166 = vmatpush.bf16.msrb.mxu1 %v10601_v22 }
 0x413   : > { %v4446_v24 = vld [vmem:[#allocation2 + $0x14] sm:$0x1]  ;;  %v3852_v42 = vld [vmem:[#allocation2 + $0x68] sm:$0x1]  ;;  %v16804_v62 = vld [vmem:[#allocation15_spill] sm:$0xff]  ;;  %v4533_v8 = vshrl.u32 %v4445_v27, 16  ;;  %9991 = vmatmul.msk.bf16.vlgmr.msrb.gmra.mxu3 %vm1028_vm6, %v13249_v30  ;;  %v3846_v46 = vsel %vm11079_vm8, %v3597_v16, %v3845_v60  ;;  %v3849_v9 = vsel %vm10962_vm5, %v3604_v5, %v3848_v49 }
 0x414   : > { %v3636_v43 = vshll.u32 %v16804_v62, 16  ;;  %v16805_v58 = vld [vmem:[#allocation34_spill] sm:$0xff]  ;;  %3833 = vst [vmem:[#allocation2 + $0x44] sm:$0x1] %v3832_v20  ;;  %v3855_v19 = vld [vmem:[#allocation2 + $0x6c] sm:$0xf] }
 0x415   : > { %v3653_v52 = vshll.u32 %v16805_v58, 16  ;;  %v16806_v25 = vld [vmem:[#allocation27_spill] sm:$0xff]  ;;  %3836 = vst [vmem:[#allocation2 + $0x48] sm:$0xf] %v3835_v61  ;;  %v4522_v53 = vrot.slane %v4520_v11, 4  ;;  %v4525_v59 = vrot.slane %v4523_v10, 5 }
 0x416   : > { %v3614_v2 = vrot.slane %v16806_v25, 4  ;;  %v4531_v47 = vrot.slane %v4529_v38, 5  ;;  %v3859_v26 = vld [vmem:[#allocation2 + $0x74] sm:$0x1]  ;;  %v16807_v14 = vld [vmem:[#allocation37_spill] sm:$0xff]  ;;  %v4535_v37 = vrot.slane %v4533_v8, 4 }
 0x417   : > { %v3621_v17 = vor.u32 %v3619_v34, %v16807_v14  ;;  %3840 = vst [vmem:[#allocation2 + $0x50] sm:$0x1] %v3839_v1  ;;  %v4539_v56 = vshll.u32 %v4446_v24, 16  ;;  %v4447_v33 = vld [vmem:[#allocation2 + $0x18] sm:$0xf]  ;;  %v16808_v36 = vld [vmem:[#allocation14_spill] sm:$0xff]  ;;  %v4526_v0 = vor.u32 %v4525_v59, %v4522_v53 }
 0x418   : > { %v3631_v21 = vrot.slane %v16808_v36, 4  ;;  %v16809_v31 = vld [vmem:[#allocation9_spill] sm:$0xff]  ;;  %3843 = vst [vmem:[#allocation2 + $0x54] sm:$0xf] %v3842_v45  ;;  %v4448_v12 = vld [vmem:[#allocation2 + $0x1c] sm:$0xf]  ;;  %v4536_v34 = vor.u32 %v4535_v37, %v4531_v47  ;;  %v3853_v20 = vsel %vm11079_vm8, %v3614_v2, %v3852_v42 }
 0x419   : > { %v3638_v39 = vor.u32 %v3636_v43, %v16809_v31  ;;  %3844 = vst.msk [vmem:[#allocation2 + $0x58] sm:$0xf] %vm363_vm0, %v13153_v15  ;;  %v4544_v51 = vshrl.u32 %v4447_v33, 16  ;;  %v4547_v50 = vshll.u32 %v4447_v33, 16  ;;  %v4553_v16 = vshll.u32 %v4448_v12, 16  ;;  %v16810_v57 = vld [vmem:[#allocation6_spill] sm:$0xff] }
 0x41a   : > { %v3648_v60 = vrot.slane %v16810_v57, 4  ;;  %3847 = vst [vmem:[#allocation2 + $0x5c] sm:$0x1] %v3846_v46  ;;  %v4527_v29 = vrot.slane %v4526_v0, 4  ;;  %v4557_v22 = vshrl.u32 %v4448_v12, 16  ;;  %v16811_v49 = vld [vmem:[#allocation10_spill] sm:$0xff]  ;;  %v3856_v5 = vsel %vm10962_vm5, %v3621_v17, %v3855_v19 }
 0x41b   : > { %v3862_v44 = vld [vmem:[#allocation2 + $0x78] sm:$0xf]  ;;  %v3655_v41 = vor.u32 %v3653_v52, %v16811_v49  ;;  %3850 = vst [vmem:[#allocation2 + $0x60] sm:$0xf] %v3849_v9  ;;  %v4537_v15 = vrot.slane %v4536_v34, 4  ;;  %v4541_v61 = vrot.slane %v4539_v56, 5  ;;  %v3860_v27 = vsel %vm11079_vm8, %v3631_v21, %v3859_v26 }
 0x41c   : > { %3851 = vst.msk [vmem:[#allocation2 + $0x64] sm:$0xf] %vm363_vm0, %v13157_v55  ;;  %v4532_v24 = vsel %vm11371_vm11, %v4527_v29, %v4531_v47  ;;  %v4546_v1 = vrot.slane %v4544_v51, 4  ;;  %v4549_v11 = vrot.slane %v4547_v50, 5  ;;  %v3866_v10 = vld [vmem:[#allocation2 + $0x80] sm:$0x1]  ;;  %v3863_v55 = vsel %vm10962_vm5, %v3638_v39, %v3862_v44 }
 0x41d   : > { %3854 = vst [vmem:[#allocation2 + $0x68] sm:$0x1] %v3853_v20  ;;  %v4542_v38 = vsel %vm11371_vm11, %v4537_v15, %v4541_v61  ;;  %v4886_v42 = vunpack.c.l.b16 %v4532_v24  ;;  %v13281_v62 = vrot.slane %v4553_v16, 5  ;;  %v4559_v43 = vrot.slane %v4557_v22, 4  ;;  %v3869_v58 = vld [vmem:[#allocation2 + $0x84] sm:$0xf] }
 0x41e   : > { %v16812_v52 = vld [vmem:[#allocation17_spill] sm:$0xff]  ;;  %3857 = vst [vmem:[#allocation2 + $0x6c] sm:$0xf] %v3856_v5  ;;  %v4887_v8 = vunpack.c.l.b16 %v4542_v38  ;;  %v16813_v25 = vld [vmem:[#allocation18_spill] sm:$0xff]  ;;  %v16814_v59 = vld [vmem:[#allocation31_spill] sm:$0xff]  ;;  %v3867_v26 = vsel %vm11079_vm8, %v3648_v60, %v3866_v10  ;;  %v3870_v33 = vsel %vm10962_vm5, %v3655_v41, %v3869_v58  ;;  %v4550_v36 = vor.u32 %v4549_v11, %v4546_v1 }
 0x41f   : > { %v3670_v45 = vshll.u32 %v16812_v52, 16  ;;  %v3873_v19 = vld [vmem:[#allocation2 + $0x8c] sm:$0x1]  ;;  %v3665_v2 = vrot.slane %v16813_v25, 4  ;;  %3858 = vst.msk [vmem:[#allocation2 + $0x70] sm:$0xf] %vm363_vm0, %v13162_v35  ;;  %v4560_v35 = vor.u32 %v4559_v43, %v13281_v62 }
 0x420   : > { %v3876_v53 = vld [vmem:[#allocation2 + $0x90] sm:$0xf]  ;;  %3861 = vst [vmem:[#allocation2 + $0x74] sm:$0x1] %v3860_v27  ;;  %v13292_v14 = vpack.c.b16 %v4887_v8, %v4886_v42  ;;  %v4449_v17 = vld [vmem:[#allocation2 + $0x20] sm:$0x1] }
 0x421   : > { %v3672_v47 = vor.u32 %v3670_v45, %v16814_v59  ;;  %v3880_v46 = vld [vmem:[#allocation2 + $0x98] sm:$0x1]  ;;  %v16815_v37 = vld [vmem:[#allocation38_spill] sm:$0xff]  ;;  %3864 = vst [vmem:[#allocation2 + $0x78] sm:$0xf] %v3863_v55  ;;  %v16817_v0 = vld [vmem:[#allocation13_spill] sm:$0xff]  ;;  %v3874_v34 = vsel %vm11079_vm8, %v3665_v2, %v3873_v19  ;;  %9932 = vmatmul.msk.bf16.gmra.mxu1 %vm1028_vm6, %v13249_v30  ;;  %9961 = vmatmul.msk.bf16.gmra.mxu2 %vm1028_vm6, %v13249_v30 }
 0x422   : > { %v3687_v56 = vshll.u32 %v16815_v37, 16  ;;  %v3883_v21 = vld [vmem:[#allocation2 + $0x9c] sm:$0xf]  ;;  %3865 = vst.msk [vmem:[#allocation2 + $0x7c] sm:$0xf] %vm363_vm0, %v13166_v7  ;;  %10020 = vmatmul.msk.bf16.gmra.mxu0 %vm1028_vm6, %v13292_v14  ;;  %v4563_v51 = vshll.u32 %v4449_v17, 16 }
 0x423   : > { %v16816_v31 = vld [vmem:[#allocation35_spill] sm:$0xff]  ;;  %v3887_v9 = vld [vmem:[#allocation2 + $0xa4] sm:$0x1]  ;;  %3868 = vst [vmem:[#allocation2 + $0x80] sm:$0x1] %v3867_v26  ;;  %v3699_v57 = vrot.slane %v13049_v13, 4  ;;  %v3877_v60 = vsel %vm10962_vm5, %v3672_v47, %v3876_v53 }
 0x424   : > { %v3682_v39 = vrot.slane %v16816_v31, 4  ;;  %v3689_v12 = vor.u32 %v3687_v56, %v16817_v0  ;;  %v16818_v50 = vld [vmem:[#allocation23_spill] sm:$0xff]  ;;  %3871 = vst [vmem:[#allocation2 + $0x84] sm:$0xf] %v3870_v33  ;;  %v10577_v7 = vld [vmem:[#allocation2 + $0x24] sm:$0xff]  ;;  %v4551_v20 = vrot.slane %v4550_v36, 4 }
 0x425   : > { %v3704_v16 = vshll.u32 %v16818_v50, 16  ;;  %3872 = vst.msk [vmem:[#allocation2 + $0x88] sm:$0xf] %vm363_vm0, %v13170_v28  ;;  %v4561_v29 = vrot.slane %v4560_v35, 4  ;;  %v4450_v22 = vld [vmem:[#allocation2 + $0x24] sm:$0xf]  ;;  %9992 = vmatmul.msk.bf16.gmra.mxu3 %vm1028_vm6, %v10577_v7  ;;  %v3888_v10 = vsel %vm11079_vm8, %v3699_v57, %v3887_v9 }
 0x426   : > { %v16819_v44 = vld [vmem:[#allocation16_spill] sm:$0xff]  ;;  %v16820_v13 = vld [vmem:[#allocation19_spill] sm:$0xff]  ;;  %v3881_v5 = vsel %vm11079_vm8, %v3682_v39, %v3880_v46  ;;  %3875 = vst [vmem:[#allocation2 + $0x8c] sm:$0x1] %v3874_v34  ;;  %v4451_v15 = vld [vmem:[#allocation2 + $0x28] sm:$0xf]  ;;  %v3884_v28 = vsel %vm10962_vm5, %v3689_v12, %v3883_v21 }
 0x427   : > { %v3721_v49 = vshll.u32 %v16819_v44, 16  ;;  %v3706_v41 = vor.u32 %v3704_v16, %v16820_v13  ;;  %v3890_v61 = vld [vmem:[#allocation2 + $0xa8] sm:$0xf]  ;;  %v3716_v30 = vrot.slane %v13053_v4, 4  ;;  %3878 = vst [vmem:[#allocation2 + $0x90] sm:$0xf] %v3877_v60  ;;  %v4556_v4 = vsel %vm11371_vm11, %v4551_v20, %v13281_v62 }
 0x428   : > { %v4565_v27 = vrot.slane %v4563_v51, 5  ;;  %v3894_v24 = vld [vmem:[#allocation2 + $0xb0] sm:$0x1]  ;;  %3879 = vst.msk [vmem:[#allocation2 + $0x94] sm:$0xf] %vm363_vm0, %v13175_v63  ;;  %v4568_v38 = vshrl.u32 %v4450_v22, 16  ;;  %v4888_v25 = vunpack.c.l.b16 %v4556_v4 }
 0x429   : > { %v16821_v1 = vld [vmem:[#allocation26_spill] sm:$0xff]  ;;  %v4571_v42 = vshll.u32 %v4450_v22, 16  ;;  %3882 = vst [vmem:[#allocation2 + $0x98] sm:$0x1] %v3881_v5  ;;  %v4577_v52 = vshll.u32 %v4451_v15, 16  ;;  %v4581_v45 = vshrl.u32 %v4451_v15, 16  ;;  %v3891_v55 = vsel %vm10962_vm5, %v3706_v41, %v3890_v61 }
 0x42a   : > { %v3723_v11 = vor.u32 %v3721_v49, %v16821_v1  ;;  %v3897_v43 = vld [vmem:[#allocation2 + $0xb4] sm:$0xf]  ;;  %v4566_v58 = vsel %vm11371_vm11, %v4561_v29, %v4565_v27  ;;  %3885 = vst [vmem:[#allocation2 + $0x9c] sm:$0xf] %v3884_v28  ;;  %v3733_v8 = vrot.slane %v13057_v32, 4  ;;  %v3895_v19 = vsel %vm11079_vm8, %v3716_v30, %v3894_v24  ;;  %v10579_v13 = vld [vmem:[#allocation2 + $0x3c] sm:$0xff] }
 0x42b   : > { %3886 = vst.msk [vmem:[#allocation2 + $0xa0] sm:$0xf] %vm363_vm0, %v13179_v54  ;;  %v3901_v63 = vld [vmem:[#allocation2 + $0xbc] sm:$0x1]  ;;  %v4889_v2 = vunpack.c.l.b16 %v4566_v58  ;;  %v4570_v53 = vrot.slane %v4568_v38, 4  ;;  %v4573_v59 = vrot.slane %v4571_v42, 5 }
 0x42c   : > { %v3898_v62 = vsel %vm10962_vm5, %v3723_v11, %v3897_v43  ;;  %3889 = vst [vmem:[#allocation2 + $0xa4] sm:$0x1] %v3888_v10  ;;  %v4579_v47 = vrot.slane %v4577_v52, 5  ;;  %v4583_v26 = vrot.slane %v4581_v45, 4  ;;  %v3902_v32 = vsel %vm11079_vm8, %v3733_v8, %v3901_v63  ;;  %v4452_v17 = vld [vmem:[#allocation2 + $0x2c] sm:$0x1] }
 0x42d   : > { %3892 = vst [vmem:[#allocation2 + $0xa8] sm:$0xf] %v3891_v55  ;;  %v13347_v54 = vpack.c.b16 %v4889_v2, %v4888_v25  ;;  %v4574_v46 = vor.u32 %v4573_v59, %v4570_v53  ;;  %v4587_v56 = vshll.u32 %v4452_v17, 16  ;;  %v4453_v35 = vld [vmem:[#allocation2 + $0x30] sm:$0xf] }
 0x42e   : > { %3893 = vst.msk [vmem:[#allocation2 + $0xac] sm:$0xf] %vm363_vm0, %v13183_v40  ;;  %v4584_v37 = vor.u32 %v4583_v26, %v4579_v47  ;;  %v10578_v40 = vld [vmem:[#allocation2 + $0x30] sm:$0xff]  ;;  %v4595_v39 = vshll.u32 %v4453_v35, 16  ;;  %v4455_v29 = vld [vmem:[#allocation2 + $0x38] sm:$0x1] }
 0x42f   : > { %3896 = vst [vmem:[#allocation2 + $0xb0] sm:$0x1] %v3895_v19  ;;  %v4575_v33 = vrot.slane %v4574_v46, 4  ;;  %v4454_v21 = vld [vmem:[#allocation2 + $0x34] sm:$0xf]  ;;  %v4589_v31 = vrot.slane %v4587_v56, 5 }
 0x430   : > { %3899 = vst [vmem:[#allocation2 + $0xb4] sm:$0xf] %v3898_v62  ;;  %v4585_v36 = vrot.slane %v4584_v37, 4  ;;  %v4601_v12 = vshll.u32 %v4454_v21, 16  ;;  %v4605_v34 = vshrl.u32 %v4454_v21, 16  ;;  %v4597_v57 = vrot.slane %v4595_v39, 5 }
 0x431   : > { %3900 = vst.msk [vmem:[#allocation2 + $0xb8] sm:$0xf] %vm363_vm0, %v13188_v48  ;;  %9933 = vmatmul.msk.bf16.gmra.mxu1 %vm1028_vm6, %v10577_v7  ;;  %9962 = vmatmul.msk.bf16.gmra.mxu2 %vm1028_vm6, %v10577_v7  ;;  %v4592_v48 = vshrl.u32 %v4453_v35, 16  ;;  %v4580_v9 = vsel %vm11371_vm11, %v4575_v33, %v4579_v47  ;;  %v4611_v49 = vshll.u32 %v4455_v29, 16  ;;  %v4456_v15 = vld [vmem:[#allocation2 + $0x3c] sm:$0xf] }
 0x432   : > { %3903 = vst [vmem:[#allocation2 + $0xbc] sm:$0x1] %v3902_v32  ;;  %10021 = vmatmul.msk.bf16.gmra.mxu0 %vm1028_vm6, %v13347_v54  ;;  %v4590_v0 = vsel %vm11371_vm11, %v4585_v36, %v4589_v31  ;;  %v4890_v51 = vunpack.c.l.b16 %v4580_v9  ;;  %v4603_v60 = vrot.slane %v4601_v12, 5  ;;  %v4607_v7 = vrot.slane %v4605_v34, 4  ;;  %v4457_v61 = vld [vmem:[#allocation2 + $0x40] sm:$0xf] }
 0x433   : > { %v4891_v50 = vunpack.c.l.b16 %v4590_v0  ;;  %v4594_v16 = vrot.slane %v4592_v48, 4  ;;  %v4613_v30 = vrot.slane %v4611_v49, 5  ;;  %v4616_v28 = vshrl.u32 %v4456_v15, 16  ;;  %v4458_v55 = vld [vmem:[#allocation2 + $0x44] sm:$0x1]  ;;  %v10580_v62 = vld [vmem:[#allocation2 + $0x48] sm:$0xff] }
 0x434   : > { %v4608_v44 = vor.u32 %v4607_v7, %v4603_v60  ;;  %v4619_v27 = vshll.u32 %v4456_v15, 16  ;;  %v4625_v11 = vshll.u32 %v4457_v61, 16  ;;  %v4629_v10 = vshrl.u32 %v4457_v61, 16  ;;  %v4459_v53 = vld [vmem:[#allocation2 + $0x48] sm:$0xf]  ;;  %v10581_v34 = vld [vmem:[#allocation2 + $0x54] sm:$0xff] }
 0x435   : > { %9993 = vmatmul.msk.bf16.gmra.mxu3 %vm1028_vm6, %v10578_v40  ;;  %v13360_v20 = vpack.c.b16 %v4891_v50, %v4890_v51  ;;  %v4598_v22 = vor.u32 %v4597_v57, %v4594_v16  ;;  %v4618_v43 = vrot.slane %v4616_v28, 4  ;;  %v4635_v19 = vshll.u32 %v4458_v55, 16  ;;  %v4460_v59 = vld [vmem:[#allocation2 + $0x4c] sm:$0xf]  ;;  %v4461_v39 = vld [vmem:[#allocation2 + $0x50] sm:$0x1] }
 0x436   : > { %v4609_v5 = vrot.slane %v4608_v44, 4  ;;  %v4621_v4 = vrot.slane %v4619_v27, 5  ;;  %v4627_v58 = vrot.slane %v4625_v11, 5  ;;  %v4631_v52 = vrot.slane %v4629_v10, 4  ;;  %v4462_v16 = vld [vmem:[#allocation2 + $0x54] sm:$0xf] }
 0x437   : > { %v4599_v41 = vrot.slane %v4598_v22, 4  ;;  %v4637_v47 = vrot.slane %v4635_v19, 5  ;;  %v4640_v26 = vshrl.u32 %v4459_v53, 16  ;;  %v4643_v32 = vshll.u32 %v4459_v53, 16  ;;  %v4463_v57 = vld [vmem:[#allocation2 + $0x58] sm:$0xf] }
 0x438   : > { %v4614_v1 = vsel %vm11371_vm11, %v4609_v5, %v4613_v30  ;;  %v4622_v8 = vor.u32 %v4621_v4, %v4618_v43  ;;  %v4632_v63 = vor.u32 %v4631_v52, %v4627_v58  ;;  %v4649_v37 = vshll.u32 %v4460_v59, 16  ;;  %v4465_v4 = vld [vmem:[#allocation2 + $0x60] sm:$0xf]  ;;  %v10600_v52 = vld [vmem:[%s10917_s11 + $0xd0] sm:$0xff] }
 0x439   : > { %v4604_v24 = vsel %vm11371_vm11, %v4599_v41, %v4603_v60  ;;  %v4893_v42 = vunpack.c.l.b16 %v4614_v1  ;;  %v4653_v56 = vshrl.u32 %v4460_v59, 16  ;;  %v4642_v36 = vrot.slane %v4640_v26, 4  ;;  %5167 = vmatpush.bf16.msrb.mxu1 %v10600_v52 }
 0x43a   : > { %v4892_v38 = vunpack.c.l.b16 %v4604_v24  ;;  %v4623_v25 = vrot.slane %v4622_v8, 4  ;;  %v4633_v2 = vrot.slane %v4632_v63, 4  ;;  %v4645_v35 = vrot.slane %v4643_v32, 5  ;;  %v4464_v24 = vld [vmem:[#allocation2 + $0x5c] sm:$0x1] }
 0x43b   : > { %v4651_v21 = vrot.slane %v4649_v37, 5  ;;  %v4655_v31 = vrot.slane %v4653_v56, 4  ;;  %v4659_v12 = vshll.u32 %v4461_v39, 16  ;;  %v4664_v7 = vshrl.u32 %v4462_v16, 16  ;;  %v13407_v37 = vld [vmem:[#allocation2 + $0x68] sm:$0x1] }
 0x43c   : > { %v13371_v45 = vpack.c.b16 %v4893_v42, %v4892_v38  ;;  %v4628_v17 = vsel %vm11371_vm11, %v4623_v25, %v4627_v58  ;;  %v4638_v46 = vsel %vm11371_vm11, %v4633_v2, %v4637_v47  ;;  %v4646_v9 = vor.u32 %v4645_v35, %v4642_v36  ;;  %v10582_v38 = vld [vmem:[#allocation2 + $0x60] sm:$0xff]  ;;  %v10583_v35 = vld [vmem:[#allocation2 + $0x6c] sm:$0xff] }
 0x43d   : > { %v4895_v33 = vunpack.c.l.b16 %v4638_v46  ;;  %v4656_v0 = vor.u32 %v4655_v31, %v4651_v21  ;;  %v4661_v60 = vrot.slane %v4659_v12, 5  ;;  %v4667_v29 = vshll.u32 %v4462_v16, 16  ;;  %v4466_v58 = vld [vmem:[#allocation2 + $0x64] sm:$0xf]  ;;  %v4468_v39 = vld [vmem:[#allocation2 + $0x6c] sm:$0xf] }
 0x43e   : > { %v4647_v51 = vrot.slane %v4646_v9, 4  ;;  %v4673_v49 = vshll.u32 %v4463_v57, 16  ;;  %v4666_v15 = vrot.slane %v4664_v7, 4  ;;  %v4683_v10 = vshll.u32 %v4464_v24, 16  ;;  %v4469_v9 = vld [vmem:[#allocation2 + $0x70] sm:$0xf] }
 0x43f   : > { %v4657_v50 = vrot.slane %v4656_v0, 4  ;;  %v4669_v61 = vrot.slane %v4667_v29, 5  ;;  %v4688_v8 = vshrl.u32 %v4465_v4, 16  ;;  %v4691_v63 = vshll.u32 %v4465_v4, 16  ;;  %v13433_v4 = vld [vmem:[#allocation2 + $0x7c] sm:$0xf] }
 0x440   : > { %v4652_v22 = vsel %vm11371_vm11, %v4647_v51, %v4651_v21  ;;  %v4675_v30 = vrot.slane %v4673_v49, 5  ;;  %v4685_v55 = vrot.slane %v4683_v10, 5  ;;  %v4697_v25 = vshll.u32 %v4466_v58, 16 }
 0x441   : > { %9934 = vmatmul.msk.bf16.gmra.mxu1 %vm1028_vm6, %v10578_v40  ;;  %9963 = vmatmul.msk.bf16.gmra.mxu2 %vm1028_vm6, %v10578_v40  ;;  %v4894_v40 = vunpack.c.l.b16 %v4628_v17  ;;  %v4662_v44 = vsel %vm11371_vm11, %v4657_v50, %v4661_v60  ;;  %v4896_v41 = vunpack.c.l.b16 %v4652_v22  ;;  %v4670_v1 = vor.u32 %v4669_v61, %v4666_v15  ;;  %v13423_v15 = vld [vmem:[#allocation2 + $0x74] sm:$0x1] }
 0x442   : > { %10022 = vmatmul.msk.bf16.gmra.mxu0 %vm1028_vm6, %v13360_v20  ;;  %v4897_v5 = vunpack.c.l.b16 %v4662_v44  ;;  %v4701_v2 = vshrl.u32 %v4466_v58, 16  ;;  %v4690_v47 = vrot.slane %v4688_v8, 4  ;;  %v4693_v26 = vrot.slane %v4691_v63, 5 }
 0x443   : > { %v13382_v48 = vpack.c.b16 %v4895_v33, %v4894_v40  ;;  %v4671_v42 = vrot.slane %v4670_v1, 4  ;;  %v4699_v32 = vrot.slane %v4697_v25, 5  ;;  %v4215_v33 = vpop.f32.mrf.mxu2  ;;  %v4707_v36 = vshll.u32 %v13407_v37, 16 }
 0x444   : > { %v13393_v27 = vpack.c.b16 %v4897_v5, %v4896_v41  ;;  %v4703_v17 = vrot.slane %v4701_v2, 4  ;;  %v4694_v56 = vor.u32 %v4693_v26, %v4690_v47  ;;  %v4712_v12 = vshrl.u32 %v4468_v39, 16 }
 0x445   : > { %9994 = vmatmul.msk.bf16.gmra.mxu3 %vm1028_vm6, %v10579_v13  ;;  %v4676_v19 = vsel %vm11371_vm11, %v4671_v42, %v4675_v30  ;;  %v4709_v0 = vrot.slane %v4707_v36, 5  ;;  %v4721_v16 = vshll.u32 %v4469_v9, 16  ;;  %v4731_v1 = vshll.u32 %v13423_v15, 16  ;;  %v4471_v42 = vld [vmem:[#allocation2 + $0x78] sm:$0xf] }
 0x446   : > { %v4898_v53 = vunpack.c.l.b16 %v4676_v19  ;;  %v4704_v40 = vor.u32 %v4703_v17, %v4699_v32  ;;  %v4695_v21 = vrot.slane %v4694_v56, 4  ;;  %v4714_v22 = vrot.slane %v4712_v12, 4 }
 0x447   : > { %v4723_v49 = vrot.slane %v4721_v16, 5  ;;  %v4733_v52 = vrot.slane %v4731_v1, 5  ;;  %v4739_v8 = vshll.u32 %v4471_v42, 16  ;;  %v4745_v2 = vshll.u32 %v13433_v4, 16  ;;  %v10585_v16 = vld [vmem:[#allocation2 + $0x84] sm:$0xff] }
 0x448   : > { %v4705_v31 = vrot.slane %v4704_v40, 4  ;;  %v4700_v51 = vsel %vm11371_vm11, %v4695_v21, %v4699_v32 }
 0x449   : > { %v4900_v60 = vunpack.c.l.b16 %v4700_v51  ;;  %v4741_v56 = vrot.slane %v4739_v8, 5  ;;  %v4747_v40 = vrot.slane %v4745_v2, 5 }
 0x44a   : > { %v4710_v50 = vsel %vm11371_vm11, %v4705_v31, %v4709_v0  ;;  %v13447_v31 = vld [vmem:[#allocation2 + $0x80] sm:$0x1] }
 0x44b   : > { %v4901_v7 = vunpack.c.l.b16 %v4710_v50  ;;  %v4217_v29 = vpop.f32.mrf.mxu2  ;;  %v4755_v50 = vshll.u32 %v13447_v31, 16 }
 0x44d   : > { %v13421_v5 = vpack.c.b16 %v4901_v7, %v4900_v60  ;;  %v4474_v7 = vld [vmem:[#allocation2 + $0x84] sm:$0xf] }
 0x451   : > { %9935 = vmatmul.msk.bf16.gmra.mxu1 %vm1028_vm6, %v10579_v13  ;;  %9964 = vmatmul.msk.bf16.gmra.mxu2 %vm1028_vm6, %v10579_v13  ;;  %v4677_v13 = vshrl.u32 %v4463_v57, 16  ;;  %v4725_v57 = vshrl.u32 %v4469_v9, 16 }
 0x452   : > { %10023 = vmatmul.msk.bf16.gmra.mxu0 %vm1028_vm6, %v13371_v45 }
 0x453   : > { %v4679_v28 = vrot.slane %v4677_v13, 4  ;;  %v4727_v13 = vrot.slane %v4725_v57, 4 }
 0x455   : > { %9995 = vmatmul.msk.bf16.gmra.mxu3 %vm1028_vm6, %v10580_v62  ;;  %v4680_v11 = vor.u32 %v4679_v28, %v4675_v30  ;;  %v4728_v28 = vor.u32 %v4727_v13, %v4723_v49  ;;  %v4760_v13 = vshrl.u32 %v4474_v7, 16 }
 0x457   : > { %v4681_v43 = vrot.slane %v4680_v11, 4  ;;  %v10584_v11 = vld [vmem:[#allocation2 + $0x78] sm:$0xff] }
 0x461   : > { %9936 = vmatmul.msk.bf16.gmra.mxu1 %vm1028_vm6, %v10580_v62  ;;  %9965 = vmatmul.msk.bf16.gmra.mxu2 %vm1028_vm6, %v10580_v62  ;;  %v4686_v62 = vsel %vm11371_vm11, %v4681_v43, %v4685_v55  ;;  %v4736_v55 = vshrl.u32 %v4471_v42, 16 }
 0x462   : > { %10024 = vmatmul.msk.bf16.gmra.mxu0 %vm1028_vm6, %v13382_v48  ;;  %v4899_v59 = vunpack.c.l.b16 %v4686_v62 }
 0x463   : > { %v4738_v17 = vrot.slane %v4736_v55, 4  ;;  %v4762_v55 = vrot.slane %v4760_v13, 4 }
 0x464   : > { %v13405_v46 = vpack.c.b16 %v4899_v59, %v4898_v53  ;;  %v4749_v53 = vshrl.u32 %v13433_v4, 16 }
 0x465   : > { %9996 = vmatmul.msk.bf16.gmra.mxu3 %vm1028_vm6, %v10581_v34  ;;  %v4742_v0 = vor.u32 %v4741_v56, %v4738_v17 }
 0x467   : > { %v4743_v57 = vrot.slane %v4742_v0, 4  ;;  %v4477_v0 = vld [vmem:[#allocation2 + $0x90] sm:$0xf] }
 0x471   : > { %9937 = vmatmul.msk.bf16.gmra.mxu1 %vm1028_vm6, %v10581_v34  ;;  %9966 = vmatmul.msk.bf16.gmra.mxu2 %vm1028_vm6, %v10581_v34  ;;  %v4715_v34 = vshll.u32 %v4468_v39, 16 }
 0x472   : > { %10025 = vmatmul.msk.bf16.gmra.mxu0 %vm1028_vm6, %v13393_v27 }
 0x473   : > { %v4717_v44 = vrot.slane %v4715_v34, 5 }
 0x475   : > { %9997 = vmatmul.msk.bf16.gmra.mxu3 %vm1028_vm6, %v10582_v38  ;;  %v4718_v30 = vor.u32 %v4717_v44, %v4714_v22 }
 0x477   : > { %v4719_v10 = vrot.slane %v4718_v30, 4 }
 0x479   : > { %v4724_v62 = vsel %vm11371_vm11, %v4719_v10, %v4723_v49  ;;  %v4757_v49 = vrot.slane %v4755_v50, 5 }
 0x47a   : > { %v4902_v26 = vunpack.c.l.b16 %v4724_v62 }
 0x481   : > { %9938 = vmatmul.msk.bf16.gmra.mxu1 %vm1028_vm6, %v10582_v38  ;;  %9967 = vmatmul.msk.bf16.gmra.mxu2 %vm1028_vm6, %v10582_v38  ;;  %v4729_v38 = vrot.slane %v4728_v28, 4 }
 0x482   : > { %10026 = vmatmul.msk.bf16.gmra.mxu0 %vm1028_vm6, %v13405_v46 }
 0x483   : > { %v4734_v25 = vsel %vm11371_vm11, %v4729_v38, %v4733_v52 }
 0x484   : > { %v4903_v32 = vunpack.c.l.b16 %v4734_v25 }
 0x485   : > { %9998 = vmatmul.msk.bf16.gmra.mxu3 %vm1028_vm6, %v10583_v35 }
 0x486   : > { %v13445_v21 = vpack.c.b16 %v4903_v32, %v4902_v26 }
 0x48d   : > { %v13419_v41 = vpop.f32.mrf.mxu0 }
 0x48e   : > { %v4106_v61 = vpop.f32.mrf.mxu1 }
 0x48f   : > { %v4216_v24 = vadd.f32 %v4215_v33, %v4106_v61  ;;  %v4751_v33 = vrot.slane %v4749_v53, 4  ;;  %v4763_v61 = vshll.u32 %v4474_v7, 16  ;;  %v13473_v53 = vld [vmem:[#allocation2 + $0x8c] sm:$0x1]  ;;  %v4787_v7 = vshll.u32 %v4477_v0, 16 }
 0x491   : > { %9939 = vmatmul.msk.bf16.gmra.mxu1 %vm1028_vm6, %v10583_v35  ;;  %9968 = vmatmul.msk.bf16.gmra.mxu2 %vm1028_vm6, %v10583_v35  ;;  %v4752_v12 = vor.u32 %v4751_v33, %v4747_v40  ;;  %v4765_v8 = vrot.slane %v4763_v61, 5  ;;  %v4779_v33 = vshll.u32 %v13473_v53, 16 }
 0x492   : > { %10027 = vmatmul.msk.bf16.gmra.mxu0 %vm1028_vm6, %v13421_v5 }
 0x493   : > { %v4753_v60 = vrot.slane %v4752_v12, 4  ;;  %v4766_v32 = vor.u32 %v4765_v8, %v4762_v55  ;;  %v13483_v12 = vld [vmem:[#allocation2 + $0x94] sm:$0xf] }
 0x494   : > { %v4220_v58 = vpop.f32.mrf.mxu2  ;;  %v4793_v61 = vshll.u32 %v13483_v12, 16 }
 0x495   : > { %9999 = vmatmul.msk.bf16.gmra.mxu3 %vm1028_vm6, %v10584_v11  ;;  %v13431_v43 = vpop.f32.mrf.mxu0  ;;  %v4758_v1 = vsel %vm11371_vm11, %v4753_v60, %v4757_v49  ;;  %v4784_v60 = vshrl.u32 %v4477_v0, 16 }
 0x496   : > { %v4329_v63 = vpop.f32.mrf.mxu3  ;;  %v4108_v19 = vpop.f32.mrf.mxu1  ;;  %v4905_v52 = vunpack.c.l.b16 %v4758_v1 }
 0x497   : > { %v13441_v59 = vadd.f32 %v4329_v63, %v4216_v24  ;;  %v4218_v47 = vadd.f32 %v4217_v29, %v4108_v19  ;;  %v13457_v29 = vld [vmem:[#allocation2 + $0x88] sm:$0xf]  ;;  %v4748_v24 = vsel %vm11371_vm11, %v4743_v57, %v4747_v40  ;;  %v4781_v57 = vrot.slane %v4779_v33, 5 }
 0x498   : > { %v4773_v10 = vshrl.u32 %v13457_v29, 16 }
 0x49a   : > { %v4775_v19 = vrot.slane %v4773_v10, 4  ;;  %v4786_v10 = vrot.slane %v4784_v60, 4  ;;  %v13509_v60 = vld [vmem:[#allocation2 + $0xa0] sm:$0xf] }
 0x49c   : > { %v4222_v35 = vpop.f32.mrf.mxu2 }
 0x49e   : > { %v4331_v39 = vpop.f32.mrf.mxu3  ;;  %v4111_v9 = vpop.f32.mrf.mxu1 }
 0x49f   : > { %v13443_v36 = vpop.f32.mrf.mxu0  ;;  %v13449_v34 = vadd.f32 %v4331_v39, %v4218_v47  ;;  %v4221_v51 = vadd.f32 %v4220_v58, %v4111_v9  ;;  %v4904_v58 = vunpack.c.l.b16 %v4748_v24  ;;  %v4767_v39 = vrot.slane %v4766_v32, 4 }
 0x4a1   : > { %9940 = vmatmul.msk.bf16.gmra.mxu1 %vm1028_vm6, %v10584_v11  ;;  %9969 = vmatmul.msk.bf16.gmra.mxu2 %vm1028_vm6, %v10584_v11  ;;  %v4769_v11 = vshll.u32 %v13457_v29, 16  ;;  %v13471_v2 = vpack.c.b16 %v4905_v52, %v4904_v58  ;;  %v4795_v58 = vrot.slane %v4793_v61, 5 }
 0x4a2   : > { %10028 = vmatmul.msk.bf16.gmra.mxu0 %vm1028_vm6, %v13445_v21 }
 0x4a3   : > { %v4771_v63 = vrot.slane %v4769_v11, 5 }
 0x4a4   : > { %v4225_v44 = vpop.f32.mrf.mxu2 }
 0x4a5   : > { %10000 = vmatmul.msk.bf16.gmra.mxu3 %vm1028_vm6, %v10585_v16  ;;  %v4776_v17 = vor.u32 %v4775_v19, %v4771_v63  ;;  %v4772_v13 = vsel %vm11371_vm11, %v4767_v39, %v4771_v63  ;;  %v13499_v19 = vld [vmem:[#allocation2 + $0x98] sm:$0x1]  ;;  %v10587_v39 = vld [vmem:[#allocation2 + $0x9c] sm:$0xff] }
 0x4a6   : > { %v4113_v28 = vpop.f32.mrf.mxu1  ;;  %v4906_v1 = vunpack.c.l.b16 %v4772_v13  ;;  %v4803_v33 = vshll.u32 %v13499_v19, 16 }
 0x4a7   : > { %v13459_v22 = vpop.f32.mrf.mxu0  ;;  %v4223_v42 = vadd.f32 %v4222_v35, %v4113_v28  ;;  %v10586_v35 = vld [vmem:[#allocation2 + $0x90] sm:$0xff]  ;;  %v4777_v9 = vrot.slane %v4776_v17, 4 }
 0x4a8   : > { %v4334_v30 = vpop.f32.mrf.mxu3 }
 0x4a9   : > { %v13467_v38 = vadd.f32 %v4334_v30, %v4221_v51  ;;  %v4797_v30 = vshrl.u32 %v13483_v12, 16 }
 0x4ab   : > { %v4799_v52 = vrot.slane %v4797_v30, 4 }
 0x4ac   : > { %v4227_v25 = vpop.f32.mrf.mxu2 }
 0x4ad   : > { %v4800_v17 = vor.u32 %v4799_v52, %v4795_v58 }
 0x4ae   : > { %v4116_v26 = vpop.f32.mrf.mxu1 }
 0x4af   : > { %v13469_v62 = vpop.f32.mrf.mxu0  ;;  %v4226_v40 = vadd.f32 %v4225_v44, %v4116_v26  ;;  %v4801_v0 = vrot.slane %v4800_v17, 4 }
 0x4b0   : > { %v4336_v47 = vpop.f32.mrf.mxu3 }
 0x4b1   : > { %v13475_v56 = vadd.f32 %v4336_v47, %v4223_v42  ;;  %9941 = vmatmul.msk.bf16.gmra.mxu1 %vm1028_vm6, %v10585_v16  ;;  %9970 = vmatmul.msk.bf16.gmra.mxu2 %vm1028_vm6, %v10585_v16  ;;  %v4782_v16 = vsel %vm11371_vm11, %v4777_v9, %v4781_v57  ;;  %v4789_v42 = vrot.slane %v4787_v7, 5  ;;  %v4480_v57 = vld [vmem:[#allocation2 + $0x9c] sm:$0xf] }
 0x4b2   : > { %10029 = vmatmul.msk.bf16.gmra.mxu0 %vm1028_vm6, %v13471_v2  ;;  %v4907_v11 = vunpack.c.l.b16 %v4782_v16  ;;  %v4808_v13 = vshrl.u32 %v4480_v57, 16 }
 0x4b3   : > { %v4790_v32 = vor.u32 %v4789_v42, %v4786_v10 }
 0x4b4   : > { %v4230_v50 = vpop.f32.mrf.mxu2  ;;  %v13497_v63 = vpack.c.b16 %v4907_v11, %v4906_v1  ;;  %v4821_v1 = vshrl.u32 %v13509_v60, 16 }
 0x4b5   : > { %10001 = vmatmul.msk.bf16.gmra.mxu3 %vm1028_vm6, %v10586_v35  ;;  %v4791_v9 = vrot.slane %v4790_v32, 4 }
 0x4b6   : > { %v4118_v49 = vpop.f32.mrf.mxu1  ;;  %v4823_v17 = vrot.slane %v4821_v1, 4 }
 0x4b7   : > { %v13485_v51 = vpop.f32.mrf.mxu0  ;;  %v4228_v24 = vadd.f32 %v4227_v25, %v4118_v49  ;;  %v4805_v49 = vrot.slane %v4803_v33, 5  ;;  %v4796_v30 = vsel %vm11371_vm11, %v4791_v9, %v4795_v58  ;;  %v13525_v9 = vld [vmem:[#allocation2 + $0xa4] sm:$0x1] }
 0x4b8   : > { %v4339_v44 = vpop.f32.mrf.mxu3  ;;  %v4908_v42 = vunpack.c.l.b16 %v4796_v30  ;;  %v4483_v30 = vld [vmem:[#allocation2 + $0xa8] sm:$0xf] }
 0x4b9   : > { %v13493_v28 = vadd.f32 %v4339_v44, %v4226_v40 }
 0x4bc   : > { %v4232_v8 = vpop.f32.mrf.mxu2 }
 0x4be   : > { %v4121_v26 = vpop.f32.mrf.mxu1 }
 0x4bf   : > { %v13495_v55 = vpop.f32.mrf.mxu0  ;;  %v4231_v25 = vadd.f32 %v4230_v50, %v4121_v26  ;;  %v4811_v50 = vshll.u32 %v4480_v57, 16 }
 0x4c0   : > { %v4341_v47 = vpop.f32.mrf.mxu3 }
 0x4c1   : > { %v13501_v40 = vadd.f32 %v4341_v47, %v4228_v24  ;;  %9942 = vmatmul.msk.bf16.gmra.mxu1 %vm1028_vm6, %v10586_v35  ;;  %9971 = vmatmul.msk.bf16.gmra.mxu2 %vm1028_vm6, %v10586_v35  ;;  %v4806_v35 = vsel %vm11371_vm11, %v4801_v0, %v4805_v49  ;;  %v4817_v24 = vshll.u32 %v13509_v60, 16  ;;  %v4810_v47 = vrot.slane %v4808_v13, 4 }
 0x4c2   : > { %10030 = vmatmul.msk.bf16.gmra.mxu0 %vm1028_vm6, %v13497_v63  ;;  %v4909_v52 = vunpack.c.l.b16 %v4806_v35  ;;  %v4813_v26 = vrot.slane %v4811_v50, 5  ;;  %v4827_v13 = vshll.u32 %v13525_v9, 16  ;;  %v10588_v50 = vld [vmem:[#allocation2 + $0xa8] sm:$0xff] }
 0x4c3   : > { %v4819_v32 = vrot.slane %v4817_v24, 5  ;;  %v13535_v35 = vld [vmem:[#allocation2 + $0xac] sm:$0xf] }
 0x4c4   : > { %v4235_v44 = vpop.f32.mrf.mxu2  ;;  %v13523_v58 = vpack.c.b16 %v4909_v52, %v4908_v42  ;;  %v4814_v18 = vor.u32 %v4813_v26, %v4810_v47  ;;  %16825 = vst [vmem:[#allocation22_spill] sm:$0xff] %v13535_v35  ;;  %v4832_v42 = vshrl.u32 %v4483_v30, 16  ;;  %v4845_v26 = vshrl.u32 %v13535_v35, 16 }
 0x4c5   : > { %10002 = vmatmul.msk.bf16.gmra.mxu3 %vm1028_vm6, %v10587_v39  ;;  %v4824_v6 = vor.u32 %v4823_v17, %v4819_v32 }
 0x4c6   : > { %v4123_v61 = vpop.f32.mrf.mxu1  ;;  %v4834_v23 = vrot.slane %v4832_v42, 4 }
 0x4c7   : > { %v13511_v7 = vpop.f32.mrf.mxu0  ;;  %v4233_v10 = vadd.f32 %v4232_v8, %v4123_v61  ;;  %v4825_v61 = vrot.slane %v4824_v6, 4 }
 0x4c8   : > { %16822 = vst [vmem:[#allocation20_spill] sm:$0xff] %v13511_v7  ;;  %v4344_v16 = vpop.f32.mrf.mxu3 }
 0x4c9   : > { %v13519_v11 = vadd.f32 %v4344_v16, %v4231_v25  ;;  %v4815_v16 = vrot.slane %v4814_v18, 4  ;;  %v4841_v18 = vshll.u32 %v13535_v35, 16  ;;  %v10606_v35 = vld [vmem:[%s10917_s11 + $0xe0] sm:$0xff] }
 0x4cc   : > { %v4237_v57 = vpop.f32.mrf.mxu2 }
 0x4ce   : > { %v4126_v49 = vpop.f32.mrf.mxu1 }
 0x4cf   : > { %v13521_v33 = vpop.f32.mrf.mxu0  ;;  %v4236_v8 = vadd.f32 %v4235_v44, %v4126_v49  ;;  %v4835_v44 = vshll.u32 %v4483_v30, 16 }
 0x4d0   : > { %16823 = vst [vmem:[#allocation21_spill] sm:$0xff] %v13521_v33  ;;  %v4346_v0 = vpop.f32.mrf.mxu3  ;;  %v4847_v33 = vrot.slane %v4845_v26, 4  ;;  %v4486_v26 = vld [vmem:[#allocation2 + $0xb4] sm:$0xf] }
 0x4d1   : > { %v13527_v25 = vadd.f32 %v4346_v0, %v4233_v10  ;;  %9943 = vmatmul.msk.bf16.gmra.mxu1 %vm1028_vm6, %v10587_v39  ;;  %9972 = vmatmul.msk.bf16.gmra.mxu2 %vm1028_vm6, %v10587_v39  ;;  %v4829_v10 = vrot.slane %v4827_v13, 5  ;;  %v4820_v39 = vsel %vm11371_vm11, %v4815_v16, %v4819_v32  ;;  %v4837_v30 = vrot.slane %v4835_v44, 5 }
 0x4d2   : > { %10031 = vmatmul.msk.bf16.gmra.mxu0 %vm1028_vm6, %v13523_v58  ;;  %v4910_v49 = vunpack.c.l.b16 %v4820_v39  ;;  %v13550_v32 = vadd.f32 %v13431_v43, %v13449_v34  ;;  %v10602_v39 = vld [vmem:[%s10917_s11 + $0x100] sm:$0xff]  ;;  %v10589_v34 = vld [vmem:[#allocation2 + $0xb4] sm:$0xff] }
 0x4d3   : > { %16824 = vst [vmem:[#allocation29_spill] sm:$0xff] %v13527_v25  ;;  %v4830_v6 = vsel %vm11371_vm11, %v4825_v61, %v4829_v10  ;;  %v10603_v25 = vld [vmem:[%s10917_s11 + $0x108] sm:$0xff] }
 0x4d4   : > { %v4240_v1 = vpop.f32.mrf.mxu2  ;;  %v4911_v13 = vunpack.c.l.b16 %v4830_v6  ;;  %5334 = vmatpush.bf16.msrb.mxu2 %v10603_v25 }
 0x4d5   : > { %10003 = vmatmul.msk.bf16.gmra.mxu3 %vm1028_vm6, %v10588_v50 }
 0x4d6   : > { %v4128_v47 = vpop.f32.mrf.mxu1  ;;  %v13554_v61 = vpack.c.b16 %v4911_v13, %v4910_v49 }
 0x4d7   : > { %v13537_v24 = vpop.f32.mrf.mxu0  ;;  %v4238_v0 = vadd.f32 %v4237_v57, %v4128_v47 }
 0x4d8   : > { %16826 = vst [vmem:[#allocation30_spill] sm:$0xff] %v13537_v24  ;;  %v4349_v52 = vpop.f32.mrf.mxu3  ;;  %v4843_v24 = vrot.slane %v4841_v18, 5  ;;  %5335 = vmatpush.bf16.msrb.mxu2 %v10602_v39 }
 0x4d9   : > { %v13545_v17 = vadd.f32 %v4349_v52, %v4236_v8  ;;  %v13556_v8 = vld [vmem:[#allocation2 + $0xb0] sm:$0x1]  ;;  %v4838_v52 = vor.u32 %v4837_v30, %v4834_v23  ;;  %v13567_v23 = vld [vmem:[#allocation2 + $0xb8] sm:$0xf] }
 0x4da   : > { %16829 = vst [vmem:[#allocation7_spill] sm:$0xff] %v13556_v8  ;;  %v4848_v42 = vor.u32 %v4847_v33, %v4843_v24  ;;  %v4851_v43 = vshll.u32 %v13556_v8, 16 }
 0x4db   : > { %16827 = vst [vmem:[#allocation12_spill] sm:$0xff] %v13545_v17  ;;  %v4839_v6 = vrot.slane %v4838_v52, 4 }
 0x4dc   : > { %v4242_v7 = vpop.f32.mrf.mxu2  ;;  %v4849_v18 = vrot.slane %v4848_v42, 4  ;;  %16831 = vst [vmem:[#allocation28_spill] sm:$0xff] %v13567_v23  ;;  %v4853_v25 = vrot.slane %v4851_v43, 5  ;;  %v10607_v43 = vld [vmem:[%s10917_s11 + $0xe8] sm:$0xff] }
 0x4dd   : > { %5900 = vmatpush.bf16.msra.mxu0 %v10607_v43  ;;  %v10609_v43 = vld [vmem:[%s10917_s11 + $0x118] sm:$0xff] }
 0x4de   : > { %v4131_v10 = vpop.f32.mrf.mxu1  ;;  %v4854_v30 = vsel %vm11371_vm11, %v4849_v18, %v4853_v25  ;;  %6054 = vmatpush.bf16.msra.mxu1 %v10609_v43 }
 0x4df   : > { %v13552_v16 = vpop.f32.mrf.mxu0  ;;  %v4241_v47 = vadd.f32 %v4240_v1, %v4131_v10  ;;  %v4856_v1 = vshrl.u32 %v4486_v26, 16  ;;  %v4869_v10 = vshrl.u32 %v13567_v23, 16 }
 0x4e0   : > { %16828 = vst [vmem:[#allocation24_spill] sm:$0xff] %v13552_v16  ;;  %v4351_v57 = vpop.f32.mrf.mxu3 }
 0x4e1   : > { %v13558_v44 = vadd.f32 %v4351_v57, %v4238_v0  ;;  %9944 = vmatmul.msk.bf16.gmra.mxu1 %vm1028_vm6, %v10588_v50  ;;  %9973 = vmatmul.msk.bf16.gmra.mxu2 %vm1028_vm6, %v10588_v50  ;;  %v4859_v0 = vshll.u32 %v4486_v26, 16  ;;  %v4844_v50 = vsel %vm11371_vm11, %v4839_v6, %v4843_v24  ;;  %v4865_v57 = vshll.u32 %v13567_v23, 16  ;;  %v10605_v26 = vld [vmem:[%s10917_s11 + $0xb8] sm:$0xff] }
 0x4e2   : > { %10032 = vmatmul.msk.bf16.gmra.mxu0 %vm1028_vm6, %v13554_v61  ;;  %v4912_v16 = vunpack.c.l.b16 %v4844_v50  ;;  %5746 = vmatpush.bf16.msra.mxu3 %v10605_v26  ;;  %v4858_v24 = vrot.slane %v4856_v1, 4  ;;  %v4871_v25 = vrot.slane %v4869_v10, 4  ;;  %v13584_v23 = vld [vmem:[#allocation2 + $0xbc] sm:$0x1] }
 0x4e3   : > { %16830 = vst [vmem:[#allocation36_spill] sm:$0xff] %v13558_v44  ;;  %v4913_v44 = vunpack.c.l.b16 %v4854_v30  ;;  %v4861_v6 = vrot.slane %v4859_v0, 5  ;;  %v4867_v18 = vrot.slane %v4865_v57, 5  ;;  %5901 = vmatpush.bf16.msra.mxu0 %v10606_v35  ;;  %v10604_v0 = vld [vmem:[%s10917_s11 + $0xb0] sm:$0xff]  ;;  %v4875_v30 = vshll.u32 %v13584_v23, 16 }
 0x4e4   : > { %v4245_v33 = vpop.f32.mrf.mxu2  ;;  %16834 = vst [vmem:[#allocation25_spill] sm:$0xff] %v13584_v23 }
 0x4e5   : > { %10004 = vmatmul.msk.bf16.gmra.mxu3 %vm1028_vm6, %v10589_v34  ;;  %v13582_v17 = vpack.c.b16 %v4913_v44, %v4912_v16  ;;  %v10590_v16 = vld [vmem:[#allocation2 + $0xc0] sm:$0xff] }
 0x4e6   : > { %v4133_v13 = vpop.f32.mrf.mxu1  ;;  %5747 = vmatpush.bf16.msra.mxu3 %v10604_v0 }
 0x4e7   : > { %v13575_v52 = vpop.f32.mrf.mxu0  ;;  %v4243_v39 = vadd.f32 %v4242_v7, %v4133_v13  ;;  %v4862_v7 = vor.u32 %v4861_v6, %v4858_v24  ;;  %v4872_v13 = vor.u32 %v4871_v25, %v4867_v18 }
 0x4e8   : > { %v4354_v49 = vpop.f32.mrf.mxu3  ;;  %16832 = vst [vmem:[#allocation32_spill] sm:$0xff] %v13575_v52 }
 0x4e9   : > { %v13577_v42 = vadd.f32 %v4354_v49, %v4241_v47  ;;  %v4863_v44 = vrot.slane %v4862_v7, 4  ;;  %v4873_v10 = vrot.slane %v4872_v13, 4 }
 0x4eb   : > { %16833 = vst [vmem:[#allocation33_spill] sm:$0xff] %v13577_v42  ;;  %v4868_v24 = vsel %vm11371_vm11, %v4863_v44, %v4867_v18  ;;  %v10701_v44 = vld [vmem:[#allocation2 + $0x4] sm:$0xf] }
 0x4ec   : > { %v4247_v8 = vpop.f32.mrf.mxu2 }
 0x4ee   : > { %v4136_v49 = vpop.f32.mrf.mxu1 }
 0x4ef   : > { %v4246_v1 = vadd.f32 %v4245_v33, %v4136_v49  ;;  %v13592_v57 = vpop.f32.mrf.mxu0 }
 0x4f0   : > { %v4356_v47 = vpop.f32.mrf.mxu3  ;;  %16836 = vst [vmem:[#allocation34_spill] sm:$0xff] %v13592_v57 }
 0x4f1   : > { %v13586_v50 = vadd.f32 %v4356_v47, %v4243_v39  ;;  %9945 = vmatmul.msk.bf16.gmra.mxu1 %vm1028_vm6, %v10589_v34  ;;  %9974 = vmatmul.msk.bf16.gmra.mxu2 %vm1028_vm6, %v10589_v34  ;;  %v4877_v39 = vrot.slane %v4875_v30, 5  ;;  %v4914_v47 = vunpack.c.l.b16 %v4868_v24  ;;  %v10700_v30 = vld [vmem:[#allocation2 + $0x10] sm:$0xf] }
 0x4f2   : > { %10033 = vmatmul.msk.bf16.gmra.mxu0 %vm1028_vm6, %v13582_v17  ;;  %v5524_v57 = vrot.slane %v10700_v30, 5 }
 0x4f3   : > { %16835 = vst [vmem:[#allocation15_spill] sm:$0xff] %v13586_v50  ;;  %v4878_v6 = vsel %vm11371_vm11, %v4873_v10, %v4877_v39  ;;  %v5450_v10 = vld [vmem:[#allocation2 + $0xc] sm:$0xe]  ;;  %v5449_v39 = vld [vmem:[#allocation2] sm:$0xe] }
 0x4f4   : > { %v4250_v35 = vpop.f32.mrf.mxu2  ;;  %v4915_v49 = vunpack.c.l.b16 %v4878_v6  ;;  %v5526_v43 = vrot.slane %v5524_v57, 4  ;;  %v10092_v24 = vrot.slane %v5450_v10, 9  ;;  %v10091_v6 = vrot.slane %v5449_v39, 9 }
 0x4f5   : > { %10005 = vmatmul.msk.bf16.gmra.mxu3 %vm1028_vm6, %v10590_v16 }
 0x4f6   : > { %v4138_v33 = vpop.f32.mrf.mxu1  ;;  %v13606_v0 = vpack.c.b16 %v4915_v49, %v4914_v47 }
 0x4f7   : > { %v4248_v34 = vadd.f32 %v4247_v8, %v4138_v33  ;;  %v13604_v7 = vpop.f32.mrf.mxu0  ;;  %v5517_v8 = vrot.slane %v10701_v44, 5 }
 0x4f8   : > { %v4359_v26 = vpop.f32.mrf.mxu3  ;;  %16838 = vst [vmem:[#allocation37_spill] sm:$0xff] %v13604_v7 }
 0x4f9   : > { %v13602_v25 = vadd.f32 %v4359_v26, %v4246_v1  ;;  %16839 = vst [vmem:[#allocation14_spill] sm:$0xff] %v13606_v0  ;;  %v10591_v1 = vld [vmem:[#allocation2 + $0xcc] sm:$0xff]  ;;  %v10702_v26 = vld [vmem:[#allocation2 + $0x14] sm:$0x1] }
 0x4fa   : > { %v5527_v33 = vrot.slane %v10702_v26, 5  ;;  %v5525_v26 = vsel %vm11443_vm14, %v10092_v24, %v5524_v57  ;;  %v5451_v24 = vld [vmem:[#allocation2 + $0x18] sm:$0xe] }
 0x4fb   : > { %16837 = vst [vmem:[#allocation27_spill] sm:$0xff] %v13602_v25 }
 0x4fc   : > { %v4252_v13 = vpop.f32.mrf.mxu2  ;;  %v5528_v44 = vsel %vm11443_vm14, %v5526_v43, %v5527_v33 }
 0x4fd   : > { %v5635_v39 = vunpack.c.l.b16 %v5528_v44 }
 0x4fe   : > { %v4141_v50 = vpop.f32.mrf.mxu1 }
 0x4ff   : > { %v4251_v18 = vadd.f32 %v4250_v35, %v4141_v50  ;;  %v10703_v50 = vld [vmem:[#allocation2 + $0x8] sm:$0x1]  ;;  %v13616_v47 = vpop.f32.mrf.mxu0 }
 0x500   : > { %v4361_v52 = vpop.f32.mrf.mxu3  ;;  %v5520_v35 = vrot.slane %v10703_v50, 5  ;;  %16841 = vst [vmem:[#allocation6_spill] sm:$0xff] %v13616_v47  ;;  %v5634_v50 = vunpack.c.l.b16 %v5525_v26 }
 0x501   : > { %v13608_v23 = vadd.f32 %v4361_v52, %v4248_v34  ;;  %9946 = vmatmul.msk.bf16.gmra.mxu1 %vm1028_vm6, %v10590_v16  ;;  %10075 = vmatmul.msk.bf16.vlgmr.msrb.gmra.mxu2 %vm1028_vm6, %v13347_v54  ;;  %v5519_v34 = vrot.slane %v5517_v8, 4 }
 0x502   : > { %10034 = vmatmul.msk.bf16.gmra.mxu0 %vm1028_vm6, %v13606_v0  ;;  %v5665_v3 = vpack.c.b16 %v5635_v39, %v5634_v50 }
 0x503   : > { %16840 = vst [vmem:[#allocation9_spill] sm:$0xff] %v13608_v23  ;;  %v5521_v10 = vsel %vm11443_vm14, %v5519_v34, %v5520_v35  ;;  %v10093_v35 = vrot.slane %v5451_v24, 9 }
 0x504   : > { %v4255_v52 = vpop.f32.mrf.mxu2  ;;  %v5633_v25 = vunpack.c.l.b16 %v5521_v10 }
 0x505   : > { %10006 = vmatmul.msk.bf16.gmra.mxu3 %vm1028_vm6, %v10591_v1  ;;  %v5518_v1 = vsel %vm11443_vm14, %v10091_v6, %v5517_v8 }
 0x506   : > { %v4143_v16 = vpop.f32.mrf.mxu1  ;;  %v5632_v47 = vunpack.c.l.b16 %v5518_v1 }
 0x507   : > { %v4253_v23 = vadd.f32 %v4252_v13, %v4143_v16  ;;  %v13628_v13 = vpop.f32.mrf.mxu0  ;;  %v10705_v16 = vld [vmem:[#allocation2 + $0x20] sm:$0x1] }
 0x508   : > { %v4364_v49 = vpop.f32.mrf.mxu3  ;;  %v5664_v8 = vpack.c.b16 %v5633_v25, %v5632_v47  ;;  %v5534_v44 = vrot.slane %v10705_v16, 5 }
 0x509   : > { %v13620_v7 = vadd.f32 %v4364_v49, %v4251_v18  ;;  %v10704_v18 = vld [vmem:[#allocation2 + $0x1c] sm:$0xf] }
 0x50a   : > { %v5531_v33 = vrot.slane %v10704_v18, 5 }
 0x50c   : > { %v4257_v42 = vpop.f32.mrf.mxu2  ;;  %v5533_v6 = vrot.slane %v5531_v33, 4 }
 0x50e   : > { %v4146_v43 = vpop.f32.mrf.mxu1 }
 0x50f   : > { %v4256_v57 = vadd.f32 %v4255_v52, %v4146_v43  ;;  %v5535_v52 = vsel %vm11443_vm14, %v5533_v6, %v5534_v44  ;;  %v13644_v26 = vpop.f32.mrf.mxu0 }
 0x510   : > { %v4366_v0 = vpop.f32.mrf.mxu3  ;;  %16843 = vst [vmem:[#allocation10_spill] sm:$0xff] %v13644_v26  ;;  %v5637_v1 = vunpack.c.l.b16 %v5535_v52 }
 0x511   : > { %v13630_v49 = vadd.f32 %v4366_v0, %v4253_v23  ;;  %10047 = vmatmul.msk.bf16.vlgmr.msrb.gmra.mxu1 %vm1028_vm6, %v13292_v14  ;;  %10076 = vmatmul.msk.bf16.gmra.mxu2 %vm1028_vm6, %v13360_v20  ;;  %v5532_v14 = vsel %vm11443_vm14, %v10093_v35, %v5531_v33  ;;  %v5452_v33 = vld [vmem:[#allocation2 + $0x24] sm:$0xe] }
 0x512   : > { %10148 = vmatmul.msk.bf16.vlgmr.msra.gmra.mxu0 %vm1028_vm6, %v5665_v3  ;;  %v5636_v10 = vunpack.c.l.b16 %v5532_v14  ;;  %v10094_v44 = vrot.slane %v5452_v33, 9 }
 0x514   : > { %v4260_v34 = vpop.f32.mrf.mxu2  ;;  %v13646_v50 = vpack.c.b16 %v5637_v1, %v5636_v10 }
 0x515   : > { %10119 = vmatmul.msk.bf16.vlgmr.msra.gmra.mxu3 %vm1028_vm6, %v5664_v8  ;;  %v10706_v8 = vld [vmem:[#allocation2 + $0x28] sm:$0xf] }
 0x516   : > { %v4148_v0 = vpop.f32.mrf.mxu1  ;;  %v5538_v24 = vrot.slane %v10706_v8, 5 }
 0x517   : > { %v4258_v47 = vadd.f32 %v4257_v42, %v4148_v0  ;;  %v13656_v6 = vpop.f32.mrf.mxu0 }
 0x518   : > { %v4369_v23 = vpop.f32.mrf.mxu3  ;;  %16845 = vst [vmem:[#allocation18_spill] sm:$0xff] %v13656_v6  ;;  %v5539_v1 = vsel %vm11443_vm14, %v10094_v44, %v5538_v24  ;;  %v10708_v6 = vld [vmem:[#allocation2 + $0x34] sm:$0xf] }
 0x519   : > { %v13640_v25 = vadd.f32 %v4369_v23, %v4256_v57  ;;  %v5540_v57 = vrot.slane %v5538_v24, 4  ;;  %v10707_v23 = vld [vmem:[#allocation2 + $0x2c] sm:$0x1]  ;;  %v5453_v24 = vld [vmem:[#allocation2 + $0x30] sm:$0xe] }
 0x51a   : > { %v5541_v0 = vrot.slane %v10707_v23, 5  ;;  %v10095_v44 = vrot.slane %v5453_v24, 9 }
 0x51c   : > { %v4262_v39 = vpop.f32.mrf.mxu2 }
 0x51e   : > { %v4151_v18 = vpop.f32.mrf.mxu1 }
 0x51f   : > { %v4261_v42 = vadd.f32 %v4260_v34, %v4151_v18  ;;  %v5542_v34 = vsel %vm11443_vm14, %v5540_v57, %v5541_v0  ;;  %v13665_v8 = vpop.f32.mrf.mxu0 }
 0x520   : > { %v4371_v43 = vpop.f32.mrf.mxu3  ;;  %v5639_v10 = vunpack.c.l.b16 %v5542_v34  ;;  %16847 = vst [vmem:[#allocation38_spill] sm:$0xff] %v13665_v8 }
 0x521   : > { %v13648_v16 = vadd.f32 %v4371_v43, %v4258_v47  ;;  %10048 = vmatmul.msk.bf16.gmra.mxu1 %vm1028_vm6, %v13347_v54  ;;  %10077 = vmatmul.msk.bf16.gmra.mxu2 %vm1028_vm6, %v13371_v45  ;;  %v5638_v43 = vunpack.c.l.b16 %v5539_v1 }
 0x522   : > { %10149 = vmatmul.msk.bf16.gmra.mxu0 %vm1028_vm6, %v13646_v50 }
 0x523   : > { %16844 = vst [vmem:[#allocation17_spill] sm:$0xff] %v13648_v16  ;;  %v5545_v16 = vrot.slane %v10708_v6, 5  ;;  %v10709_v6 = vld [vmem:[#allocation2 + $0x38] sm:$0x1] }
 0x524   : > { %v4265_v35 = vpop.f32.mrf.mxu2  ;;  %v5548_v0 = vrot.slane %v10709_v6, 5 }
 0x525   : > { %10120 = vmatmul.msk.bf16.gmra.mxu3 %vm1028_vm6, %v5665_v3  ;;  %v13667_v3 = vpack.c.b16 %v5639_v10, %v5638_v43  ;;  %v5546_v1 = vsel %vm11443_vm14, %v10095_v44, %v5545_v16 }
 0x526   : > { %v4153_v47 = vpop.f32.mrf.mxu1  ;;  %v5640_v43 = vunpack.c.l.b16 %v5546_v1 }
 0x527   : > { %v4263_v54 = vadd.f32 %v4262_v39, %v4153_v47  ;;  %v13681_v34 = vpop.f32.mrf.mxu0 }
 0x528   : > { %v4374_v52 = vpop.f32.mrf.mxu3  ;;  %16849 = vst [vmem:[#allocation13_spill] sm:$0xff] %v13681_v34 }
 0x529   : > { %v13661_v14 = vadd.f32 %v4374_v52, %v4261_v42  ;;  %v5547_v42 = vrot.slane %v5545_v16, 4  ;;  %v5454_v16 = vld [vmem:[#allocation2 + $0x3c] sm:$0xe] }
 0x52a   : > { %v10096_v44 = vrot.slane %v5454_v16, 9 }
 0x52b   : > { %16846 = vst [vmem:[#allocation31_spill] sm:$0xff] %v13661_v14 }
 0x52c   : > { %v4267_v18 = vpop.f32.mrf.mxu2 }
 0x52e   : > { %v4156_v23 = vpop.f32.mrf.mxu1 }
 0x52f   : > { %v4266_v39 = vadd.f32 %v4265_v35, %v4156_v23  ;;  %v5549_v35 = vsel %vm11443_vm14, %v5547_v42, %v5548_v0  ;;  %v13693_v42 = vpop.f32.mrf.mxu0  ;;  %v10711_v0 = vld [vmem:[#allocation2 + $0x44] sm:$0x1] }
 0x530   : > { %v4376_v33 = vpop.f32.mrf.mxu3  ;;  %v5641_v10 = vunpack.c.l.b16 %v5549_v35  ;;  %16852 = vst [vmem:[#allocation19_spill] sm:$0xff] %v13693_v42  ;;  %v10712_v42 = vld [vmem:[#allocation2 + $0x4c] sm:$0xf] }
 0x531   : > { %v13669_v26 = vadd.f32 %v4376_v33, %v4263_v54  ;;  %10049 = vmatmul.msk.bf16.gmra.mxu1 %vm1028_vm6, %v13360_v20  ;;  %10078 = vmatmul.msk.bf16.gmra.mxu2 %vm1028_vm6, %v13382_v48 }
 0x532   : > { %10150 = vmatmul.msk.bf16.gmra.mxu0 %vm1028_vm6, %v13667_v3  ;;  %v13687_v23 = vpack.c.b16 %v5641_v10, %v5640_v43 }
 0x533   : > { %16848 = vst [vmem:[#allocation35_spill] sm:$0xff] %v13669_v26  ;;  %v10710_v26 = vld [vmem:[#allocation2 + $0x40] sm:$0xf] }
 0x534   : > { %v4270_v57 = vpop.f32.mrf.mxu2  ;;  %v5552_v8 = vrot.slane %v10710_v26, 5 }
 0x535   : > { %10121 = vmatmul.msk.bf16.gmra.mxu3 %vm1028_vm6, %v13646_v50 }
 0x536   : > { %v4158_v47 = vpop.f32.mrf.mxu1  ;;  %v5553_v1 = vsel %vm11443_vm14, %v10096_v44, %v5552_v8 }
 0x537   : > { %v4268_v54 = vadd.f32 %v4267_v18, %v4158_v47  ;;  %v5554_v18 = vrot.slane %v5552_v8, 4  ;;  %v13707_v43 = vpop.f32.mrf.mxu0  ;;  %v5455_v8 = vld [vmem:[#allocation2 + $0x48] sm:$0xe] }
 0x538   : > { %v4379_v52 = vpop.f32.mrf.mxu3  ;;  %16854 = vst [vmem:[#allocation39_spill] sm:$0xff] %v13707_v43  ;;  %v10097_v44 = vrot.slane %v5455_v8, 9 }
 0x539   : > { %v13683_v20 = vadd.f32 %v4379_v52, %v4266_v39  ;;  %v5555_v52 = vrot.slane %v10711_v0, 5 }
 0x53b   : > { %16850 = vst [vmem:[#allocation23_spill] sm:$0xff] %v13683_v20  ;;  %v5559_v20 = vrot.slane %v10712_v42, 5  ;;  %v10713_v42 = vld [vmem:[#allocation2 + $0x50] sm:$0x1] }
 0x53c   : > { %v4272_v33 = vpop.f32.mrf.mxu2 }
 0x53e   : > { %v4161_v6 = vpop.f32.mrf.mxu1 }
 0x53f   : > { %v4271_v39 = vadd.f32 %v4270_v57, %v4161_v6  ;;  %v5556_v57 = vsel %vm11443_vm14, %v5554_v18, %v5555_v52  ;;  %v5562_v52 = vrot.slane %v10713_v42, 5 }
 0x540   : > { %v4381_v24 = vpop.f32.mrf.mxu3  ;;  %v5643_v10 = vunpack.c.l.b16 %v5556_v57 }
 0x541   : > { %v13689_v14 = vadd.f32 %v4381_v24, %v4268_v54  ;;  %10050 = vmatmul.msk.bf16.gmra.mxu1 %vm1028_vm6, %v13371_v45  ;;  %10079 = vmatmul.msk.bf16.gmra.mxu2 %vm1028_vm6, %v13393_v27  ;;  %v5642_v24 = vunpack.c.l.b16 %v5553_v1  ;;  %v5560_v1 = vsel %vm11443_vm14, %v10097_v44, %v5559_v20  ;;  %v10715_v44 = vld [vmem:[#allocation2 + $0x5c] sm:$0x1] }
 0x542   : > { %10151 = vmatmul.msk.bf16.gmra.mxu0 %vm1028_vm6, %v13687_v23 }
 0x543   : > { %16851 = vst [vmem:[#allocation16_spill] sm:$0xff] %v13689_v14  ;;  %v13709_v14 = vpack.c.b16 %v5643_v10, %v5642_v24  ;;  %v5644_v24 = vunpack.c.l.b16 %v5560_v1 }
 0x544   : > { %v4275_v26 = vpop.f32.mrf.mxu2 }
 0x545   : > { %10122 = vmatmul.msk.bf16.gmra.mxu3 %vm1028_vm6, %v13667_v3 }
 0x546   : > { %v4163_v35 = vpop.f32.mrf.mxu1 }
 0x547   : > { %v4273_v45 = vadd.f32 %v4272_v33, %v4163_v35 }
 0x548   : > { %v4384_v47 = vpop.f32.mrf.mxu3 }
 0x549   : > { %v13703_v54 = vadd.f32 %v4384_v47, %v4271_v39  ;;  %v5561_v39 = vrot.slane %v5559_v20, 4  ;;  %v13721_v47 = vpop.f32.mrf.mxu0  ;;  %v5456_v20 = vld [vmem:[#allocation2 + $0x54] sm:$0xe] }
 0x54a   : > { %16856 = vst [vmem:[#allocation41_spill] sm:$0xff] %v13721_v47 }
 0x54b   : > { %16853 = vst [vmem:[#allocation26_spill] sm:$0xff] %v13703_v54 }
 0x54c   : > { %v4277_v6 = vpop.f32.mrf.mxu2 }
 0x54e   : > { %v4166_v0 = vpop.f32.mrf.mxu1 }
 0x54f   : > { %v4276_v33 = vadd.f32 %v4275_v26, %v4166_v0  ;;  %v5563_v26 = vsel %vm11443_vm14, %v5561_v39, %v5562_v52  ;;  %v10098_v39 = vrot.slane %v5456_v20, 9  ;;  %v5569_v52 = vrot.slane %v10715_v44, 5 }
 0x550   : > { %v4386_v16 = vpop.f32.mrf.mxu3  ;;  %v5645_v10 = vunpack.c.l.b16 %v5563_v26 }
 0x551   : > { %v13711_v34 = vadd.f32 %v4386_v16, %v4273_v45  ;;  %10051 = vmatmul.msk.bf16.gmra.mxu1 %vm1028_vm6, %v13382_v48  ;;  %10080 = vmatmul.msk.bf16.gmra.mxu2 %vm1028_vm6, %v13405_v46  ;;  %v13731_v54 = vpop.f32.mrf.mxu0 }
 0x552   : > { %10152 = vmatmul.msk.bf16.gmra.mxu0 %vm1028_vm6, %v13709_v14  ;;  %v13729_v0 = vpack.c.b16 %v5645_v10, %v5644_v24  ;;  %16859 = vst [vmem:[#allocation44_spill] sm:$0xff] %v13731_v54 }
 0x553   : > { %16855 = vst [vmem:[#allocation40_spill] sm:$0xff] %v13711_v34  ;;  %v10714_v34 = vld [vmem:[#allocation2 + $0x58] sm:$0xf] }
 0x554   : > { %v4280_v18 = vpop.f32.mrf.mxu2  ;;  %16858 = vst [vmem:[#allocation43_spill] sm:$0xff] %v13729_v0  ;;  %v5566_v47 = vrot.slane %v10714_v34, 5 }
 0x555   : > { %10123 = vmatmul.msk.bf16.gmra.mxu3 %vm1028_vm6, %v13687_v23 }
 0x556   : > { %v4168_v57 = vpop.f32.mrf.mxu1 }
 0x557   : > { %v4278_v45 = vadd.f32 %v4277_v6, %v4168_v57 }
 0x558   : > { %v4389_v35 = vpop.f32.mrf.mxu3 }
 0x559   : > { %v13725_v48 = vadd.f32 %v4389_v35, %v4276_v33  ;;  %v5568_v33 = vrot.slane %v5566_v47, 4  ;;  %v13749_v1 = vpop.f32.mrf.mxu0 }
 0x55b   : > { %16857 = vst [vmem:[#allocation42_spill] sm:$0xff] %v13725_v48 }
 0x55c   : > { %v4282_v16 = vpop.f32.mrf.mxu2 }
 0x55e   : > { %v4171_v42 = vpop.f32.mrf.mxu1 }
 0x55f   : > { %v4281_v6 = vadd.f32 %v4280_v18, %v4171_v42  ;;  %v5570_v18 = vsel %vm11443_vm14, %v5568_v33, %v5569_v52  ;;  %v5576_v52 = vrot.slane %v13407_v37, 5 }
 0x560   : > { %v4391_v8 = vpop.f32.mrf.mxu3  ;;  %v5647_v10 = vunpack.c.l.b16 %v5570_v18 }
 0x561   : > { %v13733_v43 = vadd.f32 %v4391_v8, %v4278_v45  ;;  %10052 = vmatmul.msk.bf16.gmra.mxu1 %vm1028_vm6, %v13393_v27  ;;  %10081 = vmatmul.msk.bf16.gmra.mxu2 %vm1028_vm6, %v13421_v5  ;;  %v5567_v45 = vsel %vm11443_vm14, %v10098_v39, %v5566_v47  ;;  %v5457_v47 = vld [vmem:[#allocation2 + $0x60] sm:$0xe]  ;;  %v13761_v33 = vpop.f32.mrf.mxu0 }
 0x562   : > { %10153 = vmatmul.msk.bf16.gmra.mxu0 %vm1028_vm6, %v13729_v0  ;;  %v5646_v24 = vunpack.c.l.b16 %v5567_v45  ;;  %16863 = vst [vmem:[#allocation48_spill] sm:$0xff] %v13761_v33  ;;  %v10099_v39 = vrot.slane %v5457_v47, 9 }
 0x563   : > { %16860 = vst [vmem:[#allocation45_spill] sm:$0xff] %v13733_v43  ;;  %v10716_v43 = vld [vmem:[#allocation2 + $0x64] sm:$0xf] }
 0x564   : > { %v4285_v34 = vpop.f32.mrf.mxu2  ;;  %v13751_v42 = vpack.c.b16 %v5647_v10, %v5646_v24  ;;  %v5573_v48 = vrot.slane %v10716_v43, 5 }
 0x565   : > { %10124 = vmatmul.msk.bf16.gmra.mxu3 %vm1028_vm6, %v13709_v14 }
 0x566   : > { %v4173_v57 = vpop.f32.mrf.mxu1  ;;  %v5574_v45 = vsel %vm11443_vm14, %v10099_v39, %v5573_v48 }
 0x567   : > { %v4283_v27 = vadd.f32 %v4282_v16, %v4173_v57  ;;  %v5648_v24 = vunpack.c.l.b16 %v5574_v45 }
 0x568   : > { %v4394_v35 = vpop.f32.mrf.mxu3 }
 0x569   : > { %v13745_v26 = vadd.f32 %v4394_v35, %v4281_v6  ;;  %v5575_v6 = vrot.slane %v5573_v48, 4  ;;  %v10608_v35 = vld [vmem:[%s10917_s11 + $0x110] sm:$0xff]  ;;  %v5458_v48 = vld [vmem:[#allocation2 + $0x6c] sm:$0xe] }
 0x56a   : > { %6055 = vmatpush.bf16.msra.mxu1 %v10608_v35  ;;  %v10100_v39 = vrot.slane %v5458_v48, 9  ;;  %v5587_v48 = vrot.slane %v13433_v4, 5 }
 0x56b   : > { %16861 = vst [vmem:[#allocation46_spill] sm:$0xff] %v13745_v26  ;;  %v10717_v26 = vld [vmem:[#allocation2 + $0x70] sm:$0xf] }
 0x56c   : > { %v4287_v8 = vpop.f32.mrf.mxu2  ;;  %v5580_v33 = vrot.slane %v10717_v26, 5  ;;  %v5583_v26 = vrot.slane %v13423_v15, 5  ;;  %v5081_v15 = vadd.f32 %v13419_v41, %v13441_v59  ;;  %v5459_v41 = vld [vmem:[#allocation2 + $0x78] sm:$0xe]  ;;  %v5589_v59 = vrot.slane %v5587_v48, 4 }
 0x56e   : > { %v4176_v44 = vpop.f32.mrf.mxu1 }
 0x56f   : > { %v4286_v16 = vadd.f32 %v4285_v34, %v4176_v44  ;;  %v13773_v44 = vpop.f32.mrf.mxu0 }
 0x570   : > { %v4396_v20 = vpop.f32.mrf.mxu3 }
 0x571   : > { %v13753_v54 = vadd.f32 %v4396_v20, %v4283_v27  ;;  %10053 = vmatmul.msk.bf16.gmra.mxu1 %vm1028_vm6, %v13405_v46  ;;  %10082 = vmatmul.msk.bf16.gmra.mxu2 %vm1028_vm6, %v13445_v21  ;;  %v5577_v46 = vsel %vm11443_vm14, %v5575_v6, %v5576_v52 }
 0x572   : > { %10154 = vmatmul.msk.bf16.gmra.mxu0 %vm1028_vm6, %v13751_v42  ;;  %v5649_v10 = vunpack.c.l.b16 %v5577_v46 }
 0x573   : > { %16862 = vst [vmem:[#allocation47_spill] sm:$0xff] %v13753_v54 }
 0x574   : > { %v4290_v43 = vpop.f32.mrf.mxu2  ;;  %v13775_v47 = vpack.c.b16 %v5649_v10, %v5648_v24 }
 0x575   : > { %10125 = vmatmul.msk.bf16.gmra.mxu3 %vm1028_vm6, %v13729_v0 }
 0x576   : > { %v4178_v34 = vpop.f32.mrf.mxu1 }
 0x577   : > { %v4288_v27 = vadd.f32 %v4287_v8, %v4178_v34  ;;  %v5581_v34 = vsel %vm11443_vm14, %v10100_v39, %v5580_v33  ;;  %v10101_v39 = vrot.slane %v5459_v41, 9 }
 0x578   : > { %v4399_v57 = vpop.f32.mrf.mxu3 }
 0x579   : > { %v13769_v18 = vadd.f32 %v4399_v57, %v4286_v16  ;;  %v5582_v16 = vrot.slane %v5580_v33, 4 }
 0x57c   : > { %v4292_v20 = vpop.f32.mrf.mxu2 }
 0x57e   : > { %v4181_v54 = vpop.f32.mrf.mxu1 }
 0x57f   : > { %v4291_v8 = vadd.f32 %v4290_v43, %v4181_v54  ;;  %v5584_v54 = vsel %vm11443_vm14, %v5582_v16, %v5583_v26  ;;  %v13790_v43 = vpop.f32.mrf.mxu0  ;;  %v5590_v26 = vrot.slane %v13447_v31, 5  ;;  %v5083_v31 = vadd.f32 %v13443_v36, %v13467_v38 }
 0x580   : > { %v4401_v37 = vpop.f32.mrf.mxu3  ;;  %v5651_v46 = vunpack.c.l.b16 %v5584_v54  ;;  %v5597_v38 = vrot.slane %v13473_v53, 5 }
 0x581   : > { %v13777_v0 = vadd.f32 %v4401_v37, %v4288_v27  ;;  %10054 = vmatmul.msk.bf16.gmra.mxu1 %vm1028_vm6, %v13421_v5  ;;  %10083 = vmatmul.msk.bf16.gmra.mxu2 %vm1028_vm6, %v13471_v2  ;;  %v5650_v27 = vunpack.c.l.b16 %v5581_v34  ;;  %v5591_v54 = vsel %vm11443_vm14, %v5589_v59, %v5590_v26 }
 0x582   : > { %10155 = vmatmul.msk.bf16.gmra.mxu0 %vm1028_vm6, %v13775_v47 }
 0x583   : > { %v13796_v10 = vpack.c.b16 %v5651_v46, %v5650_v27  ;;  %v5653_v46 = vunpack.c.l.b16 %v5591_v54 }
 0x584   : > { %v5337_v6 = vpop.f32.mrf.mxu2 }
 0x585   : > { %10126 = vmatmul.msk.bf16.gmra.mxu3 %vm1028_vm6, %v13751_v42 }
 0x586   : > { %v4183_v35 = vpop.f32.mrf.mxu1 }
 0x587   : > { %v4293_v57 = vadd.f32 %v4292_v20, %v4183_v35 }
 0x588   : > { %v4404_v52 = vpop.f32.mrf.mxu3 }
 0x589   : > { %v13792_v5 = vadd.f32 %v4404_v52, %v4291_v8  ;;  %v13805_v8 = vpop.f32.mrf.mxu0 }
 0x58c   : > { %v5339_v45 = vpop.f32.mrf.mxu2 }
 0x58e   : > { %v5169_v37 = vpop.f32.mrf.mxu1 }
 0x58f   : > { %v5249_v20 = vadd.f32 %v5169_v37, %v5081_v15 }
 0x590   : > { %v4406_v24 = vpop.f32.mrf.mxu3 }
 0x591   : > { %v13801_v16 = vadd.f32 %v4406_v24, %v4293_v57  ;;  %10055 = vmatmul.msk.bf16.gmra.mxu1 %vm1028_vm6, %v13445_v21  ;;  %10084 = vmatmul.msk.bf16.gmra.mxu2 %vm1028_vm6, %v13497_v63  ;;  %v5417_v33 = vadd.f32 %v5337_v6, %v5249_v20  ;;  %v5588_v6 = vsel %vm11443_vm14, %v10101_v39, %v5587_v48  ;;  %v13821_v27 = vpop.f32.mrf.mxu0  ;;  %v5460_v48 = vld [vmem:[#allocation2 + $0x84] sm:$0xe] }
 0x592   : > { %10156 = vmatmul.msk.bf16.gmra.mxu0 %vm1028_vm6, %v13796_v10  ;;  %v5652_v15 = vunpack.c.l.b16 %v5588_v6 }
 0x594   : > { %v5342_v4 = vpop.f32.mrf.mxu2  ;;  %v13823_v37 = vpack.c.b16 %v5653_v46, %v5652_v15 }
 0x595   : > { %10127 = vmatmul.msk.bf16.gmra.mxu3 %vm1028_vm6, %v13775_v47 }
 0x596   : > { %v5171_v35 = vpop.f32.mrf.mxu1 }
 0x597   : > { %v5250_v21 = vadd.f32 %v5171_v35, %v13550_v32 }
 0x598   : > { %v5749_v52 = vpop.f32.mrf.mxu3 }
 0x599   : > { %v13816_v57 = vadd.f32 %v5749_v52, %v5417_v33  ;;  %v5418_v34 = vadd.f32 %v5339_v45, %v5250_v21  ;;  %v5594_v33 = vrot.slane %v13457_v29, 5  ;;  %v10102_v29 = vrot.slane %v5460_v48, 9  ;;  %v13839_v26 = vpop.f32.mrf.mxu0 }
 0x59a   : > { %v5084_v52 = vadd.f32 %v13459_v22, %v13475_v56  ;;  %v5085_v22 = vadd.f32 %v13469_v62, %v13493_v28  ;;  %v5461_v62 = vld [vmem:[#allocation2 + $0x90] sm:$0xe] }
 0x59b   : > { %v5596_v39 = vrot.slane %v5594_v33, 4  ;;  %v5595_v6 = vsel %vm11443_vm14, %v10102_v29, %v5594_v33  ;;  %v10103_v48 = vrot.slane %v5461_v62, 9  ;;  %v5086_v29 = vadd.f32 %v13485_v51, %v13501_v40  ;;  %v16868_v62 = vld [vmem:[#allocation29_spill] sm:$0xff] }
 0x59c   : > { %v5344_v24 = vpop.f32.mrf.mxu2  ;;  %v5654_v15 = vunpack.c.l.b16 %v5595_v6  ;;  %v5087_v51 = vadd.f32 %v13495_v55, %v13519_v11 }
 0x59d   : > { %v5598_v54 = vsel %vm11443_vm14, %v5596_v39, %v5597_v38  ;;  %v5604_v39 = vrot.slane %v13499_v19, 5 }
 0x59e   : > { %v5174_v41 = vpop.f32.mrf.mxu1  ;;  %v5655_v46 = vunpack.c.l.b16 %v5598_v54 }
 0x59f   : > { %v5251_v32 = vadd.f32 %v5174_v41, %v5083_v31  ;;  %v5601_v41 = vrot.slane %v13483_v12, 5 }
 0x5a0   : > { %v5751_v20 = vpop.f32.mrf.mxu3  ;;  %v13849_v31 = vpack.c.b16 %v5655_v46, %v5654_v15 }
 0x5a1   : > { %v13828_v59 = vadd.f32 %v5751_v20, %v5418_v34  ;;  %10056 = vmatmul.msk.bf16.gmra.mxu1 %vm1028_vm6, %v13471_v2  ;;  %10085 = vmatmul.msk.bf16.gmra.mxu2 %vm1028_vm6, %v13523_v58  ;;  %v5419_v45 = vadd.f32 %v5342_v4, %v5251_v32  ;;  %v13854_v32 = vpop.f32.mrf.mxu0  ;;  %v5603_v28 = vrot.slane %v5601_v41, 4 }
 0x5a2   : > { %10157 = vmatmul.msk.bf16.gmra.mxu0 %vm1028_vm6, %v13823_v37 }
 0x5a4   : > { %v5347_v36 = vpop.f32.mrf.mxu2 }
 0x5a5   : > { %10128 = vmatmul.msk.bf16.gmra.mxu3 %vm1028_vm6, %v13796_v10 }
 0x5a6   : > { %v5176_v2 = vpop.f32.mrf.mxu1 }
 0x5a7   : > { %v5252_v21 = vadd.f32 %v5176_v2, %v5084_v52  ;;  %v5602_v2 = vsel %vm11443_vm14, %v10103_v48, %v5601_v41  ;;  %v5462_v41 = vld [vmem:[#allocation2 + $0x9c] sm:$0xe] }
 0x5a8   : > { %v5754_v35 = vpop.f32.mrf.mxu3 }
 0x5a9   : > { %v13845_v4 = vadd.f32 %v5754_v35, %v5419_v45  ;;  %v5420_v34 = vadd.f32 %v5344_v24, %v5252_v21  ;;  %v13875_v54 = vpop.f32.mrf.mxu0 }
 0x5ac   : > { %v5349_v53 = vpop.f32.mrf.mxu2 }
 0x5ae   : > { %v5179_v20 = vpop.f32.mrf.mxu1 }
 0x5af   : > { %v5253_v24 = vadd.f32 %v5179_v20, %v5085_v22  ;;  %v5608_v22 = vrot.slane %v13509_v60, 5  ;;  %v10104_v60 = vrot.slane %v5462_v41, 9 }
 0x5b0   : > { %v5756_v56 = vpop.f32.mrf.mxu3 }
 0x5b1   : > { %v13856_v45 = vadd.f32 %v5756_v56, %v5420_v34  ;;  %10057 = vmatmul.msk.bf16.gmra.mxu1 %vm1028_vm6, %v13497_v63  ;;  %10086 = vmatmul.msk.bf16.gmra.mxu2 %vm1028_vm6, %v13554_v61  ;;  %v5421_v33 = vadd.f32 %v5347_v36, %v5253_v24  ;;  %v5605_v63 = vsel %vm11443_vm14, %v5603_v28, %v5604_v39  ;;  %v5656_v34 = vunpack.c.l.b16 %v5602_v2  ;;  %v13890_v55 = vpop.f32.mrf.mxu0  ;;  %v16869_v28 = vld [vmem:[#allocation20_spill] sm:$0xff] }
 0x5b2   : > { %10158 = vmatmul.msk.bf16.gmra.mxu0 %vm1028_vm6, %v13849_v31  ;;  %v5657_v6 = vunpack.c.l.b16 %v5605_v63  ;;  %v5610_v24 = vrot.slane %v5608_v22, 4  ;;  %v5088_v48 = vadd.f32 %v16869_v28, %v16868_v62  ;;  %v4489_v39 = vld [vmem:[#allocation2 + $0xc0] sm:$0xf] }
 0x5b3   : > { %16864 = vst [vmem:[#allocation49_spill] sm:$0xff] %v13856_v45  ;;  %v5114_v2 = vshrl.u32 %v4489_v39, 16 }
 0x5b4   : > { %v5352_v12 = vpop.f32.mrf.mxu2  ;;  %v13877_v46 = vpack.c.b16 %v5657_v6, %v5656_v34 }
 0x5b5   : > { %10129 = vmatmul.msk.bf16.gmra.mxu3 %vm1028_vm6, %v13823_v37 }
 0x5b6   : > { %v5181_v52 = vpop.f32.mrf.mxu1  ;;  %16866 = vst [vmem:[#allocation51_spill] sm:$0xff] %v13877_v46 }
 0x5b7   : > { %v5254_v36 = vadd.f32 %v5181_v52, %v5086_v29  ;;  %v13897_v29 = vld [vmem:[#allocation2 + $0xc4] sm:$0xf] }
 0x5b8   : > { %v5759_v38 = vpop.f32.mrf.mxu3  ;;  %v5127_v6 = vshrl.u32 %v13897_v29, 16 }
 0x5b9   : > { %v13871_v35 = vadd.f32 %v5759_v38, %v5421_v33  ;;  %v5422_v21 = vadd.f32 %v5349_v53, %v5254_v36  ;;  %v5611_v33 = vrot.slane %v13525_v9, 5  ;;  %v5609_v36 = vsel %vm11443_vm14, %v10104_v60, %v5608_v22  ;;  %v16872_v22 = vld [vmem:[#allocation12_spill] sm:$0xff]  ;;  %v16873_v60 = vld [vmem:[#allocation21_spill] sm:$0xff] }
 0x5ba   : > { %v5123_v9 = vshll.u32 %v13897_v29, 16  ;;  %v5089_v28 = vadd.f32 %v16873_v60, %v16872_v22  ;;  %v16877_v60 = vld [vmem:[#allocation7_spill] sm:$0xff] }
 0x5bb   : > { %16865 = vst [vmem:[#allocation50_spill] sm:$0xff] %v13871_v35  ;;  %v16893_v35 = vld [vmem:[#allocation15_spill] sm:$0xff] }
 0x5bc   : > { %v5354_v19 = vpop.f32.mrf.mxu2 }
 0x5be   : > { %v5184_v15 = vpop.f32.mrf.mxu1 }
 0x5bf   : > { %v5255_v20 = vadd.f32 %v5184_v15, %v5087_v51 }
 0x5c0   : > { %v5761_v40 = vpop.f32.mrf.mxu3 }
 0x5c1   : > { %v13882_v56 = vadd.f32 %v5761_v40, %v5422_v21  ;;  %10058 = vmatmul.msk.bf16.gmra.mxu1 %vm1028_vm6, %v13523_v58  ;;  %10087 = vmatmul.msk.bf16.gmra.mxu2 %vm1028_vm6, %v13582_v17  ;;  %v5423_v53 = vadd.f32 %v5352_v12, %v5255_v20  ;;  %v5612_v12 = vsel %vm11443_vm14, %v5610_v24, %v5611_v33  ;;  %v5117_v21 = vshll.u32 %v4489_v39, 16  ;;  %v13909_v33 = vpop.f32.mrf.mxu0 }
 0x5c2   : > { %10159 = vmatmul.msk.bf16.gmra.mxu0 %vm1028_vm6, %v13877_v46  ;;  %v5659_v51 = vunpack.c.l.b16 %v5612_v12  ;;  %v5658_v40 = vunpack.c.l.b16 %v5609_v36  ;;  %v5116_v20 = vrot.slane %v5114_v2, 4  ;;  %v5125_v24 = vrot.slane %v5123_v9, 5 }
 0x5c3   : > { %16867 = vst [vmem:[#allocation52_spill] sm:$0xff] %v13882_v56  ;;  %v5119_v41 = vrot.slane %v5117_v21, 5  ;;  %v16876_v21 = vld [vmem:[#allocation14_spill] sm:$0xff] }
 0x5c4   : > { %v5357_v11 = vpop.f32.mrf.mxu2  ;;  %v13911_v62 = vpack.c.b16 %v5659_v51, %v5658_v40 }
 0x5c5   : > { %10130 = vmatmul.msk.bf16.gmra.mxu3 %vm1028_vm6, %v13849_v31  ;;  %v5120_v36 = vor.u32 %v5119_v41, %v5116_v20 }
 0x5c6   : > { %v5186_v38 = vpop.f32.mrf.mxu1 }
 0x5c7   : > { %v5256_v63 = vadd.f32 %v5186_v38, %v5088_v48  ;;  %v5121_v20 = vrot.slane %v5120_v36, 4 }
 0x5c8   : > { %v5764_v58 = vpop.f32.mrf.mxu3 }
 0x5c9   : > { %v13901_v52 = vadd.f32 %v5764_v58, %v5423_v53  ;;  %v5424_v34 = vadd.f32 %v5354_v19, %v5256_v63  ;;  %v5129_v53 = vrot.slane %v5127_v6, 4  ;;  %v16874_v58 = vld [vmem:[#allocation22_spill] sm:$0xff]  ;;  %v13920_v63 = vld [vmem:[#allocation2 + $0xc8] sm:$0x1]  ;;  %v5463_v6 = vld [vmem:[#allocation2 + $0xa8] sm:$0xe] }
 0x5ca   : > { %v5615_v38 = vrot.slane %v16874_v58, 5  ;;  %v10105_v22 = vrot.slane %v5463_v6, 9 }
 0x5cb   : > { %16870 = vst [vmem:[#allocation29_spill] sm:$0xff] %v13901_v52  ;;  %v5130_v2 = vor.u32 %v5129_v53, %v5125_v24  ;;  %v16878_v53 = vld [vmem:[#allocation36_spill] sm:$0xff] }
 0x5cc   : > { %v13907_v15 = vpop.f32.mrf.mxu2  ;;  %v5617_v51 = vrot.slane %v5615_v38, 4  ;;  %v5616_v6 = vsel %vm11443_vm14, %v10105_v22, %v5615_v38 }
 0x5cd   : > { %16871 = vst [vmem:[#allocation20_spill] sm:$0xff] %v13907_v15  ;;  %v5131_v41 = vrot.slane %v5130_v2, 4  ;;  %v13934_v15 = vpop.f32.mrf.mxu0  ;;  %v5126_v2 = vsel %vm11371_vm11, %v5121_v20, %v5125_v24 }
 0x5ce   : > { %v5189_v39 = vpop.f32.mrf.mxu1  ;;  %16880 = vst [vmem:[#allocation21_spill] sm:$0xff] %v13934_v15  ;;  %v5142_v56 = vunpack.c.l.b16 %v5126_v2  ;;  %v16894_v15 = vld [vmem:[#allocation32_spill] sm:$0xff] }
 0x5cf   : > { %v5257_v12 = vadd.f32 %v5189_v39, %v5089_v28  ;;  %v5618_v28 = vrot.slane %v16877_v60, 5 }
 0x5d0   : > { %v5766_v48 = vpop.f32.mrf.mxu3 }
 0x5d1   : > { %v13916_v19 = vadd.f32 %v5766_v48, %v5424_v34  ;;  %10059 = vmatmul.msk.bf16.gmra.mxu1 %vm1028_vm6, %v13554_v61  ;;  %10088 = vmatmul.msk.bf16.gmra.mxu2 %vm1028_vm6, %v16876_v21  ;;  %v5425_v9 = vadd.f32 %v5357_v11, %v5257_v12  ;;  %v5133_v34 = vshll.u32 %v13920_v63, 16  ;;  %v16879_v48 = vld [vmem:[#allocation30_spill] sm:$0xff]  ;;  %v5619_v11 = vsel %vm11443_vm14, %v5617_v51, %v5618_v28 }
 0x5d2   : > { %10160 = vmatmul.msk.bf16.gmra.mxu0 %vm1028_vm6, %v13911_v62  ;;  %v5090_v61 = vadd.f32 %v16879_v48, %v16878_v53  ;;  %v5661_v53 = vunpack.c.l.b16 %v5619_v11  ;;  %v5660_v48 = vunpack.c.l.b16 %v5616_v6  ;;  %v13959_v11 = vld [vmem:[#allocation2 + $0xd0] sm:$0xf]  ;;  %v5464_v6 = vld [vmem:[#allocation2 + $0xb4] sm:$0xe] }
 0x5d3   : > { %16875 = vst [vmem:[#allocation12_spill] sm:$0xff] %v13916_v19  ;;  %v5135_v12 = vrot.slane %v5133_v34, 5 }
 0x5d4   : > { %v5362_v40 = vpop.f32.mrf.mxu2  ;;  %v13948_v28 = vpack.c.b16 %v5661_v53, %v5660_v48  ;;  %16889 = vst [vmem:[#allocation30_spill] sm:$0xff] %v13959_v11  ;;  %v5291_v53 = vshll.u32 %v13959_v11, 16  ;;  %v5295_v48 = vshrl.u32 %v13959_v11, 16  ;;  %v16892_v11 = vld [vmem:[#allocation25_spill] sm:$0xff] }
 0x5d5   : > { %10131 = vmatmul.msk.bf16.gmra.mxu3 %vm1028_vm6, %v13877_v46  ;;  %v5136_v60 = vsel %vm11371_vm11, %v5131_v41, %v5135_v12  ;;  %v4492_v41 = vld [vmem:[#allocation2 + $0xcc] sm:$0xf]  ;;  %v13961_v12 = vld [vmem:[#allocation2 + $0xd4] sm:$0x1] }
 0x5d6   : > { %v5191_v58 = vpop.f32.mrf.mxu1  ;;  %v5143_v51 = vunpack.c.l.b16 %v5136_v60  ;;  %v5282_v2 = vshrl.u32 %v4492_v41, 16  ;;  %v5285_v60 = vshll.u32 %v4492_v41, 16  ;;  %v5297_v41 = vrot.slane %v5295_v48, 4 }
 0x5d7   : > { %v13938_v52 = vadd.f32 %v5191_v58, %v5090_v61  ;;  %v16886_v61 = vld [vmem:[#allocation24_spill] sm:$0xff] }
 0x5d8   : > { %v5769_v39 = vpop.f32.mrf.mxu3  ;;  %v16887_v58 = vld [vmem:[#allocation28_spill] sm:$0xff]  ;;  %v13957_v20 = vpack.c.b16 %v5143_v51, %v5142_v56 }
 0x5d9   : > { %v13936_v19 = vadd.f32 %v5769_v39, %v5425_v9  ;;  %16882 = vst [vmem:[#allocation14_spill] sm:$0xff] %v13938_v52  ;;  %v16885_v9 = vld [vmem:[#allocation33_spill] sm:$0xff]  ;;  %v5622_v52 = vrot.slane %v16887_v58, 5  ;;  %v5287_v58 = vrot.slane %v5285_v60, 5 }
 0x5da   : > { %v5091_v39 = vadd.f32 %v16886_v61, %v16885_v9  ;;  %16890 = vst [vmem:[#allocation33_spill] sm:$0xff] %v13961_v12  ;;  %v13965_v9 = vpop.f32.mrf.mxu0  ;;  %v5301_v61 = vshll.u32 %v13961_v12, 16 }
 0x5db   : > { %16881 = vst [vmem:[#allocation22_spill] sm:$0xff] %v13936_v19  ;;  %v5624_v51 = vrot.slane %v5622_v52, 4  ;;  %v5625_v19 = vrot.slane %v16892_v11, 5 }
 0x5dc   : > { %v13946_v34 = vpop.f32.mrf.mxu2  ;;  %16891 = vst [vmem:[#allocation24_spill] sm:$0xff] %v13965_v9  ;;  %v5303_v9 = vrot.slane %v5301_v61, 5 }
 0x5dd   : > { %16884 = vst [vmem:[#allocation7_spill] sm:$0xff] %v13946_v34  ;;  %v10106_v34 = vrot.slane %v5464_v6, 9 }
 0x5de   : > { %v5194_v22 = vpop.f32.mrf.mxu1 }
 0x5df   : > { %v5259_v24 = vadd.f32 %v5194_v22, %v5091_v39  ;;  %v5284_v39 = vrot.slane %v5282_v2, 4  ;;  %v5293_v22 = vrot.slane %v5291_v53, 5  ;;  %v5626_v2 = vsel %vm11443_vm14, %v5624_v51, %v5625_v19  ;;  %v16896_v51 = vld [vmem:[#allocation34_spill] sm:$0xff] }
 0x5e0   : > { %v13953_v38 = vpop.f32.mrf.mxu3  ;;  %v5623_v11 = vsel %vm11443_vm14, %v10106_v34, %v5622_v52 }
 0x5e1   : > { %16888 = vst [vmem:[#allocation36_spill] sm:$0xff] %v13953_v38  ;;  %10060 = vmatmul.msk.bf16.gmra.mxu1 %vm1028_vm6, %v13582_v17  ;;  %10089 = vmatmul.msk.bf16.gmra.mxu2 %vm1028_vm6, %v13957_v20  ;;  %v5427_v56 = vadd.f32 %v5362_v40, %v5259_v24  ;;  %v5288_v46 = vor.u32 %v5287_v58, %v5284_v39 }
 0x5e2   : > { %10161 = vmatmul.msk.bf16.gmra.mxu0 %vm1028_vm6, %v13948_v28  ;;  %v5298_v17 = vor.u32 %v5297_v41, %v5293_v22  ;;  %v5092_v40 = vadd.f32 %v16894_v15, %v16893_v35  ;;  %v5663_v15 = vunpack.c.l.b16 %v5626_v2  ;;  %v13989_v58 = vpop.f32.mrf.mxu0 }
 0x5e3   : > { %v5289_v60 = vrot.slane %v5288_v46, 4  ;;  %v5662_v46 = vunpack.c.l.b16 %v5623_v11  ;;  %v5869_v11 = vrot.slane %v13920_v63, 5 }
 0x5e4   : > { %v5367_v38 = vpop.f32.mrf.mxu2  ;;  %v5299_v53 = vrot.slane %v5298_v17, 4  ;;  %v5866_v17 = vrot.slane %v13897_v29, 5 }
 0x5e5   : > { %10132 = vmatmul.msk.bf16.gmra.mxu3 %vm1028_vm6, %v13911_v62  ;;  %v5294_v6 = vsel %vm11371_vm11, %v5289_v60, %v5293_v22 }
 0x5e6   : > { %v5196_v45 = vpop.f32.mrf.mxu1  ;;  %v5304_v35 = vsel %vm11371_vm11, %v5299_v53, %v5303_v9  ;;  %v5310_v61 = vunpack.c.l.b16 %v5294_v6  ;;  %v5868_v2 = vrot.slane %v5866_v17, 4  ;;  %v16897_v6 = vld [vmem:[#allocation9_spill] sm:$0xff] }
 0x5e7   : > { %v13981_v12 = vadd.f32 %v5196_v45, %v5092_v40  ;;  %v5311_v39 = vunpack.c.l.b16 %v5304_v35  ;;  %v16895_v45 = vld [vmem:[#allocation27_spill] sm:$0xff]  ;;  %v16898_v35 = vld [vmem:[#allocation37_spill] sm:$0xff] }
 0x5e8   : > { %v5774_v24 = vpop.f32.mrf.mxu3  ;;  %v5093_v41 = vadd.f32 %v16896_v51, %v16895_v45 }
 0x5e9   : > { %v13979_v48 = vadd.f32 %v5774_v24, %v5427_v56  ;;  %v13993_v56 = vpack.c.b16 %v5663_v15, %v5662_v46  ;;  %v5312_v52 = vpack.c.b16 %v5311_v39, %v5310_v61  ;;  %v5465_v24 = vld [vmem:[#allocation2 + $0xc0] sm:$0xe]  ;;  %v5094_v15 = vadd.f32 %v16898_v35, %v16897_v6 }
 0x5ea   : > { %v10135_v53 = vrot.slane %v5465_v24, 9  ;;  %v14008_v29 = vpop.f32.mrf.mxu0 }
 0x5ec   : > { %v13991_v19 = vpop.f32.mrf.mxu2  ;;  %v5867_v45 = vsel %vm11443_vm14, %v10135_v53, %v5866_v17  ;;  %v5096_v53 = vadd.f32 %v13628_v13, %v13630_v49  ;;  %v16904_v49 = vld [vmem:[#allocation17_spill] sm:$0xff] }
 0x5ee   : > { %v5199_v22 = vpop.f32.mrf.mxu1 }
 0x5ef   : > { %v5261_v9 = vadd.f32 %v5199_v22, %v5093_v41  ;;  %v5876_v41 = vunpack.c.l.b16 %v5867_v45  ;;  %v16900_v22 = vld [vmem:[#allocation6_spill] sm:$0xff] }
 0x5f0   : > { %v13997_v34 = vpop.f32.mrf.mxu3 }
 0x5f1   : > { %10061 = vmatmul.msk.bf16.gmra.mxu1 %vm1028_vm6, %v16876_v21  ;;  %v5429_v40 = vadd.f32 %v5367_v38, %v5261_v9  ;;  %10090 = vmatmul.msk.bf16.gmra.mxu2 %vm1028_vm6, %v5312_v52  ;;  %v5870_v21 = vsel %vm11443_vm14, %v5868_v2, %v5869_v11  ;;  %v5095_v9 = vadd.f32 %v16900_v22, %v13620_v7  ;;  %v16905_v22 = vld [vmem:[#allocation18_spill] sm:$0xff] }
 0x5f2   : > { %10162 = vmatmul.msk.bf16.gmra.mxu0 %vm1028_vm6, %v13993_v56  ;;  %v5877_v51 = vunpack.c.l.b16 %v5870_v21  ;;  %v14028_v2 = vpop.f32.mrf.mxu0  ;;  %v16901_v21 = vld [vmem:[#allocation10_spill] sm:$0xff] }
 0x5f3   : > { %v5097_v45 = vadd.f32 %v16901_v21, %v13640_v25  ;;  %v16908_v21 = vld [vmem:[#allocation38_spill] sm:$0xff] }
 0x5f4   : > { %v5372_v60 = vpop.f32.mrf.mxu2  ;;  %v14022_v52 = vpack.c.b16 %v5877_v51, %v5876_v41 }
 0x5f5   : > { %10133 = vmatmul.msk.bf16.gmra.mxu3 %vm1028_vm6, %v13948_v28 }
 0x5f6   : > { %v5201_v39 = vpop.f32.mrf.mxu1 }
 0x5f7   : > { %v14016_v46 = vadd.f32 %v5201_v39, %v5094_v15 }
 0x5f8   : > { %v5779_v61 = vpop.f32.mrf.mxu3 }
 0x5f9   : > { %v14014_v38 = vadd.f32 %v5779_v61, %v5429_v40 }
 0x5fa   : > { %v14042_v39 = vpop.f32.mrf.mxu0 }
 0x5fc   : > { %v14020_v63 = vpop.f32.mrf.mxu2 }
 0x5fd   : > { %16899 = vst [vmem:[#allocation28_spill] sm:$0xff] %v14020_v63 }
 0x5fe   : > { %v5204_v6 = vpop.f32.mrf.mxu1 }
 0x5ff   : > { %v5263_v40 = vadd.f32 %v5204_v6, %v5095_v9  ;;  %v5098_v9 = vadd.f32 %v16905_v22, %v16904_v49  ;;  %v16912_v22 = vld [vmem:[#allocation13_spill] sm:$0xff] }
 0x600   : > { %v14026_v24 = vpop.f32.mrf.mxu3 }
 0x601   : > { %10062 = vmatmul.msk.bf16.gmra.mxu1 %vm1028_vm6, %v13957_v20  ;;  %v5431_v17 = vadd.f32 %v5372_v60, %v5263_v40 }
 0x602   : > { %10163 = vmatmul.msk.bf16.gmra.mxu0 %vm1028_vm6, %v14022_v52 }
 0x604   : > { %v5377_v35 = vpop.f32.mrf.mxu2 }
 0x605   : > { %10134 = vmatmul.msk.bf16.gmra.mxu3 %vm1028_vm6, %v13993_v56 }
 0x606   : > { %v5206_v11 = vpop.f32.mrf.mxu1 }
 0x607   : > { %v14040_v61 = vadd.f32 %v5206_v11, %v5096_v53  ;;  %v16907_v11 = vld [vmem:[#allocation31_spill] sm:$0xff] }
 0x608   : > { %v5784_v7 = vpop.f32.mrf.mxu3 }
 0x609   : > { %v14038_v15 = vadd.f32 %v5784_v7, %v5431_v17  ;;  %v14054_v17 = vpop.f32.mrf.mxu0 }
 0x60c   : > { %v14048_v41 = vpop.f32.mrf.mxu2 }
 0x60d   : > { %16903 = vst [vmem:[#allocation15_spill] sm:$0xff] %v14048_v41 }
 0x60e   : > { %v5209_v60 = vpop.f32.mrf.mxu1 }
 0x60f   : > { %v5265_v51 = vadd.f32 %v5209_v60, %v5097_v45  ;;  %v5099_v45 = vadd.f32 %v16908_v21, %v16907_v11 }
 0x610   : > { %v14046_v20 = vpop.f32.mrf.mxu3 }
 0x611   : > { %16902 = vst [vmem:[#allocation25_spill] sm:$0xff] %v14046_v20  ;;  %10177 = vmatmul.msk.bf16.vlgmr.msra.gmra.mxu1 %vm1028_vm6, %v13646_v50  ;;  %v5433_v13 = vadd.f32 %v5377_v35, %v5265_v51  ;;  %v14064_v35 = vpop.f32.mrf.mxu0 }
 0x614   : > { %v5382_v7 = vpop.f32.mrf.mxu2 }
 0x616   : > { %v5211_v40 = vpop.f32.mrf.mxu1 }
 0x617   : > { %v14058_v25 = vadd.f32 %v5211_v40, %v5098_v9 }
 0x618   : > { %v5789_v6 = vpop.f32.mrf.mxu3 }
 0x619   : > { %v14056_v53 = vadd.f32 %v5789_v6, %v5433_v13  ;;  %16906 = vst [vmem:[#allocation32_spill] sm:$0xff] %v14058_v25  ;;  %v16911_v13 = vld [vmem:[#allocation35_spill] sm:$0xff]  ;;  %v14076_v21 = vpop.f32.mrf.mxu0 }
 0x61a   : > { %v5100_v9 = vadd.f32 %v16912_v22, %v16911_v13 }
 0x61c   : > { %v14068_v49 = vpop.f32.mrf.mxu2 }
 0x61d   : > { %16910 = vst [vmem:[#allocation34_spill] sm:$0xff] %v14068_v49 }
 0x61e   : > { %v5214_v36 = vpop.f32.mrf.mxu1 }
 0x61f   : > { %v5267_v50 = vadd.f32 %v5214_v36, %v5099_v45  ;;  %v16914_v36 = vld [vmem:[#allocation23_spill] sm:$0xff] }
 0x620   : > { %v14062_v60 = vpop.f32.mrf.mxu3  ;;  %v16915_v45 = vld [vmem:[#allocation19_spill] sm:$0xff] }
 0x621   : > { %16909 = vst [vmem:[#allocation27_spill] sm:$0xff] %v14062_v60  ;;  %10178 = vmatmul.msk.bf16.gmra.mxu1 %vm1028_vm6, %v13667_v3  ;;  %v5435_v51 = vadd.f32 %v5382_v7, %v5267_v50  ;;  %v5101_v60 = vadd.f32 %v16915_v45, %v16914_v36  ;;  %v14084_v22 = vpop.f32.mrf.mxu0  ;;  %v16919_v36 = vld [vmem:[#allocation26_spill] sm:$0xff]  ;;  %v16920_v45 = vld [vmem:[#allocation41_spill] sm:$0xff] }
 0x624   : > { %v5387_v50 = vpop.f32.mrf.mxu2 }
 0x626   : > { %v5216_v40 = vpop.f32.mrf.mxu1 }
 0x627   : > { %v14074_v11 = vadd.f32 %v5216_v40, %v5100_v9 }
 0x628   : > { %v5794_v6 = vpop.f32.mrf.mxu3 }
 0x629   : > { %v14072_v41 = vadd.f32 %v5794_v6, %v5435_v51  ;;  %16913 = vst [vmem:[#allocation9_spill] sm:$0xff] %v14074_v11  ;;  %v16917_v51 = vld [vmem:[#allocation16_spill] sm:$0xff]  ;;  %v16918_v6 = vld [vmem:[#allocation39_spill] sm:$0xff] }
 0x62a   : > { %v5102_v9 = vadd.f32 %v16918_v6, %v16917_v51 }
 0x62e   : > { %v5219_v3 = vpop.f32.mrf.mxu1 }
 0x62f   : > { %v5269_v7 = vadd.f32 %v5219_v3, %v5101_v60  ;;  %v14094_v3 = vpop.f32.mrf.mxu0 }
 0x630   : > { %v14080_v25 = vpop.f32.mrf.mxu3 }
 0x631   : > { %16916 = vst [vmem:[#allocation37_spill] sm:$0xff] %v14080_v25  ;;  %10179 = vmatmul.msk.bf16.gmra.mxu1 %vm1028_vm6, %v13687_v23  ;;  %v5437_v13 = vadd.f32 %v5387_v50, %v5269_v7  ;;  %v5103_v25 = vadd.f32 %v16920_v45, %v16919_v36  ;;  %v16922_v23 = vld [vmem:[#allocation40_spill] sm:$0xff] }
 0x632   : > { %v16923_v7 = vld [vmem:[#allocation44_spill] sm:$0xff] }
 0x633   : > { %v5104_v50 = vadd.f32 %v16923_v7, %v16922_v23  ;;  %v16929_v45 = vld [vmem:[#allocation48_spill] sm:$0xff] }
 0x636   : > { %v5221_v49 = vpop.f32.mrf.mxu1 }
 0x637   : > { %v14088_v20 = vadd.f32 %v5221_v49, %v5102_v9  ;;  %v16925_v49 = vld [vmem:[#allocation42_spill] sm:$0xff] }
 0x638   : > { %v5799_v40 = vpop.f32.mrf.mxu3  ;;  %v5105_v9 = vadd.f32 %v13749_v1, %v16925_v49 }
 0x639   : > { %v5849_v11 = vadd.f32 %v5799_v40, %v5437_v13  ;;  %v14102_v13 = vpop.f32.mrf.mxu0 }
 0x63e   : > { %v5224_v63 = vpop.f32.mrf.mxu1 }
 0x63f   : > { %v14092_v60 = vadd.f32 %v5224_v63, %v5103_v25  ;;  %v16927_v63 = vld [vmem:[#allocation43_spill] sm:$0xff] }
 0x641   : > { %16921 = vst [vmem:[#allocation6_spill] sm:$0xff] %v14092_v60  ;;  %10180 = vmatmul.msk.bf16.gmra.mxu1 %vm1028_vm6, %v13709_v14  ;;  %v14110_v25 = vpop.f32.mrf.mxu0  ;;  %v16928_v14 = vld [vmem:[#allocation45_spill] sm:$0xff] }
 0x642   : > { %v5106_v60 = vadd.f32 %v16929_v45, %v16928_v14 }
 0x646   : > { %v5226_v51 = vpop.f32.mrf.mxu1 }
 0x647   : > { %v14100_v6 = vadd.f32 %v5226_v51, %v5104_v50  ;;  %v16930_v50 = vld [vmem:[#allocation46_spill] sm:$0xff] }
 0x648   : > { %v5107_v51 = vadd.f32 %v13773_v44, %v16930_v50 }
 0x649   : > { %16924 = vst [vmem:[#allocation10_spill] sm:$0xff] %v14100_v6  ;;  %v14118_v6 = vpop.f32.mrf.mxu0 }
 0x64e   : > { %v5229_v40 = vpop.f32.mrf.mxu1 }
 0x64f   : > { %v14106_v36 = vadd.f32 %v5229_v40, %v5105_v9  ;;  %v16931_v9 = vld [vmem:[#allocation47_spill] sm:$0xff] }
 0x650   : > { %v5108_v40 = vadd.f32 %v13790_v43, %v16931_v9 }
 0x651   : > { %16926 = vst [vmem:[#allocation17_spill] sm:$0xff] %v14106_v36  ;;  %10181 = vmatmul.msk.bf16.gmra.mxu1 %vm1028_vm6, %v16927_v63  ;;  %v14128_v14 = vpop.f32.mrf.mxu0 }
 0x656   : > { %v5231_v23 = vpop.f32.mrf.mxu1 }
 0x657   : > { %v14114_v7 = vadd.f32 %v5231_v23, %v5106_v60  ;;  %v5109_v60 = vadd.f32 %v13805_v8, %v13769_v18 }
 0x659   : > { %v14136_v23 = vpop.f32.mrf.mxu0 }
 0x65e   : > { %v5234_v1 = vpop.f32.mrf.mxu1 }
 0x65f   : > { %v14120_v49 = vadd.f32 %v5234_v1, %v5107_v51  ;;  %v5111_v1 = vadd.f32 %v13839_v26, %v13792_v5 }
 0x661   : > { %10182 = vmatmul.msk.bf16.gmra.mxu1 %vm1028_vm6, %v13751_v42  ;;  %v5110_v42 = vadd.f32 %v13821_v27, %v13777_v0  ;;  %v14142_v51 = vpop.f32.mrf.mxu0 }
 0x666   : > { %v5236_v63 = vpop.f32.mrf.mxu1 }
 0x667   : > { %v14126_v36 = vadd.f32 %v5236_v63, %v5108_v40  ;;  %v5983_v63 = vadd.f32 %v13875_v54, %v13816_v57  ;;  %v16939_v57 = vld [vmem:[#allocation49_spill] sm:$0xff] }
 0x668   : > { %v16940_v54 = vld [vmem:[#allocation21_spill] sm:$0xff] }
 0x669   : > { %v5953_v9 = vpop.f32.mrf.mxu0 }
 0x66a   : > { %v14154_v27 = vadd.f32 %v5953_v9, %v5849_v11 }
 0x66e   : > { %v5239_v44 = vpop.f32.mrf.mxu1 }
 0x66f   : > { %v14132_v45 = vadd.f32 %v5239_v44, %v5109_v60 }
 0x671   : > { %16932 = vst [vmem:[#allocation18_spill] sm:$0xff] %v14132_v45  ;;  %10183 = vmatmul.msk.bf16.gmra.mxu1 %vm1028_vm6, %v13775_v47  ;;  %v5112_v47 = vadd.f32 %v13854_v32, %v13801_v16  ;;  %v5985_v32 = vadd.f32 %v13909_v33, %v13845_v4  ;;  %v16944_v4 = vld [vmem:[#allocation51_spill] sm:$0xff]  ;;  %v16945_v33 = vld [vmem:[#allocation52_spill] sm:$0xff] }
 0x672   : > { %v5988_v9 = vadd.f32 %v13989_v58, %v16945_v33  ;;  %v16948_v58 = vld [vmem:[#allocation22_spill] sm:$0xff] }
 0x676   : > { %v5241_v43 = vpop.f32.mrf.mxu1 }
 0x677   : > { %v14140_v50 = vadd.f32 %v5241_v43, %v5110_v42  ;;  %v5986_v42 = vadd.f32 %v16940_v54, %v16939_v57 }
 0x679   : > { %16933 = vst [vmem:[#allocation31_spill] sm:$0xff] %v14140_v50 }
 0x67e   : > { %v5244_v18 = vpop.f32.mrf.mxu1 }
 0x67f   : > { %v14146_v8 = vadd.f32 %v5244_v18, %v5111_v1  ;;  %v16942_v1 = vld [vmem:[#allocation50_spill] sm:$0xff] }
 0x681   : > { %16934 = vst [vmem:[#allocation38_spill] sm:$0xff] %v14146_v8  ;;  %10184 = vmatmul.msk.bf16.gmra.mxu1 %vm1028_vm6, %v13796_v10  ;;  %v5984_v10 = vadd.f32 %v13890_v55, %v13828_v59  ;;  %v16943_v59 = vld [vmem:[#allocation24_spill] sm:$0xff] }
 0x682   : > { %v5987_v55 = vadd.f32 %v16943_v59, %v16942_v1  ;;  %v16962_v8 = vld [vmem:[#allocation20_spill] sm:$0xff] }
 0x686   : > { %v5246_v40 = vpop.f32.mrf.mxu1 }
 0x687   : > { %v14152_v0 = vadd.f32 %v5246_v40, %v5112_v47 }
 0x689   : > { %16935 = vst [vmem:[#allocation35_spill] sm:$0xff] %v14152_v0  ;;  %v16961_v0 = vld [vmem:[#allocation14_spill] sm:$0xff] }
 0x68a   : > { %v5426_v50 = vadd.f32 %v16962_v8, %v16961_v0 }
 0x68e   : > { %v6057_v60 = vpop.f32.mrf.mxu1 }
 0x68f   : > { %v14158_v5 = vadd.f32 %v6057_v60, %v5983_v63  ;;  %v16946_v60 = vld [vmem:[#allocation29_spill] sm:$0xff] }
 0x691   : > { %16936 = vst [vmem:[#allocation13_spill] sm:$0xff] %v14158_v5  ;;  %10185 = vmatmul.msk.bf16.gmra.mxu1 %vm1028_vm6, %v13823_v37 }
 0x696   : > { %v6059_v16 = vpop.f32.mrf.mxu1 }
 0x697   : > { %v14164_v26 = vadd.f32 %v6059_v16, %v5984_v10  ;;  %v5989_v10 = vadd.f32 %v14008_v29, %v16946_v60 }
 0x699   : > { %16937 = vst [vmem:[#allocation23_spill] sm:$0xff] %v14164_v26 }
 0x69e   : > { %v6062_v11 = vpop.f32.mrf.mxu1 }
 0x69f   : > { %v14168_v44 = vadd.f32 %v6062_v11, %v5985_v32  ;;  %v16947_v11 = vld [vmem:[#allocation12_spill] sm:$0xff] }
 0x6a0   : > { %v5990_v57 = vadd.f32 %v14028_v2, %v16947_v11  ;;  %v5997_v11 = vadd.f32 %v14102_v13, %v14038_v15  ;;  %v14248_v15 = vpop.f32.mrf.mxu3  ;;  %v6001_v13 = vadd.f32 %v14136_v23, %v14072_v41 }
 0x6a1   : > { %16938 = vst [vmem:[#allocation19_spill] sm:$0xff] %v14168_v44  ;;  %10186 = vmatmul.msk.bf16.gmra.mxu1 %vm1028_vm6, %v13849_v31  ;;  %v10631_v31 = vld [vmem:[%s14186_s13 + $0x38] sm:$0xff]  ;;  %v6240_v30 = vmul.f32 %v14168_v44, %v14168_v44 }
 0x6a2   : > { %7118 = vmatpush.bf16.msra.mxu2 %v10631_v31  ;;  %v16949_v31 = vld [vmem:[#allocation30_spill] sm:$0xff] }
 0x6a3   : > { %v6020_v33 = vrot.slane %v16949_v31, 5  ;;  %v6273_v0 = vsel %vm1028_vm6, %v6240_v30, 0.0 }
 0x6a6   : > { %v6064_v43 = vpop.f32.mrf.mxu1 }
 0x6a7   : > { %v14174_v37 = vadd.f32 %v6064_v43, %v5986_v42  ;;  %v5991_v43 = vadd.f32 %v14042_v39, %v16948_v58  ;;  %v5995_v39 = vadd.f32 %v14084_v22, %v14014_v38 }
 0x6a9   : > { %16941 = vst [vmem:[#allocation16_spill] sm:$0xff] %v14174_v37 }
 0x6ae   : > { %v6067_v18 = vpop.f32.mrf.mxu1 }
 0x6af   : > { %v14178_v47 = vadd.f32 %v6067_v18, %v5987_v55 }
 0x6b1   : > { %10187 = vmatmul.msk.bf16.gmra.mxu1 %vm1028_vm6, %v16944_v4 }
 0x6b6   : > { %v6069_v40 = vpop.f32.mrf.mxu1 }
 0x6b7   : > { %v14191_v63 = vadd.f32 %v6069_v40, %v5988_v9  ;;  %v5466_v9 = vld [vmem:[#allocation2 + $0xcc] sm:$0xe] }
 0x6b8   : > { %v16950_v40 = vld [vmem:[#allocation33_spill] sm:$0xff] }
 0x6b9   : > { %v6023_v60 = vrot.slane %v16950_v40, 5 }
 0x6be   : > { %v6072_v16 = vpop.f32.mrf.mxu1 }
 0x6bf   : > { %v14195_v32 = vadd.f32 %v6072_v16, %v5989_v10 }
 0x6c1   : > { %10188 = vmatmul.msk.bf16.gmra.mxu1 %vm1028_vm6, %v13911_v62  ;;  %v5993_v62 = vadd.f32 %v14064_v35, %v13979_v48  ;;  %v10164_v48 = vrot.slane %v5466_v9, 9  ;;  %v6022_v35 = vrot.slane %v6020_v33, 4 }
 0x6c3   : > { %v6024_v38 = vsel %vm11443_vm14, %v6022_v35, %v6023_v60 }
 0x6c4   : > { %v6031_v16 = vunpack.c.l.b16 %v6024_v38 }
 0x6c6   : > { %v6074_v54 = vpop.f32.mrf.mxu1 }
 0x6c7   : > { %v14201_v42 = vadd.f32 %v6074_v54, %v5990_v57 }
 0x6ce   : > { %v6077_v1 = vpop.f32.mrf.mxu1 }
 0x6cf   : > { %v14205_v59 = vadd.f32 %v6077_v1, %v5991_v43  ;;  %v5999_v43 = vadd.f32 %v14118_v6, %v14056_v53  ;;  %v14258_v53 = vpop.f32.mrf.mxu3 }
 0x6d1   : > { %10189 = vmatmul.msk.bf16.gmra.mxu1 %vm1028_vm6, %v13948_v28 }
 0x6d6   : > { %v14209_v29 = vpop.f32.mrf.mxu1 }
 0x6d7   : > { %v14266_v40 = vpop.f32.mrf.mxu3 }
 0x6de   : > { %v6082_v55 = vpop.f32.mrf.mxu1 }
 0x6df   : > { %v14213_v18 = vadd.f32 %v6082_v55, %v5993_v62 }
 0x6e1   : > { %10190 = vmatmul.msk.bf16.gmra.mxu1 %vm1028_vm6, %v13993_v56  ;;  %v6021_v56 = vsel %vm11443_vm14, %v10164_v48, %v6020_v33  ;;  %v14254_v33 = vpop.f32.mrf.mxu0 }
 0x6e2   : > { %v6030_v22 = vunpack.c.l.b16 %v6021_v56  ;;  %16952 = vst [vmem:[#allocation26_spill] sm:$0xff] %v14254_v33  ;;  %v10630_v56 = vld [vmem:[%s14186_s13 + $0x30] sm:$0xff] }
 0x6e3   : > { %7119 = vmatpush.bf16.msra.mxu2 %v10630_v56  ;;  %v6170_v56 = vsel %vm1028_vm6, %v14164_v26, 0.0 }
 0x6e4   : > { %v6032_v57 = vpack.c.b16 %v6031_v16, %v6030_v22  ;;  %v14278_v16 = vpop.f32.mrf.mxu3 }
 0x6e6   : > { %v14217_v2 = vpop.f32.mrf.mxu1 }
 0x6e9   : > { %v14262_v48 = vpop.f32.mrf.mxu0 }
 0x6ea   : > { %16953 = vst [vmem:[#allocation41_spill] sm:$0xff] %v14262_v48 }
 0x6ee   : > { %v6087_v4 = vpop.f32.mrf.mxu1 }
 0x6ef   : > { %v14222_v28 = vadd.f32 %v6087_v4, %v5995_v39  ;;  %v14246_v39 = vpop.f32.mrf.mxu2 }
 0x6f1   : > { %10191 = vmatmul.msk.bf16.gmra.mxu1 %vm1028_vm6, %v14022_v52  ;;  %v14271_v23 = vpop.f32.mrf.mxu0 }
 0x6f2   : > { %16955 = vst [vmem:[#allocation44_spill] sm:$0xff] %v14271_v23 }
 0x6f6   : > { %v14227_v10 = vpop.f32.mrf.mxu1 }
 0x6f7   : > { %v14256_v9 = vpop.f32.mrf.mxu2 }
 0x6fe   : > { %v6092_v54 = vpop.f32.mrf.mxu1 }
 0x6ff   : > { %v14235_v52 = vadd.f32 %v6092_v54, %v5997_v11  ;;  %v14264_v35 = vpop.f32.mrf.mxu2  ;;  %v14280_v11 = vpop.f32.mrf.mxu0 }
 0x700   : > { %16957 = vst [vmem:[#allocation43_spill] sm:$0xff] %v14280_v11 }
 0x701   : > { %10192 = vmatmul.msk.bf16.gmra.mxu1 %vm1028_vm6, %v6032_v57 }
 0x706   : > { %v14238_v58 = vpop.f32.mrf.mxu1 }
 0x707   : > { %v14276_v22 = vpop.f32.mrf.mxu2 }
 0x70e   : > { %v6097_v1 = vpop.f32.mrf.mxu1 }
 0x70f   : > { %v14242_v62 = vadd.f32 %v6097_v1, %v5999_v43  ;;  %v14284_v54 = vpop.f32.mrf.mxu2  ;;  %v14286_v43 = vpop.f32.mrf.mxu3 }
 0x710   : > { %v14290_v1 = vpop.f32.mrf.mxu0 }
 0x711   : > { %16960 = vst [vmem:[#allocation46_spill] sm:$0xff] %v14290_v1  ;;  %v6169_v1 = vsel %vm1028_vm6, %v14158_v5, 0.0 }
 0x712   : > { %v6171_v45 = vadd.f32 %v6170_v56, %v6169_v1  ;;  %v6243_v1 = vmul.f32 %v14191_v63, %v14191_v63 }
 0x716   : > { %v14244_v55 = vpop.f32.mrf.mxu1 }
 0x71e   : > { %v6102_v4 = vpop.f32.mrf.mxu1 }
 0x71f   : > { %v14252_v31 = vadd.f32 %v6102_v4, %v6001_v13  ;;  %v6239_v13 = vmul.f32 %v14164_v26, %v14164_v26  ;;  %v14294_v4 = vpop.f32.mrf.mxu2  ;;  %v16963_v26 = vld [vmem:[#allocation36_spill] sm:$0xff] }
 0x720   : > { %v5838_v23 = vadd.f32 %v16963_v26, %v5426_v50  ;;  %v6176_v26 = vsel %vm1028_vm6, %v14178_v47, 0.0 }
 0x721   : > { %16951 = vst [vmem:[#allocation39_spill] sm:$0xff] %v14252_v31  ;;  %v6271_v11 = vsel %vm1028_vm6, %v6239_v13, 0.0  ;;  %v6242_v13 = vmul.f32 %v14178_v47, %v14178_v47 }
 0x726   : > { %v14260_v6 = vpop.f32.mrf.mxu1 }
 0x72e   : > { %v6107_v60 = vpop.f32.mrf.mxu1 }
 0x72f   : > { %v14269_v41 = vadd.f32 %v6107_v60, %v14154_v27  ;;  %v6238_v60 = vmul.f32 %v14158_v5, %v14158_v5  ;;  %v6174_v5 = vsel %vm1028_vm6, %v14174_v37, 0.0 }
 0x731   : > { %16954 = vst [vmem:[#allocation40_spill] sm:$0xff] %v14269_v41  ;;  %v6241_v41 = vmul.f32 %v14174_v37, %v14174_v37  ;;  %v6270_v8 = vsel %vm1028_vm6, %v6238_v60, 0.0  ;;  %v14330_v60 = vpop.f32.mrf.mxu0 }
 0x732   : > { %v6272_v33 = vadd.f32 %v6271_v11, %v6270_v8 }
 0x733   : > { %v6275_v50 = vsel %vm1028_vm6, %v6241_v41, 0.0  ;;  %v5430_v41 = vadd.f32 %v13991_v19, %v14016_v46 }
 0x734   : > { %v6274_v56 = vadd.f32 %v6273_v0, %v6272_v33  ;;  %v6279_v33 = vsel %vm1028_vm6, %v6243_v1, 0.0  ;;  %v6182_v0 = vsel %vm1028_vm6, %v14201_v42, 0.0 }
 0x736   : > { %v14274_v38 = vpop.f32.mrf.mxu1  ;;  %v6276_v11 = vadd.f32 %v6275_v50, %v6274_v56  ;;  %v6184_v56 = vsel %vm1028_vm6, %v14205_v59, 0.0 }
 0x737   : > { %16956 = vst [vmem:[#allocation42_spill] sm:$0xff] %v14274_v38 }
 0x73e   : > { %v14282_v57 = vpop.f32.mrf.mxu1 }
 0x73f   : > { %16958 = vst [vmem:[#allocation45_spill] sm:$0xff] %v14282_v57  ;;  %v6172_v57 = vsel %vm1028_vm6, %v14168_v44, 0.0  ;;  %v16965_v44 = vld [vmem:[#allocation7_spill] sm:$0xff] }
 0x740   : > { %v5428_v48 = vadd.f32 %v16965_v44, %v13981_v12  ;;  %v6173_v31 = vadd.f32 %v6172_v57, %v6171_v45  ;;  %v6178_v12 = vsel %vm1028_vm6, %v14191_v63, 0.0  ;;  %v6244_v45 = vmul.f32 %v14195_v32, %v14195_v32 }
 0x741   : > { %v5992_v44 = vadd.f32 %v14054_v17, %v5838_v23  ;;  %v5842_v17 = vadd.f32 %v14026_v24, %v5430_v41 }
 0x742   : > { %v5840_v30 = vadd.f32 %v13997_v34, %v5428_v48  ;;  %v6175_v37 = vadd.f32 %v6174_v5, %v6173_v31  ;;  %v14340_v34 = vpop.f32.mrf.mxu2  ;;  %v6180_v5 = vsel %vm1028_vm6, %v14195_v32, 0.0  ;;  %v6245_v31 = vmul.f32 %v14201_v42, %v14201_v42 }
 0x743   : > { %v14348_v48 = vadd.f32 %v14209_v29, %v5992_v44  ;;  %v6281_v8 = vsel %vm1028_vm6, %v6244_v45, 0.0  ;;  %v16966_v29 = vld [vmem:[#allocation28_spill] sm:$0xff]  ;;  %v16967_v44 = vld [vmem:[#allocation25_spill] sm:$0xff] }
 0x744   : > { %v6177_v57 = vadd.f32 %v6176_v26, %v6175_v37  ;;  %v5994_v50 = vadd.f32 %v14076_v21, %v5840_v30  ;;  %v5432_v26 = vadd.f32 %v16966_v29, %v14040_v61  ;;  %v16969_v21 = vld [vmem:[#allocation15_spill] sm:$0xff]  ;;  %v16972_v29 = vld [vmem:[#allocation34_spill] sm:$0xff] }
 0x746   : > { %v14288_v27 = vpop.f32.mrf.mxu1  ;;  %v6179_v46 = vadd.f32 %v6178_v12, %v6177_v57  ;;  %v6247_v12 = vmul.f32 %v14348_v48, %v14348_v48  ;;  %v14369_v45 = vadd.f32 %v14217_v2, %v5994_v50  ;;  %v5844_v41 = vadd.f32 %v16967_v44, %v5432_v26  ;;  %v16971_v50 = vld [vmem:[#allocation9_spill] sm:$0xff]  ;;  %v14383_v44 = vpop.f32.mrf.mxu0 }
 0x747   : > { %16959 = vst [vmem:[#allocation48_spill] sm:$0xff] %v14288_v27  ;;  %v14304_v27 = vpop.f32.mrf.mxu3  ;;  %v5436_v26 = vadd.f32 %v16972_v29, %v16971_v50  ;;  %v16974_v50 = vld [vmem:[#allocation6_spill] sm:$0xff] }
 0x748   : > { %v6181_v1 = vadd.f32 %v6180_v5, %v6179_v46  ;;  %v6186_v5 = vsel %vm1028_vm6, %v14348_v48, 0.0  ;;  %v16970_v46 = vld [vmem:[#allocation27_spill] sm:$0xff] }
 0x74a   : > { %v6183_v61 = vadd.f32 %v6182_v0, %v6181_v1  ;;  %v6287_v0 = vsel %vm1028_vm6, %v6247_v12, 0.0 }
 0x74e   : > { %v14314_v38 = vpop.f32.mrf.mxu1 }
 0x74f   : > { %16964 = vst [vmem:[#allocation47_spill] sm:$0xff] %v14314_v38  ;;  %v6277_v38 = vsel %vm1028_vm6, %v6242_v13, 0.0  ;;  %v14351_v23 = vpop.f32.mrf.mxu3  ;;  %v6246_v13 = vmul.f32 %v14205_v59, %v14205_v59 }
 0x750   : > { %v6278_v19 = vadd.f32 %v6277_v38, %v6276_v11  ;;  %v6283_v38 = vsel %vm1028_vm6, %v6245_v31, 0.0  ;;  %v16968_v11 = vld [vmem:[#allocation32_spill] sm:$0xff]  ;;  %v6248_v31 = vmul.f32 %v14213_v18, %v14213_v18 }
 0x751   : > { %v5434_v30 = vadd.f32 %v16969_v21, %v16968_v11  ;;  %v5438_v21 = vadd.f32 %v14246_v39, %v14088_v20  ;;  %v5439_v20 = vadd.f32 %v14256_v9, %v16974_v50 }
 0x752   : > { %v6280_v24 = vadd.f32 %v6279_v33, %v6278_v19  ;;  %v6285_v33 = vsel %vm1028_vm6, %v6246_v13, 0.0  ;;  %v5996_v19 = vadd.f32 %v14094_v3, %v5842_v17  ;;  %v6188_v13 = vsel %vm1028_vm6, %v14213_v18, 0.0  ;;  %v16973_v3 = vld [vmem:[#allocation37_spill] sm:$0xff] }
 0x753   : > { %v5846_v2 = vadd.f32 %v16970_v46, %v5434_v30  ;;  %v5848_v17 = vadd.f32 %v16973_v3, %v5436_v26  ;;  %v6289_v12 = vsel %vm1028_vm6, %v6248_v31, 0.0  ;;  %v6192_v31 = vsel %vm1028_vm6, %v14222_v28, 0.0 }
 0x754   : > { %v6282_v57 = vadd.f32 %v6281_v8, %v6280_v24  ;;  %v6185_v8 = vadd.f32 %v6184_v56, %v6183_v61  ;;  %v6249_v24 = vmul.f32 %v14369_v45, %v14369_v45  ;;  %v14391_v1 = vadd.f32 %v14227_v10, %v5996_v19  ;;  %v14398_v56 = vpop.f32.mrf.mxu2 }
 0x755   : > { %v6250_v10 = vmul.f32 %v14222_v28, %v14222_v28  ;;  %v5998_v61 = vadd.f32 %v14110_v25, %v5844_v41  ;;  %v5850_v19 = vadd.f32 %v14248_v15, %v5438_v21  ;;  %v5851_v25 = vadd.f32 %v14258_v53, %v5439_v20  ;;  %v16975_v15 = vld [vmem:[#allocation10_spill] sm:$0xff]  ;;  %v16976_v21 = vld [vmem:[#allocation17_spill] sm:$0xff] }
 0x756   : > { %v14353_v37 = vpop.f32.mrf.mxu1  ;;  %v6284_v11 = vadd.f32 %v6283_v38, %v6282_v57  ;;  %v6187_v46 = vadd.f32 %v6186_v5, %v6185_v8  ;;  %v6190_v57 = vsel %vm1028_vm6, %v14369_v45, 0.0  ;;  %v6291_v29 = vsel %vm1028_vm6, %v6249_v24, 0.0 }
 0x757   : > { %v14409_v39 = vpop.f32.mrf.mxu3  ;;  %v6251_v26 = vmul.f32 %v14391_v1, %v14391_v1  ;;  %v5440_v9 = vadd.f32 %v14264_v35, %v16975_v15  ;;  %v6252_v24 = vmul.f32 %v14235_v52, %v14235_v52  ;;  %v6000_v3 = vadd.f32 %v14128_v14, %v5846_v2  ;;  %v14442_v2 = vpop.f32.mrf.mxu0 }
 0x758   : > { %v6286_v30 = vadd.f32 %v6285_v33, %v6284_v11  ;;  %v6189_v5 = vadd.f32 %v6188_v13, %v6187_v46  ;;  %v14417_v11 = vadd.f32 %v14238_v58, %v5998_v61  ;;  %v6194_v13 = vsel %vm1028_vm6, %v14391_v1, 0.0 }
 0x759   : > { %v5852_v58 = vadd.f32 %v14266_v40, %v5440_v9  ;;  %v5441_v53 = vadd.f32 %v14276_v22, %v16976_v21  ;;  %v6295_v35 = vsel %vm1028_vm6, %v6251_v26, 0.0  ;;  %v5442_v40 = vadd.f32 %v14284_v54, %v14114_v7 }
 0x75a   : > { %v6288_v33 = vadd.f32 %v6287_v0, %v6286_v30  ;;  %v6191_v8 = vadd.f32 %v6190_v57, %v6189_v5  ;;  %v6293_v0 = vsel %vm1028_vm6, %v6250_v10, 0.0  ;;  %v6253_v57 = vmul.f32 %v14417_v11, %v14417_v11 }
 0x75b   : > { %v14437_v10 = vadd.f32 %v14244_v55, %v6000_v3  ;;  %v5853_v14 = vadd.f32 %v14278_v16, %v5441_v53  ;;  %v6297_v20 = vsel %vm1028_vm6, %v6252_v24, 0.0  ;;  %v6254_v55 = vmul.f32 %v14242_v62, %v14242_v62  ;;  %v16978_v3 = vld [vmem:[#allocation26_spill] sm:$0xff] }
 0x75c   : > { %v6290_v41 = vadd.f32 %v6289_v12, %v6288_v33  ;;  %v6193_v46 = vadd.f32 %v6192_v31, %v6191_v8  ;;  %v6196_v12 = vsel %vm1028_vm6, %v14235_v52, 0.0  ;;  %v6198_v33 = vsel %vm1028_vm6, %v14417_v11, 0.0  ;;  %v5409_v31 = vpop.f32.mrf.mxu2 }
 0x75d   : > { %v6002_v5 = vadd.f32 %v14142_v51, %v5848_v17  ;;  %v5854_v16 = vadd.f32 %v14286_v43, %v5442_v40  ;;  %v5443_v7 = vadd.f32 %v14294_v4, %v14120_v49  ;;  %v6299_v26 = vsel %vm1028_vm6, %v6253_v57, 0.0  ;;  %v16981_v40 = vld [vmem:[#allocation18_spill] sm:$0xff] }
 0x75e   : > { %v14396_v38 = vpop.f32.mrf.mxu1  ;;  %v6292_v30 = vadd.f32 %v6291_v29, %v6290_v41  ;;  %v6195_v61 = vadd.f32 %v6194_v13, %v6193_v46  ;;  %v6200_v15 = vsel %vm1028_vm6, %v14242_v62, 0.0  ;;  %v6255_v9 = vmul.f32 %v14437_v10, %v14437_v10  ;;  %v16977_v13 = vld [vmem:[#allocation39_spill] sm:$0xff] }
 0x75f   : > { %v14461_v41 = vadd.f32 %v14260_v6, %v6002_v5  ;;  %v5855_v51 = vadd.f32 %v14304_v27, %v5443_v7  ;;  %v5444_v43 = vadd.f32 %v14340_v34, %v14126_v36  ;;  %v5821_v49 = vpop.f32.mrf.mxu3  ;;  %v6301_v8 = vsel %vm1028_vm6, %v6254_v55, 0.0  ;;  %v16983_v5 = vld [vmem:[#allocation40_spill] sm:$0xff] }
 0x760   : > { %v6294_v22 = vadd.f32 %v6293_v0, %v6292_v30  ;;  %v6197_v29 = vadd.f32 %v6196_v12, %v6195_v61  ;;  %v6202_v0 = vsel %vm1028_vm6, %v14437_v10, 0.0  ;;  %v6256_v24 = vmul.f32 %v16977_v13, %v16977_v13  ;;  %v16979_v30 = vld [vmem:[#allocation41_spill] sm:$0xff]  ;;  %v16980_v12 = vld [vmem:[#allocation42_spill] sm:$0xff]  ;;  %v16982_v61 = vld [vmem:[#allocation44_spill] sm:$0xff] }
 0x761   : > { %v6004_v21 = vadd.f32 %v16978_v3, %v5850_v19  ;;  %v5856_v6 = vadd.f32 %v14351_v23, %v5444_v43  ;;  %v6005_v46 = vadd.f32 %v16979_v30, %v5851_v25  ;;  %v6303_v36 = vsel %vm1028_vm6, %v6255_v9, 0.0  ;;  %v16985_v43 = vld [vmem:[#allocation43_spill] sm:$0xff]  ;;  %v16988_v30 = vld [vmem:[#allocation46_spill] sm:$0xff] }
 0x762   : > { %v6296_v54 = vadd.f32 %v6295_v35, %v6294_v22  ;;  %v6199_v17 = vadd.f32 %v6198_v33, %v6197_v29  ;;  %v6204_v34 = vsel %vm1028_vm6, %v16977_v13, 0.0  ;;  %v6257_v35 = vmul.f32 %v14461_v41, %v14461_v41 }
 0x763   : > { %v14480_v57 = vadd.f32 %v16980_v12, %v6004_v21  ;;  %v5445_v19 = vadd.f32 %v14398_v56, %v16981_v40  ;;  %v6305_v25 = vsel %vm1028_vm6, %v6256_v24, 0.0  ;;  %v6206_v55 = vsel %vm1028_vm6, %v14461_v41, 0.0  ;;  %v16986_v24 = vld [vmem:[#allocation48_spill] sm:$0xff]  ;;  %v16987_v21 = vld [vmem:[#allocation31_spill] sm:$0xff] }
 0x764   : > { %v6298_v4 = vadd.f32 %v6297_v20, %v6296_v54  ;;  %v6201_v27 = vadd.f32 %v6200_v15, %v6199_v17  ;;  %v6006_v20 = vadd.f32 %v16982_v61, %v5852_v58  ;;  %v6258_v7 = vmul.f32 %v16983_v5, %v16983_v5  ;;  %v16984_v54 = vld [vmem:[#allocation45_spill] sm:$0xff]  ;;  %v5412_v58 = vpop.f32.mrf.mxu2 }
 0x765   : > { %v14491_v29 = vadd.f32 %v16984_v54, %v6005_v46  ;;  %v5857_v15 = vadd.f32 %v14409_v39, %v5445_v19  ;;  %v6307_v17 = vsel %vm1028_vm6, %v6257_v35, 0.0  ;;  %v6008_v46 = vadd.f32 %v16988_v30, %v5854_v16  ;;  %v16989_v35 = vld [vmem:[#allocation47_spill] sm:$0xff] }
 0x766   : > { %v14444_v50 = vpop.f32.mrf.mxu1  ;;  %v6300_v53 = vadd.f32 %v6299_v26, %v6298_v4  ;;  %v6203_v23 = vadd.f32 %v6202_v0, %v6201_v27  ;;  %v5975_v26 = vpop.f32.mrf.mxu0  ;;  %v6007_v4 = vadd.f32 %v16985_v43, %v5853_v14  ;;  %v6259_v0 = vmul.f32 %v14480_v57, %v14480_v57 }
 0x767   : > { %v14501_v3 = vadd.f32 %v16986_v24, %v6006_v20  ;;  %v6309_v14 = vsel %vm1028_vm6, %v6258_v7, 0.0  ;;  %v5824_v19 = vpop.f32.mrf.mxu3  ;;  %v6212_v16 = vsel %vm1028_vm6, %v14491_v29, 0.0 }
 0x768   : > { %v6302_v22 = vadd.f32 %v6301_v8, %v6300_v53  ;;  %v6205_v9 = vadd.f32 %v6204_v34, %v6203_v23  ;;  %v6208_v8 = vsel %vm1028_vm6, %v16983_v5, 0.0  ;;  %v5446_v53 = vadd.f32 %v5409_v31, %v16987_v21 }
 0x769   : > { %v6260_v34 = vmul.f32 %v14491_v29, %v14491_v29  ;;  %v14511_v12 = vadd.f32 %v16989_v35, %v6007_v4  ;;  %v6009_v31 = vadd.f32 %v14330_v60, %v5855_v51  ;;  %v6311_v61 = vsel %vm1028_vm6, %v6259_v0, 0.0 }
 0x76a   : > { %v6304_v56 = vadd.f32 %v6303_v36, %v6302_v22  ;;  %v6207_v39 = vadd.f32 %v6206_v55, %v6205_v9  ;;  %v6210_v36 = vsel %vm1028_vm6, %v14480_v57, 0.0  ;;  %v5858_v40 = vadd.f32 %v5821_v49, %v5446_v53  ;;  %v16990_v55 = vld [vmem:[#allocation38_spill] sm:$0xff] }
 0x76b   : > { %v6261_v20 = vmul.f32 %v14501_v3, %v14501_v3  ;;  %v5447_v7 = vadd.f32 %v5412_v58, %v16990_v55  ;;  %v6313_v60 = vsel %vm1028_vm6, %v6260_v34, 0.0  ;;  %v6214_v51 = vsel %vm1028_vm6, %v14501_v3, 0.0 }
 0x76c   : > { %v6306_v27 = vadd.f32 %v6305_v25, %v6304_v56  ;;  %v6209_v23 = vadd.f32 %v6208_v8, %v6207_v39  ;;  %v14520_v25 = vadd.f32 %v14353_v37, %v6008_v46  ;;  %v6010_v56 = vadd.f32 %v14383_v44, %v5856_v6  ;;  %v5414_v39 = vpop.f32.mrf.mxu2 }
 0x76d   : > { %v6262_v43 = vmul.f32 %v14511_v12, %v14511_v12  ;;  %v14530_v4 = vadd.f32 %v14396_v38, %v6009_v31  ;;  %v5859_v37 = vadd.f32 %v5824_v19, %v5447_v7  ;;  %v6011_v58 = vadd.f32 %v14442_v2, %v5857_v15  ;;  %v16991_v19 = vld [vmem:[#allocation35_spill] sm:$0xff] }
 0x76e   : > { %v6127_v33 = vpop.f32.mrf.mxu1  ;;  %v6308_v22 = vadd.f32 %v6307_v17, %v6306_v27  ;;  %v6211_v49 = vadd.f32 %v6210_v36, %v6209_v23  ;;  %v6315_v0 = vsel %vm1028_vm6, %v6261_v20, 0.0  ;;  %v6216_v44 = vsel %vm1028_vm6, %v14511_v12, 0.0  ;;  %v5978_v21 = vpop.f32.mrf.mxu0 }
 0x76f   : > { %v6263_v6 = vmul.f32 %v14520_v25, %v14520_v25  ;;  %v14539_v24 = vadd.f32 %v14444_v50, %v6010_v56  ;;  %v6012_v27 = vadd.f32 %v5975_v26, %v5858_v40  ;;  %v6317_v30 = vsel %vm1028_vm6, %v6262_v43, 0.0  ;;  %v5826_v23 = vpop.f32.mrf.mxu3 }
 0x770   : > { %v6310_v54 = vadd.f32 %v6309_v14, %v6308_v22  ;;  %v6213_v8 = vadd.f32 %v6212_v16, %v6211_v49  ;;  %v6218_v2 = vsel %vm1028_vm6, %v14520_v25, 0.0  ;;  %v6264_v15 = vmul.f32 %v14530_v4, %v14530_v4 }
 0x771   : > { %v14546_v46 = vadd.f32 %v6127_v33, %v6011_v58  ;;  %v6013_v34 = vadd.f32 %v5978_v21, %v5859_v37  ;;  %v6319_v50 = vsel %vm1028_vm6, %v6263_v6, 0.0  ;;  %v6220_v35 = vsel %vm1028_vm6, %v14530_v4, 0.0 }
 0x772   : > { %v6312_v17 = vadd.f32 %v6311_v61, %v6310_v54  ;;  %v6215_v38 = vadd.f32 %v6214_v51, %v6213_v8  ;;  %v6265_v26 = vmul.f32 %v14539_v24, %v14539_v24  ;;  %v5448_v22 = vadd.f32 %v5414_v39, %v16991_v19 }
 0x773   : > { %v6321_v16 = vsel %vm1028_vm6, %v6264_v15, 0.0  ;;  %v6222_v20 = vsel %vm1028_vm6, %v14539_v24, 0.0  ;;  %v6266_v55 = vmul.f32 %v14546_v46, %v14546_v46 }
 0x774   : > { %v6314_v53 = vadd.f32 %v6313_v60, %v6312_v17  ;;  %v6217_v36 = vadd.f32 %v6216_v44, %v6215_v38  ;;  %v5860_v56 = vadd.f32 %v5826_v23, %v5448_v22  ;;  %v6224_v60 = vsel %vm1028_vm6, %v14546_v46, 0.0 }
 0x775   : > { %v6325_v17 = vsel %vm1028_vm6, %v6266_v55, 0.0 }
 0x776   : > { %v6129_v9 = vpop.f32.mrf.mxu1  ;;  %v6316_v14 = vadd.f32 %v6315_v0, %v6314_v53  ;;  %v6219_v61 = vadd.f32 %v6218_v2, %v6217_v36  ;;  %v5980_v0 = vpop.f32.mrf.mxu0 }
 0x777   : > { %v14553_v40 = vadd.f32 %v6129_v9, %v6012_v27  ;;  %v6323_v9 = vsel %vm1028_vm6, %v6265_v26, 0.0  ;;  %v6014_v38 = vadd.f32 %v5980_v0, %v5860_v56 }
 0x778   : > { %v6318_v31 = vadd.f32 %v6317_v30, %v6316_v14  ;;  %v6221_v49 = vadd.f32 %v6220_v35, %v6219_v61 }
 0x779   : > { %v6267_v51 = vmul.f32 %v14553_v40, %v14553_v40  ;;  %v6226_v8 = vsel %vm1028_vm6, %v14553_v40, 0.0 }
 0x77a   : > { %v6320_v54 = vadd.f32 %v6319_v50, %v6318_v31  ;;  %v6223_v37 = vadd.f32 %v6222_v20, %v6221_v49 }
 0x77b   : > { %v6327_v21 = vsel %vm1028_vm6, %v6267_v51, 0.0 }
 0x77c   : > { %v6322_v43 = vadd.f32 %v6321_v16, %v6320_v54  ;;  %v6225_v6 = vadd.f32 %v6224_v60, %v6223_v37 }
 0x77e   : > { %v6132_v33 = vpop.f32.mrf.mxu1  ;;  %v6324_v44 = vadd.f32 %v6323_v9, %v6322_v43  ;;  %v6227_v39 = vadd.f32 %v6226_v8, %v6225_v6 }
 0x77f   : > { %v14561_v7 = vadd.f32 %v6132_v33, %v6013_v34 }
 0x780   : > { %v6326_v27 = vadd.f32 %v6325_v17, %v6324_v44  ;;  %v10629_v44 = vld [vmem:[%s14186_s13 + $0x8] sm:$0xff] }
 0x781   : > { %v6268_v58 = vmul.f32 %v14561_v7, %v14561_v7  ;;  %v6228_v53 = vsel %vm1028_vm6, %v14561_v7, 0.0  ;;  %7227 = vmatpush.bf16.msrb.mxu3 %v10629_v44 }
 0x782   : > { %v6328_v14 = vadd.f32 %v6327_v21, %v6326_v27  ;;  %v6229_v36 = vadd.f32 %v6228_v53, %v6227_v39  ;;  %v10628_v21 = vld [vmem:[%s14186_s13] sm:$0xff] }
 0x783   : > { %v6329_v2 = vsel %vm1028_vm6, %v6268_v58, 0.0  ;;  %v10193_v27 = vld [vmem:[%s12713_s30 + $0x1] sm:$0x1] }
 0x784   : > { %v6330_v35 = vadd.f32 %v6329_v2, %v6328_v14  ;;  %v10610_v14 = vld [vmem:[#allocation2] sm:$0xff] }
 0x785   : > { %7228 = vmatpush.bf16.msrb.mxu3 %v10628_v21 }
 0x786   : > { %v6134_v30 = vpop.f32.mrf.mxu1 }
 0x787   : > { %v6168_v15 = vadd.f32 %v6134_v30, %v6014_v38 }
 0x788   : > { %10299 = vmatmul.msk.bf16.vlgmr.msrb.gmra.mxu3 %vm1028_vm6, %v10610_v14 }
 0x789   : > { %v6230_v34 = vsel %vm1028_vm6, %v6168_v15, 0.0  ;;  %v6269_v50 = vmul.f32 %v6168_v15, %v6168_v15 }
 0x78a   : > { %v6231_v26 = vadd.f32 %v6230_v34, %v6229_v36  ;;  %v10194_v36 = vld [vmem:[%s12719_s9 + $0x1] sm:$0x1] }
 0x78b   : > { %v6331_v19 = vsel %vm1028_vm6, %v6269_v50, 0.0 }
 0x78c   : > { %v6232_v22 = vrot.slane %v6231_v26, 4  ;;  %v6332_v23 = vadd.f32 %v6331_v19, %v6330_v35 }
 0x78e   : > { %v6233_v31 = vadd.f32 %v6232_v22, %v6231_v26  ;;  %v6333_v61 = vrot.slane %v6332_v23, 4  ;;  %v16992_v22 = vld [vmem:[#allocation13_spill] sm:$0xff] }
 0x790   : > { %v6234_v33 = vrot.slane %v6233_v31, 2  ;;  %v6334_v16 = vadd.f32 %v6333_v61, %v6332_v23 }
 0x792   : > { %v6235_v20 = vadd.f32 %v6234_v33, %v6233_v31  ;;  %v6335_v55 = vrot.slane %v6334_v16, 2  ;;  %v16993_v31 = vld [vmem:[#allocation23_spill] sm:$0xff] }
 0x793   : > { %v16994_v33 = vld [vmem:[#allocation19_spill] sm:$0xff] }
 0x794   : > { %v6236_v54 = vrot.slane %v6235_v20, 1  ;;  %v6336_v49 = vadd.f32 %v6335_v55, %v6334_v16 }
 0x796   : > { %v6237_v56 = vadd.f32 %v6236_v54, %v6235_v20  ;;  %v6337_v9 = vrot.slane %v6336_v49, 1  ;;  %v16995_v20 = vld [vmem:[#allocation16_spill] sm:$0xff] }
 0x798   : > { %v6338_v60 = vadd.f32 %v6337_v9, %v6336_v49  ;;  %v6339_v51 = vmul.f32 0.00390625, %v6237_v56 }
 0x79a   : > { %v6340_v43 = vmul.f32 0.00390625, %v6338_v60  ;;  %v6341_v37 = vmul.f32 %v6339_v51, %v6339_v51 }
 0x79c   : > { %v6342_v17 = vsub.f32 %v6340_v43, %v6341_v37  ;;  %v10635_v43 = vld [vmem:[%s14186_s13 + $0x18] sm:$0xff] }
 0x79d   : > { %8013 = vmatpush.bf16.msrb.mxu1 %v10635_v43 }
 0x79e   : > { %v6345_v8 = vadd.f32 1e-05, %v6342_v17 }
 0x7a0   : > { %10698 = vrsqrt.f32 %v6345_v8  ;;  %vm6352_vm7 = vweird.f32 %v6345_v8 }
 0x7a6   : > { %v10699_v58 = vpop.eup %10698 }
 0x7a7   : > { %v6347_v0 = vmul.f32 %v10699_v58, %v6345_v8  ;;  %vm6353_vm3 = vweird.f32 %v10699_v58 }
 0x7a8   : > { %vm6354_vm9 = vmor %vm6352_vm7, %vm6353_vm3 }
 0x7a9   : > { %v6348_v6 = vmul.f32 %v10699_v58, %v6347_v0 }
 0x7ab   : > { %v6349_v53 = vmul.f32 0.5, %v6348_v6 }
 0x7ad   : > { %v6350_v38 = vsub.f32 1.5, %v6349_v53 }
 0x7af   : > { %v6351_v39 = vmul.f32 %v10699_v58, %v6350_v38 }
 0x7b1   : > { %v6355_v30 = vsel %vm6354_vm9, %v10699_v58, %v6351_v39 }
 0x7b2   : > { %v6356_v2 = vmul.f32 %v10193_v27, %v6355_v30 }
 0x7b4   : > { %v6359_v34 = vmul.f32 %v6356_v2, %v6339_v51  ;;  %v6362_v50 = vperm.slane %v6356_v2, 0 }
 0x7b6   : > { %v6360_v35 = vsub.f32 %v10194_v36, %v6359_v34  ;;  %v6394_v26 = vmul.f32 %v6362_v50, %v14561_v7  ;;  %v6395_v19 = vmul.f32 %v6362_v50, %v6168_v15  ;;  %v6364_v23 = vmul.f32 %v6362_v50, %v16992_v22 }
 0x7b7   : > { %v6365_v61 = vmul.f32 %v6362_v50, %v16993_v31  ;;  %v6366_v16 = vmul.f32 %v6362_v50, %v16994_v33  ;;  %v6367_v55 = vmul.f32 %v6362_v50, %v16995_v20  ;;  %v6368_v49 = vmul.f32 %v6362_v50, %v14178_v47 }
 0x7b8   : > { %v14589_v54 = vperm.slane %v6360_v35, 0  ;;  %v6369_v56 = vmul.f32 %v6362_v50, %v14191_v63  ;;  %v6370_v9 = vmul.f32 %v6362_v50, %v14195_v32  ;;  %v6371_v60 = vmul.f32 %v6362_v50, %v14201_v42  ;;  %v6924_v35 = vld [vmem:[#allocation2 + $0xc8] sm:$0x1] }
 0x7b9   : > { %v6372_v7 = vmul.f32 %v6362_v50, %v14205_v59  ;;  %v6373_v15 = vmul.f32 %v6362_v50, %v14348_v48  ;;  %v6374_v51 = vmul.f32 %v6362_v50, %v14213_v18  ;;  %v6375_v8 = vmul.f32 %v6362_v50, %v14369_v45 }
 0x7ba   : > { %v6429_v37 = vadd.f32 %v14589_v54, %v6394_v26  ;;  %v6430_v17 = vadd.f32 %v14589_v54, %v6395_v19  ;;  %v6376_v47 = vmul.f32 %v6362_v50, %v14222_v28  ;;  %v6377_v63 = vmul.f32 %v6362_v50, %v14391_v1 }
 0x7bb   : > { %v6378_v32 = vmul.f32 %v6362_v50, %v14235_v52  ;;  %v6379_v42 = vmul.f32 %v6362_v50, %v14417_v11  ;;  %v6380_v59 = vmul.f32 %v6362_v50, %v14242_v62  ;;  %v6381_v58 = vmul.f32 %v6362_v50, %v14437_v10 }
 0x7bc   : > { %v6461_v48 = vmax.f32 %v6429_v37, 0.0  ;;  %v6462_v18 = vmax.f32 %v6430_v17, 0.0  ;;  %v6382_v0 = vmul.f32 %v6362_v50, %v16977_v13  ;;  %v6383_v44 = vmul.f32 %v6362_v50, %v14461_v41  ;;  %v10634_v37 = vld [vmem:[%s14186_s13 + $0x10] sm:$0xff] }
 0x7bd   : > { %v6384_v45 = vmul.f32 %v6362_v50, %v16983_v5  ;;  %v6385_v28 = vmul.f32 %v6362_v50, %v14480_v57  ;;  %v6386_v1 = vmul.f32 %v6362_v50, %v14491_v29  ;;  %v6387_v11 = vmul.f32 %v6362_v50, %v14501_v3  ;;  %8014 = vmatpush.bf16.msrb.mxu1 %v10634_v37 }
 0x7be   : > { %v6493_v52 = vpack.c.bf16 %v6461_v48, %v6461_v48  ;;  %v6494_v6 = vpack.c.bf16 %v6462_v18, %v6462_v18  ;;  %v6388_v62 = vmul.f32 %v6362_v50, %v14511_v12  ;;  %v6389_v21 = vmul.f32 %v6362_v50, %v14520_v25  ;;  %v10633_v48 = vld [vmem:[%s14186_s13 + $0x68] sm:$0xff]  ;;  %v6920_v18 = vld [vmem:[#allocation2 + $0xc0] sm:$0xf] }
 0x7bf   : > { %v6390_v10 = vmul.f32 %v6362_v50, %v14530_v4  ;;  %v6391_v13 = vmul.f32 %v6362_v50, %v14539_v24  ;;  %v6392_v41 = vmul.f32 %v6362_v50, %v14546_v46  ;;  %v6393_v57 = vmul.f32 %v6362_v50, %v14553_v40  ;;  %7341 = vmatpush.bf16.msrb.mxu0 %v10633_v48 }
 0x7c0   : > { %v6751_v53 = vshrl.u32 %v6493_v52, 16  ;;  %v6759_v5 = vshrl.u32 %v6494_v6, 16  ;;  %v6762_v38 = vshll.u32 %v6494_v6, 16  ;;  %v14621_v29 = vadd.f32 %v14589_v54, %v6364_v23 }
 0x7c1   : > { %v14624_v3 = vadd.f32 %v14589_v54, %v6365_v61  ;;  %v14627_v12 = vadd.f32 %v14589_v54, %v6366_v16  ;;  %v14630_v25 = vadd.f32 %v14589_v54, %v6367_v55  ;;  %v14633_v46 = vadd.f32 %v14589_v54, %v6368_v49 }
 0x7c2   : > { %v6753_v4 = vrot.slane %v6751_v53, 7  ;;  %v6761_v24 = vrot.slane %v6759_v5, 7  ;;  %v14636_v27 = vadd.f32 %v14589_v54, %v6369_v56  ;;  %v14639_v40 = vadd.f32 %v14589_v54, %v6370_v9 }
 0x7c3   : > { %v14642_v39 = vadd.f32 %v14589_v54, %v6371_v60  ;;  %v14645_v30 = vadd.f32 %v14589_v54, %v6372_v7  ;;  %v14648_v2 = vadd.f32 %v14589_v54, %v6373_v15  ;;  %v14651_v50 = vadd.f32 %v14589_v54, %v6374_v51 }
 0x7c4   : > { %v6757_v14 = vrot.slane %v6753_v4, 4  ;;  %v6764_v36 = vor.u32 %v6762_v38, %v6761_v24  ;;  %v6766_v34 = vrot.slane %v6761_v24, 4  ;;  %v14654_v26 = vadd.f32 %v14589_v54, %v6375_v8 }
 0x7c5   : > { %v14657_v19 = vadd.f32 %v14589_v54, %v6376_v47  ;;  %v14660_v22 = vadd.f32 %v14589_v54, %v6377_v63  ;;  %v14663_v23 = vadd.f32 %v14589_v54, %v6378_v32  ;;  %v14670_v20 = vadd.f32 %v14589_v54, %v6379_v42 }
 0x7c6   : > { %v6765_v61 = vsel %vm10952_vm4, %v6757_v14, %v6764_v36  ;;  %v6925_v16 = vsel %vm11079_vm8, %v6766_v34, %v6924_v35  ;;  %v14673_v55 = vadd.f32 %v14589_v54, %v6380_v59  ;;  %v14677_v49 = vadd.f32 %v14589_v54, %v6381_v58 }
 0x7c7   : > { %6923 = vst.msk [vmem:[#allocation2 + $0xc4] sm:$0xf] %vm363_vm0, %v6765_v61  ;;  %v14680_v56 = vadd.f32 %v14589_v54, %v6382_v0  ;;  %v14683_v9 = vadd.f32 %v14589_v54, %v6383_v44  ;;  %v14686_v60 = vadd.f32 %v14589_v54, %v6384_v45  ;;  %v14689_v7 = vadd.f32 %v14589_v54, %v6385_v28 }
 0x7c8   : > { %6926 = vst [vmem:[#allocation2 + $0xc8] sm:$0x1] %v6925_v16  ;;  %v14692_v15 = vadd.f32 %v14589_v54, %v6386_v1  ;;  %v14695_v51 = vadd.f32 %v14589_v54, %v6387_v11  ;;  %v14698_v43 = vadd.f32 %v14589_v54, %v6388_v62  ;;  %v14702_v17 = vadd.f32 %v14589_v54, %v6389_v21 }
 0x7c9   : > { %v14705_v8 = vadd.f32 %v14589_v54, %v6390_v10  ;;  %v14708_v47 = vadd.f32 %v14589_v54, %v6391_v13  ;;  %v14711_v63 = vadd.f32 %v14589_v54, %v6392_v41  ;;  %v14714_v32 = vadd.f32 %v14589_v54, %v6393_v57 }
 0x7ca   : > { %v6754_v42 = vshll.u32 %v6493_v52, 16  ;;  %v6431_v44 = vmax.f32 %v14621_v29, 0.0  ;;  %v6432_v45 = vmax.f32 %v14624_v3, 0.0  ;;  %v6433_v28 = vmax.f32 %v14627_v12, 0.0 }
 0x7cb   : > { %v6434_v1 = vmax.f32 %v14630_v25, 0.0  ;;  %v6435_v54 = vmax.f32 %v14633_v46, 0.0  ;;  %v6436_v52 = vmax.f32 %v14636_v27, 0.0  ;;  %v6437_v6 = vmax.f32 %v14639_v40, 0.0 }
 0x7cc   : > { %v6756_v59 = vor.u32 %v6754_v42, %v6753_v4  ;;  %v6438_v11 = vmax.f32 %v14642_v39, 0.0  ;;  %v6439_v62 = vmax.f32 %v14645_v30, 0.0  ;;  %v6440_v21 = vmax.f32 %v14648_v2, 0.0 }
 0x7cd   : > { %v6441_v10 = vmax.f32 %v14651_v50, 0.0  ;;  %v6442_v13 = vmax.f32 %v14654_v26, 0.0  ;;  %v6443_v41 = vmax.f32 %v14657_v19, 0.0  ;;  %v6444_v53 = vmax.f32 %v14660_v22, 0.0 }
 0x7ce   : > { %v6921_v0 = vsel %vm10962_vm5, %v6756_v59, %v6920_v18  ;;  %v6445_v5 = vmax.f32 %v14663_v23, 0.0  ;;  %v6446_v38 = vmax.f32 %v14670_v20, 0.0  ;;  %v6447_v57 = vmax.f32 %v14673_v55, 0.0 }
 0x7cf   : > { %6922 = vst [vmem:[#allocation2 + $0xc0] sm:$0xf] %v6921_v0  ;;  %v6448_v29 = vmax.f32 %v14677_v49, 0.0  ;;  %v6449_v3 = vmax.f32 %v14680_v56, 0.0  ;;  %v6450_v12 = vmax.f32 %v14683_v9, 0.0  ;;  %v6451_v25 = vmax.f32 %v14686_v60, 0.0 }
 0x7d0   : > { %v6452_v4 = vmax.f32 %v14689_v7, 0.0  ;;  %v6453_v24 = vmax.f32 %v14692_v15, 0.0  ;;  %v6454_v46 = vmax.f32 %v14695_v51, 0.0  ;;  %v6455_v27 = vmax.f32 %v14698_v43, 0.0 }
 0x7d1   : > { %v6456_v40 = vmax.f32 %v14702_v17, 0.0  ;;  %v6457_v39 = vmax.f32 %v14705_v8, 0.0  ;;  %v6458_v30 = vmax.f32 %v14708_v47, 0.0  ;;  %v6459_v2 = vmax.f32 %v14711_v63, 0.0 }
 0x7d2   : > { %v6460_v14 = vmax.f32 %v14714_v32, 0.0  ;;  %v14749_v36 = vpack.c.bf16 %v6431_v44, %v6431_v44  ;;  %v14751_v34 = vpack.c.bf16 %v6432_v45, %v6432_v45  ;;  %v14753_v50 = vpack.c.bf16 %v6433_v28, %v6433_v28 }
 0x7d3   : > { %v14755_v35 = vpack.c.bf16 %v6434_v1, %v6434_v1  ;;  %v14757_v26 = vpack.c.bf16 %v6435_v54, %v6435_v54  ;;  %v14759_v19 = vpack.c.bf16 %v6436_v52, %v6436_v52  ;;  %v14761_v22 = vpack.c.bf16 %v6437_v6, %v6437_v6 }
 0x7d4   : > { %v14763_v23 = vpack.c.bf16 %v6438_v11, %v6438_v11  ;;  %v14765_v61 = vpack.c.bf16 %v6439_v62, %v6439_v62  ;;  %v14767_v16 = vpack.c.bf16 %v6440_v21, %v6440_v21  ;;  %v14769_v20 = vpack.c.bf16 %v6441_v10, %v6441_v10 }
 0x7d5   : > { %v14771_v55 = vpack.c.bf16 %v6442_v13, %v6442_v13  ;;  %v14773_v49 = vpack.c.bf16 %v6443_v41, %v6443_v41  ;;  %v14775_v56 = vpack.c.bf16 %v6444_v53, %v6444_v53  ;;  %v14777_v9 = vpack.c.bf16 %v6445_v5, %v6445_v5 }
 0x7d6   : > { %16999 = vst [vmem:[#allocation49_spill] sm:$0xff] %v14765_v61  ;;  %v14779_v60 = vpack.c.bf16 %v6446_v38, %v6446_v38  ;;  %v14781_v7 = vpack.c.bf16 %v6447_v57, %v6447_v57  ;;  %v14783_v15 = vpack.c.bf16 %v6448_v29, %v6448_v29  ;;  %v14785_v51 = vpack.c.bf16 %v6449_v3, %v6449_v3 }
 0x7d7   : > { %17000 = vst [vmem:[#allocation21_spill] sm:$0xff] %v14773_v49  ;;  %v14787_v43 = vpack.c.bf16 %v6450_v12, %v6450_v12  ;;  %v14789_v37 = vpack.c.bf16 %v6451_v25, %v6451_v25  ;;  %v14791_v17 = vpack.c.bf16 %v6452_v4, %v6452_v4  ;;  %v14793_v8 = vpack.c.bf16 %v6453_v24, %v6453_v24 }
 0x7d8   : > { %17001 = vst [vmem:[#allocation50_spill] sm:$0xff] %v14777_v9  ;;  %v14795_v47 = vpack.c.bf16 %v6454_v46, %v6454_v46  ;;  %v14797_v63 = vpack.c.bf16 %v6455_v27, %v6455_v27  ;;  %v14799_v32 = vpack.c.bf16 %v6456_v40, %v6456_v40  ;;  %v14801_v42 = vpack.c.bf16 %v6457_v39, %v6457_v39 }
 0x7d9   : > { %17002 = vst [vmem:[#allocation24_spill] sm:$0xff] %v14781_v7  ;;  %v14803_v59 = vpack.c.bf16 %v6458_v30, %v6458_v30  ;;  %v14805_v48 = vpack.c.bf16 %v6459_v2, %v6459_v2  ;;  %v14807_v18 = vpack.c.bf16 %v6460_v14, %v6460_v14  ;;  %v6496_v0 = vshrl.u32 %v14749_v36, 16 }
 0x7da   : > { %17003 = vst [vmem:[#allocation51_spill] sm:$0xff] %v14785_v51  ;;  %v6504_v45 = vshrl.u32 %v14751_v34, 16  ;;  %v6513_v1 = vshrl.u32 %v14753_v50, 16  ;;  %v6521_v52 = vshrl.u32 %v14755_v35, 16  ;;  %v6530_v11 = vshrl.u32 %v14757_v26, 16 }
 0x7db   : > { %17004 = vst [vmem:[#allocation52_spill] sm:$0xff] %v14789_v37  ;;  %v6538_v21 = vshrl.u32 %v14759_v19, 16  ;;  %v6547_v13 = vshrl.u32 %v14761_v22, 16  ;;  %v6555_v53 = vshrl.u32 %v14763_v23, 16  ;;  %v6564_v38 = vshrl.u32 %v14765_v61, 16 }
 0x7dc   : > { %17005 = vst [vmem:[#allocation29_spill] sm:$0xff] %v14793_v8  ;;  %v6572_v29 = vshrl.u32 %v14767_v16, 16  ;;  %v6581_v12 = vshrl.u32 %v14769_v20, 16  ;;  %v6589_v25 = vshrl.u32 %v14771_v55, 16  ;;  %v6598_v24 = vshrl.u32 %v14773_v49, 16 }
 0x7dd   : > { %17006 = vst [vmem:[#allocation12_spill] sm:$0xff] %v14797_v63  ;;  %v6606_v46 = vshrl.u32 %v14775_v56, 16  ;;  %v6615_v40 = vshrl.u32 %v14777_v9, 16  ;;  %v6623_v39 = vshrl.u32 %v14779_v60, 16  ;;  %v6632_v2 = vshrl.u32 %v14781_v7, 16 }
 0x7de   : > { %17007 = vst [vmem:[#allocation22_spill] sm:$0xff] %v14801_v42  ;;  %v6640_v14 = vshrl.u32 %v14783_v15, 16  ;;  %v6649_v41 = vshrl.u32 %v14785_v51, 16  ;;  %v6657_v4 = vshrl.u32 %v14787_v43, 16  ;;  %v6666_v27 = vshrl.u32 %v14789_v37, 16 }
 0x7df   : > { %17008 = vst [vmem:[#allocation30_spill] sm:$0xff] %v14805_v48  ;;  %v6674_v5 = vshrl.u32 %v14791_v17, 16  ;;  %v6683_v30 = vshrl.u32 %v14793_v8, 16  ;;  %v6691_v62 = vshrl.u32 %v14795_v47, 16  ;;  %v6700_v57 = vshrl.u32 %v14797_v63, 16 }
 0x7e0   : > { %v6708_v54 = vshrl.u32 %v14799_v32, 16  ;;  %v6717_v3 = vshrl.u32 %v14801_v42, 16  ;;  %v6725_v44 = vshrl.u32 %v14803_v59, 16  ;;  %v6734_v10 = vshrl.u32 %v14805_v48, 16  ;;  %v10632_v42 = vld [vmem:[%s14186_s13 + $0x60] sm:$0xff] }
 0x7e1   : > { %v6742_v8 = vshrl.u32 %v14807_v18, 16  ;;  %v14859_v7 = vrot.slane %v6496_v0, 7  ;;  %v14861_v6 = vrot.slane %v6504_v45, 7  ;;  %v14863_v63 = vrot.slane %v6513_v1, 7  ;;  %7342 = vmatpush.bf16.msrb.mxu0 %v10632_v42 }
 0x7e2   : > { %v14865_v9 = vrot.slane %v6521_v52, 7  ;;  %v14867_v28 = vrot.slane %v6530_v11, 7  ;;  %v14870_v49 = vrot.slane %v6538_v21, 7  ;;  %v14872_v37 = vrot.slane %v6547_v13, 7 }
 0x7e3   : > { %v14874_v48 = vrot.slane %v6555_v53, 7  ;;  %v14876_v61 = vrot.slane %v6564_v38, 7  ;;  %v14878_v51 = vrot.slane %v6572_v29, 7  ;;  %v14880_v0 = vrot.slane %v6581_v12, 7 }
 0x7e4   : > { %17009 = vst [vmem:[#allocation33_spill] sm:$0xff] %v14870_v49  ;;  %v14882_v45 = vrot.slane %v6589_v25, 7  ;;  %v14884_v1 = vrot.slane %v6598_v24, 7  ;;  %v14886_v52 = vrot.slane %v6606_v46, 7  ;;  %v14888_v11 = vrot.slane %v6615_v40, 7 }
 0x7e5   : > { %17010 = vst [vmem:[#allocation14_spill] sm:$0xff] %v14876_v61  ;;  %v14890_v21 = vrot.slane %v6623_v39, 7  ;;  %v14892_v13 = vrot.slane %v6632_v2, 7  ;;  %v14894_v53 = vrot.slane %v6640_v14, 7  ;;  %v14896_v38 = vrot.slane %v6649_v41, 7 }
 0x7e6   : > { %17011 = vst [vmem:[#allocation20_spill] sm:$0xff] %v14880_v0  ;;  %v14898_v29 = vrot.slane %v6657_v4, 7  ;;  %v14900_v12 = vrot.slane %v6666_v27, 7  ;;  %v14902_v25 = vrot.slane %v6674_v5, 7  ;;  %v14904_v24 = vrot.slane %v6683_v30, 7 }
 0x7e7   : > { %17012 = vst [vmem:[#allocation36_spill] sm:$0xff] %v14884_v1  ;;  %v14906_v42 = vrot.slane %v6691_v62, 7  ;;  %v14908_v46 = vrot.slane %v6700_v57, 7  ;;  %v14910_v40 = vrot.slane %v6708_v54, 7  ;;  %v14912_v39 = vrot.slane %v6717_v3, 7 }
 0x7e8   : > { %17013 = vst [vmem:[#allocation7_spill] sm:$0xff] %v14888_v11  ;;  %v14914_v2 = vrot.slane %v6725_v44, 7  ;;  %v14916_v41 = vrot.slane %v6734_v10, 7  ;;  %v14918_v4 = vrot.slane %v6742_v8, 7  ;;  %v17026_v5 = vshll.u32 %v14749_v36, 16 }
 0x7e9   : > { %17014 = vst [vmem:[#allocation28_spill] sm:$0xff] %v14890_v21  ;;  %v6502_v62 = vrot.slane %v14859_v7, 4  ;;  %v17027_v57 = vshll.u32 %v14751_v34, 16  ;;  %v17028_v44 = vshll.u32 %v14753_v50, 16  ;;  %v6519_v8 = vrot.slane %v14863_v63, 4 }
 0x7ea   : > { %17015 = vst [vmem:[#allocation25_spill] sm:$0xff] %v14892_v13  ;;  %v14923_v27 = vor.u32 %v17026_v5, %v14859_v7  ;;  %v17029_v36 = vshll.u32 %v14755_v35, 16  ;;  %v17030_v7 = vshll.u32 %v14757_v26, 16  ;;  %v6536_v5 = vrot.slane %v14867_v28, 4 }
 0x7eb   : > { %17016 = vst [vmem:[#allocation32_spill] sm:$0xff] %v14894_v53  ;;  %v6509_v54 = vor.u32 %v17027_v57, %v14861_v6  ;;  %v14933_v10 = vor.u32 %v17028_v44, %v14863_v63  ;;  %v17031_v50 = vshll.u32 %v14759_v19, 16  ;;  %v6553_v63 = vrot.slane %v14872_v37, 4 }
 0x7ec   : > { %17017 = vst [vmem:[#allocation15_spill] sm:$0xff] %v14896_v38  ;;  %v6526_v30 = vor.u32 %v17029_v36, %v14865_v9  ;;  %v14943_v34 = vor.u32 %v17030_v7, %v14867_v28  ;;  %v17032_v35 = vshll.u32 %v14763_v23, 16  ;;  %v6570_v14 = vrot.slane %v14876_v61, 4 }
 0x7ed   : > { %17018 = vst [vmem:[#allocation27_spill] sm:$0xff] %v14898_v29  ;;  %v6543_v57 = vor.u32 %v17031_v50, %v14870_v49  ;;  %v17033_v26 = vshll.u32 %v14767_v16, 16  ;;  %v6587_v28 = vrot.slane %v14880_v0, 4  ;;  %v17034_v19 = vshll.u32 %v14771_v55, 16 }
 0x7ee   : > { %17019 = vst [vmem:[#allocation9_spill] sm:$0xff] %v14900_v12  ;;  %v6560_v36 = vor.u32 %v17032_v35, %v14874_v48  ;;  %v6604_v44 = vrot.slane %v14884_v1, 4  ;;  %v17035_v3 = vshll.u32 %v14775_v56, 16  ;;  %v6621_v23 = vrot.slane %v14888_v11, 4  ;;  %v7457_v11 = vld [vmem:[#allocation2 + $0x4] sm:$0xf] }
 0x7ef   : > { %17020 = vst [vmem:[#allocation34_spill] sm:$0xff] %v14902_v25  ;;  %v6577_v7 = vor.u32 %v17033_v26, %v14878_v51  ;;  %v6594_v50 = vor.u32 %v17034_v19, %v14882_v45  ;;  %v17036_v35 = vshll.u32 %v14779_v60, 16  ;;  %v6638_v16 = vrot.slane %v14892_v13, 4 }
 0x7f0   : > { %17021 = vst [vmem:[#allocation37_spill] sm:$0xff] %v14904_v24  ;;  %v6611_v49 = vor.u32 %v17035_v3, %v14886_v52  ;;  %v17037_v26 = vshll.u32 %v14783_v15, 16  ;;  %v6655_v55 = vrot.slane %v14896_v38, 4  ;;  %v17038_v19 = vshll.u32 %v14787_v43, 16  ;;  %v7456_v3 = vld [vmem:[#allocation2] sm:$0xf] }
 0x7f1   : > { %17022 = vst [vmem:[#allocation6_spill] sm:$0xff] %v14906_v42  ;;  %v6628_v61 = vor.u32 %v17036_v35, %v14890_v21  ;;  %v6672_v56 = vrot.slane %v14900_v12, 4  ;;  %v17039_v60 = vshll.u32 %v14791_v17, 16  ;;  %v6689_v13 = vrot.slane %v14904_v24, 4 }
 0x7f2   : > { %17023 = vst [vmem:[#allocation10_spill] sm:$0xff] %v14908_v46  ;;  %v6645_v0 = vor.u32 %v17037_v26, %v14894_v53  ;;  %v6662_v1 = vor.u32 %v17038_v19, %v14898_v29  ;;  %v17040_v15 = vshll.u32 %v14795_v47, 16  ;;  %v6706_v38 = vrot.slane %v14908_v46, 4  ;;  %v7458_v53 = vld [vmem:[#allocation2 + $0x8] sm:$0x1] }
 0x7f3   : > { %17024 = vst [vmem:[#allocation17_spill] sm:$0xff] %v14912_v39  ;;  %v6679_v35 = vor.u32 %v17039_v60, %v14902_v25  ;;  %v17041_v43 = vshll.u32 %v14799_v32, 16  ;;  %v6723_v12 = vrot.slane %v14912_v39, 4  ;;  %v17042_v29 = vshll.u32 %v14803_v59, 16 }
 0x7f4   : > { %17025 = vst [vmem:[#allocation39_spill] sm:$0xff] %v14916_v41  ;;  %v6696_v26 = vor.u32 %v17040_v15, %v14906_v42  ;;  %v6740_v60 = vrot.slane %v14916_v41, 4  ;;  %v17043_v24 = vshll.u32 %v14807_v18, 16  ;;  %v7511_v15 = vshrl.u32 %v7456_v3, 16 }
 0x7f5   : > { %v6713_v19 = vor.u32 %v17041_v43, %v14910_v40  ;;  %v6730_v17 = vor.u32 %v17042_v29, %v14914_v2  ;;  %v7514_v42 = vshll.u32 %v7456_v3, 16  ;;  %v7520_v46 = vshll.u32 %v7457_v11, 16  ;;  %v6840_v3 = vld [vmem:[#allocation2 + $0x38] sm:$0x1] }
 0x7f6   : > { %v6747_v47 = vor.u32 %v17043_v24, %v14918_v4  ;;  %v7524_v25 = vshrl.u32 %v7457_v11, 16  ;;  %v7530_v21 = vshll.u32 %v7458_v53, 16  ;;  %v6510_v32 = vsel %vm10952_vm4, %v6502_v62, %v6509_v54  ;;  %v6819_v54 = vld [vmem:[#allocation2 + $0x14] sm:$0x1] }
 0x7f7   : > { %v6527_v43 = vsel %vm10952_vm4, %v6519_v8, %v6526_v30  ;;  %v7513_v39 = vrot.slane %v7511_v15, 4  ;;  %v7516_v59 = vrot.slane %v7514_v42, 5  ;;  %v7522_v29 = vrot.slane %v7520_v46, 5  ;;  %6818 = vst.msk [vmem:[#allocation2 + $0x10] sm:$0xf] %vm363_vm0, %v6510_v32 }
 0x7f8   : > { %v6544_v41 = vsel %vm10952_vm4, %v6536_v5, %v6543_v57  ;;  %v7526_v18 = vrot.slane %v7524_v25, 4  ;;  %v7532_v24 = vrot.slane %v7530_v21, 5  ;;  %v6561_v11 = vsel %vm10952_vm4, %v6553_v63, %v6560_v36  ;;  %6825 = vst.msk [vmem:[#allocation2 + $0x1c] sm:$0xf] %vm363_vm0, %v6527_v43  ;;  %v6815_v21 = vld [vmem:[#allocation2 + $0xc] sm:$0xf] }
 0x7f9   : > { %v6578_v53 = vsel %vm10952_vm4, %v6570_v14, %v6577_v7  ;;  %v7517_v62 = vor.u32 %v7516_v59, %v7513_v39  ;;  %v6595_v42 = vsel %vm10952_vm4, %v6587_v28, %v6594_v50  ;;  %v15014_v46 = vsel %vm10952_vm4, %v6604_v44, %v6611_v49  ;;  %6832 = vst.msk [vmem:[#allocation2 + $0x28] sm:$0xf] %vm363_vm0, %v6544_v41  ;;  %v6826_v5 = vld [vmem:[#allocation2 + $0x20] sm:$0x1]  ;;  %v6833_v36 = vld [vmem:[#allocation2 + $0x2c] sm:$0x1] }
 0x7fa   : > { %v15018_v25 = vsel %vm10952_vm4, %v6621_v23, %v6628_v61  ;;  %v7527_v8 = vor.u32 %v7526_v18, %v7522_v29  ;;  %v15023_v30 = vsel %vm10952_vm4, %v6638_v16, %v6645_v0  ;;  %v15027_v39 = vsel %vm10952_vm4, %v6655_v55, %v6662_v1  ;;  %6839 = vst.msk [vmem:[#allocation2 + $0x34] sm:$0xf] %vm363_vm0, %v6561_v11  ;;  %v6822_v61 = vld [vmem:[#allocation2 + $0x18] sm:$0xf]  ;;  %v6836_v16 = vld [vmem:[#allocation2 + $0x30] sm:$0xf] }
 0x7fb   : > { %v15031_v49 = vsel %vm10952_vm4, %v6672_v56, %v6679_v35  ;;  %v7518_v14 = vrot.slane %v7517_v62, 4  ;;  %v15036_v41 = vsel %vm10952_vm4, %v6689_v13, %v6696_v26  ;;  %v15040_v0 = vsel %vm10952_vm4, %v6706_v38, %v6713_v19  ;;  %6846 = vst.msk [vmem:[#allocation2 + $0x40] sm:$0xf] %vm363_vm0, %v6578_v53  ;;  %v17049_v35 = vld [vmem:[#allocation49_spill] sm:$0xff]  ;;  %v6843_v15 = vld [vmem:[#allocation2 + $0x3c] sm:$0xf] }
 0x7fc   : > { %v15044_v1 = vsel %vm10952_vm4, %v6723_v12, %v6730_v17  ;;  %v7528_v57 = vrot.slane %v7527_v8, 4  ;;  %v15049_v44 = vsel %vm10952_vm4, %v6740_v60, %v6747_v47  ;;  %v6816_v13 = vsel %vm10962_vm5, %v14923_v27, %v6815_v21  ;;  %6853 = vst.msk [vmem:[#allocation2 + $0x4c] sm:$0xf] %vm363_vm0, %v6595_v42  ;;  %v6829_v12 = vld [vmem:[#allocation2 + $0x24] sm:$0xf]  ;;  %v17051_v60 = vld [vmem:[#allocation33_spill] sm:$0xff] }
 0x7fd   : > { %v17044_v63 = vrot.slane %v14861_v6, 4  ;;  %v17045_v7 = vshll.u32 %v14761_v22, 16  ;;  %v7523_v50 = vsel %vm11371_vm11, %v7518_v14, %v7522_v29  ;;  %v6823_v27 = vsel %vm10962_vm5, %v14933_v10, %v6822_v61  ;;  %6817 = vst [vmem:[#allocation2 + $0xc] sm:$0xf] %v6816_v13  ;;  %v17053_v43 = vld [vmem:[#allocation21_spill] sm:$0xff]  ;;  %v17054_v29 = vld [vmem:[#allocation20_spill] sm:$0xff] }
 0x7fe   : > { %v17047_v6 = vrot.slane %v14865_v9, 4  ;;  %v6562_v55 = vrot.slane %v14874_v48, 4  ;;  %v7533_v22 = vsel %vm11371_vm11, %v7528_v57, %v7532_v24  ;;  %v6830_v56 = vsel %vm10962_vm5, %v14943_v34, %v6829_v12  ;;  %v17048_v9 = vld [vmem:[#allocation14_spill] sm:$0xff]  ;;  %6824 = vst [vmem:[#allocation2 + $0x18] sm:$0xf] %v6823_v27  ;;  %v17056_v62 = vld [vmem:[#allocation24_spill] sm:$0xff] }
 0x7ff   : > { %v6820_v38 = vsel %vm11079_vm8, %v17044_v63, %v6819_v54  ;;  %v6552_v28 = vor.u32 %v17045_v7, %v14872_v37  ;;  %v7899_v37 = vunpack.c.l.b16 %v7523_v50  ;;  %v6584_v10 = vshll.u32 %v14769_v20, 16  ;;  %v6847_v34 = vld [vmem:[#allocation2 + $0x44] sm:$0x1]  ;;  %6831 = vst [vmem:[#allocation2 + $0x24] sm:$0xf] %v6830_v56  ;;  %v17055_v11 = vld [vmem:[#allocation50_spill] sm:$0xff] }
 0x800   : > { %v6827_v23 = vsel %vm11079_vm8, %v17047_v6, %v6826_v5  ;;  %6821 = vst [vmem:[#allocation2 + $0x14] sm:$0x1] %v6820_v38  ;;  %v17050_v26 = vshll.u32 %v17049_v35, 16  ;;  %v7900_v17 = vunpack.c.l.b16 %v7533_v22  ;;  %v17052_v47 = vrot.slane %v17051_v60, 4  ;;  %v6850_v54 = vld [vmem:[#allocation2 + $0x48] sm:$0xf] }
 0x801   : > { %v6579_v32 = vrot.slane %v14878_v51, 4  ;;  %6828 = vst [vmem:[#allocation2 + $0x20] sm:$0x1] %v6827_v23  ;;  %v6601_v59 = vshll.u32 %v17053_v43, 16  ;;  %v6586_v20 = vor.u32 %v6584_v10, %v17054_v29  ;;  %v6837_v24 = vsel %vm10962_vm5, %v6552_v28, %v6836_v16  ;;  %v6854_v8 = vld [vmem:[#allocation2 + $0x50] sm:$0x1] }
 0x802   : > { %v6569_v19 = vor.u32 %v17050_v26, %v17048_v9  ;;  %v6834_v48 = vsel %vm11079_vm8, %v17052_v47, %v6833_v36  ;;  %v7931_v18 = vpack.c.b16 %v7900_v17, %v7899_v37  ;;  %v6618_v53 = vshll.u32 %v17055_v11, 16  ;;  %v17057_v61 = vld [vmem:[#allocation51_spill] sm:$0xff]  ;;  %v17058_v5 = vld [vmem:[#allocation36_spill] sm:$0xff]  ;;  %v6857_v38 = vld [vmem:[#allocation2 + $0x54] sm:$0xf] }
 0x803   : > { %v6635_v42 = vshll.u32 %v17056_v62, 16  ;;  %v6596_v21 = vrot.slane %v14882_v45, 4  ;;  %v6841_v51 = vsel %vm11079_vm8, %v6562_v55, %v6840_v3  ;;  %6835 = vst [vmem:[#allocation2 + $0x2c] sm:$0x1] %v6834_v48  ;;  %v6652_v14 = vshll.u32 %v17057_v61, 16  ;;  %v10637_v36 = vld [vmem:[%s14186_s13 + $0x48] sm:$0xff] }
 0x804   : > { %v6603_v57 = vor.u32 %v6601_v59, %v17058_v5  ;;  %v6613_v13 = vrot.slane %v14886_v52, 4  ;;  %10359 = vmatmul.msk.bf16.vlgmr.msrb.gmra.mxu1 %vm1028_vm6, %v7931_v18  ;;  %v6844_v63 = vsel %vm10962_vm5, %v6569_v19, %v6843_v15  ;;  %v6848_v45 = vsel %vm11079_vm8, %v6579_v32, %v6847_v34  ;;  %6838 = vst [vmem:[#allocation2 + $0x30] sm:$0xf] %v6837_v24  ;;  %v10611_v12 = vld [vmem:[#allocation2 + $0xc] sm:$0xff]  ;;  %v17059_v28 = vld [vmem:[#allocation7_spill] sm:$0xff]  ;;  %v17060_v10 = vld [vmem:[#allocation52_spill] sm:$0xff] }
 0x805   : > { %v7459_v7 = vld [vmem:[#allocation2 + $0xc] sm:$0xf]  ;;  %v6620_v50 = vor.u32 %v6618_v53, %v17059_v28  ;;  %v6851_v27 = vsel %vm10962_vm5, %v6586_v20, %v6850_v54  ;;  %6842 = vst [vmem:[#allocation2 + $0x38] sm:$0x1] %v6841_v51  ;;  %v15107_v52 = vld [vmem:[#allocation2 + $0x10] sm:$0xf]  ;;  %v6855_v16 = vsel %vm11079_vm8, %v6596_v21, %v6854_v8  ;;  %10271 = vmatmul.msk.bf16.vlgmr.msra.gmra.mxu2 %vm1028_vm6, %v10611_v12 }
 0x806   : > { %v6861_v23 = vld [vmem:[#allocation2 + $0x5c] sm:$0x1]  ;;  %6845 = vst [vmem:[#allocation2 + $0x3c] sm:$0xf] %v6844_v63  ;;  %10300 = vmatmul.msk.bf16.gmra.mxu3 %vm1028_vm6, %v10611_v12  ;;  %v7535_v22 = vshrl.u32 %v7459_v7, 16  ;;  %v7538_v37 = vshll.u32 %v7459_v7, 16  ;;  %v6858_v19 = vsel %vm10962_vm5, %v6603_v57, %v6857_v38  ;;  %8181 = vmatpush.bf16.msrb.mxu2 %v10637_v36 }
 0x807   : > { %v15109_v6 = vld [vmem:[#allocation2 + $0x14] sm:$0x1]  ;;  %v15115_v55 = vld [vmem:[#allocation2 + $0x18] sm:$0xff]  ;;  %v7544_v56 = vshll.u32 %v15107_v52, 16  ;;  %v6864_v3 = vld [vmem:[#allocation2 + $0x60] sm:$0xf]  ;;  %v6862_v29 = vsel %vm11079_vm8, %v6613_v13, %v6861_v23 }
 0x808   : > { %v6669_v9 = vshll.u32 %v17060_v10, 16  ;;  %v17061_v35 = vld [vmem:[#allocation28_spill] sm:$0xff]  ;;  %6849 = vst [vmem:[#allocation2 + $0x44] sm:$0x1] %v6848_v45  ;;  %v7548_v17 = vshrl.u32 %v15107_v52, 16  ;;  %v17062_v60 = vld [vmem:[#allocation25_spill] sm:$0xff]  ;;  %10331 = vmatmul.msk.bf16.vlgmr.msrb.gmra.mxu0 %vm1028_vm6, %v15115_v55  ;;  %v6865_v62 = vsel %vm10962_vm5, %v6620_v50, %v6864_v3 }
 0x809   : > { %v6630_v26 = vrot.slane %v17061_v35, 4  ;;  %v6637_v47 = vor.u32 %v6635_v42, %v17062_v60  ;;  %6852 = vst [vmem:[#allocation2 + $0x48] sm:$0xf] %v6851_v27  ;;  %v7537_v48 = vrot.slane %v7535_v22, 4  ;;  %v7540_v15 = vrot.slane %v7538_v37, 5  ;;  %v17063_v43 = vld [vmem:[#allocation32_spill] sm:$0xff] }
 0x80a   : > { %v7546_v32 = vrot.slane %v7544_v56, 5  ;;  %v6868_v34 = vld [vmem:[#allocation2 + $0x68] sm:$0x1]  ;;  %v6647_v59 = vrot.slane %v17063_v43, 4  ;;  %6856 = vst [vmem:[#allocation2 + $0x50] sm:$0x1] %v6855_v16 }
 0x80b   : > { %v7550_v20 = vrot.slane %v7548_v17, 4  ;;  %v7554_v18 = vshll.u32 %v15109_v6, 16  ;;  %v6871_v24 = vld [vmem:[#allocation2 + $0x6c] sm:$0xf]  ;;  %v17064_v11 = vld [vmem:[#allocation15_spill] sm:$0xff]  ;;  %v7541_v42 = vor.u32 %v7540_v15, %v7537_v48  ;;  %v6869_v13 = vsel %vm11079_vm8, %v6630_v26, %v6868_v34  ;;  %v17068_v17 = vld [vmem:[#allocation34_spill] sm:$0xff] }
 0x80c   : > { %v6654_v53 = vor.u32 %v6652_v14, %v17064_v11  ;;  %6859 = vst [vmem:[#allocation2 + $0x54] sm:$0xf] %v6858_v19  ;;  %v7462_v21 = vld [vmem:[#allocation2 + $0x18] sm:$0xf]  ;;  %v7463_v51 = vld [vmem:[#allocation2 + $0x1c] sm:$0xf]  ;;  %v6872_v7 = vsel %vm10962_vm5, %v6637_v47, %v6871_v24 }
 0x80d   : > { %v17065_v54 = vld [vmem:[#allocation27_spill] sm:$0xff]  ;;  %6860 = vst.msk [vmem:[#allocation2 + $0x58] sm:$0xf] %vm363_vm0, %v15014_v46  ;;  %v7551_v61 = vor.u32 %v7550_v20, %v7546_v32  ;;  %v7559_v5 = vshrl.u32 %v7462_v21, 16  ;;  %v7562_v57 = vshll.u32 %v7462_v21, 16  ;;  %v7542_v14 = vrot.slane %v7541_v42, 4 }
 0x80e   : > { %v6664_v8 = vrot.slane %v17065_v54, 4  ;;  %6863 = vst [vmem:[#allocation2 + $0x5c] sm:$0x1] %v6862_v29  ;;  %v7568_v63 = vshll.u32 %v7463_v51, 16  ;;  %v7572_v38 = vshrl.u32 %v7463_v51, 16  ;;  %v17066_v12 = vld [vmem:[#allocation9_spill] sm:$0xff] }
 0x80f   : > { %v6875_v45 = vld [vmem:[#allocation2 + $0x74] sm:$0x1]  ;;  %v6671_v36 = vor.u32 %v6669_v9, %v17066_v12  ;;  %6866 = vst [vmem:[#allocation2 + $0x60] sm:$0xf] %v6865_v62  ;;  %v7552_v28 = vrot.slane %v7551_v61, 4  ;;  %v7556_v50 = vrot.slane %v7554_v18, 5  ;;  %v7547_v27 = vsel %vm11371_vm11, %v7542_v14, %v7546_v32 }
 0x810   : > { %v6876_v46 = vsel %vm11079_vm8, %v6647_v59, %v6875_v45  ;;  %6867 = vst.msk [vmem:[#allocation2 + $0x64] sm:$0xf] %vm363_vm0, %v15018_v25  ;;  %v7561_v23 = vrot.slane %v7559_v5, 4  ;;  %v7564_v16 = vrot.slane %v7562_v57, 5  ;;  %v6878_v22 = vld [vmem:[#allocation2 + $0x78] sm:$0xf]  ;;  %v7901_v56 = vunpack.c.l.b16 %v7547_v27 }
 0x811   : > { %6870 = vst [vmem:[#allocation2 + $0x68] sm:$0x1] %v6869_v13  ;;  %v7557_v37 = vsel %vm11371_vm11, %v7552_v28, %v7556_v50  ;;  %v15149_v3 = vrot.slane %v7568_v63, 5  ;;  %v7574_v10 = vrot.slane %v7572_v38, 4  ;;  %v17067_v9 = vld [vmem:[#allocation29_spill] sm:$0xff]  ;;  %v6879_v26 = vsel %vm10962_vm5, %v6654_v53, %v6878_v22  ;;  %v17070_v29 = vld [vmem:[#allocation12_spill] sm:$0xff] }
 0x812   : > { %v6686_v35 = vshll.u32 %v17067_v9, 16  ;;  %6873 = vst [vmem:[#allocation2 + $0x6c] sm:$0xf] %v6872_v7  ;;  %v7902_v25 = vunpack.c.l.b16 %v7557_v37  ;;  %v6882_v19 = vld [vmem:[#allocation2 + $0x80] sm:$0x1]  ;;  %v6681_v60 = vrot.slane %v17068_v17, 4  ;;  %v7565_v24 = vor.u32 %v7564_v16, %v7561_v23 }
 0x813   : > { %6874 = vst.msk [vmem:[#allocation2 + $0x70] sm:$0xf] %vm363_vm0, %v15023_v30  ;;  %v6885_v47 = vld [vmem:[#allocation2 + $0x84] sm:$0xf]  ;;  %v17069_v48 = vld [vmem:[#allocation37_spill] sm:$0xff]  ;;  %v6883_v32 = vsel %vm11079_vm8, %v6664_v8, %v6882_v19  ;;  %v6703_v20 = vshll.u32 %v17070_v29, 16  ;;  %v7575_v30 = vor.u32 %v7574_v10, %v15149_v3 }
 0x814   : > { %v6688_v15 = vor.u32 %v6686_v35, %v17069_v48  ;;  %6877 = vst [vmem:[#allocation2 + $0x74] sm:$0x1] %v6876_v46  ;;  %v15160_v34 = vpack.c.b16 %v7902_v25, %v7901_v56  ;;  %v7464_v43 = vld [vmem:[#allocation2 + $0x20] sm:$0x1]  ;;  %v6889_v59 = vld [vmem:[#allocation2 + $0x8c] sm:$0x1]  ;;  %v6886_v18 = vsel %vm10962_vm5, %v6671_v36, %v6885_v47 }
 0x815   : > { %6880 = vst [vmem:[#allocation2 + $0x78] sm:$0xf] %v6879_v26  ;;  %v6892_v11 = vld [vmem:[#allocation2 + $0x90] sm:$0xf]  ;;  %v6896_v42 = vld [vmem:[#allocation2 + $0x98] sm:$0x1]  ;;  %v6890_v54 = vsel %vm11079_vm8, %v6681_v60, %v6889_v59  ;;  %10272 = vmatmul.msk.bf16.gmra.mxu2 %vm1028_vm6, %v15115_v55 }
 0x816   : > { %v17071_v53 = vld [vmem:[#allocation6_spill] sm:$0xff]  ;;  %6881 = vst.msk [vmem:[#allocation2 + $0x7c] sm:$0xf] %vm363_vm0, %v15027_v39  ;;  %10360 = vmatmul.msk.bf16.gmra.mxu1 %vm1028_vm6, %v15160_v34  ;;  %v7578_v8 = vshll.u32 %v7464_v43, 16  ;;  %v6899_v61 = vld [vmem:[#allocation2 + $0x9c] sm:$0xf]  ;;  %v6893_v14 = vsel %vm10962_vm5, %v6688_v15, %v6892_v11  ;;  %10301 = vmatmul.msk.bf16.gmra.mxu3 %vm1028_vm6, %v15115_v55 }
 0x817   : > { %v6698_v62 = vrot.slane %v17071_v53, 4  ;;  %v17072_v21 = vld [vmem:[#allocation10_spill] sm:$0xff]  ;;  %6884 = vst [vmem:[#allocation2 + $0x80] sm:$0x1] %v6883_v32  ;;  %v6715_v13 = vrot.slane %v14910_v40, 4  ;;  %v10613_v39 = vld [vmem:[#allocation2 + $0x24] sm:$0xff] }
 0x818   : > { %v6705_v51 = vor.u32 %v6703_v20, %v17072_v21  ;;  %v17073_v5 = vld [vmem:[#allocation22_spill] sm:$0xff]  ;;  %6887 = vst [vmem:[#allocation2 + $0x84] sm:$0xf] %v6886_v18  ;;  %v7566_v63 = vrot.slane %v7565_v24, 4  ;;  %v7576_v38 = vrot.slane %v7575_v30, 4  ;;  %v17075_v40 = vld [vmem:[#allocation17_spill] sm:$0xff]  ;;  %10332 = vmatmul.msk.bf16.gmra.mxu0 %vm1028_vm6, %v10613_v39 }
 0x819   : > { %v6720_v57 = vshll.u32 %v17073_v5, 16  ;;  %6888 = vst.msk [vmem:[#allocation2 + $0x88] sm:$0xf] %vm363_vm0, %v15031_v49  ;;  %v7465_v45 = vld [vmem:[#allocation2 + $0x24] sm:$0xf]  ;;  %v17074_v12 = vld [vmem:[#allocation30_spill] sm:$0xff]  ;;  %v6897_v28 = vsel %vm11079_vm8, %v6698_v62, %v6896_v42 }
 0x81a   : > { %v6737_v36 = vshll.u32 %v17074_v12, 16  ;;  %6891 = vst [vmem:[#allocation2 + $0x8c] sm:$0x1] %v6890_v54  ;;  %v7466_v50 = vld [vmem:[#allocation2 + $0x28] sm:$0xf]  ;;  %v6732_v55 = vrot.slane %v14914_v2, 4  ;;  %v6900_v49 = vsel %vm10962_vm5, %v6705_v51, %v6899_v61  ;;  %v7571_v2 = vsel %vm11371_vm11, %v7566_v63, %v15149_v3 }
 0x81b   : > { %v6722_v7 = vor.u32 %v6720_v57, %v17075_v40  ;;  %v6903_v46 = vld [vmem:[#allocation2 + $0xa4] sm:$0x1]  ;;  %6894 = vst [vmem:[#allocation2 + $0x90] sm:$0xf] %v6893_v14  ;;  %v7580_v27 = vrot.slane %v7578_v8, 5  ;;  %v17076_v23 = vld [vmem:[#allocation39_spill] sm:$0xff]  ;;  %v7903_v47 = vunpack.c.l.b16 %v7571_v2 }
 0x81c   : > { %v6739_v16 = vor.u32 %v6737_v36, %v17076_v23  ;;  %v6904_v22 = vsel %vm11079_vm8, %v6715_v13, %v6903_v46  ;;  %6895 = vst.msk [vmem:[#allocation2 + $0x94] sm:$0xf] %vm363_vm0, %v15036_v41  ;;  %v7583_v37 = vshrl.u32 %v7465_v45, 16  ;;  %v7586_v56 = vshll.u32 %v7465_v45, 16  ;;  %v6906_v10 = vld [vmem:[#allocation2 + $0xa8] sm:$0xf] }
 0x81d   : > { %6898 = vst [vmem:[#allocation2 + $0x98] sm:$0x1] %v6897_v28  ;;  %v7581_v9 = vsel %vm11371_vm11, %v7576_v38, %v7580_v27  ;;  %v7592_v35 = vshll.u32 %v7466_v50, 16  ;;  %v7596_v26 = vshrl.u32 %v7466_v50, 16  ;;  %v6910_v25 = vld [vmem:[#allocation2 + $0xb0] sm:$0x1]  ;;  %v6907_v19 = vsel %vm10962_vm5, %v6722_v7, %v6906_v10 }
 0x81e   : > { %6901 = vst [vmem:[#allocation2 + $0x9c] sm:$0xf] %v6900_v49  ;;  %v6913_v17 = vld [vmem:[#allocation2 + $0xb4] sm:$0xf]  ;;  %v6749_v41 = vrot.slane %v14918_v4, 4  ;;  %v6911_v60 = vsel %vm11079_vm8, %v6732_v55, %v6910_v25  ;;  %v7904_v48 = vunpack.c.l.b16 %v7581_v9  ;;  %v7585_v15 = vrot.slane %v7583_v37, 4 }
 0x81f   : > { %6902 = vst.msk [vmem:[#allocation2 + $0xa0] sm:$0xf] %vm363_vm0, %v15040_v0  ;;  %v6914_v3 = vsel %vm10962_vm5, %v6739_v16, %v6913_v17  ;;  %v7588_v32 = vrot.slane %v7586_v56, 5  ;;  %v7594_v43 = vrot.slane %v7592_v35, 5  ;;  %v7598_v59 = vrot.slane %v7596_v26, 4  ;;  %v10614_v33 = vld [vmem:[#allocation2 + $0x30] sm:$0xff] }
 0x820   : > { %6905 = vst [vmem:[#allocation2 + $0xa4] sm:$0x1] %v6904_v22  ;;  %v6917_v29 = vld [vmem:[#allocation2 + $0xbc] sm:$0x1]  ;;  %v15215_v0 = vpack.c.b16 %v7904_v48, %v7903_v47  ;;  %v7467_v58 = vld [vmem:[#allocation2 + $0x2c] sm:$0x1] }
 0x821   : > { %6908 = vst [vmem:[#allocation2 + $0xa8] sm:$0xf] %v6907_v19  ;;  %v6918_v4 = vsel %vm11079_vm8, %v6749_v41, %v6917_v29  ;;  %v7589_v20 = vor.u32 %v7588_v32, %v7585_v15  ;;  %v7599_v18 = vor.u32 %v7598_v59, %v7594_v43  ;;  %v7602_v24 = vshll.u32 %v7467_v58, 16  ;;  %v7468_v11 = vld [vmem:[#allocation2 + $0x30] sm:$0xf]  ;;  %v10615_v40 = vld [vmem:[#allocation2 + $0x3c] sm:$0xff] }
 0x822   : > { %6909 = vst.msk [vmem:[#allocation2 + $0xac] sm:$0xf] %vm363_vm0, %v15044_v1  ;;  %v7469_v53 = vld [vmem:[#allocation2 + $0x34] sm:$0xf]  ;;  %v7610_v42 = vshll.u32 %v7468_v11, 16 }
 0x823   : > { %6912 = vst [vmem:[#allocation2 + $0xb0] sm:$0x1] %v6911_v60  ;;  %v7590_v1 = vrot.slane %v7589_v20, 4  ;;  %v7600_v30 = vrot.slane %v7599_v18, 4  ;;  %v7604_v62 = vrot.slane %v7602_v24, 5  ;;  %v7616_v54 = vshll.u32 %v7469_v53, 16 }
 0x824   : > { %6915 = vst [vmem:[#allocation2 + $0xb4] sm:$0xf] %v6914_v3  ;;  %v7620_v8 = vshrl.u32 %v7469_v53, 16  ;;  %v7612_v13 = vrot.slane %v7610_v42, 5  ;;  %v7470_v38 = vld [vmem:[#allocation2 + $0x38] sm:$0x1] }
 0x825   : > { %6916 = vst.msk [vmem:[#allocation2 + $0xb8] sm:$0xf] %vm363_vm0, %v15049_v44  ;;  %10273 = vmatmul.msk.bf16.gmra.mxu2 %vm1028_vm6, %v10613_v39  ;;  %v7607_v44 = vshrl.u32 %v7468_v11, 16  ;;  %v7595_v21 = vsel %vm11371_vm11, %v7590_v1, %v7594_v43  ;;  %v7605_v51 = vsel %vm11371_vm11, %v7600_v30, %v7604_v62  ;;  %v7618_v14 = vrot.slane %v7616_v54, 5  ;;  %v7471_v50 = vld [vmem:[#allocation2 + $0x3c] sm:$0xf] }
 0x826   : > { %6919 = vst [vmem:[#allocation2 + $0xbc] sm:$0x1] %v6918_v4  ;;  %10361 = vmatmul.msk.bf16.gmra.mxu1 %vm1028_vm6, %v15215_v0  ;;  %10302 = vmatmul.msk.bf16.gmra.mxu3 %vm1028_vm6, %v10613_v39  ;;  %v7905_v61 = vunpack.c.l.b16 %v7595_v21  ;;  %v7906_v5 = vunpack.c.l.b16 %v7605_v51  ;;  %v7622_v39 = vrot.slane %v7620_v8, 4  ;;  %v7626_v36 = vshll.u32 %v7470_v38, 16  ;;  %v15235_v46 = vld [vmem:[#allocation2 + $0x40] sm:$0xf] }
 0x827   : > { %v7609_v57 = vrot.slane %v7607_v44, 4  ;;  %v7631_v49 = vshrl.u32 %v7471_v50, 16  ;;  %v7634_v27 = vshll.u32 %v7471_v50, 16  ;;  %v7640_v22 = vshll.u32 %v15235_v46, 16  ;;  %v7474_v56 = vld [vmem:[#allocation2 + $0x48] sm:$0xf] }
 0x828   : > { %10333 = vmatmul.msk.bf16.gmra.mxu0 %vm1028_vm6, %v10614_v33  ;;  %v15228_v63 = vpack.c.b16 %v7906_v5, %v7905_v61  ;;  %v7623_v12 = vor.u32 %v7622_v39, %v7618_v14  ;;  %v7628_v55 = vrot.slane %v7626_v36, 5  ;;  %v7644_v37 = vshrl.u32 %v15235_v46, 16  ;;  %v15243_v19 = vld [vmem:[#allocation2 + $0x4c] sm:$0xf]  ;;  %v15247_v3 = vld [vmem:[#allocation2 + $0x44] sm:$0x1] }
 0x829   : > { %v7613_v45 = vor.u32 %v7612_v13, %v7609_v57  ;;  %v7633_v9 = vrot.slane %v7631_v49, 4  ;;  %v7636_v35 = vrot.slane %v7634_v27, 5  ;;  %v7642_v26 = vrot.slane %v7640_v22, 5  ;;  %v10616_v4 = vld [vmem:[#allocation2 + $0x48] sm:$0xff]  ;;  %v7477_v30 = vld [vmem:[#allocation2 + $0x54] sm:$0xf] }
 0x82a   : > { %v7624_v28 = vrot.slane %v7623_v12, 4  ;;  %v7646_v25 = vrot.slane %v7644_v37, 4  ;;  %v7655_v17 = vshrl.u32 %v7474_v56, 16  ;;  %v7658_v41 = vshll.u32 %v7474_v56, 16  ;;  %v15258_v53 = vld [vmem:[#allocation2 + $0x50] sm:$0x1] }
 0x82b   : > { %v7614_v7 = vrot.slane %v7613_v45, 4  ;;  %v7664_v47 = vshll.u32 %v15243_v19, 16  ;;  %v7668_v48 = vshrl.u32 %v15243_v19, 16  ;;  %v7637_v15 = vor.u32 %v7636_v35, %v7633_v9  ;;  %v15260_v44 = vld [vmem:[#allocation2 + $0x58] sm:$0xf] }
 0x82c   : > { %v7629_v16 = vsel %vm11371_vm11, %v7624_v28, %v7628_v55  ;;  %v7647_v32 = vor.u32 %v7646_v25, %v7642_v26  ;;  %v7657_v43 = vrot.slane %v7655_v17, 4  ;;  %v7660_v59 = vrot.slane %v7658_v41, 5  ;;  %v8465_v42 = vld [vmem:[#allocation2 + $0xc] sm:$0xe]  ;;  %v15276_v27 = vld [vmem:[#allocation2 + $0x5c] sm:$0x1] }
 0x82d   : > { %v7619_v23 = vsel %vm11371_vm11, %v7614_v7, %v7618_v14  ;;  %v7908_v2 = vunpack.c.l.b16 %v7629_v16  ;;  %v7650_v29 = vshll.u32 %v15247_v3, 16  ;;  %v7666_v58 = vrot.slane %v7664_v47, 5  ;;  %v15289_v25 = vld [vmem:[#allocation2 + $0x64] sm:$0xf] }
 0x82e   : > { %v7907_v10 = vunpack.c.l.b16 %v7619_v23  ;;  %v7670_v20 = vrot.slane %v7668_v48, 4  ;;  %v7638_v18 = vrot.slane %v7637_v15, 4  ;;  %v7648_v24 = vrot.slane %v7647_v32, 4  ;;  %v8469_v15 = vld [vmem:[#allocation2 + $0x3c] sm:$0xe]  ;;  %v15294_v32 = vld [vmem:[#allocation2 + $0x54] sm:$0xff] }
 0x82f   : > { %v7661_v1 = vor.u32 %v7660_v59, %v7657_v43  ;;  %v7652_v11 = vrot.slane %v7650_v29, 5  ;;  %v7679_v54 = vshrl.u32 %v7477_v30, 16  ;;  %v7682_v8 = vshll.u32 %v7477_v30, 16 }
 0x830   : > { %v15245_v60 = vpack.c.b16 %v7908_v2, %v7907_v10  ;;  %v7671_v62 = vor.u32 %v7670_v20, %v7666_v58  ;;  %v7643_v21 = vsel %vm11371_vm11, %v7638_v18, %v7642_v26  ;;  %v7674_v5 = vshll.u32 %v15258_v53, 16  ;;  %v7480_v10 = vld [vmem:[#allocation2 + $0x60] sm:$0xf] }
 0x831   : > { %v7653_v51 = vsel %vm11371_vm11, %v7648_v24, %v7652_v11  ;;  %v7662_v61 = vrot.slane %v7661_v1, 4  ;;  %v7688_v57 = vshll.u32 %v15260_v44, 16  ;;  %v7692_v13 = vshrl.u32 %v15260_v44, 16  ;;  %v8471_v11 = vld [vmem:[#allocation2 + $0x54] sm:$0xe] }
 0x832   : > { %v10432_v14 = vrot.slane %v8465_v42, 9  ;;  %v8542_v39 = vrot.slane %v15109_v6, 5  ;;  %v7909_v38 = vunpack.c.l.b16 %v7643_v21  ;;  %v7910_v45 = vunpack.c.l.b16 %v7653_v51 }
 0x833   : > { %v7672_v12 = vrot.slane %v7671_v62, 4  ;;  %v7681_v36 = vrot.slane %v7679_v54, 4  ;;  %v7667_v7 = vsel %vm11371_vm11, %v7662_v61, %v7666_v58  ;;  %v7676_v28 = vrot.slane %v7674_v5, 5  ;;  %v8470_v58 = vld [vmem:[#allocation2 + $0x48] sm:$0xe] }
 0x834   : > { %v15278_v23 = vrot.slane %v7688_v57, 5  ;;  %v7694_v6 = vrot.slane %v7692_v13, 4  ;;  %v15280_v37 = vpack.c.b16 %v7910_v45, %v7909_v38  ;;  %v7911_v35 = vunpack.c.l.b16 %v7667_v7  ;;  %v8472_v61 = vld [vmem:[#allocation2 + $0x60] sm:$0xe] }
 0x835   : > { %10274 = vmatmul.msk.bf16.gmra.mxu2 %vm1028_vm6, %v10614_v33  ;;  %v7677_v56 = vsel %vm11371_vm11, %v7672_v12, %v7676_v28  ;;  %v7698_v26 = vshll.u32 %v15276_v27, 16  ;;  %v7703_v47 = vshrl.u32 %v7480_v10, 16  ;;  %v7706_v48 = vshll.u32 %v7480_v10, 16 }
 0x836   : > { %10362 = vmatmul.msk.bf16.gmra.mxu1 %vm1028_vm6, %v15228_v63  ;;  %10303 = vmatmul.msk.bf16.gmra.mxu3 %vm1028_vm6, %v10614_v33  ;;  %v8539_v33 = vrot.slane %v15107_v52, 5  ;;  %v7912_v17 = vunpack.c.l.b16 %v7677_v56  ;;  %v7695_v41 = vor.u32 %v7694_v6, %v15278_v23  ;;  %v7712_v59 = vshll.u32 %v15289_v25, 16 }
 0x837   : > { %v7716_v29 = vshrl.u32 %v15289_v25, 16  ;;  %v15302_v20 = vrot.slane %v7698_v26, 5  ;;  %v10436_v18 = vrot.slane %v8469_v15, 9  ;;  %v8567_v24 = vrot.slane %v15235_v46, 5  ;;  %v15350_v26 = vld [vmem:[#allocation2 + $0x7c] sm:$0xf] }
 0x838   : > { %10334 = vmatmul.msk.bf16.gmra.mxu0 %vm1028_vm6, %v10615_v40  ;;  %v8541_v52 = vrot.slane %v8539_v33, 4  ;;  %v8540_v55 = vsel %vm11443_vm14, %v10432_v14, %v8539_v33  ;;  %v15305_v33 = vpack.c.b16 %v7912_v17, %v7911_v35  ;;  %v15309_v1 = vrot.slane %v7703_v47, 4  ;;  %v15328_v14 = vld [vmem:[#allocation2 + $0x68] sm:$0x1]  ;;  %v8474_v35 = vld [vmem:[#allocation2 + $0x78] sm:$0xe] }
 0x839   : > { %v8649_v16 = vunpack.c.l.b16 %v8540_v55  ;;  %v15311_v30 = vrot.slane %v7706_v48, 5  ;;  %v8568_v62 = vsel %vm11443_vm14, %v10436_v18, %v8567_v24  ;;  %v8569_v42 = vrot.slane %v8567_v24, 4  ;;  %v8473_v55 = vld [vmem:[#allocation2 + $0x6c] sm:$0xe]  ;;  %v15356_v48 = vld [vmem:[#allocation2 + $0x80] sm:$0x1] }
 0x83a   : > { %v8543_v49 = vsel %vm11443_vm14, %v8541_v52, %v8542_v39  ;;  %v8570_v21 = vrot.slane %v15247_v3, 5  ;;  %v10437_v51 = vrot.slane %v8470_v58, 9  ;;  %v15320_v54 = vrot.slane %v7712_v59, 5  ;;  %v15330_v39 = vld [vmem:[#allocation2 + $0x70] sm:$0xf] }
 0x83b   : > { %v8650_v22 = vunpack.c.l.b16 %v8543_v49  ;;  %v8574_v52 = vrot.slane %v15243_v19, 5  ;;  %v8657_v57 = vunpack.c.l.b16 %v8568_v62  ;;  %v8577_v13 = vrot.slane %v15258_v53, 5  ;;  %v8475_v58 = vld [vmem:[#allocation2 + $0x84] sm:$0xe]  ;;  %v15362_v18 = vld [vmem:[#allocation2 + $0x88] sm:$0xf] }
 0x83c   : > { %v8571_v5 = vsel %vm11443_vm14, %v8569_v42, %v8570_v21  ;;  %v10438_v3 = vrot.slane %v8471_v11, 9  ;;  %v8584_v7 = vrot.slane %v15276_v27, 5  ;;  %v10439_v28 = vrot.slane %v8472_v61, 9  ;;  %v15368_v21 = vld [vmem:[#allocation2 + $0x8c] sm:$0x1] }
 0x83d   : > { %v15284_v9 = vpack.c.b16 %v8650_v22, %v8649_v16  ;;  %v8658_v38 = vunpack.c.l.b16 %v8571_v5  ;;  %v8575_v45 = vsel %vm11443_vm14, %v10437_v51, %v8574_v52  ;;  %v8576_v12 = vrot.slane %v8574_v52, 4 }
 0x83e   : > { %v8659_v53 = vunpack.c.l.b16 %v8575_v45  ;;  %v8588_v10 = vrot.slane %v15289_v25, 5  ;;  %v10440_v17 = vrot.slane %v8473_v55, 9  ;;  %v10441_v42 = vrot.slane %v8474_v35, 9 }
 0x83f   : > { %v15342_v49 = vpack.c.b16 %v8658_v38, %v8657_v57  ;;  %v8578_v6 = vsel %vm11443_vm14, %v8576_v12, %v8577_v13  ;;  %v8602_v5 = vrot.slane %v15350_v26, 5  ;;  %v8476_v57 = vld [vmem:[#allocation2 + $0x90] sm:$0xe]  ;;  %v15375_v13 = vld [vmem:[#allocation2 + $0x60] sm:$0xff]  ;;  %v8605_v45 = vrot.slane %v15356_v48, 5 }
 0x840   : > { %v8660_v22 = vunpack.c.l.b16 %v8578_v6  ;;  %v8589_v25 = vsel %vm11443_vm14, %v10439_v28, %v8588_v10  ;;  %v10442_v12 = vrot.slane %v8475_v58, 9  ;;  %v8609_v6 = vrot.slane %v15362_v18, 5 }
 0x841   : > { %v8663_v24 = vunpack.c.l.b16 %v8589_v25  ;;  %v8603_v28 = vsel %vm11443_vm14, %v10441_v42, %v8602_v5  ;;  %v8604_v55 = vrot.slane %v8602_v5, 4  ;;  %v8478_v25 = vld [vmem:[#allocation2 + $0xa8] sm:$0xe] }
 0x842   : > { %v15358_v15 = vpack.c.b16 %v8660_v22, %v8659_v53  ;;  %v15386_v53 = vld [vmem:[#allocation2 + $0x98] sm:$0x1]  ;;  %v8612_v22 = vrot.slane %v15368_v21, 5 }
 0x845   : > { %10275 = vmatmul.msk.bf16.gmra.mxu2 %vm1028_vm6, %v10615_v40 }
 0x846   : > { %10363 = vmatmul.msk.bf16.gmra.mxu1 %vm1028_vm6, %v15245_v60  ;;  %10304 = vmatmul.msk.bf16.gmra.mxu3 %vm1028_vm6, %v10615_v40  ;;  %v7684_v40 = vrot.slane %v7682_v8, 5  ;;  %v15322_v8 = vrot.slane %v7716_v29, 4  ;;  %v8590_v29 = vrot.slane %v8588_v10, 4  ;;  %v8477_v10 = vld [vmem:[#allocation2 + $0x9c] sm:$0xe] }
 0x848   : > { %10335 = vmatmul.msk.bf16.gmra.mxu0 %vm1028_vm6, %v10616_v4  ;;  %v7685_v2 = vor.u32 %v7684_v40, %v7681_v36  ;;  %v8581_v36 = vrot.slane %v15260_v44, 5  ;;  %v15339_v40 = vld [vmem:[#allocation2 + $0x74] sm:$0x1] }
 0x849   : > { %v8598_v47 = vrot.slane %v15339_v40, 5 }
 0x84a   : > { %v15296_v43 = vrot.slane %v7685_v2, 4  ;;  %v8582_v44 = vsel %vm11443_vm14, %v10438_v3, %v8581_v36  ;;  %v8583_v16 = vrot.slane %v8581_v36, 4  ;;  %v8591_v2 = vrot.slane %v15328_v14, 5  ;;  %v15384_v36 = vld [vmem:[#allocation2 + $0x94] sm:$0xf] }
 0x84b   : > { %v8661_v56 = vunpack.c.l.b16 %v8582_v44 }
 0x84c   : > { %v7691_v46 = vsel %vm11371_vm11, %v15296_v43, %v15278_v23  ;;  %v8585_v27 = vsel %vm11443_vm14, %v8583_v16, %v8584_v7  ;;  %v8592_v52 = vsel %vm11443_vm14, %v8590_v29, %v8591_v2  ;;  %v15396_v16 = vld [vmem:[#allocation2 + $0xa0] sm:$0xf]  ;;  %v8610_v23 = vsel %vm11443_vm14, %v10442_v12, %v8609_v6  ;;  %v15413_v29 = vld [vmem:[#allocation2 + $0xac] sm:$0xf] }
 0x84d   : > { %v8662_v59 = vunpack.c.l.b16 %v8585_v27  ;;  %v8664_v3 = vunpack.c.l.b16 %v8592_v52  ;;  %v7913_v44 = vunpack.c.l.b16 %v7691_v46  ;;  %v10636_v2 = vld [vmem:[%s14186_s13 + $0x40] sm:$0xff]  ;;  %v8606_v27 = vsel %vm11443_vm14, %v8604_v55, %v8605_v45 }
 0x84e   : > { %v8611_v43 = vrot.slane %v8609_v6, 4  ;;  %v15410_v46 = vld [vmem:[#allocation2 + $0xa4] sm:$0x1]  ;;  %8182 = vmatpush.bf16.msrb.mxu2 %v10636_v2  ;;  %v10445_v12 = vrot.slane %v8478_v25, 9  ;;  %v8630_v6 = vrot.slane %v15413_v29, 5 }
 0x84f   : > { %v15370_v51 = vpack.c.b16 %v8662_v59, %v8661_v56  ;;  %v10443_v56 = vrot.slane %v8476_v57, 9  ;;  %v8616_v59 = vrot.slane %v15384_v36, 5  ;;  %v15423_v57 = vld [vmem:[#allocation2 + $0xb0] sm:$0x1]  ;;  %v8626_v45 = vrot.slane %v15410_v46, 5 }
 0x850   : > { %v8613_v58 = vsel %vm11443_vm14, %v8611_v43, %v8612_v22  ;;  %v8632_v43 = vrot.slane %v8630_v6, 4  ;;  %v15453_v25 = vld [vmem:[#allocation2 + $0xbc] sm:$0x1] }
 0x851   : > { %v8670_v52 = vunpack.c.l.b16 %v8613_v58  ;;  %v8618_v5 = vrot.slane %v8616_v59, 4 }
 0x855   : > { %10276 = vmatmul.msk.bf16.gmra.mxu2 %vm1028_vm6, %v10616_v4 }
 0x856   : > { %10364 = vmatmul.msk.bf16.gmra.mxu1 %vm1028_vm6, %v15280_v37  ;;  %10305 = vmatmul.msk.bf16.gmra.mxu3 %vm1028_vm6, %v10616_v4  ;;  %v15307_v4 = vrot.slane %v7695_v41, 4  ;;  %v8595_v41 = vrot.slane %v15330_v39, 5 }
 0x858   : > { %10336 = vmatmul.msk.bf16.gmra.mxu0 %vm1028_vm6, %v15294_v32  ;;  %v7701_v19 = vsel %vm11371_vm11, %v15307_v4, %v15302_v20  ;;  %v8596_v11 = vsel %vm11443_vm14, %v10440_v17, %v8595_v41  ;;  %v8597_v62 = vrot.slane %v8595_v41, 4  ;;  %v8667_v17 = vunpack.c.l.b16 %v8603_v28  ;;  %v8479_v4 = vld [vmem:[#allocation2 + $0xb4] sm:$0xe] }
 0x859   : > { %v8665_v61 = vunpack.c.l.b16 %v8596_v11  ;;  %v8668_v41 = vunpack.c.l.b16 %v8606_v27  ;;  %v10444_v11 = vrot.slane %v8477_v10, 9  ;;  %v8633_v20 = vrot.slane %v15423_v57, 5 }
 0x85a   : > { %v8599_v38 = vsel %vm11443_vm14, %v8597_v62, %v8598_v47  ;;  %v8669_v47 = vunpack.c.l.b16 %v8610_v23  ;;  %v8623_v62 = vrot.slane %v15396_v16, 5  ;;  %v8631_v23 = vsel %vm11443_vm14, %v10445_v12, %v8630_v6 }
 0x85b   : > { %v8666_v7 = vunpack.c.l.b16 %v8599_v38  ;;  %v15419_v42 = vpack.c.b16 %v8668_v41, %v8667_v17  ;;  %v8675_v58 = vunpack.c.l.b16 %v8631_v23  ;;  %v8640_v12 = vrot.slane %v15453_v25, 5 }
 0x85c   : > { %v8625_v38 = vrot.slane %v8623_v62, 4  ;;  %v15433_v28 = vpack.c.b16 %v8670_v52, %v8669_v47  ;;  %v8634_v47 = vsel %vm11443_vm14, %v8632_v43, %v8633_v20  ;;  %v7719_v52 = vor.u32 %v15322_v8, %v15320_v54 }
 0x85d   : > { %v15404_v35 = vpack.c.b16 %v8666_v7, %v8665_v61  ;;  %17078 = vst [vmem:[#allocation26_spill] sm:$0xff] %v15419_v42  ;;  %v8617_v61 = vsel %vm11443_vm14, %v10443_v56, %v8616_v59  ;;  %v7914_v7 = vunpack.c.l.b16 %v7701_v19  ;;  %v15443_v19 = vld [vmem:[#allocation2 + $0xb8] sm:$0xf]  ;;  %v7736_v23 = vshll.u32 %v15330_v39, 16 }
 0x85e   : > { %17079 = vst [vmem:[#allocation41_spill] sm:$0xff] %v15433_v28  ;;  %v8671_v22 = vunpack.c.l.b16 %v8617_v61  ;;  %v8627_v10 = vsel %vm11443_vm14, %v8625_v38, %v8626_v45  ;;  %v8637_v61 = vrot.slane %v15443_v19, 5  ;;  %v7720_v8 = vrot.slane %v7719_v52, 4 }
 0x85f   : > { %v8674_v27 = vunpack.c.l.b16 %v8627_v10  ;;  %v15451_v59 = vpack.c.b16 %v7914_v7, %v7913_v44  ;;  %v7230_v44 = vpop.f32.mrf.mxu3  ;;  %v7483_v7 = vld [vmem:[#allocation2 + $0x6c] sm:$0xf]  ;;  %v7740_v43 = vshrl.u32 %v15330_v39, 16  ;;  %v10620_v39 = vld [vmem:[#allocation2 + $0x78] sm:$0xff] }
 0x860   : > { %v8639_v45 = vrot.slane %v8637_v61, 4  ;;  %v7730_v10 = vshll.u32 %v7483_v7, 16 }
 0x865   : > { %10277 = vmatmul.msk.bf16.gmra.mxu2 %vm1028_vm6, %v15294_v32 }
 0x866   : > { %10365 = vmatmul.msk.bf16.gmra.mxu1 %vm1028_vm6, %v15305_v33  ;;  %10306 = vmatmul.msk.bf16.gmra.mxu3 %vm1028_vm6, %v15294_v32  ;;  %v15398_v32 = vpack.c.b16 %v8664_v3, %v8663_v24  ;;  %v8619_v24 = vrot.slane %v15386_v53, 5  ;;  %v8624_v3 = vsel %vm11443_vm14, %v10444_v11, %v8623_v62  ;;  %v10446_v11 = vrot.slane %v8479_v4, 9 }
 0x867   : > { %v8673_v2 = vunpack.c.l.b16 %v8624_v3  ;;  %v7709_v62 = vor.u32 %v15311_v30, %v15309_v1  ;;  %v7722_v3 = vshll.u32 %v15328_v14, 16  ;;  %v10619_v1 = vld [vmem:[#allocation2 + $0x6c] sm:$0xff] }
 0x868   : > { %10337 = vmatmul.msk.bf16.gmra.mxu0 %vm1028_vm6, %v15375_v13  ;;  %v8620_v55 = vsel %vm11443_vm14, %v8618_v5, %v8619_v24  ;;  %v8676_v24 = vunpack.c.l.b16 %v8634_v47  ;;  %v8638_v38 = vsel %vm11443_vm14, %v10446_v11, %v8637_v61  ;;  %v7232_v47 = vpop.f32.mrf.mxu3  ;;  %v7738_v11 = vrot.slane %v7736_v23, 5 }
 0x869   : > { %v8672_v56 = vunpack.c.l.b16 %v8620_v55  ;;  %v15447_v41 = vpack.c.b16 %v8674_v27, %v8673_v2  ;;  %v7710_v30 = vrot.slane %v7709_v62, 4  ;;  %v8641_v55 = vsel %vm11443_vm14, %v8639_v45, %v8640_v12 }
 0x86a   : > { %v15462_v5 = vpack.c.b16 %v8676_v24, %v8675_v58  ;;  %v8677_v14 = vunpack.c.l.b16 %v8638_v38  ;;  %v8678_v6 = vunpack.c.l.b16 %v8641_v55  ;;  %v7732_v24 = vrot.slane %v7730_v10, 5 }
 0x86b   : > { %v15445_v17 = vpack.c.b16 %v8672_v56, %v8671_v22  ;;  %17081 = vst [vmem:[#allocation18_spill] sm:$0xff] %v15447_v41  ;;  %v7724_v22 = vrot.slane %v7722_v3, 5  ;;  %v7727_v56 = vshrl.u32 %v7483_v7, 16  ;;  %v7742_v62 = vrot.slane %v7740_v43, 4 }
 0x86c   : > { %17082 = vst [vmem:[#allocation44_spill] sm:$0xff] %v15462_v5  ;;  %v15475_v2 = vpack.c.b16 %v8678_v6, %v8677_v14  ;;  %v7746_v45 = vshll.u32 %v15339_v40, 16 }
 0x86d   : > { %17080 = vst [vmem:[#allocation42_spill] sm:$0xff] %v15445_v17  ;;  %v7725_v27 = vsel %vm11371_vm11, %v7720_v8, %v7724_v22  ;;  %v7729_v58 = vrot.slane %v7727_v56, 4  ;;  %v7486_v8 = vld [vmem:[#allocation2 + $0x78] sm:$0xf] }
 0x86e   : > { %17083 = vst [vmem:[#allocation40_spill] sm:$0xff] %v15475_v2  ;;  %v7916_v4 = vunpack.c.l.b16 %v7725_v27  ;;  %v7748_v6 = vrot.slane %v7746_v45, 5  ;;  %v7751_v56 = vshrl.u32 %v7486_v8, 16  ;;  %v7754_v10 = vshll.u32 %v7486_v8, 16 }
 0x86f   : > { %v7733_v3 = vor.u32 %v7732_v24, %v7729_v58  ;;  %v7764_v27 = vshrl.u32 %v15350_v26, 16 }
 0x870   : > { %v7753_v58 = vrot.slane %v7751_v56, 4  ;;  %v7756_v24 = vrot.slane %v7754_v10, 5  ;;  %v7489_v56 = vld [vmem:[#allocation2 + $0x84] sm:$0xf] }
 0x871   : > { %v7734_v12 = vrot.slane %v7733_v3, 4 }
 0x873   : > { %v7739_v40 = vsel %vm11371_vm11, %v7734_v12, %v7738_v11 }
 0x875   : > { %10278 = vmatmul.msk.bf16.gmra.mxu2 %vm1028_vm6, %v15375_v13 }
 0x876   : > { %10366 = vmatmul.msk.bf16.gmra.mxu1 %vm1028_vm6, %v15451_v59  ;;  %10307 = vmatmul.msk.bf16.gmra.mxu3 %vm1028_vm6, %v15375_v13  ;;  %v7715_v13 = vsel %vm11371_vm11, %v7710_v30, %v15320_v54  ;;  %v7743_v54 = vor.u32 %v7742_v62, %v7738_v11  ;;  %v7766_v62 = vrot.slane %v7764_v27, 4 }
 0x877   : > { %v7915_v20 = vunpack.c.l.b16 %v7715_v13  ;;  %v7760_v13 = vshll.u32 %v15350_v26, 16 }
 0x878   : > { %10338 = vmatmul.msk.bf16.gmra.mxu0 %vm1028_vm6, %v10619_v1  ;;  %v7744_v30 = vrot.slane %v7743_v54, 4 }
 0x879   : > { %v15486_v61 = vpack.c.b16 %v7916_v4, %v7915_v20  ;;  %v7917_v20 = vunpack.c.l.b16 %v7739_v40 }
 0x881   : > { %v15484_v52 = vpop.f32.mrf.mxu1 }
 0x885   : > { %v7344_v38 = vpop.f32.mrf.mxu0  ;;  %10279 = vmatmul.msk.bf16.gmra.mxu2 %vm1028_vm6, %v10619_v1 }
 0x886   : > { %10367 = vmatmul.msk.bf16.gmra.mxu1 %vm1028_vm6, %v15486_v61  ;;  %10308 = vmatmul.msk.bf16.gmra.mxu3 %vm1028_vm6, %v10619_v1  ;;  %v7749_v1 = vsel %vm11371_vm11, %v7744_v30, %v7748_v6  ;;  %v7757_v30 = vor.u32 %v7756_v24, %v7753_v58  ;;  %v10621_v6 = vld [vmem:[#allocation2 + $0x84] sm:$0xff]  ;;  %v7788_v58 = vshrl.u32 %v15362_v18, 16 }
 0x887   : > { %v7918_v4 = vunpack.c.l.b16 %v7749_v1 }
 0x888   : > { %10339 = vmatmul.msk.bf16.gmra.mxu0 %vm1028_vm6, %v10620_v39  ;;  %v7121_v55 = vpop.f32.mrf.mxu2 }
 0x889   : > { %v15494_v7 = vpop.f32.mrf.mxu1  ;;  %v7235_v14 = vpop.f32.mrf.mxu3  ;;  %v7231_v22 = vadd.f32 %v7230_v44, %v7121_v55  ;;  %v7762_v44 = vrot.slane %v7760_v13, 5  ;;  %v15506_v12 = vpack.c.b16 %v7918_v4, %v7917_v20  ;;  %v7778_v20 = vshll.u32 %v7489_v56, 16 }
 0x88a   : > { %v7784_v4 = vshll.u32 %v15362_v18, 16 }
 0x88b   : > { %v15502_v23 = vadd.f32 %v7344_v38, %v7231_v22  ;;  %v7767_v8 = vor.u32 %v7766_v62, %v7762_v44  ;;  %v7770_v38 = vshll.u32 %v15356_v48, 16  ;;  %v7758_v22 = vrot.slane %v7757_v30, 4 }
 0x88d   : > { %v7346_v43 = vpop.f32.mrf.mxu0  ;;  %v7772_v1 = vrot.slane %v7770_v38, 5  ;;  %v7763_v48 = vsel %vm11371_vm11, %v7758_v22, %v7762_v44  ;;  %v7790_v38 = vrot.slane %v7788_v58, 4 }
 0x890   : > { %v7123_v54 = vpop.f32.mrf.mxu2 }
 0x891   : > { %v7233_v11 = vadd.f32 %v7232_v47, %v7123_v54  ;;  %v7237_v45 = vpop.f32.mrf.mxu3  ;;  %v7768_v47 = vrot.slane %v7767_v8, 4  ;;  %v7919_v54 = vunpack.c.l.b16 %v7763_v48  ;;  %v7786_v8 = vrot.slane %v7784_v4, 5 }
 0x893   : > { %v15504_v3 = vpop.f32.mrf.mxu1  ;;  %v15508_v55 = vadd.f32 %v7346_v43, %v7233_v11  ;;  %v7775_v43 = vshrl.u32 %v7489_v56, 16 }
 0x895   : > { %v7349_v26 = vpop.f32.mrf.mxu0  ;;  %10280 = vmatmul.msk.bf16.gmra.mxu2 %vm1028_vm6, %v10620_v39  ;;  %v7777_v30 = vrot.slane %v7775_v43, 4 }
 0x896   : > { %10368 = vmatmul.msk.bf16.gmra.mxu1 %vm1028_vm6, %v15506_v12  ;;  %10309 = vmatmul.msk.bf16.gmra.mxu3 %vm1028_vm6, %v10620_v39  ;;  %v7773_v39 = vsel %vm11371_vm11, %v7768_v47, %v7772_v1  ;;  %v7791_v1 = vor.u32 %v7790_v38, %v7786_v8 }
 0x897   : > { %v7920_v11 = vunpack.c.l.b16 %v7773_v39 }
 0x898   : > { %10340 = vmatmul.msk.bf16.gmra.mxu0 %vm1028_vm6, %v10621_v6  ;;  %v7126_v40 = vpop.f32.mrf.mxu2 }
 0x899   : > { %v7236_v13 = vadd.f32 %v7235_v14, %v7126_v40  ;;  %v7240_v27 = vpop.f32.mrf.mxu3  ;;  %v7780_v14 = vrot.slane %v7778_v20, 5  ;;  %v15528_v2 = vpack.c.b16 %v7920_v11, %v7919_v54  ;;  %v7492_v20 = vld [vmem:[#allocation2 + $0x90] sm:$0xf] }
 0x89a   : > { %v7799_v54 = vshrl.u32 %v7492_v20, 16  ;;  %v7802_v11 = vshll.u32 %v7492_v20, 16 }
 0x89b   : > { %v15516_v10 = vpop.f32.mrf.mxu1  ;;  %v15524_v24 = vadd.f32 %v7349_v26, %v7236_v13  ;;  %v7781_v47 = vor.u32 %v7780_v14, %v7777_v30  ;;  %v7794_v26 = vshll.u32 %v15368_v21, 16  ;;  %v10622_v13 = vld [vmem:[#allocation2 + $0x90] sm:$0xff]  ;;  %v7808_v30 = vshll.u32 %v15384_v36, 16 }
 0x89c   : > { %v7812_v14 = vshrl.u32 %v15384_v36, 16 }
 0x89d   : > { %v7351_v62 = vpop.f32.mrf.mxu0  ;;  %v7782_v43 = vrot.slane %v7781_v47, 4  ;;  %v7796_v4 = vrot.slane %v7794_v26, 5  ;;  %v7810_v26 = vrot.slane %v7808_v30, 5 }
 0x89f   : > { %v7787_v21 = vsel %vm11371_vm11, %v7782_v43, %v7786_v8 }
 0x8a0   : > { %v7128_v40 = vpop.f32.mrf.mxu2 }
 0x8a1   : > { %v7238_v44 = vadd.f32 %v7237_v45, %v7128_v40  ;;  %v7242_v22 = vpop.f32.mrf.mxu3  ;;  %v7792_v45 = vrot.slane %v7791_v1, 4  ;;  %v7801_v1 = vrot.slane %v7799_v54, 4 }
 0x8a3   : > { %v15526_v56 = vpop.f32.mrf.mxu1  ;;  %v15530_v5 = vadd.f32 %v7351_v62, %v7238_v44  ;;  %v7921_v44 = vunpack.c.l.b16 %v7787_v21 }
 0x8a5   : > { %v7354_v18 = vpop.f32.mrf.mxu0  ;;  %10281 = vmatmul.msk.bf16.gmra.mxu2 %vm1028_vm6, %v10621_v6 }
 0x8a6   : > { %10369 = vmatmul.msk.bf16.gmra.mxu1 %vm1028_vm6, %v15528_v2  ;;  %10310 = vmatmul.msk.bf16.gmra.mxu3 %vm1028_vm6, %v10621_v6  ;;  %v7797_v6 = vsel %vm11371_vm11, %v7792_v45, %v7796_v4 }
 0x8a7   : > { %v7922_v47 = vunpack.c.l.b16 %v7797_v6 }
 0x8a8   : > { %10341 = vmatmul.msk.bf16.gmra.mxu0 %vm1028_vm6, %v10622_v13  ;;  %v7131_v39 = vpop.f32.mrf.mxu2 }
 0x8a9   : > { %v7241_v58 = vadd.f32 %v7240_v27, %v7131_v39  ;;  %v7245_v62 = vpop.f32.mrf.mxu3  ;;  %v7804_v27 = vrot.slane %v7802_v11, 5  ;;  %v7814_v39 = vrot.slane %v7812_v14, 4  ;;  %v15550_v17 = vpack.c.b16 %v7922_v47, %v7921_v44 }
 0x8aa   : > { %v7832_v47 = vshll.u32 %v15396_v16, 16 }
 0x8ab   : > { %v15538_v48 = vpop.f32.mrf.mxu1  ;;  %v15546_v38 = vadd.f32 %v7354_v18, %v7241_v58  ;;  %v7805_v45 = vor.u32 %v7804_v27, %v7801_v1  ;;  %v7815_v4 = vor.u32 %v7814_v39, %v7810_v26  ;;  %v7818_v18 = vshll.u32 %v15386_v53, 16  ;;  %v10623_v58 = vld [vmem:[#allocation2 + $0x9c] sm:$0xff] }
 0x8ac   : > { %17084 = vst [vmem:[#allocation45_spill] sm:$0xff] %v15538_v48  ;;  %v7836_v1 = vshrl.u32 %v15396_v16, 16 }
 0x8ad   : > { %v7356_v40 = vpop.f32.mrf.mxu0  ;;  %v7806_v54 = vrot.slane %v7805_v45, 4  ;;  %v7820_v6 = vrot.slane %v7818_v18, 5  ;;  %v7834_v18 = vrot.slane %v7832_v47, 5 }
 0x8af   : > { %v7811_v53 = vsel %vm11371_vm11, %v7806_v54, %v7810_v26 }
 0x8b0   : > { %v7133_v41 = vpop.f32.mrf.mxu2 }
 0x8b1   : > { %v7243_v8 = vadd.f32 %v7242_v22, %v7133_v41  ;;  %v7247_v43 = vpop.f32.mrf.mxu3  ;;  %v7816_v41 = vrot.slane %v7815_v4, 4  ;;  %v7495_v22 = vld [vmem:[#allocation2 + $0x9c] sm:$0xf] }
 0x8b2   : > { %v7826_v44 = vshll.u32 %v7495_v22, 16 }
 0x8b3   : > { %v15548_v20 = vpop.f32.mrf.mxu1  ;;  %v15552_v48 = vadd.f32 %v7356_v40, %v7243_v8  ;;  %v7823_v40 = vshrl.u32 %v7495_v22, 16  ;;  %v7923_v8 = vunpack.c.l.b16 %v7811_v53 }
 0x8b4   : > { %17085 = vst [vmem:[#allocation43_spill] sm:$0xff] %v15548_v20 }
 0x8b5   : > { %17086 = vst [vmem:[#allocation48_spill] sm:$0xff] %v15552_v48  ;;  %v7359_v36 = vpop.f32.mrf.mxu0  ;;  %10282 = vmatmul.msk.bf16.gmra.mxu2 %vm1028_vm6, %v10622_v13  ;;  %v7825_v4 = vrot.slane %v7823_v40, 4 }
 0x8b6   : > { %10370 = vmatmul.msk.bf16.gmra.mxu1 %vm1028_vm6, %v15550_v17  ;;  %10311 = vmatmul.msk.bf16.gmra.mxu3 %vm1028_vm6, %v10622_v13  ;;  %v7821_v13 = vsel %vm11371_vm11, %v7816_v41, %v7820_v6 }
 0x8b7   : > { %v7924_v45 = vunpack.c.l.b16 %v7821_v13 }
 0x8b8   : > { %10342 = vmatmul.msk.bf16.gmra.mxu0 %vm1028_vm6, %v10623_v58  ;;  %v7136_v21 = vpop.f32.mrf.mxu2 }
 0x8b9   : > { %v7246_v30 = vadd.f32 %v7245_v62, %v7136_v21  ;;  %v7250_v14 = vpop.f32.mrf.mxu3  ;;  %v7828_v62 = vrot.slane %v7826_v44, 5  ;;  %v7838_v21 = vrot.slane %v7836_v1, 4  ;;  %v15572_v20 = vpack.c.b16 %v7924_v45, %v7923_v8 }
 0x8ba   : > { %v7856_v45 = vshll.u32 %v15413_v29, 16 }
 0x8bb   : > { %v15560_v11 = vpop.f32.mrf.mxu1  ;;  %v15568_v27 = vadd.f32 %v7359_v36, %v7246_v30  ;;  %v7829_v41 = vor.u32 %v7828_v62, %v7825_v4  ;;  %v7839_v6 = vor.u32 %v7838_v21, %v7834_v18  ;;  %v7842_v36 = vshll.u32 %v15410_v46, 16  ;;  %v10624_v30 = vld [vmem:[#allocation2 + $0xa8] sm:$0xff] }
 0x8bc   : > { %17087 = vst [vmem:[#allocation31_spill] sm:$0xff] %v15560_v11  ;;  %v7860_v4 = vshrl.u32 %v15413_v29, 16 }
 0x8bd   : > { %v7361_v39 = vpop.f32.mrf.mxu0  ;;  %v7830_v40 = vrot.slane %v7829_v41, 4  ;;  %v7844_v13 = vrot.slane %v7842_v36, 5  ;;  %v7858_v36 = vrot.slane %v7856_v45, 5  ;;  %v7501_v45 = vld [vmem:[#allocation2 + $0xb4] sm:$0xf] }
 0x8bf   : > { %v7835_v46 = vsel %vm11371_vm11, %v7830_v40, %v7834_v18 }
 0x8c0   : > { %v7138_v11 = vpop.f32.mrf.mxu2 }
 0x8c1   : > { %v7248_v26 = vadd.f32 %v7247_v43, %v7138_v11  ;;  %v7252_v54 = vpop.f32.mrf.mxu3  ;;  %v7840_v43 = vrot.slane %v7839_v6, 4  ;;  %v7498_v11 = vld [vmem:[#allocation2 + $0xa8] sm:$0xf] }
 0x8c2   : > { %v7850_v8 = vshll.u32 %v7498_v11, 16 }
 0x8c3   : > { %v15570_v22 = vpop.f32.mrf.mxu1  ;;  %v15574_v48 = vadd.f32 %v7361_v39, %v7248_v26  ;;  %v7847_v39 = vshrl.u32 %v7498_v11, 16  ;;  %v7925_v26 = vunpack.c.l.b16 %v7835_v46  ;;  %v7862_v11 = vrot.slane %v7860_v4, 4 }
 0x8c4   : > { %17088 = vst [vmem:[#allocation46_spill] sm:$0xff] %v15570_v22  ;;  %v7852_v6 = vrot.slane %v7850_v8, 5  ;;  %v10638_v8 = vld [vmem:[%s14186_s13 + $0x70] sm:$0xff] }
 0x8c5   : > { %v7364_v16 = vpop.f32.mrf.mxu0  ;;  %10283 = vmatmul.msk.bf16.gmra.mxu2 %vm1028_vm6, %v10623_v58  ;;  %v7863_v29 = vor.u32 %v7862_v11, %v7858_v36 }
 0x8c6   : > { %10371 = vmatmul.msk.bf16.gmra.mxu1 %vm1028_vm6, %v15572_v20  ;;  %10312 = vmatmul.msk.bf16.gmra.mxu3 %vm1028_vm6, %v10623_v58  ;;  %v7845_v58 = vsel %vm11371_vm11, %v7840_v43, %v7844_v13 }
 0x8c7   : > { %v7926_v41 = vunpack.c.l.b16 %v7845_v58  ;;  %v7864_v58 = vrot.slane %v7863_v29, 4 }
 0x8c8   : > { %10343 = vmatmul.msk.bf16.gmra.mxu0 %vm1028_vm6, %v10624_v30  ;;  %v7141_v53 = vpop.f32.mrf.mxu2 }
 0x8c9   : > { %v7251_v47 = vadd.f32 %v7250_v14, %v7141_v53  ;;  %v7255_v1 = vpop.f32.mrf.mxu3  ;;  %v7849_v14 = vrot.slane %v7847_v39, 4  ;;  %v15595_v13 = vpack.c.b16 %v7926_v41, %v7925_v26  ;;  %v7866_v39 = vshll.u32 %v15423_v57, 16 }
 0x8ca   : > { %v7871_v41 = vshrl.u32 %v7501_v45, 16 }
 0x8cb   : > { %v15582_v44 = vpop.f32.mrf.mxu1  ;;  %v15590_v62 = vadd.f32 %v7364_v16, %v7251_v47  ;;  %v7853_v22 = vor.u32 %v7852_v6, %v7849_v14  ;;  %v7868_v4 = vrot.slane %v7866_v39, 5  ;;  %v7874_v14 = vshll.u32 %v7501_v45, 16 }
 0x8cc   : > { %17089 = vst [vmem:[#allocation47_spill] sm:$0xff] %v15582_v44  ;;  %v10639_v44 = vld [vmem:[%s14186_s13 + $0x78] sm:$0xff]  ;;  %v7884_v6 = vshrl.u32 %v15443_v19, 16 }
 0x8cd   : > { %v7366_v21 = vpop.f32.mrf.mxu0  ;;  %8349 = vmatpush.bf16.msra.mxu3 %v10639_v44  ;;  %v7854_v46 = vrot.slane %v7853_v22, 4  ;;  %v7880_v22 = vshll.u32 %v15443_v19, 16 }
 0x8ce   : > { %v7886_v45 = vrot.slane %v7884_v6, 4 }
 0x8cf   : > { %v7859_v57 = vsel %vm11371_vm11, %v7854_v46, %v7858_v36  ;;  %v7876_v36 = vrot.slane %v7874_v14, 5  ;;  %v7882_v46 = vrot.slane %v7880_v22, 5  ;;  %v7890_v14 = vshll.u32 %v15453_v25, 16 }
 0x8d0   : > { %v7143_v53 = vpop.f32.mrf.mxu2  ;;  %v7927_v29 = vunpack.c.l.b16 %v7859_v57  ;;  %v10640_v57 = vld [vmem:[%s14186_s13 + $0x20] sm:$0xff] }
 0x8d1   : > { %v7253_v40 = vadd.f32 %v7252_v54, %v7143_v53  ;;  %v7257_v43 = vpop.f32.mrf.mxu3  ;;  %v10625_v54 = vld [vmem:[#allocation2 + $0xb4] sm:$0xff]  ;;  %8350 = vmatpush.bf16.msra.mxu3 %v10638_v8  ;;  %v7873_v8 = vrot.slane %v7871_v41, 4 }
 0x8d3   : > { %v15593_v18 = vpop.f32.mrf.mxu1  ;;  %v15597_v16 = vadd.f32 %v7366_v21, %v7253_v40 }
 0x8d4   : > { %17090 = vst [vmem:[#allocation38_spill] sm:$0xff] %v15593_v18 }
 0x8d5   : > { %17091 = vst [vmem:[#allocation35_spill] sm:$0xff] %v15597_v16  ;;  %v7369_v47 = vpop.f32.mrf.mxu0  ;;  %10284 = vmatmul.msk.bf16.gmra.mxu2 %vm1028_vm6, %v10624_v30 }
 0x8d6   : > { %10372 = vmatmul.msk.bf16.gmra.mxu1 %vm1028_vm6, %v15595_v13  ;;  %10313 = vmatmul.msk.bf16.gmra.mxu3 %vm1028_vm6, %v10624_v30  ;;  %v7869_v30 = vsel %vm11371_vm11, %v7864_v58, %v7868_v4  ;;  %v10641_v4 = vld [vmem:[%s14186_s13 + $0x28] sm:$0xff] }
 0x8d7   : > { %v7928_v39 = vunpack.c.l.b16 %v7869_v30  ;;  %8761 = vmatpush.bf16.msra.mxu0 %v10641_v4 }
 0x8d8   : > { %10344 = vmatmul.msk.bf16.gmra.mxu0 %vm1028_vm6, %v10625_v54  ;;  %v7146_v44 = vpop.f32.mrf.mxu2 }
 0x8d9   : > { %v7256_v21 = vadd.f32 %v7255_v1, %v7146_v44  ;;  %v7260_v26 = vpop.f32.mrf.mxu3  ;;  %v10643_v1 = vld [vmem:[%s14186_s13 + $0x58] sm:$0xff]  ;;  %v10642_v44 = vld [vmem:[%s14186_s13 + $0x50] sm:$0xff]  ;;  %v15619_v19 = vpack.c.b16 %v7928_v39, %v7927_v29 }
 0x8da   : > { %8915 = vmatpush.bf16.msra.mxu1 %v10643_v1  ;;  %v7892_v1 = vrot.slane %v7890_v14, 5 }
 0x8db   : > { %v15612_v11 = vpop.f32.mrf.mxu1  ;;  %v15614_v53 = vadd.f32 %v7369_v47, %v7256_v21  ;;  %v7887_v47 = vor.u32 %v7886_v45, %v7882_v46  ;;  %8762 = vmatpush.bf16.msra.mxu0 %v10640_v57 }
 0x8dc   : > { %17092 = vst [vmem:[#allocation13_spill] sm:$0xff] %v15612_v11  ;;  %v7877_v11 = vor.u32 %v7876_v36, %v7873_v8 }
 0x8dd   : > { %v7371_v40 = vpop.f32.mrf.mxu0  ;;  %v7888_v6 = vrot.slane %v7887_v47, 4 }
 0x8de   : > { %8916 = vmatpush.bf16.msra.mxu1 %v10642_v44  ;;  %v7878_v22 = vrot.slane %v7877_v11, 4 }
 0x8df   : > { %v7893_v8 = vsel %vm11371_vm11, %v7888_v6, %v7892_v1  ;;  %v8464_v6 = vld [vmem:[#allocation2] sm:$0xe] }
 0x8e0   : > { %v7148_v58 = vpop.f32.mrf.mxu2  ;;  %v7883_v25 = vsel %vm11371_vm11, %v7878_v22, %v7882_v46  ;;  %v7930_v45 = vunpack.c.l.b16 %v7893_v8  ;;  %v10627_v46 = vld [vmem:[#allocation2 + $0xcc] sm:$0xff]  ;;  %v10718_v22 = vld [vmem:[#allocation2 + $0x4] sm:$0xf] }
 0x8e1   : > { %v7258_v18 = vadd.f32 %v7257_v43, %v7148_v58  ;;  %v7262_v16 = vpop.f32.mrf.mxu3  ;;  %v10626_v43 = vld [vmem:[#allocation2 + $0xc0] sm:$0xff]  ;;  %v7929_v11 = vunpack.c.l.b16 %v7883_v25 }
 0x8e3   : > { %v15621_v21 = vadd.f32 %v7371_v40, %v7258_v18  ;;  %v15627_v30 = vpop.f32.mrf.mxu1  ;;  %v10645_v40 = vld [vmem:[%s14186_s13 + $0x88] sm:$0xff]  ;;  %v15641_v14 = vpack.c.b16 %v7930_v45, %v7929_v11 }
 0x8e4   : > { %17093 = vst [vmem:[#allocation23_spill] sm:$0xff] %v15627_v30  ;;  %9069 = vmatpush.bf16.msra.mxu2 %v10645_v40  ;;  %v10719_v40 = vld [vmem:[#allocation2 + $0x8] sm:$0x1] }
 0x8e5   : > { %v7374_v41 = vpop.f32.mrf.mxu0  ;;  %10285 = vmatmul.msk.bf16.gmra.mxu2 %vm1028_vm6, %v10625_v54 }
 0x8e6   : > { %10373 = vmatmul.msk.bf16.gmra.mxu1 %vm1028_vm6, %v15619_v19  ;;  %10314 = vmatmul.msk.bf16.gmra.mxu3 %vm1028_vm6, %v10625_v54 }
 0x8e8   : > { %10345 = vmatmul.msk.bf16.gmra.mxu0 %vm1028_vm6, %v10626_v43  ;;  %v7151_v18 = vpop.f32.mrf.mxu2 }
 0x8e9   : > { %v7261_v29 = vadd.f32 %v7260_v26, %v7151_v18  ;;  %v7265_v39 = vpop.f32.mrf.mxu3  ;;  %v10431_v18 = vrot.slane %v8464_v6, 9 }
 0x8eb   : > { %v15637_v36 = vadd.f32 %v7374_v41, %v7261_v29  ;;  %v15639_v58 = vpop.f32.mrf.mxu1  ;;  %v8532_v41 = vrot.slane %v10718_v22, 5  ;;  %v8535_v29 = vrot.slane %v10719_v40, 5 }
 0x8ec   : > { %17094 = vst [vmem:[#allocation19_spill] sm:$0xff] %v15639_v58 }
 0x8ed   : > { %v7376_v54 = vpop.f32.mrf.mxu0  ;;  %v8534_v1 = vrot.slane %v8532_v41, 4 }
 0x8f0   : > { %v7153_v44 = vpop.f32.mrf.mxu2 }
 0x8f1   : > { %v7263_v4 = vadd.f32 %v7262_v16, %v7153_v44  ;;  %v7267_v47 = vpop.f32.mrf.mxu3  ;;  %v8536_v44 = vsel %vm11443_vm14, %v8534_v1, %v8535_v29  ;;  %v10721_v1 = vld [vmem:[#allocation2 + $0x20] sm:$0x1] }
 0x8f2   : > { %v8549_v29 = vrot.slane %v10721_v1, 5 }
 0x8f3   : > { %v15643_v26 = vadd.f32 %v7376_v54, %v7263_v4  ;;  %v15651_v25 = vpop.f32.mrf.mxu1 }
 0x8f5   : > { %17095 = vst [vmem:[#allocation16_spill] sm:$0xff] %v15643_v26  ;;  %v7379_v57 = vpop.f32.mrf.mxu0  ;;  %10286 = vmatmul.msk.bf16.gmra.mxu2 %vm1028_vm6, %v10626_v43  ;;  %v8533_v43 = vsel %vm11443_vm14, %v10431_v18, %v8532_v41  ;;  %v10720_v26 = vld [vmem:[#allocation2 + $0x1c] sm:$0xf]  ;;  %v8466_v41 = vld [vmem:[#allocation2 + $0x18] sm:$0xe] }
 0x8f6   : > { %10374 = vmatmul.msk.bf16.gmra.mxu1 %vm1028_vm6, %v15641_v14  ;;  %10415 = vmatmul.msk.bf16.vlgmr.msra.gmra.mxu3 %vm1028_vm6, %v15215_v0  ;;  %v8647_v4 = vunpack.c.l.b16 %v8533_v43  ;;  %v8546_v40 = vrot.slane %v10720_v26, 5  ;;  %v10433_v18 = vrot.slane %v8466_v41, 9 }
 0x8f8   : > { %10346 = vmatmul.msk.bf16.gmra.mxu0 %vm1028_vm6, %v10627_v46  ;;  %v7156_v16 = vpop.f32.mrf.mxu2  ;;  %v8648_v46 = vunpack.c.l.b16 %v8536_v44 }
 0x8f9   : > { %v7266_v8 = vadd.f32 %v7265_v39, %v7156_v16  ;;  %v7270_v54 = vpop.f32.mrf.mxu3 }
 0x8fb   : > { %v15653_v11 = vadd.f32 %v7379_v57, %v7266_v8  ;;  %v15659_v30 = vpop.f32.mrf.mxu1  ;;  %v8679_v57 = vpack.c.b16 %v8648_v46, %v8647_v4 }
 0x8fc   : > { %17096 = vst [vmem:[#allocation3_spill] sm:$0xff] %v15659_v30 }
 0x8fd   : > { %v7381_v45 = vpop.f32.mrf.mxu0 }
 0x900   : > { %v7158_v22 = vpop.f32.mrf.mxu2 }
 0x901   : > { %v7268_v6 = vadd.f32 %v7267_v47, %v7158_v22  ;;  %v7272_v58 = vpop.f32.mrf.mxu3  ;;  %v8548_v47 = vrot.slane %v8546_v40, 4 }
 0x903   : > { %v15661_v39 = vadd.f32 %v7381_v45, %v7268_v6  ;;  %v8550_v43 = vsel %vm11443_vm14, %v8548_v47, %v8549_v29  ;;  %v15676_v46 = vpop.f32.mrf.mxu1  ;;  %v10723_v29 = vld [vmem:[#allocation2 + $0x2c] sm:$0x1] }
 0x904   : > { %17098 = vst [vmem:[#allocation4_spill] sm:$0xff] %v15676_v46  ;;  %v8652_v22 = vunpack.c.l.b16 %v8550_v43 }
 0x905   : > { %17097 = vst [vmem:[#allocation5_spill] sm:$0xff] %v15661_v39  ;;  %v7384_v16 = vpop.f32.mrf.mxu0  ;;  %10387 = vmatmul.msk.bf16.vlgmr.msrb.gmra.mxu2 %vm1028_vm6, %v15160_v34  ;;  %v8547_v34 = vsel %vm11443_vm14, %v10433_v18, %v8546_v40  ;;  %v8467_v40 = vld [vmem:[#allocation2 + $0x24] sm:$0xe] }
 0x906   : > { %10488 = vmatmul.msk.bf16.vlgmr.msra.gmra.mxu1 %vm1028_vm6, %v15284_v9  ;;  %10416 = vmatmul.msk.bf16.gmra.mxu3 %vm1028_vm6, %v15228_v63  ;;  %v8651_v6 = vunpack.c.l.b16 %v8547_v34 }
 0x908   : > { %10459 = vmatmul.msk.bf16.vlgmr.msra.gmra.mxu0 %vm1028_vm6, %v8679_v57  ;;  %v7161_v26 = vpop.f32.mrf.mxu2  ;;  %v15678_v39 = vpack.c.b16 %v8652_v22, %v8651_v6 }
 0x909   : > { %v7271_v8 = vadd.f32 %v7270_v54, %v7161_v26  ;;  %v7275_v45 = vpop.f32.mrf.mxu3  ;;  %v10722_v54 = vld [vmem:[#allocation2 + $0x28] sm:$0xf] }
 0x90a   : > { %v8553_v26 = vrot.slane %v10722_v54, 5 }
 0x90b   : > { %v15672_v44 = vadd.f32 %v7384_v16, %v7271_v8  ;;  %v8556_v8 = vrot.slane %v10723_v29, 5 }
 0x90c   : > { %v8555_v47 = vrot.slane %v8553_v26, 4 }
 0x90d   : > { %v7386_v4 = vpop.f32.mrf.mxu0 }
 0x90e   : > { %v8557_v34 = vsel %vm11443_vm14, %v8555_v47, %v8556_v8 }
 0x910   : > { %v7163_v57 = vpop.f32.mrf.mxu2 }
 0x911   : > { %v7273_v30 = vadd.f32 %v7272_v58, %v7163_v57  ;;  %v7277_v41 = vpop.f32.mrf.mxu3  ;;  %v15688_v58 = vpop.f32.mrf.mxu1  ;;  %v8654_v57 = vunpack.c.l.b16 %v8557_v34 }
 0x912   : > { %17100 = vst [vmem:[#allocation14_spill] sm:$0xff] %v15688_v58 }
 0x913   : > { %v15680_v1 = vadd.f32 %v7386_v4, %v7273_v30  ;;  %v10434_v30 = vrot.slane %v8467_v40, 9 }
 0x915   : > { %17099 = vst [vmem:[#allocation8_spill] sm:$0xff] %v15680_v1  ;;  %v7389_v16 = vpop.f32.mrf.mxu0  ;;  %10388 = vmatmul.msk.bf16.gmra.mxu2 %vm1028_vm6, %v15215_v0  ;;  %v8554_v6 = vsel %vm11443_vm14, %v10434_v30, %v8553_v26  ;;  %v8468_v26 = vld [vmem:[#allocation2 + $0x30] sm:$0xe]  ;;  %v10725_v30 = vld [vmem:[#allocation2 + $0x38] sm:$0x1] }
 0x916   : > { %10489 = vmatmul.msk.bf16.gmra.mxu1 %vm1028_vm6, %v15678_v39  ;;  %10417 = vmatmul.msk.bf16.gmra.mxu3 %vm1028_vm6, %v15245_v60  ;;  %v8653_v54 = vunpack.c.l.b16 %v8554_v6  ;;  %v8563_v8 = vrot.slane %v10725_v30, 5 }
 0x918   : > { %10460 = vmatmul.msk.bf16.gmra.mxu0 %vm1028_vm6, %v15284_v9  ;;  %v7166_v18 = vpop.f32.mrf.mxu2  ;;  %v15700_v46 = vpack.c.b16 %v8654_v57, %v8653_v54 }
 0x919   : > { %v7276_v43 = vadd.f32 %v7275_v45, %v7166_v18  ;;  %v7280_v4 = vpop.f32.mrf.mxu3  ;;  %v15698_v1 = vpop.f32.mrf.mxu1  ;;  %v10724_v45 = vld [vmem:[#allocation2 + $0x34] sm:$0xf] }
 0x91a   : > { %17102 = vst [vmem:[#allocation33_spill] sm:$0xff] %v15698_v1  ;;  %v8560_v18 = vrot.slane %v10724_v45, 5 }
 0x91b   : > { %v15694_v0 = vadd.f32 %v7389_v16, %v7276_v43 }
 0x91c   : > { %v8562_v47 = vrot.slane %v8560_v18, 4 }
 0x91d   : > { %17101 = vst [vmem:[#allocation49_spill] sm:$0xff] %v15694_v0  ;;  %v7391_v22 = vpop.f32.mrf.mxu0 }
 0x920   : > { %v7168_v58 = vpop.f32.mrf.mxu2 }
 0x921   : > { %v7278_v9 = vadd.f32 %v7277_v41, %v7168_v58  ;;  %v7282_v40 = vpop.f32.mrf.mxu3  ;;  %v10435_v58 = vrot.slane %v8468_v26, 9  ;;  %v15714_v6 = vpop.f32.mrf.mxu1 }
 0x923   : > { %v15702_v29 = vadd.f32 %v7391_v22, %v7278_v9  ;;  %v8564_v22 = vsel %vm11443_vm14, %v8562_v47, %v8563_v8  ;;  %v8561_v54 = vsel %vm11443_vm14, %v10435_v58, %v8560_v18 }
 0x924   : > { %v8656_v9 = vunpack.c.l.b16 %v8564_v22  ;;  %v8655_v45 = vunpack.c.l.b16 %v8561_v54 }
 0x925   : > { %17103 = vst [vmem:[#allocation21_spill] sm:$0xff] %v15702_v29  ;;  %v7394_v16 = vpop.f32.mrf.mxu0  ;;  %10389 = vmatmul.msk.bf16.gmra.mxu2 %vm1028_vm6, %v15228_v63 }
 0x926   : > { %10490 = vmatmul.msk.bf16.gmra.mxu1 %vm1028_vm6, %v15700_v46  ;;  %10418 = vmatmul.msk.bf16.gmra.mxu3 %vm1028_vm6, %v15280_v37  ;;  %v15720_v0 = vpack.c.b16 %v8656_v9, %v8655_v45 }
 0x928   : > { %10461 = vmatmul.msk.bf16.gmra.mxu0 %vm1028_vm6, %v15678_v39  ;;  %v7171_v41 = vpop.f32.mrf.mxu2 }
 0x929   : > { %v7281_v43 = vadd.f32 %v7280_v4, %v7171_v41  ;;  %v7285_v34 = vpop.f32.mrf.mxu3  ;;  %v15726_v41 = vpop.f32.mrf.mxu1 }
 0x92b   : > { %v15716_v63 = vadd.f32 %v7394_v16, %v7281_v43 }
 0x92d   : > { %v7396_v57 = vpop.f32.mrf.mxu0 }
 0x930   : > { %v7173_v29 = vpop.f32.mrf.mxu2 }
 0x931   : > { %v7283_v1 = vadd.f32 %v7282_v40, %v7173_v29  ;;  %v7287_v26 = vpop.f32.mrf.mxu3  ;;  %v15736_v58 = vpop.f32.mrf.mxu1 }
 0x933   : > { %v15722_v4 = vadd.f32 %v7396_v57, %v7283_v1 }
 0x935   : > { %v7399_v47 = vpop.f32.mrf.mxu0  ;;  %10390 = vmatmul.msk.bf16.gmra.mxu2 %vm1028_vm6, %v15245_v60 }
 0x936   : > { %10491 = vmatmul.msk.bf16.gmra.mxu1 %vm1028_vm6, %v15720_v0  ;;  %10419 = vmatmul.msk.bf16.gmra.mxu3 %vm1028_vm6, %v15305_v33 }
 0x938   : > { %10462 = vmatmul.msk.bf16.gmra.mxu0 %vm1028_vm6, %v15700_v46  ;;  %v7176_v40 = vpop.f32.mrf.mxu2 }
 0x939   : > { %v7286_v18 = vadd.f32 %v7285_v34, %v7176_v40  ;;  %v7290_v29 = vpop.f32.mrf.mxu3  ;;  %v15748_v57 = vpop.f32.mrf.mxu1 }
 0x93b   : > { %v15734_v1 = vadd.f32 %v7399_v47, %v7286_v18 }
 0x93d   : > { %v7401_v16 = vpop.f32.mrf.mxu0 }
 0x940   : > { %v7178_v30 = vpop.f32.mrf.mxu2 }
 0x941   : > { %v7288_v8 = vadd.f32 %v7287_v26, %v7178_v30  ;;  %v7292_v43 = vpop.f32.mrf.mxu3 }
 0x943   : > { %v15738_v22 = vadd.f32 %v7401_v16, %v7288_v8  ;;  %v15752_v16 = vpop.f32.mrf.mxu1 }
 0x945   : > { %v7404_v60 = vpop.f32.mrf.mxu0  ;;  %10391 = vmatmul.msk.bf16.gmra.mxu2 %vm1028_vm6, %v15280_v37 }
 0x946   : > { %10492 = vmatmul.msk.bf16.gmra.mxu1 %vm1028_vm6, %v15342_v49  ;;  %10420 = vmatmul.msk.bf16.gmra.mxu3 %vm1028_vm6, %v15451_v59 }
 0x948   : > { %10463 = vmatmul.msk.bf16.gmra.mxu0 %vm1028_vm6, %v15720_v0  ;;  %v7181_v34 = vpop.f32.mrf.mxu2 }
 0x949   : > { %v7291_v54 = vadd.f32 %v7290_v29, %v7181_v34  ;;  %v7295_v9 = vpop.f32.mrf.mxu3 }
 0x94b   : > { %v15750_v45 = vadd.f32 %v7404_v60, %v7291_v54  ;;  %v15766_v54 = vpop.f32.mrf.mxu1 }
 0x94c   : > { %17106 = vst [vmem:[#allocation24_spill] sm:$0xff] %v15766_v54 }
 0x94d   : > { %v7406_v26 = vpop.f32.mrf.mxu0 }
 0x950   : > { %v7183_v47 = vpop.f32.mrf.mxu2 }
 0x951   : > { %v7293_v40 = vadd.f32 %v7292_v43, %v7183_v47  ;;  %v7297_v18 = vpop.f32.mrf.mxu3 }
 0x953   : > { %v15754_v37 = vadd.f32 %v7406_v26, %v7293_v40 }
 0x955   : > { %17104 = vst [vmem:[#allocation20_spill] sm:$0xff] %v15754_v37  ;;  %v7409_v30 = vpop.f32.mrf.mxu0  ;;  %10392 = vmatmul.msk.bf16.gmra.mxu2 %vm1028_vm6, %v15305_v33 }
 0x956   : > { %10493 = vmatmul.msk.bf16.gmra.mxu1 %vm1028_vm6, %v15358_v15  ;;  %10421 = vmatmul.msk.bf16.gmra.mxu3 %vm1028_vm6, %v15486_v61 }
 0x958   : > { %10464 = vmatmul.msk.bf16.gmra.mxu0 %vm1028_vm6, %v15342_v49  ;;  %v7186_v29 = vpop.f32.mrf.mxu2 }
 0x959   : > { %v7296_v8 = vadd.f32 %v7295_v9, %v7186_v29  ;;  %v7300_v43 = vpop.f32.mrf.mxu3  ;;  %v15776_v9 = vpop.f32.mrf.mxu1 }
 0x95b   : > { %v15764_v60 = vadd.f32 %v7409_v30, %v7296_v8 }
 0x95d   : > { %17105 = vst [vmem:[#allocation50_spill] sm:$0xff] %v15764_v60  ;;  %v7411_v34 = vpop.f32.mrf.mxu0 }
 0x960   : > { %v7188_v26 = vpop.f32.mrf.mxu2 }
 0x961   : > { %v7298_v47 = vadd.f32 %v7297_v18, %v7188_v26  ;;  %v7302_v40 = vpop.f32.mrf.mxu3  ;;  %v10644_v18 = vld [vmem:[%s14186_s13 + $0x80] sm:$0xff] }
 0x962   : > { %9070 = vmatpush.bf16.msra.mxu2 %v10644_v18 }
 0x963   : > { %v15768_v37 = vadd.f32 %v7411_v34, %v7298_v47 }
 0x965   : > { %17107 = vst [vmem:[#allocation51_spill] sm:$0xff] %v15768_v37  ;;  %v7414_v33 = vpop.f32.mrf.mxu0  ;;  %10393 = vmatmul.msk.bf16.gmra.mxu2 %vm1028_vm6, %v15451_v59  ;;  %v15783_v37 = vpop.f32.mrf.mxu1 }
 0x966   : > { %10494 = vmatmul.msk.bf16.gmra.mxu1 %vm1028_vm6, %v15370_v51  ;;  %10422 = vmatmul.msk.bf16.gmra.mxu3 %vm1028_vm6, %v15506_v12 }
 0x968   : > { %10465 = vmatmul.msk.bf16.gmra.mxu0 %vm1028_vm6, %v15358_v15  ;;  %v7191_v30 = vpop.f32.mrf.mxu2 }
 0x969   : > { %v7301_v29 = vadd.f32 %v7300_v43, %v7191_v30  ;;  %v7305_v8 = vpop.f32.mrf.mxu3 }
 0x96b   : > { %v15781_v34 = vadd.f32 %v7414_v33, %v7301_v29 }
 0x96d   : > { %17108 = vst [vmem:[#allocation36_spill] sm:$0xff] %v15781_v34  ;;  %v7416_v26 = vpop.f32.mrf.mxu0 }
 0x970   : > { %v7193_v47 = vpop.f32.mrf.mxu2 }
 0x971   : > { %v7303_v59 = vadd.f32 %v7302_v40, %v7193_v47  ;;  %v7307_v60 = vpop.f32.mrf.mxu3  ;;  %v15795_v40 = vpop.f32.mrf.mxu1 }
 0x973   : > { %v15785_v54 = vadd.f32 %v7416_v26, %v7303_v59 }
 0x975   : > { %17109 = vst [vmem:[#allocation7_spill] sm:$0xff] %v15785_v54  ;;  %10394 = vmatmul.msk.bf16.gmra.mxu2 %vm1028_vm6, %v15486_v61  ;;  %v7419_v43 = vpop.f32.mrf.mxu0 }
 0x976   : > { %10495 = vmatmul.msk.bf16.gmra.mxu1 %vm1028_vm6, %v15398_v32  ;;  %10423 = vmatmul.msk.bf16.gmra.mxu3 %vm1028_vm6, %v15528_v2 }
 0x978   : > { %10466 = vmatmul.msk.bf16.gmra.mxu0 %vm1028_vm6, %v15370_v51  ;;  %v7196_v33 = vpop.f32.mrf.mxu2 }
 0x979   : > { %v7306_v30 = vadd.f32 %v7305_v8, %v7196_v33  ;;  %v8352_v18 = vpop.f32.mrf.mxu3  ;;  %v15803_v61 = vpop.f32.mrf.mxu1 }
 0x97b   : > { %v15797_v29 = vadd.f32 %v7419_v43, %v7306_v30 }
 0x97d   : > { %17110 = vst [vmem:[#allocation52_spill] sm:$0xff] %v15797_v29  ;;  %v7421_v54 = vpop.f32.mrf.mxu0 }
 0x980   : > { %v7198_v26 = vpop.f32.mrf.mxu2 }
 0x981   : > { %v7308_v47 = vadd.f32 %v7307_v60, %v7198_v26  ;;  %v8354_v59 = vpop.f32.mrf.mxu3  ;;  %v8096_v60 = vadd.f32 %v15484_v52, %v15502_v23  ;;  %v15815_v30 = vpop.f32.mrf.mxu1  ;;  %v8097_v26 = vadd.f32 %v15494_v7, %v15508_v55  ;;  %v8098_v52 = vadd.f32 %v15504_v3, %v15524_v24 }
 0x983   : > { %v15799_v34 = vadd.f32 %v7421_v54, %v7308_v47 }
 0x985   : > { %17111 = vst [vmem:[#allocation28_spill] sm:$0xff] %v15799_v34  ;;  %10395 = vmatmul.msk.bf16.gmra.mxu2 %vm1028_vm6, %v15506_v12 }
 0x986   : > { %10496 = vmatmul.msk.bf16.gmra.mxu1 %vm1028_vm6, %v15404_v35  ;;  %10424 = vmatmul.msk.bf16.gmra.mxu3 %vm1028_vm6, %v15550_v17 }
 0x988   : > { %10467 = vmatmul.msk.bf16.gmra.mxu0 %vm1028_vm6, %v15398_v32  ;;  %v8184_v8 = vpop.f32.mrf.mxu2 }
 0x989   : > { %v8264_v54 = vadd.f32 %v8184_v8, %v8096_v60  ;;  %v8357_v43 = vpop.f32.mrf.mxu3  ;;  %v15831_v23 = vpop.f32.mrf.mxu1  ;;  %v8099_v60 = vadd.f32 %v15516_v10, %v15530_v5  ;;  %v8100_v5 = vadd.f32 %v15526_v56, %v15546_v38  ;;  %v17122_v38 = vld [vmem:[#allocation43_spill] sm:$0xff] }
 0x98b   : > { %v15813_v33 = vadd.f32 %v8352_v18, %v8264_v54 }
 0x990   : > { %v8186_v12 = vpop.f32.mrf.mxu2 }
 0x991   : > { %v8265_v47 = vadd.f32 %v8186_v12, %v8097_v26  ;;  %v8359_v34 = vpop.f32.mrf.mxu3  ;;  %v15837_v26 = vpop.f32.mrf.mxu1 }
 0x993   : > { %v15819_v29 = vadd.f32 %v8354_v59, %v8265_v47  ;;  %v15855_v47 = vpop.f32.mrf.mxu0 }
 0x995   : > { %17112 = vst [vmem:[#allocation25_spill] sm:$0xff] %v15819_v29  ;;  %10396 = vmatmul.msk.bf16.gmra.mxu2 %vm1028_vm6, %v15528_v2 }
 0x996   : > { %10497 = vmatmul.msk.bf16.gmra.mxu1 %vm1028_vm6, %v15419_v42  ;;  %10425 = vmatmul.msk.bf16.gmra.mxu3 %vm1028_vm6, %v15572_v20 }
 0x998   : > { %10468 = vmatmul.msk.bf16.gmra.mxu0 %vm1028_vm6, %v15404_v35  ;;  %v8189_v7 = vpop.f32.mrf.mxu2 }
 0x999   : > { %v8266_v55 = vadd.f32 %v8189_v7, %v8098_v52  ;;  %v8362_v18 = vpop.f32.mrf.mxu3  ;;  %v17117_v52 = vld [vmem:[#allocation48_spill] sm:$0xff] }
 0x99b   : > { %v15833_v59 = vadd.f32 %v8357_v43, %v8266_v55  ;;  %v15853_v43 = vpop.f32.mrf.mxu1 }
 0x99c   : > { %17116 = vst [vmem:[#allocation9_spill] sm:$0xff] %v15853_v43 }
 0x99d   : > { %17113 = vst [vmem:[#allocation32_spill] sm:$0xff] %v15833_v59 }
 0x9a0   : > { %v8191_v2 = vpop.f32.mrf.mxu2 }
 0x9a1   : > { %v8267_v8 = vadd.f32 %v8191_v2, %v8099_v60  ;;  %v8364_v54 = vpop.f32.mrf.mxu3 }
 0x9a3   : > { %v15839_v12 = vadd.f32 %v8359_v34, %v8267_v8  ;;  %v15867_v56 = vpop.f32.mrf.mxu1 }
 0x9a4   : > { %17121 = vst [vmem:[#allocation34_spill] sm:$0xff] %v15867_v56 }
 0x9a5   : > { %17114 = vst [vmem:[#allocation15_spill] sm:$0xff] %v15839_v12  ;;  %10397 = vmatmul.msk.bf16.gmra.mxu2 %vm1028_vm6, %v15550_v17  ;;  %v17118_v17 = vld [vmem:[#allocation45_spill] sm:$0xff]  ;;  %v17120_v12 = vld [vmem:[#allocation42_spill] sm:$0xff] }
 0x9a6   : > { %10498 = vmatmul.msk.bf16.gmra.mxu1 %vm1028_vm6, %v15433_v28  ;;  %10426 = vmatmul.msk.bf16.gmra.mxu3 %vm1028_vm6, %v15595_v13  ;;  %v8101_v7 = vadd.f32 %v17118_v17, %v17117_v52  ;;  %v7504_v52 = vld [vmem:[#allocation2 + $0xc0] sm:$0xf]  ;;  %v15875_v17 = vld [vmem:[#allocation2 + $0xc4] sm:$0xf] }
 0x9a8   : > { %10469 = vmatmul.msk.bf16.gmra.mxu0 %vm1028_vm6, %v15419_v42  ;;  %v8194_v3 = vpop.f32.mrf.mxu2 }
 0x9a9   : > { %v8268_v10 = vadd.f32 %v8194_v3, %v8100_v5  ;;  %v8367_v24 = vpop.f32.mrf.mxu3 }
 0x9ab   : > { %v15851_v34 = vadd.f32 %v8362_v18, %v8268_v10  ;;  %v8102_v18 = vadd.f32 %v17122_v38, %v15568_v27 }
 0x9ad   : > { %17115 = vst [vmem:[#allocation27_spill] sm:$0xff] %v15851_v34  ;;  %v17125_v34 = vld [vmem:[#allocation31_spill] sm:$0xff] }
 0x9b0   : > { %v8196_v55 = vpop.f32.mrf.mxu2 }
 0x9b1   : > { %v8269_v60 = vadd.f32 %v8196_v55, %v8101_v7  ;;  %v8369_v2 = vpop.f32.mrf.mxu3  ;;  %v8129_v7 = vshrl.u32 %v7504_v52, 16  ;;  %v8132_v55 = vshll.u32 %v7504_v52, 16  ;;  %v17129_v52 = vld [vmem:[#allocation18_spill] sm:$0xff] }
 0x9b3   : > { %v15859_v8 = vadd.f32 %v8364_v54, %v8269_v60  ;;  %v15873_v54 = vpop.f32.mrf.mxu0  ;;  %v8138_v60 = vshll.u32 %v15875_v17, 16  ;;  %v8131_v38 = vrot.slane %v8129_v7, 4  ;;  %v8134_v59 = vrot.slane %v8132_v55, 5 }
 0x9b4   : > { %17123 = vst [vmem:[#allocation37_spill] sm:$0xff] %v15873_v54 }
 0x9b5   : > { %17119 = vst [vmem:[#allocation29_spill] sm:$0xff] %v15859_v8  ;;  %10398 = vmatmul.msk.bf16.gmra.mxu2 %vm1028_vm6, %v15572_v20  ;;  %v8142_v8 = vshrl.u32 %v15875_v17, 16  ;;  %v8140_v56 = vrot.slane %v8138_v60, 5  ;;  %v8135_v43 = vor.u32 %v8134_v59, %v8131_v38 }
 0x9b6   : > { %10499 = vmatmul.msk.bf16.gmra.mxu1 %vm1028_vm6, %v17120_v12  ;;  %10427 = vmatmul.msk.bf16.gmra.mxu3 %vm1028_vm6, %v15619_v19 }
 0x9b8   : > { %10470 = vmatmul.msk.bf16.gmra.mxu0 %vm1028_vm6, %v15433_v28  ;;  %v8199_v5 = vpop.f32.mrf.mxu2  ;;  %v8103_v28 = vadd.f32 %v17125_v34, %v15574_v48  ;;  %v17130_v34 = vld [vmem:[#allocation46_spill] sm:$0xff] }
 0x9b9   : > { %v8270_v3 = vadd.f32 %v8199_v5, %v8102_v18  ;;  %v8372_v10 = vpop.f32.mrf.mxu3  ;;  %v8144_v18 = vrot.slane %v8142_v8, 4  ;;  %v15883_v5 = vpop.f32.mrf.mxu1 }
 0x9ba   : > { %17126 = vst [vmem:[#allocation6_spill] sm:$0xff] %v15883_v5 }
 0x9bb   : > { %v15877_v20 = vadd.f32 %v8367_v24, %v8270_v3  ;;  %v15885_v24 = vpop.f32.mrf.mxu0  ;;  %v8145_v48 = vor.u32 %v8144_v18, %v8140_v56 }
 0x9bc   : > { %17127 = vst [vmem:[#allocation10_spill] sm:$0xff] %v15885_v24 }
 0x9bd   : > { %17124 = vst [vmem:[#allocation12_spill] sm:$0xff] %v15877_v20  ;;  %v15891_v20 = vld [vmem:[#allocation2 + $0xc8] sm:$0x1]  ;;  %v8146_v7 = vrot.slane %v8145_v48, 4 }
 0x9c0   : > { %v8201_v27 = vpop.f32.mrf.mxu2 }
 0x9c1   : > { %v8271_v54 = vadd.f32 %v8201_v27, %v8103_v28  ;;  %v8374_v29 = vpop.f32.mrf.mxu3  ;;  %v8148_v28 = vshll.u32 %v15891_v20, 16  ;;  %v15902_v27 = vpop.f32.mrf.mxu1 }
 0x9c2   : > { %17131 = vst [vmem:[#allocation30_spill] sm:$0xff] %v15902_v27 }
 0x9c3   : > { %v15887_v3 = vadd.f32 %v8369_v2, %v8271_v54  ;;  %v8104_v2 = vadd.f32 %v17130_v34, %v15590_v62  ;;  %v8136_v54 = vrot.slane %v8135_v43, 4  ;;  %v8150_v60 = vrot.slane %v8148_v28, 5  ;;  %v17135_v62 = vld [vmem:[#allocation47_spill] sm:$0xff] }
 0x9c5   : > { %17128 = vst [vmem:[#allocation22_spill] sm:$0xff] %v15887_v3  ;;  %10399 = vmatmul.msk.bf16.gmra.mxu2 %vm1028_vm6, %v15595_v13  ;;  %v8141_v38 = vsel %vm11371_vm11, %v8136_v54, %v8140_v56  ;;  %v8151_v18 = vsel %vm11371_vm11, %v8146_v7, %v8150_v60  ;;  %v15910_v3 = vpop.f32.mrf.mxu0  ;;  %v7507_v60 = vld [vmem:[#allocation2 + $0xcc] sm:$0xf] }
 0x9c6   : > { %10500 = vmatmul.msk.bf16.gmra.mxu1 %vm1028_vm6, %v17129_v52  ;;  %10428 = vmatmul.msk.bf16.gmra.mxu3 %vm1028_vm6, %v15641_v14  ;;  %17133 = vst [vmem:[#allocation39_spill] sm:$0xff] %v15910_v3  ;;  %v8157_v43 = vunpack.c.l.b16 %v8141_v38  ;;  %v8158_v48 = vunpack.c.l.b16 %v8151_v18  ;;  %v15932_v38 = vld [vmem:[#allocation2 + $0xd0] sm:$0xf]  ;;  %v15934_v18 = vld [vmem:[#allocation2 + $0xd4] sm:$0x1] }
 0x9c7   : > { %17141 = vst [vmem:[#allocation43_spill] sm:$0xff] %v15932_v38 }
 0x9c8   : > { %10471 = vmatmul.msk.bf16.gmra.mxu0 %vm1028_vm6, %v17120_v12  ;;  %v8204_v8 = vpop.f32.mrf.mxu2  ;;  %v17134_v12 = vld [vmem:[#allocation35_spill] sm:$0xff]  ;;  %17142 = vst [vmem:[#allocation31_spill] sm:$0xff] %v15934_v18 }
 0x9c9   : > { %v8272_v55 = vadd.f32 %v8204_v8, %v8104_v2  ;;  %v8377_v59 = vpop.f32.mrf.mxu3  ;;  %v8105_v34 = vadd.f32 %v17135_v62, %v17134_v12  ;;  %v15920_v56 = vpop.f32.mrf.mxu1 }
 0x9ca   : > { %17138 = vst [vmem:[#allocation48_spill] sm:$0xff] %v15920_v56 }
 0x9cb   : > { %v15904_v13 = vadd.f32 %v8372_v10, %v8272_v55  ;;  %v17137_v10 = vld [vmem:[#allocation44_spill] sm:$0xff]  ;;  %v15918_v55 = vpack.c.b16 %v8158_v48, %v8157_v43  ;;  %v8300_v43 = vshll.u32 %v7507_v60, 16  ;;  %v8306_v48 = vshll.u32 %v15932_v38, 16 }
 0x9cd   : > { %17132 = vst [vmem:[#allocation17_spill] sm:$0xff] %v15904_v13  ;;  %v15926_v12 = vpop.f32.mrf.mxu0 }
 0x9ce   : > { %17139 = vst [vmem:[#allocation45_spill] sm:$0xff] %v15926_v12 }
 0x9d0   : > { %v8206_v2 = vpop.f32.mrf.mxu2 }
 0x9d1   : > { %v8273_v8 = vadd.f32 %v8206_v2, %v8105_v34  ;;  %v8379_v28 = vpop.f32.mrf.mxu3  ;;  %v8310_v2 = vshrl.u32 %v15932_v38, 16  ;;  %v15941_v3 = vpop.f32.mrf.mxu1 }
 0x9d3   : > { %v15914_v5 = vadd.f32 %v8374_v29, %v8273_v8  ;;  %v17140_v29 = vld [vmem:[#allocation38_spill] sm:$0xff]  ;;  %v8316_v8 = vshll.u32 %v15934_v18, 16 }
 0x9d4   : > { %v8106_v54 = vadd.f32 %v17140_v29, %v15614_v53  ;;  %v8302_v53 = vrot.slane %v8300_v43, 5  ;;  %v8308_v29 = vrot.slane %v8306_v48, 5  ;;  %v17144_v48 = vld [vmem:[#allocation40_spill] sm:$0xff] }
 0x9d5   : > { %17136 = vst [vmem:[#allocation11_spill] sm:$0xff] %v15914_v5  ;;  %10400 = vmatmul.msk.bf16.gmra.mxu2 %vm1028_vm6, %v15619_v19  ;;  %v8297_v19 = vshrl.u32 %v7507_v60, 16  ;;  %v8318_v27 = vrot.slane %v8316_v8, 5  ;;  %v15945_v38 = vpop.f32.mrf.mxu0 }
 0x9d6   : > { %10501 = vmatmul.msk.bf16.gmra.mxu1 %vm1028_vm6, %v17137_v10  ;;  %10429 = vmatmul.msk.bf16.gmra.mxu3 %vm1028_vm6, %v15918_v55 }
 0x9d7   : > { %v8299_v13 = vrot.slane %v8297_v19, 4  ;;  %v8881_v19 = vrot.slane %v15875_v17, 5  ;;  %v17145_v17 = vld [vmem:[#allocation23_spill] sm:$0xff] }
 0x9d8   : > { %10472 = vmatmul.msk.bf16.gmra.mxu0 %vm1028_vm6, %v17129_v52  ;;  %v8209_v7 = vpop.f32.mrf.mxu2  ;;  %v8312_v52 = vrot.slane %v8310_v2, 4  ;;  %v8108_v31 = vadd.f32 %v17145_v17, %v15637_v36 }
 0x9d9   : > { %v8274_v62 = vadd.f32 %v8209_v7, %v8106_v54  ;;  %v8382_v34 = vpop.f32.mrf.mxu3  ;;  %v8303_v56 = vor.u32 %v8302_v53, %v8299_v13  ;;  %v17143_v54 = vld [vmem:[#allocation13_spill] sm:$0xff] }
 0x9da   : > { %v8313_v12 = vor.u32 %v8312_v52, %v8308_v29  ;;  %v8107_v7 = vadd.f32 %v17143_v54, %v15621_v21 }
 0x9db   : > { %v15939_v5 = vadd.f32 %v8377_v59, %v8274_v62  ;;  %v8304_v60 = vrot.slane %v8303_v56, 4 }
 0x9dc   : > { %v8314_v42 = vrot.slane %v8313_v12, 4  ;;  %v8883_v12 = vrot.slane %v8881_v19, 4 }
 0x9dd   : > { %v8309_v62 = vsel %vm11371_vm11, %v8304_v60, %v8308_v29  ;;  %v15968_v53 = vpop.f32.mrf.mxu0  ;;  %v17147_v60 = vld [vmem:[#allocation19_spill] sm:$0xff] }
 0x9de   : > { %v8319_v52 = vsel %vm11371_vm11, %v8314_v42, %v8318_v27  ;;  %v8325_v13 = vunpack.c.l.b16 %v8309_v62 }
 0x9df   : > { %v8326_v21 = vunpack.c.l.b16 %v8319_v52 }
 0x9e0   : > { %v8211_v24 = vpop.f32.mrf.mxu2 }
 0x9e1   : > { %v8275_v18 = vadd.f32 %v8211_v24, %v8107_v7  ;;  %v8384_v59 = vpop.f32.mrf.mxu3  ;;  %v8480_v24 = vld [vmem:[#allocation2 + $0xc0] sm:$0xe]  ;;  %v8327_v56 = vpack.c.b16 %v8326_v21, %v8325_v13 }
 0x9e2   : > { %v10475_v27 = vrot.slane %v8480_v24, 9  ;;  %v17146_v7 = vld [vmem:[#allocation16_spill] sm:$0xff] }
 0x9e3   : > { %v15952_v43 = vadd.f32 %v8379_v28, %v8275_v18  ;;  %v8884_v28 = vrot.slane %v15891_v20, 5  ;;  %v15964_v18 = vpop.f32.mrf.mxu1  ;;  %v8109_v62 = vadd.f32 %v17147_v60, %v17146_v7 }
 0x9e4   : > { %v8882_v36 = vsel %vm11443_vm14, %v10475_v27, %v8881_v19  ;;  %v8110_v19 = vadd.f32 %v15651_v25, %v15653_v11  ;;  %v17150_v11 = vld [vmem:[#allocation4_spill] sm:$0xff] }
 0x9e5   : > { %10401 = vmatmul.msk.bf16.gmra.mxu2 %vm1028_vm6, %v15641_v14  ;;  %v8885_v14 = vsel %vm11443_vm14, %v8883_v12, %v8884_v28  ;;  %v8891_v52 = vunpack.c.l.b16 %v8882_v36  ;;  %v17148_v28 = vld [vmem:[#allocation5_spill] sm:$0xff] }
 0x9e6   : > { %10502 = vmatmul.msk.bf16.gmra.mxu1 %vm1028_vm6, %v17144_v48  ;;  %10430 = vmatmul.msk.bf16.gmra.mxu3 %vm1028_vm6, %v8327_v56  ;;  %v8892_v54 = vunpack.c.l.b16 %v8885_v14 }
 0x9e8   : > { %10473 = vmatmul.msk.bf16.gmra.mxu0 %vm1028_vm6, %v17137_v10  ;;  %v8214_v42 = vpop.f32.mrf.mxu2  ;;  %v15976_v21 = vpack.c.b16 %v8892_v54, %v8891_v52 }
 0x9e9   : > { %v8276_v2 = vadd.f32 %v8214_v42, %v8108_v31  ;;  %v8387_v8 = vpop.f32.mrf.mxu3 }
 0x9eb   : > { %v15970_v29 = vadd.f32 %v8382_v34, %v8276_v2  ;;  %v15978_v56 = vpop.f32.mrf.mxu1  ;;  %v15984_v34 = vpop.f32.mrf.mxu0  ;;  %v17149_v2 = vld [vmem:[#allocation3_spill] sm:$0xff] }
 0x9ec   : > { %v8111_v14 = vadd.f32 %v17149_v2, %v17148_v28 }
 0x9f0   : > { %v8216_v20 = vpop.f32.mrf.mxu2 }
 0x9f1   : > { %v8277_v13 = vadd.f32 %v8216_v20, %v8109_v62  ;;  %v8389_v24 = vpop.f32.mrf.mxu3 }
 0x9f3   : > { %v15980_v12 = vadd.f32 %v8384_v59, %v8277_v13  ;;  %v15994_v27 = vpop.f32.mrf.mxu0  ;;  %v15998_v54 = vpop.f32.mrf.mxu1 }
 0x9f5   : > { %10402 = vmatmul.msk.bf16.gmra.mxu2 %vm1028_vm6, %v15918_v55 }
 0x9f6   : > { %10503 = vmatmul.msk.bf16.gmra.mxu1 %vm1028_vm6, %v15976_v21 }
 0x9f8   : > { %10474 = vmatmul.msk.bf16.gmra.mxu0 %vm1028_vm6, %v17144_v48  ;;  %v8219_v17 = vpop.f32.mrf.mxu2 }
 0x9f9   : > { %v8278_v31 = vadd.f32 %v8219_v17, %v8110_v19  ;;  %v8392_v59 = vpop.f32.mrf.mxu3  ;;  %v17152_v19 = vld [vmem:[#allocation14_spill] sm:$0xff] }
 0x9fb   : > { %v15992_v42 = vadd.f32 %v8387_v8, %v8278_v31  ;;  %v8112_v8 = vadd.f32 %v17150_v11, %v15672_v44  ;;  %v16010_v62 = vpop.f32.mrf.mxu0  ;;  %v16012_v20 = vpop.f32.mrf.mxu1  ;;  %v17154_v44 = vld [vmem:[#allocation49_spill] sm:$0xff] }
 0xa00   : > { %v8221_v36 = vpop.f32.mrf.mxu2 }
 0xa01   : > { %v8279_v55 = vadd.f32 %v8221_v36, %v8111_v14  ;;  %v8394_v25 = vpop.f32.mrf.mxu3 }
 0xa03   : > { %v16000_v7 = vadd.f32 %v8389_v24, %v8279_v55  ;;  %v17151_v24 = vld [vmem:[#allocation8_spill] sm:$0xff]  ;;  %v16018_v2 = vpop.f32.mrf.mxu0  ;;  %v16022_v36 = vpop.f32.mrf.mxu1  ;;  %v17155_v55 = vld [vmem:[#allocation33_spill] sm:$0xff] }
 0xa04   : > { %v8113_v17 = vadd.f32 %v17152_v19, %v17151_v24  ;;  %v8114_v11 = vadd.f32 %v17155_v55, %v17154_v44 }
 0xa05   : > { %10517 = vmatmul.msk.bf16.vlgmr.msra.gmra.mxu2 %vm1028_vm6, %v15678_v39 }
 0xa08   : > { %v8224_v60 = vpop.f32.mrf.mxu2 }
 0xa09   : > { %v8280_v52 = vadd.f32 %v8224_v60, %v8112_v8  ;;  %v8397_v39 = vpop.f32.mrf.mxu3 }
 0xa0b   : > { %v16014_v13 = vadd.f32 %v8392_v59, %v8280_v52  ;;  %v16030_v24 = vpop.f32.mrf.mxu0  ;;  %v16032_v19 = vpop.f32.mrf.mxu1 }
 0xa10   : > { %v8226_v31 = vpop.f32.mrf.mxu2 }
 0xa11   : > { %v8281_v28 = vadd.f32 %v8226_v31, %v8113_v17  ;;  %v8399_v60 = vpop.f32.mrf.mxu3  ;;  %v17156_v17 = vld [vmem:[#allocation21_spill] sm:$0xff] }
 0xa13   : > { %v16020_v14 = vadd.f32 %v8394_v25, %v8281_v28  ;;  %v8115_v25 = vadd.f32 %v15714_v6, %v17156_v17  ;;  %v16040_v44 = vpop.f32.mrf.mxu0 }
 0xa15   : > { %17153 = vst [vmem:[#allocation46_spill] sm:$0xff] %v16020_v14  ;;  %10518 = vmatmul.msk.bf16.gmra.mxu2 %vm1028_vm6, %v15700_v46 }
 0xa18   : > { %v8229_v59 = vpop.f32.mrf.mxu2 }
 0xa19   : > { %v8282_v8 = vadd.f32 %v8229_v59, %v8114_v11  ;;  %v8402_v46 = vpop.f32.mrf.mxu3  ;;  %v16044_v11 = vpop.f32.mrf.mxu1 }
 0xa1b   : > { %v16028_v52 = vadd.f32 %v8397_v39, %v8282_v8  ;;  %v8116_v39 = vadd.f32 %v15726_v41, %v15716_v63  ;;  %v8118_v63 = vadd.f32 %v15748_v57, %v15734_v1  ;;  %v17159_v57 = vld [vmem:[#allocation24_spill] sm:$0xff] }
 0xa20   : > { %v8231_v31 = vpop.f32.mrf.mxu2 }
 0xa21   : > { %v8283_v28 = vadd.f32 %v8231_v31, %v8115_v25  ;;  %v8404_v6 = vpop.f32.mrf.mxu3  ;;  %v16050_v25 = vpop.f32.mrf.mxu0 }
 0xa23   : > { %v16036_v14 = vadd.f32 %v8399_v60, %v8283_v28  ;;  %v8117_v60 = vadd.f32 %v15736_v58, %v15722_v4 }
 0xa25   : > { %10519 = vmatmul.msk.bf16.gmra.mxu2 %vm1028_vm6, %v15720_v0  ;;  %v16052_v0 = vpop.f32.mrf.mxu1 }
 0xa28   : > { %v8234_v55 = vpop.f32.mrf.mxu2 }
 0xa29   : > { %v8284_v59 = vadd.f32 %v8234_v55, %v8116_v39  ;;  %v8407_v41 = vpop.f32.mrf.mxu3  ;;  %v16060_v55 = vpop.f32.mrf.mxu0 }
 0xa2a   : > { %v8858_v50 = vadd.f32 %v16060_v55, %v15992_v42 }
 0xa2b   : > { %v16046_v8 = vadd.f32 %v8402_v46, %v8284_v59  ;;  %v8119_v59 = vadd.f32 %v15752_v16, %v15738_v22  ;;  %v17161_v22 = vld [vmem:[#allocation20_spill] sm:$0xff] }
 0xa2c   : > { %v8121_v16 = vadd.f32 %v15776_v9, %v17161_v22 }
 0xa2d   : > { %v16064_v58 = vpop.f32.mrf.mxu1 }
 0xa30   : > { %v8236_v17 = vpop.f32.mrf.mxu2 }
 0xa31   : > { %v8285_v31 = vadd.f32 %v8236_v17, %v8117_v60  ;;  %v8409_v17 = vpop.f32.mrf.mxu3 }
 0xa33   : > { %v16054_v28 = vadd.f32 %v8404_v6, %v8285_v31 }
 0xa35   : > { %17157 = vst [vmem:[#allocation35_spill] sm:$0xff] %v16054_v28  ;;  %10520 = vmatmul.msk.bf16.gmra.mxu2 %vm1028_vm6, %v15342_v49  ;;  %v16068_v49 = vpop.f32.mrf.mxu0  ;;  %v16072_v1 = vpop.f32.mrf.mxu1  ;;  %v17189_v28 = vld [vmem:[#allocation10_spill] sm:$0xff] }
 0xa38   : > { %v8239_v46 = vpop.f32.mrf.mxu2 }
 0xa39   : > { %v8286_v39 = vadd.f32 %v8239_v46, %v8118_v63  ;;  %v8120_v63 = vadd.f32 %v17159_v57, %v15750_v45 }
 0xa3b   : > { %v16062_v4 = vadd.f32 %v8407_v41, %v8286_v39 }
 0xa3d   : > { %17158 = vst [vmem:[#allocation47_spill] sm:$0xff] %v16062_v4  ;;  %v16078_v39 = vpop.f32.mrf.mxu0 }
 0xa3e   : > { %v8860_v42 = vadd.f32 %v16078_v39, %v16014_v13 }
 0xa40   : > { %v8241_v6 = vpop.f32.mrf.mxu2 }
 0xa41   : > { %v8287_v60 = vadd.f32 %v8241_v6, %v8119_v59  ;;  %v16082_v6 = vpop.f32.mrf.mxu1 }
 0xa42   : > { %v9014_v55 = vadd.f32 %v16082_v6, %v8860_v42 }
 0xa43   : > { %v8455_v31 = vadd.f32 %v8409_v17, %v8287_v60 }
 0xa45   : > { %10521 = vmatmul.msk.bf16.gmra.mxu2 %vm1028_vm6, %v15358_v15  ;;  %v17163_v15 = vld [vmem:[#allocation50_spill] sm:$0xff]  ;;  %v16090_v57 = vpop.f32.mrf.mxu0 }
 0xa46   : > { %v8122_v17 = vadd.f32 %v15783_v37, %v17163_v15 }
 0xa48   : > { %v8244_v41 = vpop.f32.mrf.mxu2 }
 0xa49   : > { %v16076_v46 = vadd.f32 %v8244_v41, %v8120_v63  ;;  %v16094_v41 = vpop.f32.mrf.mxu1 }
 0xa4b   : > { %17160 = vst [vmem:[#allocation44_spill] sm:$0xff] %v16076_v46  ;;  %v17165_v46 = vld [vmem:[#allocation51_spill] sm:$0xff] }
 0xa4c   : > { %v8123_v9 = vadd.f32 %v15795_v40, %v17165_v46  ;;  %v17169_v40 = vld [vmem:[#allocation7_spill] sm:$0xff] }
 0xa4d   : > { %v8125_v46 = vadd.f32 %v15815_v30, %v17169_v40 }
 0xa50   : > { %v8246_v59 = vpop.f32.mrf.mxu2 }
 0xa51   : > { %v16084_v60 = vadd.f32 %v8246_v59, %v8121_v16  ;;  %v16100_v16 = vpop.f32.mrf.mxu0  ;;  %v16102_v59 = vpop.f32.mrf.mxu1 }
 0xa52   : > { %v8862_v13 = vadd.f32 %v16100_v16, %v16028_v52 }
 0xa53   : > { %17162 = vst [vmem:[#allocation38_spill] sm:$0xff] %v16084_v60 }
 0xa54   : > { %v9016_v39 = vadd.f32 %v16102_v59, %v8862_v13 }
 0xa55   : > { %10522 = vmatmul.msk.bf16.gmra.mxu2 %vm1028_vm6, %v15370_v51  ;;  %v17167_v51 = vld [vmem:[#allocation36_spill] sm:$0xff] }
 0xa56   : > { %v8124_v37 = vadd.f32 %v15803_v61, %v17167_v51  ;;  %v17172_v61 = vld [vmem:[#allocation52_spill] sm:$0xff] }
 0xa57   : > { %v8126_v51 = vadd.f32 %v15831_v23, %v17172_v61  ;;  %v17180_v23 = vld [vmem:[#allocation9_spill] sm:$0xff] }
 0xa58   : > { %v8249_v45 = vpop.f32.mrf.mxu2 }
 0xa59   : > { %v16092_v63 = vadd.f32 %v8249_v45, %v8122_v17  ;;  %v16110_v45 = vpop.f32.mrf.mxu0 }
 0xa5a   : > { %v17217_v13 = vld [vmem:[#allocation38_spill] sm:$0xff] }
 0xa5b   : > { %17164 = vst [vmem:[#allocation13_spill] sm:$0xff] %v16092_v63  ;;  %v16112_v63 = vpop.f32.mrf.mxu1 }
 0xa60   : > { %v8251_v22 = vpop.f32.mrf.mxu2 }
 0xa61   : > { %v16098_v4 = vadd.f32 %v8251_v22, %v8123_v9 }
 0xa63   : > { %17166 = vst [vmem:[#allocation40_spill] sm:$0xff] %v16098_v4  ;;  %v17175_v4 = vld [vmem:[#allocation28_spill] sm:$0xff] }
 0xa64   : > { %v8127_v30 = vadd.f32 %v15837_v26, %v17175_v4  ;;  %v16146_v26 = vld [vmem:[%s352_s16] ss:$0 sm:$0xff] }
 0xa65   : > { %10523 = vmatmul.msk.bf16.gmra.mxu2 %vm1028_vm6, %v15398_v32  ;;  %v16120_v32 = vpop.f32.mrf.mxu0 }
 0xa66   : > { %17171 = vst [vmem:[#allocation19_spill] sm:$0xff] %v16120_v32 }
 0xa68   : > { %v8254_v15 = vpop.f32.mrf.mxu2 }
 0xa69   : > { %v16108_v17 = vadd.f32 %v8254_v15, %v8124_v37  ;;  %v16124_v15 = vpop.f32.mrf.mxu1 }
 0xa6a   : > { %17173 = vst [vmem:[#allocation5_spill] sm:$0xff] %v16124_v15  ;;  %v17191_v15 = vld [vmem:[#allocation6_spill] sm:$0xff] }
 0xa6b   : > { %17168 = vst [vmem:[#allocation23_spill] sm:$0xff] %v16108_v17 }
 0xa6d   : > { %v16130_v60 = vpop.f32.mrf.mxu0 }
 0xa6e   : > { %17176 = vst [vmem:[#allocation4_spill] sm:$0xff] %v16130_v60  ;;  %v17188_v60 = vld [vmem:[#allocation32_spill] sm:$0xff] }
 0xa70   : > { %v8256_v9 = vpop.f32.mrf.mxu2 }
 0xa71   : > { %v16116_v22 = vadd.f32 %v8256_v9, %v8125_v46  ;;  %v16134_v9 = vpop.f32.mrf.mxu1  ;;  %v17209_v16 = vld [vmem:[#allocation5_spill] sm:$0xff] }
 0xa72   : > { %17178 = vst [vmem:[#allocation14_spill] sm:$0xff] %v16134_v9 }
 0xa73   : > { %17170 = vst [vmem:[#allocation16_spill] sm:$0xff] %v16116_v22  ;;  %v17179_v22 = vld [vmem:[#allocation26_spill] sm:$0xff] }
 0xa75   : > { %10524 = vmatmul.msk.bf16.gmra.mxu2 %vm1028_vm6, %v15404_v35  ;;  %v8844_v35 = vadd.f32 %v15855_v47, %v15813_v33  ;;  %v17184_v33 = vld [vmem:[#allocation37_spill] sm:$0xff] }
 0xa77   : > { %v8998_v61 = vadd.f32 %v17180_v23, %v8844_v35 }
 0xa78   : > { %v8259_v37 = vpop.f32.mrf.mxu2 }
 0xa79   : > { %v16126_v17 = vadd.f32 %v8259_v37, %v8126_v51  ;;  %v16148_v37 = vpop.f32.mrf.mxu0 }
 0xa7a   : > { %17181 = vst [vmem:[#allocation49_spill] sm:$0xff] %v16148_v37  ;;  %v17190_v37 = vld [vmem:[#allocation41_spill] sm:$0xff] }
 0xa7b   : > { %17174 = vst [vmem:[#allocation3_spill] sm:$0xff] %v16126_v17 }
 0xa80   : > { %v8261_v40 = vpop.f32.mrf.mxu2 }
 0xa81   : > { %v16132_v46 = vadd.f32 %v8261_v40, %v8127_v30  ;;  %v17183_v40 = vld [vmem:[#allocation25_spill] sm:$0xff] }
 0xa82   : > { %v8845_v47 = vadd.f32 %v17184_v33, %v17183_v40 }
 0xa83   : > { %17177 = vst [vmem:[#allocation8_spill] sm:$0xff] %v16132_v46  ;;  %v16155_v46 = vpop.f32.mrf.mxu1 }
 0xa84   : > { %17185 = vst [vmem:[#allocation21_spill] sm:$0xff] %v16155_v46 }
 0xa85   : > { %10525 = vmatmul.msk.bf16.gmra.mxu2 %vm1028_vm6, %v17179_v22  ;;  %v17186_v22 = vld [vmem:[#allocation34_spill] sm:$0xff] }
 0xa86   : > { %v8999_v35 = vadd.f32 %v17186_v22, %v8845_v47 }
 0xa88   : > { %v9072_v4 = vpop.f32.mrf.mxu2 }
 0xa89   : > { %v9152_v51 = vadd.f32 %v9072_v4, %v8998_v61  ;;  %v8846_v61 = vadd.f32 %v17189_v28, %v17188_v60  ;;  %v8821_v4 = vpop.f32.mrf.mxu0 }
 0xa8b   : > { %v16151_v30 = vadd.f32 %v16146_v26, %v9152_v51  ;;  %v8867_v51 = vadd.f32 %v8821_v4, %v8455_v31  ;;  %v9000_v40 = vadd.f32 %v17191_v15, %v8846_v61  ;;  %v17195_v31 = vld [vmem:[#allocation27_spill] sm:$0xff]  ;;  %v17196_v4 = vld [vmem:[#allocation45_spill] sm:$0xff]  ;;  %v17197_v61 = vld [vmem:[#allocation42_spill] sm:$0xff] }
 0xa8c   : > { %v8848_v15 = vadd.f32 %v17196_v4, %v17195_v31  ;;  %v17201_v4 = vld [vmem:[#allocation18_spill] sm:$0xff] }
 0xa8d   : > { %17182 = vst [vmem:[#allocation33_spill] sm:$0xff] %v16151_v30  ;;  %v8975_v30 = vpop.f32.mrf.mxu1 }
 0xa8e   : > { %v16166_v46 = vadd.f32 %v8975_v30, %v8867_v51  ;;  %v17198_v30 = vld [vmem:[#allocation48_spill] sm:$0xff] }
 0xa8f   : > { %v9002_v51 = vadd.f32 %v17198_v30, %v8848_v15 }
 0xa90   : > { %v9074_v23 = vpop.f32.mrf.mxu2 }
 0xa91   : > { %v9153_v17 = vadd.f32 %v9074_v23, %v8999_v35  ;;  %v17193_v35 = vld [vmem:[#allocation39_spill] sm:$0xff] }
 0xa93   : > { %v16159_v9 = vadd.f32 %v16146_v26, %v9153_v17  ;;  %v17192_v17 = vld [vmem:[#allocation15_spill] sm:$0xff] }
 0xa94   : > { %v8847_v23 = vadd.f32 %v17193_v35, %v17192_v17  ;;  %v17199_v17 = vld [vmem:[#allocation29_spill] sm:$0xff] }
 0xa95   : > { %17187 = vst [vmem:[#allocation24_spill] sm:$0xff] %v16159_v9  ;;  %10526 = vmatmul.msk.bf16.gmra.mxu2 %vm1028_vm6, %v17190_v37  ;;  %v17194_v9 = vld [vmem:[#allocation30_spill] sm:$0xff] }
 0xa96   : > { %v9001_v28 = vadd.f32 %v17194_v9, %v8847_v23  ;;  %v8849_v9 = vadd.f32 %v15945_v38, %v17199_v17  ;;  %v17202_v38 = vld [vmem:[#allocation22_spill] sm:$0xff] }
 0xa98   : > { %v9077_v33 = vpop.f32.mrf.mxu2  ;;  %v9003_v35 = vadd.f32 %v15941_v3, %v8849_v9  ;;  %v8851_v3 = vadd.f32 %v15984_v34, %v17202_v38  ;;  %v17204_v34 = vld [vmem:[#allocation11_spill] sm:$0xff] }
 0xa99   : > { %v9154_v47 = vadd.f32 %v9077_v33, %v9000_v40 }
 0xa9b   : > { %v16169_v22 = vadd.f32 %v16146_v26, %v9154_v47 }
 0xaa0   : > { %v9079_v60 = vpop.f32.mrf.mxu2 }
 0xaa1   : > { %v9155_v32 = vadd.f32 %v9079_v60, %v9001_v28  ;;  %v17200_v60 = vld [vmem:[#allocation12_spill] sm:$0xff] }
 0xaa2   : > { %v8850_v31 = vadd.f32 %v15968_v53, %v17200_v60  ;;  %v17203_v53 = vld [vmem:[#allocation17_spill] sm:$0xff] }
 0xaa3   : > { %v16175_v37 = vadd.f32 %v16146_v26, %v9155_v32 }
 0xaa4   : > { %v9004_v15 = vadd.f32 %v15964_v18, %v8850_v31 }
 0xaa5   : > { %10527 = vmatmul.msk.bf16.gmra.mxu2 %vm1028_vm6, %v17197_v61 }
 0xaa8   : > { %v9082_v40 = vpop.f32.mrf.mxu2 }
 0xaa9   : > { %v9156_v33 = vadd.f32 %v9082_v40, %v9002_v51  ;;  %v9005_v40 = vadd.f32 %v15978_v56, %v8851_v3  ;;  %v8853_v56 = vadd.f32 %v16010_v62, %v17204_v34  ;;  %v8855_v62 = vadd.f32 %v16030_v24, %v15952_v43 }
 0xaab   : > { %v16183_v47 = vadd.f32 %v16146_v26, %v9156_v33  ;;  %v9007_v31 = vadd.f32 %v16012_v20, %v8853_v56  ;;  %v9009_v20 = vadd.f32 %v16032_v19, %v8855_v62 }
 0xab0   : > { %v9084_v32 = vpop.f32.mrf.mxu2 }
 0xab1   : > { %v9157_v23 = vadd.f32 %v9084_v32, %v9003_v35  ;;  %v8852_v35 = vadd.f32 %v15994_v27, %v17203_v53 }
 0xab3   : > { %v16189_v28 = vadd.f32 %v16146_v26, %v9157_v23  ;;  %v9006_v18 = vadd.f32 %v15998_v54, %v8852_v35  ;;  %v17206_v35 = vld [vmem:[#allocation31_spill] sm:$0xff] }
 0xab4   : > { %v9038_v43 = vrot.slane %v17206_v35, 5 }
 0xab5   : > { %10528 = vmatmul.msk.bf16.gmra.mxu2 %vm1028_vm6, %v17201_v4 }
 0xab8   : > { %v9087_v61 = vpop.f32.mrf.mxu2 }
 0xab9   : > { %v9158_v30 = vadd.f32 %v9087_v61, %v9004_v15 }
 0xabb   : > { %v16197_v51 = vadd.f32 %v16146_v26, %v9158_v30 }
 0xac0   : > { %v9089_v33 = vpop.f32.mrf.mxu2 }
 0xac1   : > { %v9159_v17 = vadd.f32 %v9089_v33, %v9005_v40  ;;  %v17205_v33 = vld [vmem:[#allocation43_spill] sm:$0xff] }
 0xac3   : > { %v16203_v9 = vadd.f32 %v16146_v26, %v9159_v17  ;;  %v9035_v17 = vrot.slane %v17205_v33, 5  ;;  %v17207_v33 = vld [vmem:[#allocation46_spill] sm:$0xff] }
 0xac5   : > { %10529 = vmatmul.msk.bf16.gmra.mxu2 %vm1028_vm6, %v17137_v10  ;;  %v8854_v10 = vadd.f32 %v16018_v2, %v15939_v5  ;;  %v8481_v2 = vld [vmem:[#allocation2 + $0xcc] sm:$0xe]  ;;  %v9037_v53 = vrot.slane %v9035_v17, 4 }
 0xac7   : > { %v9008_v27 = vadd.f32 %v16022_v36, %v8854_v10  ;;  %v10504_v36 = vrot.slane %v8481_v2, 9  ;;  %v9012_v10 = vadd.f32 %v16064_v58, %v8858_v50  ;;  %v8824_v50 = vpop.f32.mrf.mxu0 }
 0xac8   : > { %v9092_v32 = vpop.f32.mrf.mxu2 }
 0xac9   : > { %v9160_v23 = vadd.f32 %v9092_v32, %v9006_v18  ;;  %v9036_v32 = vsel %vm11443_vm14, %v10504_v36, %v9035_v17 }
 0xacb   : > { %v16211_v60 = vadd.f32 %v16146_v26, %v9160_v23  ;;  %v9039_v23 = vsel %vm11443_vm14, %v9037_v53, %v9038_v43 }
 0xacc   : > { %v9046_v34 = vunpack.c.l.b16 %v9039_v23  ;;  %v17210_v23 = vld [vmem:[#allocation35_spill] sm:$0xff] }
 0xacf   : > { %v8826_v42 = vpop.f32.mrf.mxu0 }
 0xad0   : > { %v9094_v4 = vpop.f32.mrf.mxu2 }
 0xad1   : > { %v9161_v15 = vadd.f32 %v9094_v4, %v9007_v31 }
 0xad3   : > { %v16217_v61 = vadd.f32 %v16146_v26, %v9161_v15 }
 0xad5   : > { %10530 = vmatmul.msk.bf16.gmra.mxu2 %vm1028_vm6, %v17144_v48  ;;  %v8856_v48 = vadd.f32 %v16040_v44, %v15970_v29  ;;  %v9045_v44 = vunpack.c.l.b16 %v9036_v32 }
 0xad7   : > { %v9010_v24 = vadd.f32 %v16044_v11, %v8856_v48  ;;  %v9047_v4 = vpack.c.b16 %v9046_v34, %v9045_v44  ;;  %v8412_v44 = vpop.f32.mrf.mxu3 }
 0xad8   : > { %v9097_v54 = vpop.f32.mrf.mxu2 }
 0xad9   : > { %v9162_v30 = vadd.f32 %v9097_v54, %v9008_v27 }
 0xadb   : > { %v16225_v38 = vadd.f32 %v16146_v26, %v9162_v30 }
 0xae0   : > { %v9099_v3 = vpop.f32.mrf.mxu2 }
 0xae1   : > { %v9163_v40 = vadd.f32 %v9099_v3, %v9009_v20 }
 0xae3   : > { %v16232_v5 = vadd.f32 %v16146_v26, %v9163_v40 }
 0xae5   : > { %10531 = vmatmul.msk.bf16.gmra.mxu2 %vm1028_vm6, %v15976_v21  ;;  %v8857_v21 = vadd.f32 %v16050_v25, %v15980_v12  ;;  %v8859_v25 = vadd.f32 %v16068_v49, %v16000_v7  ;;  %v8861_v7 = vadd.f32 %v16090_v57, %v17207_v33  ;;  %v8863_v57 = vadd.f32 %v16110_v45, %v16036_v14  ;;  %v17212_v45 = vld [vmem:[#allocation14_spill] sm:$0xff] }
 0xae7   : > { %v9011_v56 = vadd.f32 %v16052_v0, %v8857_v21  ;;  %v9013_v0 = vadd.f32 %v16072_v1, %v8859_v25  ;;  %v9015_v49 = vadd.f32 %v16094_v41, %v8861_v7  ;;  %v9017_v41 = vadd.f32 %v16112_v63, %v8863_v57  ;;  %v17211_v21 = vld [vmem:[#allocation4_spill] sm:$0xff] }
 0xae8   : > { %v9102_v19 = vpop.f32.mrf.mxu2  ;;  %v8865_v14 = vadd.f32 %v17211_v21, %v17210_v23 }
 0xae9   : > { %v9164_v18 = vadd.f32 %v9102_v19, %v9010_v24  ;;  %v17208_v24 = vld [vmem:[#allocation19_spill] sm:$0xff] }
 0xaea   : > { %v8864_v52 = vadd.f32 %v17208_v24, %v16046_v8  ;;  %v9019_v63 = vadd.f32 %v17212_v45, %v8865_v14  ;;  %v17214_v8 = vld [vmem:[#allocation49_spill] sm:$0xff] }
 0xaeb   : > { %v16245_v29 = vadd.f32 %v16146_v26, %v9164_v18 }
 0xaec   : > { %v9018_v59 = vadd.f32 %v17209_v16, %v8864_v52  ;;  %v17218_v16 = vld [vmem:[#allocation13_spill] sm:$0xff] }
 0xaf0   : > { %v9104_v31 = vpop.f32.mrf.mxu2 }
 0xaf1   : > { %v9165_v11 = vadd.f32 %v9104_v31, %v9011_v56 }
 0xaf3   : > { %v16251_v15 = vadd.f32 %v16146_v26, %v9165_v11  ;;  %v17213_v11 = vld [vmem:[#allocation47_spill] sm:$0xff] }
 0xaf5   : > { %10532 = vmatmul.msk.bf16.gmra.mxu2 %vm1028_vm6, %v9047_v4  ;;  %v8866_v4 = vadd.f32 %v17214_v8, %v17213_v11 }
 0xaf8   : > { %v9107_v27 = vpop.f32.mrf.mxu2 }
 0xaf9   : > { %v9166_v54 = vadd.f32 %v9107_v27, %v9012_v10  ;;  %v17215_v10 = vld [vmem:[#allocation21_spill] sm:$0xff] }
 0xafa   : > { %v9020_v27 = vadd.f32 %v17215_v10, %v8866_v4 }
 0xafb   : > { %v16258_v12 = vadd.f32 %v16146_v26, %v9166_v54  ;;  %v8978_v54 = vpop.f32.mrf.mxu1 }
 0xb00   : > { %v9109_v30 = vpop.f32.mrf.mxu2 }
 0xb01   : > { %v9167_v62 = vadd.f32 %v9109_v30, %v9013_v0  ;;  %v8414_v30 = vpop.f32.mrf.mxu3 }
 0xb03   : > { %v16264_v20 = vadd.f32 %v16146_v26, %v9167_v62  ;;  %v8980_v7 = vpop.f32.mrf.mxu1 }
 0xb08   : > { %v9112_v58 = vpop.f32.mrf.mxu2 }
 0xb09   : > { %v9168_v3 = vadd.f32 %v9112_v58, %v9014_v55  ;;  %v17216_v55 = vld [vmem:[#allocation44_spill] sm:$0xff] }
 0xb0a   : > { %v8456_v58 = vadd.f32 %v8412_v44, %v17216_v55 }
 0xb0b   : > { %v16270_v40 = vadd.f32 %v16146_v26, %v9168_v3  ;;  %v8983_v24 = vpop.f32.mrf.mxu1 }
 0xb10   : > { %v9114_v1 = vpop.f32.mrf.mxu2 }
 0xb11   : > { %v9169_v17 = vadd.f32 %v9114_v1, %v9015_v49  ;;  %v8868_v1 = vadd.f32 %v8824_v50, %v8456_v58 }
 0xb13   : > { %v16276_v48 = vadd.f32 %v16146_v26, %v9169_v17  ;;  %v8417_v17 = vpop.f32.mrf.mxu3  ;;  %v8985_v45 = vpop.f32.mrf.mxu1 }
 0xb18   : > { %v9117_v6 = vpop.f32.mrf.mxu2 }
 0xb19   : > { %v9170_v2 = vadd.f32 %v9117_v6, %v9016_v39  ;;  %v8457_v39 = vadd.f32 %v8414_v30, %v17217_v13  ;;  %v9022_v6 = vadd.f32 %v8978_v54, %v8868_v1 }
 0xb1b   : > { %v16282_v36 = vadd.f32 %v16146_v26, %v9170_v2  ;;  %v8829_v2 = vpop.f32.mrf.mxu0  ;;  %v8419_v52 = vpop.f32.mrf.mxu3 }
 0xb20   : > { %v9119_v53 = vpop.f32.mrf.mxu2 }
 0xb21   : > { %v9171_v35 = vadd.f32 %v9119_v53, %v9017_v41 }
 0xb23   : > { %v16288_v43 = vadd.f32 %v16146_v26, %v9171_v35  ;;  %v8869_v35 = vadd.f32 %v8826_v42, %v8457_v39  ;;  %v8831_v23 = vpop.f32.mrf.mxu0 }
 0xb28   : > { %v9122_v19 = vpop.f32.mrf.mxu2 }
 0xb29   : > { %v9172_v18 = vadd.f32 %v9122_v19, %v9018_v59  ;;  %v9023_v59 = vadd.f32 %v8980_v7, %v8869_v35  ;;  %v17221_v7 = vld [vmem:[#allocation16_spill] sm:$0xff]  ;;  %v17222_v35 = vld [vmem:[#allocation3_spill] sm:$0xff] }
 0xb2b   : > { %v16294_v32 = vadd.f32 %v16146_v26, %v9172_v18  ;;  %v8834_v10 = vpop.f32.mrf.mxu0 }
 0xb30   : > { %v9124_v34 = vpop.f32.mrf.mxu2 }
 0xb31   : > { %v9173_v56 = vadd.f32 %v9124_v34, %v9019_v63  ;;  %v17219_v63 = vld [vmem:[#allocation40_spill] sm:$0xff] }
 0xb32   : > { %v8459_v44 = vadd.f32 %v8419_v52, %v17219_v63 }
 0xb33   : > { %v16300_v31 = vadd.f32 %v16146_v26, %v9173_v56  ;;  %v8422_v56 = vpop.f32.mrf.mxu3 }
 0xb34   : > { %v8871_v50 = vadd.f32 %v8831_v23, %v8459_v44 }
 0xb38   : > { %v9127_v25 = vpop.f32.mrf.mxu2 }
 0xb39   : > { %v9174_v0 = vadd.f32 %v9127_v25, %v9020_v27  ;;  %v17220_v27 = vld [vmem:[#allocation23_spill] sm:$0xff]  ;;  %v9025_v25 = vadd.f32 %v8985_v45, %v8871_v50  ;;  %v17223_v45 = vld [vmem:[#allocation8_spill] sm:$0xff] }
 0xb3a   : > { %v8460_v54 = vadd.f32 %v8422_v56, %v17220_v27 }
 0xb3b   : > { %v16306_v62 = vadd.f32 %v16146_v26, %v9174_v0  ;;  %v8988_v0 = vpop.f32.mrf.mxu1  ;;  %v8424_v55 = vpop.f32.mrf.mxu3 }
 0xb3c   : > { %v8461_v1 = vadd.f32 %v8424_v55, %v17221_v7 }
 0xb40   : > { %v9129_v3 = vpop.f32.mrf.mxu2 }
 0xb41   : > { %v9175_v33 = vadd.f32 %v9129_v3, %v16166_v46  ;;  %v8458_v46 = vadd.f32 %v8417_v17, %v17218_v16  ;;  %v8872_v3 = vadd.f32 %v8834_v10, %v8460_v54 }
 0xb43   : > { %v16311_v49 = vadd.f32 %v16146_v26, %v9175_v33  ;;  %v8870_v14 = vadd.f32 %v8829_v2, %v8458_v46  ;;  %v8836_v33 = vpop.f32.mrf.mxu0  ;;  %v9026_v17 = vadd.f32 %v8988_v0, %v8872_v3  ;;  %v8427_v2 = vpop.f32.mrf.mxu3 }
 0xb45   : > { %v9024_v34 = vadd.f32 %v8983_v24, %v8870_v14  ;;  %v8462_v24 = vadd.f32 %v8427_v2, %v17222_v35 }
 0xb48   : > { %v9132_v57 = vpop.f32.mrf.mxu2 }
 0xb49   : > { %v9176_v41 = vadd.f32 %v9132_v57, %v9022_v6  ;;  %v8990_v6 = vpop.f32.mrf.mxu1 }
 0xb4b   : > { %v16315_v53 = vadd.f32 %v16146_v26, %v9176_v41  ;;  %v8873_v41 = vadd.f32 %v8836_v33, %v8461_v1  ;;  %v8839_v16 = vpop.f32.mrf.mxu0  ;;  %v8429_v14 = vpop.f32.mrf.mxu3 }
 0xb4c   : > { %v8463_v63 = vadd.f32 %v8429_v14, %v17223_v45 }
 0xb4d   : > { %v9027_v52 = vadd.f32 %v8990_v6, %v8873_v41 }
 0xb50   : > { %v9134_v19 = vpop.f32.mrf.mxu2 }
 0xb51   : > { %v9177_v18 = vadd.f32 %v9134_v19, %v9023_v59  ;;  %v8874_v19 = vadd.f32 %v8839_v16, %v8462_v24  ;;  %v8993_v23 = vpop.f32.mrf.mxu1 }
 0xb53   : > { %v16319_v21 = vadd.f32 %v16146_v26, %v9177_v18  ;;  %v9028_v44 = vadd.f32 %v8993_v23, %v8874_v19 }
 0xb58   : > { %v9137_v11 = vpop.f32.mrf.mxu2 }
 0xb59   : > { %v9178_v8 = vadd.f32 %v9137_v11, %v9024_v34  ;;  %v8841_v11 = vpop.f32.mrf.mxu0  ;;  %v8995_v10 = vpop.f32.mrf.mxu1 }
 0xb5b   : > { %v16323_v4 = vadd.f32 %v16146_v26, %v9178_v8  ;;  %v8875_v8 = vadd.f32 %v8841_v11, %v8463_v63 }
 0xb5d   : > { %v9029_v27 = vadd.f32 %v8995_v10, %v8875_v8 }
 0xb60   : > { %v9139_v30 = vpop.f32.mrf.mxu2 }
 0xb61   : > { %v9179_v42 = vadd.f32 %v9139_v30, %v9025_v25 }
 0xb63   : > { %v16327_v58 = vadd.f32 %v16146_v26, %v9179_v42 }
 0xb68   : > { %v9142_v13 = vpop.f32.mrf.mxu2 }
 0xb69   : > { %v9180_v39 = vadd.f32 %v9142_v13, %v9026_v17 }
 0xb6b   : > { %v16331_v57 = vadd.f32 %v16146_v26, %v9180_v39 }
 0xb70   : > { %v9144_v46 = vpop.f32.mrf.mxu2 }
 0xb71   : > { %v9181_v59 = vadd.f32 %v9144_v46, %v9027_v52 }
 0xb73   : > { %v16335_v18 = vadd.f32 %v16146_v26, %v9181_v59 }
 0xb78   : > { %v9147_v34 = vpop.f32.mrf.mxu2 }
 0xb79   : > { %v9182_v56 = vadd.f32 %v9147_v34, %v9028_v44 }
 0xb7b   : > { %v16339_v50 = vadd.f32 %v16146_v26, %v9182_v56 }
 0xb7f   : > { %9223 = sbr.rel (%p10533_p7) target bundleno = 2980 (0xba4), region = 48 }
 0xb80   : > { %v9149_v54 = vpop.f32.mrf.mxu2 }
 0xb81   : > { %v9183_v25 = vadd.f32 %v9149_v54, %v9029_v27 }
 0xb83   : > { %v16342_v0 = vadd.f32 %v16146_v26, %v9183_v25 }
 0xb84   : > { %v17224_v30 = vld [vmem:[#allocation33_spill] sm:$0xff]  ;;  %v17225_v26 = vld [vmem:[#allocation24_spill] sm:$0xff]  ;;  %9226 = vst [vmem:[%s10939_s19 + $0x10] sm:$0xff] %v16169_v22 }
 0xb85   : > { %9224 = vst [vmem:[%s10939_s19] sm:$0xff] %v17224_v30 }
 0xb86   : > { %9225 = vst [vmem:[%s10939_s19 + $0x8] sm:$0xff] %v17225_v26 }
 0xb87   : > { %9227 = vst [vmem:[%s10939_s19 + $0x18] sm:$0xff] %v16175_v37 }
 0xb88   : > { %9228 = vst [vmem:[%s10939_s19 + $0x20] sm:$0xff] %v16183_v47 }
 0xb89   : > { %9229 = vst [vmem:[%s10939_s19 + $0x28] sm:$0xff] %v16189_v28 }
 0xb8a   : > { %9230 = vst [vmem:[%s10939_s19 + $0x30] sm:$0xff] %v16197_v51 }
 0xb8b   : > { %9231 = vst [vmem:[%s10939_s19 + $0x38] sm:$0xff] %v16203_v9 }
 0xb8c   : > { %9232 = vst [vmem:[%s10939_s19 + $0x40] sm:$0xff] %v16211_v60 }
 0xb8d   : > { %9233 = vst [vmem:[%s10939_s19 + $0x48] sm:$0xff] %v16217_v61 }
 0xb8e   : > { %9234 = vst [vmem:[%s10939_s19 + $0x50] sm:$0xff] %v16225_v38 }
 0xb8f   : > { %9235 = vst [vmem:[%s10939_s19 + $0x58] sm:$0xff] %v16232_v5 }
 0xb90   : > { %9236 = vst [vmem:[%s10939_s19 + $0x60] sm:$0xff] %v16245_v29 }
 0xb91   : > { %9237 = vst [vmem:[%s10939_s19 + $0x68] sm:$0xff] %v16251_v15 }
 0xb92   : > { %9238 = vst [vmem:[%s10939_s19 + $0x70] sm:$0xff] %v16258_v12 }
 0xb93   : > { %9239 = vst [vmem:[%s10939_s19 + $0x78] sm:$0xff] %v16264_v20 }
 0xb94   : > { %9240 = vst [vmem:[%s10939_s19 + $0x80] sm:$0xff] %v16270_v40 }
 0xb95   : > { %9241 = vst [vmem:[%s10939_s19 + $0x88] sm:$0xff] %v16276_v48 }
 0xb96   : > { %9242 = vst [vmem:[%s10939_s19 + $0x90] sm:$0xff] %v16282_v36 }
 0xb97   : > { %9243 = vst [vmem:[%s10939_s19 + $0x98] sm:$0xff] %v16288_v43 }
 0xb98   : > { %9244 = vst [vmem:[%s10939_s19 + $0xa0] sm:$0xff] %v16294_v32 }
 0xb99   : > { %9245 = vst [vmem:[%s10939_s19 + $0xa8] sm:$0xff] %v16300_v31 }
 0xb9a   : > { %9246 = vst [vmem:[%s10939_s19 + $0xb0] sm:$0xff] %v16306_v62 }
 0xb9b   : > { %9247 = vst [vmem:[%s10939_s19 + $0xb8] sm:$0xff] %v16311_v49 }
 0xb9c   : > { %9248 = vst [vmem:[%s10939_s19 + $0xc0] sm:$0xff] %v16315_v53 }
 0xb9d   : > { %9249 = vst [vmem:[%s10939_s19 + $0xc8] sm:$0xff] %v16319_v21 }
 0xb9e   : > { %9250 = vst [vmem:[%s10939_s19 + $0xd0] sm:$0xff] %v16323_v4 }
 0xb9f   : > { %9251 = vst [vmem:[%s10939_s19 + $0xd8] sm:$0xff] %v16327_v58 }
 0xba0   : > { %9252 = vst [vmem:[%s10939_s19 + $0xe0] sm:$0xff] %v16331_v57 }
 0xba1   : > { %9253 = vst [vmem:[%s10939_s19 + $0xe8] sm:$0xff] %v16335_v18 }
 0xba2   : > { %9254 = vst [vmem:[%s10939_s19 + $0xf0] sm:$0xff] %v16339_v50 }
 0xba3   : > { %9255 = vst [vmem:[%s10939_s19 + $0xf8] sm:$0xff] %v16342_v0 }
 0xba4 PF: > { %p10534_p8 = scmp.ne.s32.totalorder %s10812_s21, 1 }
 0xba6   : > { %9259 = sbr.rel (%p10534_p8) target bundleno = 3029 (0xbd5), region = 52 }
 0xbab   : > { %v17226_v42 = vld [vmem:[#allocation33_spill] sm:$0xff]  ;;  %v17227_v3 = vld [vmem:[#allocation24_spill] sm:$0xff]  ;;  %v9264_v7 = vmul.f32 1.442695, %v16169_v22  ;;  %v9266_v1 = vmul.f32 1.442695, %v16175_v37 }
 0xbac   : > { %v9260_v55 = vmul.f32 1.442695, %v17226_v42  ;;  %v9262_v33 = vmul.f32 1.442695, %v17227_v3  ;;  %v9268_v17 = vmul.f32 1.442695, %v16183_v47 }
 0xbad   : > { %v9270_v13 = vmul.f32 1.442695, %v16189_v28  ;;  %v9272_v39 = vmul.f32 1.442695, %v16197_v51  ;;  %v9274_v6 = vmul.f32 1.442695, %v16203_v9 }
 0xbae   : > { %10726 = vpow2.f32 %v9260_v55  ;;  %v9276_v22 = vmul.f32 1.442695, %v16211_v60  ;;  %v9278_v37 = vmul.f32 1.442695, %v16217_v61  ;;  %v9280_v47 = vmul.f32 1.442695, %v16225_v38 }
 0xbaf   : > { %10728 = vpow2.f32 %v9262_v33  ;;  %v9282_v51 = vmul.f32 1.442695, %v16232_v5  ;;  %v9284_v9 = vmul.f32 1.442695, %v16245_v29  ;;  %v9286_v61 = vmul.f32 1.442695, %v16251_v15 }
 0xbb0   : > { %10730 = vpow2.f32 %v9264_v7  ;;  %v9288_v38 = vmul.f32 1.442695, %v16258_v12  ;;  %v9290_v5 = vmul.f32 1.442695, %v16264_v20  ;;  %v9292_v29 = vmul.f32 1.442695, %v16270_v40 }
 0xbb1   : > { %10732 = vpow2.f32 %v9266_v1  ;;  %v9294_v15 = vmul.f32 1.442695, %v16276_v48  ;;  %v9296_v12 = vmul.f32 1.442695, %v16282_v36  ;;  %v9298_v20 = vmul.f32 1.442695, %v16288_v43 }
 0xbb2   : > { %10734 = vpow2.f32 %v9268_v17  ;;  %v9300_v40 = vmul.f32 1.442695, %v16294_v32  ;;  %v9302_v48 = vmul.f32 1.442695, %v16300_v31  ;;  %v9304_v36 = vmul.f32 1.442695, %v16306_v62 }
 0xbb3   : > { %10736 = vpow2.f32 %v9270_v13  ;;  %v9306_v43 = vmul.f32 1.442695, %v16311_v49  ;;  %v9308_v32 = vmul.f32 1.442695, %v16315_v53  ;;  %v9310_v31 = vmul.f32 1.442695, %v16319_v21 }
 0xbb4   : > { %v10727_v2 = vpop.eup %10726  ;;  %10738 = vpow2.f32 %v9272_v39  ;;  %v9312_v62 = vmul.f32 1.442695, %v16323_v4  ;;  %v9314_v49 = vmul.f32 1.442695, %v16327_v58  ;;  %v9316_v53 = vmul.f32 1.442695, %v16331_v57 }
 0xbb5   : > { %v10729_v28 = vpop.eup %10728  ;;  %9324 = vst [vmem:[%s10939_s19] sm:$0xff] %v10727_v2  ;;  %10740 = vpow2.f32 %v9274_v6  ;;  %v9318_v21 = vmul.f32 1.442695, %v16335_v18  ;;  %v9320_v10 = vmul.f32 1.442695, %v16339_v50  ;;  %v9322_v27 = vmul.f32 1.442695, %v16342_v0 }
 0xbb6   : > { %v10731_v41 = vpop.eup %10730  ;;  %9325 = vst [vmem:[%s10939_s19 + $0x8] sm:$0xff] %v10729_v28  ;;  %10742 = vpow2.f32 %v9276_v22 }
 0xbb7   : > { %v10733_v60 = vpop.eup %10732  ;;  %9326 = vst [vmem:[%s10939_s19 + $0x10] sm:$0xff] %v10731_v41  ;;  %10744 = vpow2.f32 %v9278_v37 }
 0xbb8   : > { %v10735_v35 = vpop.eup %10734  ;;  %9327 = vst [vmem:[%s10939_s19 + $0x18] sm:$0xff] %v10733_v60  ;;  %10746 = vpow2.f32 %v9280_v47 }
 0xbb9   : > { %v10737_v24 = vpop.eup %10736  ;;  %9328 = vst [vmem:[%s10939_s19 + $0x20] sm:$0xff] %v10735_v35  ;;  %10748 = vpow2.f32 %v9282_v51 }
 0xbba   : > { %v10739_v52 = vpop.eup %10738  ;;  %9329 = vst [vmem:[%s10939_s19 + $0x28] sm:$0xff] %v10737_v24  ;;  %10750 = vpow2.f32 %v9284_v9 }
 0xbbb   : > { %v10741_v16 = vpop.eup %10740  ;;  %9330 = vst [vmem:[%s10939_s19 + $0x30] sm:$0xff] %v10739_v52  ;;  %10752 = vpow2.f32 %v9286_v61 }
 0xbbc   : > { %v10743_v46 = vpop.eup %10742  ;;  %9331 = vst [vmem:[%s10939_s19 + $0x38] sm:$0xff] %v10741_v16  ;;  %10754 = vpow2.f32 %v9288_v38 }
 0xbbd   : > { %v10745_v59 = vpop.eup %10744  ;;  %9332 = vst [vmem:[%s10939_s19 + $0x40] sm:$0xff] %v10743_v46  ;;  %10756 = vpow2.f32 %v9290_v5 }
 0xbbe   : > { %v10747_v19 = vpop.eup %10746  ;;  %9333 = vst [vmem:[%s10939_s19 + $0x48] sm:$0xff] %v10745_v59  ;;  %10758 = vpow2.f32 %v9292_v29 }
 0xbbf   : > { %v10749_v23 = vpop.eup %10748  ;;  %9334 = vst [vmem:[%s10939_s19 + $0x50] sm:$0xff] %v10747_v19  ;;  %10760 = vpow2.f32 %v9294_v15 }
 0xbc0   : > { %v10751_v14 = vpop.eup %10750  ;;  %9335 = vst [vmem:[%s10939_s19 + $0x58] sm:$0xff] %v10749_v23  ;;  %10762 = vpow2.f32 %v9296_v12 }
 0xbc1   : > { %v10753_v45 = vpop.eup %10752  ;;  %9336 = vst [vmem:[%s10939_s19 + $0x60] sm:$0xff] %v10751_v14  ;;  %10764 = vpow2.f32 %v9298_v20 }
 0xbc2   : > { %v10755_v63 = vpop.eup %10754  ;;  %9337 = vst [vmem:[%s10939_s19 + $0x68] sm:$0xff] %v10753_v45  ;;  %10766 = vpow2.f32 %v9300_v40 }
 0xbc3   : > { %v10757_v44 = vpop.eup %10756  ;;  %9338 = vst [vmem:[%s10939_s19 + $0x70] sm:$0xff] %v10755_v63  ;;  %10768 = vpow2.f32 %v9302_v48 }
 0xbc4   : > { %v10759_v34 = vpop.eup %10758  ;;  %9339 = vst [vmem:[%s10939_s19 + $0x78] sm:$0xff] %v10757_v44  ;;  %10770 = vpow2.f32 %v9304_v36 }
 0xbc5   : > { %v10761_v56 = vpop.eup %10760  ;;  %9340 = vst [vmem:[%s10939_s19 + $0x80] sm:$0xff] %v10759_v34  ;;  %10772 = vpow2.f32 %v9306_v43 }
 0xbc6   : > { %v10763_v11 = vpop.eup %10762  ;;  %9341 = vst [vmem:[%s10939_s19 + $0x88] sm:$0xff] %v10761_v56  ;;  %10774 = vpow2.f32 %v9308_v32 }
 0xbc7   : > { %v10765_v8 = vpop.eup %10764  ;;  %9342 = vst [vmem:[%s10939_s19 + $0x90] sm:$0xff] %v10763_v11  ;;  %10776 = vpow2.f32 %v9310_v31 }
 0xbc8   : > { %v10767_v4 = vpop.eup %10766  ;;  %9343 = vst [vmem:[%s10939_s19 + $0x98] sm:$0xff] %v10765_v8  ;;  %10778 = vpow2.f32 %v9312_v62 }
 0xbc9   : > { %v10769_v58 = vpop.eup %10768  ;;  %9344 = vst [vmem:[%s10939_s19 + $0xa0] sm:$0xff] %v10767_v4  ;;  %10780 = vpow2.f32 %v9314_v49 }
 0xbca   : > { %v10771_v57 = vpop.eup %10770  ;;  %9345 = vst [vmem:[%s10939_s19 + $0xa8] sm:$0xff] %v10769_v58  ;;  %10782 = vpow2.f32 %v9316_v53 }
 0xbcb   : > { %v10773_v54 = vpop.eup %10772  ;;  %9346 = vst [vmem:[%s10939_s19 + $0xb0] sm:$0xff] %v10771_v57  ;;  %10784 = vpow2.f32 %v9318_v21 }
 0xbcc   : > { %v10775_v18 = vpop.eup %10774  ;;  %9347 = vst [vmem:[%s10939_s19 + $0xb8] sm:$0xff] %v10773_v54  ;;  %10786 = vpow2.f32 %v9320_v10 }
 0xbcd   : > { %v10777_v50 = vpop.eup %10776  ;;  %9348 = vst [vmem:[%s10939_s19 + $0xc0] sm:$0xff] %v10775_v18  ;;  %10788 = vpow2.f32 %v9322_v27 }
 0xbce   : > { %v10779_v25 = vpop.eup %10778  ;;  %9349 = vst [vmem:[%s10939_s19 + $0xc8] sm:$0xff] %v10777_v50 }
 0xbcf   : > { %v10781_v0 = vpop.eup %10780  ;;  %9350 = vst [vmem:[%s10939_s19 + $0xd0] sm:$0xff] %v10779_v25 }
 0xbd0   : > { %v10783_v30 = vpop.eup %10782  ;;  %9351 = vst [vmem:[%s10939_s19 + $0xd8] sm:$0xff] %v10781_v0 }
 0xbd1   : > { %v10785_v26 = vpop.eup %10784  ;;  %9352 = vst [vmem:[%s10939_s19 + $0xe0] sm:$0xff] %v10783_v30 }
 0xbd2   : > { %v10787_v42 = vpop.eup %10786  ;;  %9353 = vst [vmem:[%s10939_s19 + $0xe8] sm:$0xff] %v10785_v26 }
 0xbd3   : > { %v10789_v55 = vpop.eup %10788  ;;  %9354 = vst [vmem:[%s10939_s19 + $0xf0] sm:$0xff] %v10787_v42 }
 0xbd4   : > { %9355 = vst [vmem:[%s10939_s19 + $0xf8] sm:$0xff] %v10789_v55 }
 0xbd5 PF: > { %s16_s25 = sadd.s32 1, %s10828_s25   ;;  %s17228_s21 = smov %s10820_s23 }
 0xbd6   : > { %p13_p9 = scmp.ge.s32.totalorder %s16_s25, 6   ;;  %s17229_s22 = smov %s10824_s24 }
 0xbd7   : > { %s17230_s23 = smov %s17233_s26  ;;  %s17231_s24 = smov %s17237_s27 }
 0xbd8   :  { %15 = sbr.rel (!%p13_p9) target bundleno = 3 (0x3), region = 125 }

</bundles_post_ra>
